<compile_context>
chip_gen: v7x
topology: tpu7x:2x2x1
jax: 0.10.0
libtpu: 0.0.40
codegen_flags: <defaults>
</compile_context>

<pallas_src>
import functools
import math

import jax
import jax.numpy as jnp
from jax.experimental import pallas as pl
from jax.experimental.pallas import tpu as pltpu

_SQRT2 = math.sqrt(2.0)


def _gelu(x):
    # exact erf-based GELU == torch.nn.GELU() default
    return 0.5 * x * (1.0 + jax.lax.erf(x / _SQRT2))


# ----------------------------- fused Pallas kernel -----------------------------

def _down_block_kernel(x_ref, w1_ref, b1_ref, w2_ref, wsc_ref, b2s_ref,
                       wqkv_ref, bqkv_ref, wot_ref, bo_ref, o_ref,
                       pad1_ref, pad2_ref, *, H, W, pad):
    f32 = jnp.float32
    N = H * W
    Cout = o_ref.shape[1]

    x = x_ref[0]                                                   # (N, Cin)
    # pixel x-coordinate of every flattened pixel (for 3x3 conv edge masking)
    xx = jax.lax.broadcasted_iota(jnp.int32, (N, 1), 0) % W

    def conv3x3(pad_ref, act, w_ref, acc):
        """3x3 'SAME' conv on flattened pixels via 9 shifted matmuls.

        pad_ref: (N + 2*pad, C) VMEM scratch (zero padded linear buffer).
        act:     (N, C) activation (GELU already applied, once).
        w_ref:   (9, C, Cout) weights, tap = (dy+1)*3 + (dx+1).
        acc:     (N, Cout) f32 starting accumulator.
        """
        pad_ref[...] = jnp.zeros(pad_ref.shape, f32)
        pad_ref[pad:pad + N, :] = act
        for dy in (-1, 0, 1):
            for dx in (-1, 0, 1):
                tap = (dy + 1) * 3 + (dx + 1)
                off = dy * W + dx
                sh = pad_ref[pad + off: pad + off + N, :]          # (N, C)
                # linear zero padding handles dy out-of-range; mask x wrap for dx = +-1
                if dx == -1:
                    sh = jnp.where(xx >= 1, sh, 0.0)
                elif dx == 1:
                    sh = jnp.where(xx <= W - 2, sh, 0.0)
                acc = acc + jnp.dot(sh, w_ref[tap], preferred_element_type=f32)
        return acc

    # ---- ResidualBlock: h1 = conv1(gelu(x)) ----
    h1 = conv3x3(pad1_ref, _gelu(x), w1_ref,
                 jnp.zeros((N, Cout), f32)) + b1_ref[...]          # (N, Cout)

    # ---- ResidualBlock: r = conv2(gelu(h1)) + shortcut(x)  (merged bias b2+bs) ----
    sc = jnp.dot(x, wsc_ref[...], preferred_element_type=f32) + b2s_ref[...]
    r = conv3x3(pad2_ref, _gelu(h1), w2_ref, sc)                   # (N, Cout)

    # ---- AttentionBlock (n_heads=1, d_k=Cout), fused qkv projection ----
    qkv = jnp.dot(r, wqkv_ref[...], preferred_element_type=f32) + bqkv_ref[...]
    q = qkv[:, :Cout]
    k = qkv[:, Cout:2 * Cout]
    v = qkv[:, 2 * Cout:3 * Cout]
    scale = float(Cout) ** -0.5

    # torch softmax(dim=1) on (b,i,j,h) == softmax over the *query* axis i, so each
    # key-column block is independent -> tile over j, accumulate res over blocks.
    tj = 128 if N % 128 == 0 else N
    res = jnp.zeros((N, Cout), f32)
    for j0 in range(0, N, tj):
        kb = k[j0:j0 + tj, :]                                      # (tj, Cout)
        vb = v[j0:j0 + tj, :]
        s = jax.lax.dot_general(q, kb, (((1,), (1,)), ((), ())),
                                preferred_element_type=f32) * scale  # (N, tj)
        m = jnp.max(s, axis=0, keepdims=True)                      # over query axis
        e = jnp.exp(s - m)
        p = e * pl.reciprocal(jnp.sum(e, axis=0, keepdims=True), approx=True)
        res = res + jnp.dot(p, vb, preferred_element_type=f32)     # (N, Cout)

    # ---- output projection + residual, written lane-dense as (Cout, N) ----
    rows = jax.lax.broadcasted_iota(jnp.int32, (Cout, Cout), 0)
    cols = jax.lax.broadcasted_iota(jnp.int32, (Cout, Cout), 1)
    eye = jnp.where(rows == cols, jnp.float32(1.0), jnp.float32(0.0))
    r_t = jax.lax.dot_general(eye, r, (((1,), (1,)), ((), ())),
                              preferred_element_type=f32)          # (Cout, N) == r.T
    out_t = (jax.lax.dot_general(wot_ref[...], res, (((1,), (1,)), ((), ())),
                                 preferred_element_type=f32)
             + bo_ref[...] + r_t)                                  # (Cout, N)
    o_ref[0] = out_t.astype(o_ref.dtype)


# ------------------------------ wrapper ----------------------------------

def _full_spec(shape):
    return pl.BlockSpec(shape, lambda b, _s=shape: (0,) * len(_s))


def down_block(x_nchw, p):
    """DownBlock forward. x_nchw: (B, Cin, H, W) float32 -> (B, Cout, H, W)."""
    x = jnp.transpose(x_nchw, (0, 2, 3, 1)).astype(jnp.float32)    # NHWC (tiny input)
    B, H, W, Cin = x.shape
    Cout = p["w1"].shape[-1]
    N = H * W
    PAD = -(-(W + 1) // 8) * 8                                     # >= W+1, 8-aligned
    assert PAD >= W + 1

    xf = x.reshape(B, N, Cin)

    # ---- host-side weight packing (tiny, one-time) ----
    w1s = p["w1"].reshape(9, Cin, Cout)                            # tap-major (9, Cin, Cout)
    w2s = p["w2"].reshape(9, Cout, Cout)
    wsc = p["ws"]                                                  # (Cin, Cout)
    b1 = p["b1"]                                                   # (1, Cout)
    b2s = p["b2"] + p["bs"]                                        # merged conv2+shortcut bias
    wqkv = jnp.concatenate([p["wq"], p["wk"], p["wv"]], axis=1)    # (Cout, 3*Cout)
    bqkv = jnp.concatenate([p["bq"], p["bk"], p["bv"]], axis=1)    # (1, 3*Cout)
    wot = p["wo"].T                                                # (Cout, Cout)
    bo_t = p["bo"].T                                               # (Cout, 1)

    out = pl.pallas_call(
        functools.partial(_down_block_kernel, H=H, W=W, pad=PAD),
        out_shape=jax.ShapeDtypeStruct((B, Cout, N), jnp.float32),
        grid_spec=pltpu.PrefetchScalarGridSpec(
            num_scalar_prefetch=0,
            grid=(B,),
            in_specs=[
                pl.BlockSpec((1, N, Cin), lambda b: (b, 0, 0)),    # x (per-batch)
                _full_spec((9, Cin, Cout)),                        # w1
                _full_spec((1, Cout)),                             # b1
                _full_spec((9, Cout, Cout)),                       # w2
                _full_spec((Cin, Cout)),                           # shortcut w
                _full_spec((1, Cout)),                             # b2 + bs
                _full_spec((Cout, 3 * Cout)),                      # wq|wk|wv
                _full_spec((1, 3 * Cout)),                         # bq|bk|bv
                _full_spec((Cout, Cout)),                          # wo^T
                _full_spec((Cout, 1)),                             # bo^T
            ],
            out_specs=pl.BlockSpec((1, Cout, N), lambda b: (b, 0, 0)),
            scratch_shapes=[
                pltpu.VMEM((N + 2 * PAD, Cin), jnp.float32),       # padded gelu(x)
                pltpu.VMEM((N + 2 * PAD, Cout), jnp.float32),      # padded gelu(h1)
            ],
        ),
        compiler_params=pltpu.CompilerParams(
            dimension_semantics=("parallel",)),                    # v7x: one batch per TC
    )(xf, w1s, b1, w2s, wsc, b2s, wqkv, bqkv, wot, bo_t)

    return out.reshape(B, Cout, H, W)                              # NCHW, free reshape


# ------------------------- params & pure-JAX reference ---------------------

def init_params(key, cin, cout):
    ks = jax.random.split(key, 14)
    s = 0.1
    n = lambda k, shp: (jax.random.normal(k, shp, jnp.float32) * s)
    return {
        "w1": n(ks[0], (3, 3, cin, cout)),  "b1": n(ks[1], (1, cout)),
        "w2": n(ks[2], (3, 3, cout, cout)), "b2": n(ks[3], (1, cout)),
        "ws": n(ks[4], (cin, cout)),        "bs": n(ks[5], (1, cout)),
        "wq": n(ks[6], (cout, cout)),       "bq": n(ks[7], (1, cout)),
        "wk": n(ks[8], (cout, cout)),       "bk": n(ks[9], (1, cout)),
        "wv": n(ks[10], (cout, cout)),      "bv": n(ks[11], (1, cout)),
        "wo": n(ks[12], (cout, cout)),      "bo": n(ks[13], (1, cout)),
    }


def ref_down_block(x_nchw, p):
    x = jnp.transpose(x_nchw, (0, 2, 3, 1)).astype(jnp.float32)
    B, H, W, Cin = x.shape
    Cout = p["w1"].shape[-1]

    def conv3(a, w, b):
        return jax.lax.conv_general_dilated(
            a, w, (1, 1), "SAME",
            dimension_numbers=("NHWC", "HWIO", "NHWC")) + b

    h = conv3(_gelu(x), p["w1"], p["b1"])
    h = conv3(_gelu(h), p["w2"], p["b2"])
    sc = jnp.einsum("bhwc,co->bhwo", x, p["ws"]) + p["bs"]
    r = h + sc                                                     # ResidualBlock out

    xf = r.reshape(B, H * W, Cout)
    q = xf @ p["wq"] + p["bq"]
    k = xf @ p["wk"] + p["bk"]
    v = xf @ p["wv"] + p["bv"]
    attn = jnp.einsum("bic,bjc->bij", q, k) * (float(Cout) ** -0.5)
    attn = jax.nn.softmax(attn, axis=1)                            # torch dim=1 == query axis
    res = jnp.einsum("bij,bjc->bic", attn, v)
    out = res @ p["wo"] + p["bo"] + xf
    return jnp.transpose(out.reshape(B, H, W, Cout), (0, 3, 1, 2))


if __name__ == "__main__":
    key = jax.random.PRNGKey(0)
    kx, kp = jax.random.split(key)
    B, Cin, H, W = 2, 4, 16, 16
    Cout = 8
    x = jax.random.normal(kx, (B, Cin, H, W), jnp.float32)
    params = init_params(kp, Cin, Cout)

    out = down_block(x, params)
    out = jax.block_until_ready(out)

    ref = ref_down_block(x, params)
    assert out.shape == (B, Cout, H, W)
    max_err = float(jnp.max(jnp.abs(out - ref)))
    assert max_err < 1e-3, f"max abs err {max_err}"
    print("KERNEL_OK")
</pallas_src>

<mosaic_0001>
module attributes {stable_mosaic.version = 11 : i64} {
  func.func @_down_block_kernel(%arg0: i32, %arg1: memref<1x256x4xf32, #tpu.memory_space<vmem>>, %arg2: memref<9x4x8xf32, #tpu.memory_space<vmem>>, %arg3: memref<1x8xf32, #tpu.memory_space<vmem>>, %arg4: memref<9x8x8xf32, #tpu.memory_space<vmem>>, %arg5: memref<4x8xf32, #tpu.memory_space<vmem>>, %arg6: memref<1x8xf32, #tpu.memory_space<vmem>>, %arg7: memref<8x24xf32, #tpu.memory_space<vmem>>, %arg8: memref<1x24xf32, #tpu.memory_space<vmem>>, %arg9: memref<8x8xf32, #tpu.memory_space<vmem>>, %arg10: memref<8x1xf32, #tpu.memory_space<vmem>>, %arg11: memref<1x8x256xf32, #tpu.memory_space<vmem>>, %arg12: memref<304x4xf32, #tpu.memory_space<vmem>>, %arg13: memref<304x8xf32, #tpu.memory_space<vmem>>) attributes {dimension_semantics = [#tpu.dimension_semantics<parallel>], iteration_bounds = array<i64: 2>, scalar_prefetch = 0 : i64, scratch_operands = 2 : i64, tpu.core_type = #tpu.core_type<tc>, window_params = [{transform_indices = @transform_0, window_bounds = array<i64: 1, 256, 4>}, {pipeline_mode = #tpu.pipeline_mode<synchronous>, transform_indices = @transform_1, window_bounds = array<i64: 9, 4, 8>}, {pipeline_mode = #tpu.pipeline_mode<synchronous>, transform_indices = @transform_2, window_bounds = array<i64: 1, 8>}, {pipeline_mode = #tpu.pipeline_mode<synchronous>, transform_indices = @transform_3, window_bounds = array<i64: 9, 8, 8>}, {pipeline_mode = #tpu.pipeline_mode<synchronous>, transform_indices = @transform_4, window_bounds = array<i64: 4, 8>}, {pipeline_mode = #tpu.pipeline_mode<synchronous>, transform_indices = @transform_5, window_bounds = array<i64: 1, 8>}, {pipeline_mode = #tpu.pipeline_mode<synchronous>, transform_indices = @transform_6, window_bounds = array<i64: 8, 24>}, {pipeline_mode = #tpu.pipeline_mode<synchronous>, transform_indices = @transform_7, window_bounds = array<i64: 1, 24>}, {pipeline_mode = #tpu.pipeline_mode<synchronous>, transform_indices = @transform_8, window_bounds = array<i64: 8, 8>}, {pipeline_mode = #tpu.pipeline_mode<synchronous>, transform_indices = @transform_9, window_bounds = array<i64: 8, 1>}, {transform_indices = @transform_10, window_bounds = array<i64: 1, 8, 256>}]} {
    %c0 = arith.constant 0 : index
    %c0_0 = arith.constant 0 : index
    %c0_1 = arith.constant 0 : index
    %0 = vector.load %arg1[%c0, %c0_0, %c0_1] : memref<1x256x4xf32, #tpu.memory_space<vmem>>, vector<1x256x4xf32>
    %1 = vector.shape_cast %0 : vector<1x256x4xf32> to vector<256x4xf32>
    %2 = tpu.iota {dimensions = array<i32: 0>} : vector<256x1xi32>
    %c16_i32 = arith.constant 16 : i32
    %c0_i32 = arith.constant 0 : i32
    %3 = arith.cmpi eq, %c16_i32, %c0_i32 : i32
    %c1_i32 = arith.constant 1 : i32
    %4 = arith.select %3, %c1_i32, %c16_i32 : i32
    %5 = vector.broadcast %4 : i32 to vector<256x1xi32>
    %6 = arith.remsi %2, %5 : vector<256x1xi32>
    %c0_i32_2 = arith.constant 0 : i32
    %7 = vector.broadcast %c0_i32_2 : i32 to vector<256x1xi32>
    %8 = arith.cmpi ne, %6, %7 : vector<256x1xi32>
    %c0_i32_3 = arith.constant 0 : i32
    %9 = vector.broadcast %c0_i32_3 : i32 to vector<256x1xi32>
    %10 = arith.cmpi slt, %6, %9 : vector<256x1xi32>
    %c0_i32_4 = arith.constant 0 : i32
    %11 = arith.cmpi slt, %4, %c0_i32_4 : i32
    %12 = vector.broadcast %11 : i1 to vector<256x1xi1>
    %13 = vector.broadcast %12 : vector<256x1xi1> to vector<256x1xi1>
    %14 = arith.xori %10, %13 : vector<256x1xi1>
    %15 = arith.andi %14, %8 : vector<256x1xi1>
    %16 = vector.broadcast %4 : i32 to vector<256x1xi32>
    %17 = arith.addi %6, %16 : vector<256x1xi32>
    %18 = arith.select %15, %17, %6 : vector<256x1xi1>, vector<256x1xi32>
    %cst = arith.constant 5.000000e-01 : f32
    %19 = vector.broadcast %cst : f32 to vector<256x4xf32>
    %20 = arith.mulf %19, %1 : vector<256x4xf32>
    %cst_5 = arith.constant 1.41421354 : f32
    %21 = vector.broadcast %cst_5 : f32 to vector<256x4xf32>
    %22 = arith.divf %1, %21 : vector<256x4xf32>
    %23 = math.erf %22 : vector<256x4xf32>
    %cst_6 = arith.constant 1.000000e+00 : f32
    %24 = vector.broadcast %cst_6 : f32 to vector<256x4xf32>
    %25 = arith.addf %24, %23 : vector<256x4xf32>
    %26 = arith.mulf %20, %25 : vector<256x4xf32>
    %cst_7 = arith.constant 0.000000e+00 : f32
    %27 = vector.broadcast %cst_7 : f32 to vector<256x8xf32>
    %cst_8 = arith.constant 0.000000e+00 : f32
    %28 = vector.broadcast %cst_8 : f32 to vector<304x4xf32>
    %c0_9 = arith.constant 0 : index
    %c0_10 = arith.constant 0 : index
    %29 = vector.load %arg12[%c0_9, %c0_10] : memref<304x4xf32, #tpu.memory_space<vmem>>, vector<304x4xf32>
    tpu.vector_store %arg12[%c0_9, %c0_10], %28 {strides = array<i32>} : memref<304x4xf32, #tpu.memory_space<vmem>>, vector<304x4xf32>,
    %c24 = arith.constant 24 : index
    %c0_11 = arith.constant 0 : index
    %30 = vector.load %arg12[%c24, %c0_11] : memref<304x4xf32, #tpu.memory_space<vmem>>, vector<256x4xf32>
    tpu.vector_store %arg12[%c24, %c0_11], %26 {strides = array<i32>} : memref<304x4xf32, #tpu.memory_space<vmem>>, vector<256x4xf32>,
    %c7 = arith.constant 7 : index
    %c0_12 = arith.constant 0 : index
    %31 = vector.load %arg12[%c7, %c0_12] : memref<304x4xf32, #tpu.memory_space<vmem>>, vector<256x4xf32>
    %c1_i32_13 = arith.constant 1 : i32
    %32 = vector.broadcast %c1_i32_13 : i32 to vector<256x1xi32>
    %33 = arith.cmpi sge, %18, %32 : vector<256x1xi32>
    %cst_14 = arith.constant 0.000000e+00 : f32
    %34 = vector.shape_cast %33 : vector<256x1xi1> to vector<256x1xi1>
    %35 = vector.broadcast %34 : vector<256x1xi1> to vector<256x4xi1>
    %36 = vector.broadcast %cst_14 : f32 to vector<256x4xf32>
    %37 = arith.select %35, %31, %36 : vector<256x4xi1>, vector<256x4xf32>
    %c0_15 = arith.constant 0 : index
    %c0_16 = arith.constant 0 : index
    %c0_17 = arith.constant 0 : index
    %38 = vector.load %arg2[%c0_15, %c0_16, %c0_17] : memref<9x4x8xf32, #tpu.memory_space<vmem>>, vector<1x4x8xf32>
    %39 = vector.shape_cast %38 : vector<1x4x8xf32> to vector<4x8xf32>
    %cst_18 = arith.constant dense<0.000000e+00> : vector<256x8xf32>
    %40 = tpu.matmul %37, %39, %cst_18 {dimension_numbers = #tpu.dot_dimension_numbers<[1], [0], [0], [1], [0, 0, 1, 1], [], []>} : vector<256x4xf32>, vector<4x8xf32>, vector<256x8xf32> -> vector<256x8xf32>
    %41 = arith.addf %27, %40 : vector<256x8xf32>
    %c8 = arith.constant 8 : index
    %c0_19 = arith.constant 0 : index
    %42 = vector.load %arg12[%c8, %c0_19] : memref<304x4xf32, #tpu.memory_space<vmem>>, vector<256x4xf32>
    %c1 = arith.constant 1 : index
    %c0_20 = arith.constant 0 : index
    %c0_21 = arith.constant 0 : index
    %43 = vector.load %arg2[%c1, %c0_20, %c0_21] : memref<9x4x8xf32, #tpu.memory_space<vmem>>, vector<1x4x8xf32>
    %44 = vector.shape_cast %43 : vector<1x4x8xf32> to vector<4x8xf32>
    %cst_22 = arith.constant dense<0.000000e+00> : vector<256x8xf32>
    %45 = tpu.matmul %42, %44, %cst_22 {dimension_numbers = #tpu.dot_dimension_numbers<[1], [0], [0], [1], [0, 0, 1, 1], [], []>} : vector<256x4xf32>, vector<4x8xf32>, vector<256x8xf32> -> vector<256x8xf32>
    %46 = arith.addf %41, %45 : vector<256x8xf32>
    %c9 = arith.constant 9 : index
    %c0_23 = arith.constant 0 : index
    %47 = vector.load %arg12[%c9, %c0_23] : memref<304x4xf32, #tpu.memory_space<vmem>>, vector<256x4xf32>
    %c14_i32 = arith.constant 14 : i32
    %48 = vector.broadcast %c14_i32 : i32 to vector<256x1xi32>
    %49 = arith.cmpi sle, %18, %48 : vector<256x1xi32>
    %cst_24 = arith.constant 0.000000e+00 : f32
    %50 = vector.shape_cast %49 : vector<256x1xi1> to vector<256x1xi1>
    %51 = vector.broadcast %50 : vector<256x1xi1> to vector<256x4xi1>
    %52 = vector.broadcast %cst_24 : f32 to vector<256x4xf32>
    %53 = arith.select %51, %47, %52 : vector<256x4xi1>, vector<256x4xf32>
    %c2 = arith.constant 2 : index
    %c0_25 = arith.constant 0 : index
    %c0_26 = arith.constant 0 : index
    %54 = vector.load %arg2[%c2, %c0_25, %c0_26] : memref<9x4x8xf32, #tpu.memory_space<vmem>>, vector<1x4x8xf32>
    %55 = vector.shape_cast %54 : vector<1x4x8xf32> to vector<4x8xf32>
    %cst_27 = arith.constant dense<0.000000e+00> : vector<256x8xf32>
    %56 = tpu.matmul %53, %55, %cst_27 {dimension_numbers = #tpu.dot_dimension_numbers<[1], [0], [0], [1], [0, 0, 1, 1], [], []>} : vector<256x4xf32>, vector<4x8xf32>, vector<256x8xf32> -> vector<256x8xf32>
    %57 = arith.addf %46, %56 : vector<256x8xf32>
    %c23 = arith.constant 23 : index
    %c0_28 = arith.constant 0 : index
    %58 = vector.load %arg12[%c23, %c0_28] : memref<304x4xf32, #tpu.memory_space<vmem>>, vector<256x4xf32>
    %c1_i32_29 = arith.constant 1 : i32
    %59 = vector.broadcast %c1_i32_29 : i32 to vector<256x1xi32>
    %60 = arith.cmpi sge, %18, %59 : vector<256x1xi32>
    %cst_30 = arith.constant 0.000000e+00 : f32
    %61 = vector.shape_cast %60 : vector<256x1xi1> to vector<256x1xi1>
    %62 = vector.broadcast %61 : vector<256x1xi1> to vector<256x4xi1>
    %63 = vector.broadcast %cst_30 : f32 to vector<256x4xf32>
    %64 = arith.select %62, %58, %63 : vector<256x4xi1>, vector<256x4xf32>
    %c3 = arith.constant 3 : index
    %c0_31 = arith.constant 0 : index
    %c0_32 = arith.constant 0 : index
    %65 = vector.load %arg2[%c3, %c0_31, %c0_32] : memref<9x4x8xf32, #tpu.memory_space<vmem>>, vector<1x4x8xf32>
    %66 = vector.shape_cast %65 : vector<1x4x8xf32> to vector<4x8xf32>
    %cst_33 = arith.constant dense<0.000000e+00> : vector<256x8xf32>
    %67 = tpu.matmul %64, %66, %cst_33 {dimension_numbers = #tpu.dot_dimension_numbers<[1], [0], [0], [1], [0, 0, 1, 1], [], []>} : vector<256x4xf32>, vector<4x8xf32>, vector<256x8xf32> -> vector<256x8xf32>
    %68 = arith.addf %57, %67 : vector<256x8xf32>
    %c24_34 = arith.constant 24 : index
    %c0_35 = arith.constant 0 : index
    %69 = vector.load %arg12[%c24_34, %c0_35] : memref<304x4xf32, #tpu.memory_space<vmem>>, vector<256x4xf32>
    %c4 = arith.constant 4 : index
    %c0_36 = arith.constant 0 : index
    %c0_37 = arith.constant 0 : index
    %70 = vector.load %arg2[%c4, %c0_36, %c0_37] : memref<9x4x8xf32, #tpu.memory_space<vmem>>, vector<1x4x8xf32>
    %71 = vector.shape_cast %70 : vector<1x4x8xf32> to vector<4x8xf32>
    %cst_38 = arith.constant dense<0.000000e+00> : vector<256x8xf32>
    %72 = tpu.matmul %69, %71, %cst_38 {dimension_numbers = #tpu.dot_dimension_numbers<[1], [0], [0], [1], [0, 0, 1, 1], [], []>} : vector<256x4xf32>, vector<4x8xf32>, vector<256x8xf32> -> vector<256x8xf32>
    %73 = arith.addf %68, %72 : vector<256x8xf32>
    %c25 = arith.constant 25 : index
    %c0_39 = arith.constant 0 : index
    %74 = vector.load %arg12[%c25, %c0_39] : memref<304x4xf32, #tpu.memory_space<vmem>>, vector<256x4xf32>
    %c14_i32_40 = arith.constant 14 : i32
    %75 = vector.broadcast %c14_i32_40 : i32 to vector<256x1xi32>
    %76 = arith.cmpi sle, %18, %75 : vector<256x1xi32>
    %cst_41 = arith.constant 0.000000e+00 : f32
    %77 = vector.shape_cast %76 : vector<256x1xi1> to vector<256x1xi1>
    %78 = vector.broadcast %77 : vector<256x1xi1> to vector<256x4xi1>
    %79 = vector.broadcast %cst_41 : f32 to vector<256x4xf32>
    %80 = arith.select %78, %74, %79 : vector<256x4xi1>, vector<256x4xf32>
    %c5 = arith.constant 5 : index
    %c0_42 = arith.constant 0 : index
    %c0_43 = arith.constant 0 : index
    %81 = vector.load %arg2[%c5, %c0_42, %c0_43] : memref<9x4x8xf32, #tpu.memory_space<vmem>>, vector<1x4x8xf32>
    %82 = vector.shape_cast %81 : vector<1x4x8xf32> to vector<4x8xf32>
    %cst_44 = arith.constant dense<0.000000e+00> : vector<256x8xf32>
    %83 = tpu.matmul %80, %82, %cst_44 {dimension_numbers = #tpu.dot_dimension_numbers<[1], [0], [0], [1], [0, 0, 1, 1], [], []>} : vector<256x4xf32>, vector<4x8xf32>, vector<256x8xf32> -> vector<256x8xf32>
    %84 = arith.addf %73, %83 : vector<256x8xf32>
    %c39 = arith.constant 39 : index
    %c0_45 = arith.constant 0 : index
    %85 = vector.load %arg12[%c39, %c0_45] : memref<304x4xf32, #tpu.memory_space<vmem>>, vector<256x4xf32>
    %c1_i32_46 = arith.constant 1 : i32
    %86 = vector.broadcast %c1_i32_46 : i32 to vector<256x1xi32>
    %87 = arith.cmpi sge, %18, %86 : vector<256x1xi32>
    %cst_47 = arith.constant 0.000000e+00 : f32
    %88 = vector.shape_cast %87 : vector<256x1xi1> to vector<256x1xi1>
    %89 = vector.broadcast %88 : vector<256x1xi1> to vector<256x4xi1>
    %90 = vector.broadcast %cst_47 : f32 to vector<256x4xf32>
    %91 = arith.select %89, %85, %90 : vector<256x4xi1>, vector<256x4xf32>
    %c6 = arith.constant 6 : index
    %c0_48 = arith.constant 0 : index
    %c0_49 = arith.constant 0 : index
    %92 = vector.load %arg2[%c6, %c0_48, %c0_49] : memref<9x4x8xf32, #tpu.memory_space<vmem>>, vector<1x4x8xf32>
    %93 = vector.shape_cast %92 : vector<1x4x8xf32> to vector<4x8xf32>
    %cst_50 = arith.constant dense<0.000000e+00> : vector<256x8xf32>
    %94 = tpu.matmul %91, %93, %cst_50 {dimension_numbers = #tpu.dot_dimension_numbers<[1], [0], [0], [1], [0, 0, 1, 1], [], []>} : vector<256x4xf32>, vector<4x8xf32>, vector<256x8xf32> -> vector<256x8xf32>
    %95 = arith.addf %84, %94 : vector<256x8xf32>
    %c40 = arith.constant 40 : index
    %c0_51 = arith.constant 0 : index
    %96 = vector.load %arg12[%c40, %c0_51] : memref<304x4xf32, #tpu.memory_space<vmem>>, vector<256x4xf32>
    %c7_52 = arith.constant 7 : index
    %c0_53 = arith.constant 0 : index
    %c0_54 = arith.constant 0 : index
    %97 = vector.load %arg2[%c7_52, %c0_53, %c0_54] : memref<9x4x8xf32, #tpu.memory_space<vmem>>, vector<1x4x8xf32>
    %98 = vector.shape_cast %97 : vector<1x4x8xf32> to vector<4x8xf32>
    %cst_55 = arith.constant dense<0.000000e+00> : vector<256x8xf32>
    %99 = tpu.matmul %96, %98, %cst_55 {dimension_numbers = #tpu.dot_dimension_numbers<[1], [0], [0], [1], [0, 0, 1, 1], [], []>} : vector<256x4xf32>, vector<4x8xf32>, vector<256x8xf32> -> vector<256x8xf32>
    %100 = arith.addf %95, %99 : vector<256x8xf32>
    %c41 = arith.constant 41 : index
    %c0_56 = arith.constant 0 : index
    %101 = vector.load %arg12[%c41, %c0_56] : memref<304x4xf32, #tpu.memory_space<vmem>>, vector<256x4xf32>
    %c14_i32_57 = arith.constant 14 : i32
    %102 = vector.broadcast %c14_i32_57 : i32 to vector<256x1xi32>
    %103 = arith.cmpi sle, %18, %102 : vector<256x1xi32>
    %cst_58 = arith.constant 0.000000e+00 : f32
    %104 = vector.shape_cast %103 : vector<256x1xi1> to vector<256x1xi1>
    %105 = vector.broadcast %104 : vector<256x1xi1> to vector<256x4xi1>
    %106 = vector.broadcast %cst_58 : f32 to vector<256x4xf32>
    %107 = arith.select %105, %101, %106 : vector<256x4xi1>, vector<256x4xf32>
    %c8_59 = arith.constant 8 : index
    %c0_60 = arith.constant 0 : index
    %c0_61 = arith.constant 0 : index
    %108 = vector.load %arg2[%c8_59, %c0_60, %c0_61] : memref<9x4x8xf32, #tpu.memory_space<vmem>>, vector<1x4x8xf32>
    %109 = vector.shape_cast %108 : vector<1x4x8xf32> to vector<4x8xf32>
    %cst_62 = arith.constant dense<0.000000e+00> : vector<256x8xf32>
    %110 = tpu.matmul %107, %109, %cst_62 {dimension_numbers = #tpu.dot_dimension_numbers<[1], [0], [0], [1], [0, 0, 1, 1], [], []>} : vector<256x4xf32>, vector<4x8xf32>, vector<256x8xf32> -> vector<256x8xf32>
    %111 = arith.addf %100, %110 : vector<256x8xf32>
    %c0_63 = arith.constant 0 : index
    %c0_64 = arith.constant 0 : index
    %112 = vector.load %arg3[%c0_63, %c0_64] : memref<1x8xf32, #tpu.memory_space<vmem>>, vector<1x8xf32>
    %113 = vector.broadcast %112 : vector<1x8xf32> to vector<256x8xf32>
    %114 = arith.addf %111, %113 : vector<256x8xf32>
    %c0_65 = arith.constant 0 : index
    %c0_66 = arith.constant 0 : index
    %115 = vector.load %arg5[%c0_65, %c0_66] : memref<4x8xf32, #tpu.memory_space<vmem>>, vector<4x8xf32>
    %cst_67 = arith.constant dense<0.000000e+00> : vector<256x8xf32>
    %116 = tpu.matmul %1, %115, %cst_67 {dimension_numbers = #tpu.dot_dimension_numbers<[1], [0], [0], [1], [0, 0, 1, 1], [], []>} : vector<256x4xf32>, vector<4x8xf32>, vector<256x8xf32> -> vector<256x8xf32>
    %c0_68 = arith.constant 0 : index
    %c0_69 = arith.constant 0 : index
    %117 = vector.load %arg6[%c0_68, %c0_69] : memref<1x8xf32, #tpu.memory_space<vmem>>, vector<1x8xf32>
    %118 = vector.broadcast %117 : vector<1x8xf32> to vector<256x8xf32>
    %119 = arith.addf %116, %118 : vector<256x8xf32>
    %cst_70 = arith.constant 5.000000e-01 : f32
    %120 = vector.broadcast %cst_70 : f32 to vector<256x8xf32>
    %121 = arith.mulf %120, %114 : vector<256x8xf32>
    %cst_71 = arith.constant 1.41421354 : f32
    %122 = vector.broadcast %cst_71 : f32 to vector<256x8xf32>
    %123 = arith.divf %114, %122 : vector<256x8xf32>
    %124 = math.erf %123 : vector<256x8xf32>
    %cst_72 = arith.constant 1.000000e+00 : f32
    %125 = vector.broadcast %cst_72 : f32 to vector<256x8xf32>
    %126 = arith.addf %125, %124 : vector<256x8xf32>
    %127 = arith.mulf %121, %126 : vector<256x8xf32>
    %cst_73 = arith.constant 0.000000e+00 : f32
    %128 = vector.broadcast %cst_73 : f32 to vector<304x8xf32>
    %c0_74 = arith.constant 0 : index
    %c0_75 = arith.constant 0 : index
    %129 = vector.load %arg13[%c0_74, %c0_75] : memref<304x8xf32, #tpu.memory_space<vmem>>, vector<304x8xf32>
    tpu.vector_store %arg13[%c0_74, %c0_75], %128 {strides = array<i32>} : memref<304x8xf32, #tpu.memory_space<vmem>>, vector<304x8xf32>,
    %c24_76 = arith.constant 24 : index
    %c0_77 = arith.constant 0 : index
    %130 = vector.load %arg13[%c24_76, %c0_77] : memref<304x8xf32, #tpu.memory_space<vmem>>, vector<256x8xf32>
    tpu.vector_store %arg13[%c24_76, %c0_77], %127 {strides = array<i32>} : memref<304x8xf32, #tpu.memory_space<vmem>>, vector<256x8xf32>,
    %c7_78 = arith.constant 7 : index
    %c0_79 = arith.constant 0 : index
    %131 = vector.load %arg13[%c7_78, %c0_79] : memref<304x8xf32, #tpu.memory_space<vmem>>, vector<256x8xf32>
    %c1_i32_80 = arith.constant 1 : i32
    %132 = vector.broadcast %c1_i32_80 : i32 to vector<256x1xi32>
    %133 = arith.cmpi sge, %18, %132 : vector<256x1xi32>
    %cst_81 = arith.constant 0.000000e+00 : f32
    %134 = vector.shape_cast %133 : vector<256x1xi1> to vector<256x1xi1>
    %135 = vector.broadcast %134 : vector<256x1xi1> to vector<256x8xi1>
    %136 = vector.broadcast %cst_81 : f32 to vector<256x8xf32>
    %137 = arith.select %135, %131, %136 : vector<256x8xi1>, vector<256x8xf32>
    %c0_82 = arith.constant 0 : index
    %c0_83 = arith.constant 0 : index
    %c0_84 = arith.constant 0 : index
    %138 = vector.load %arg4[%c0_82, %c0_83, %c0_84] : memref<9x8x8xf32, #tpu.memory_space<vmem>>, vector<1x8x8xf32>
    %139 = vector.shape_cast %138 : vector<1x8x8xf32> to vector<8x8xf32>
    %cst_85 = arith.constant dense<0.000000e+00> : vector<256x8xf32>
    %140 = tpu.matmul %137, %139, %cst_85 {dimension_numbers = #tpu.dot_dimension_numbers<[1], [0], [0], [1], [0, 0, 1, 1], [], []>} : vector<256x8xf32>, vector<8x8xf32>, vector<256x8xf32> -> vector<256x8xf32>
    %141 = arith.addf %119, %140 : vector<256x8xf32>
    %c8_86 = arith.constant 8 : index
    %c0_87 = arith.constant 0 : index
    %142 = vector.load %arg13[%c8_86, %c0_87] : memref<304x8xf32, #tpu.memory_space<vmem>>, vector<256x8xf32>
    %c1_88 = arith.constant 1 : index
    %c0_89 = arith.constant 0 : index
    %c0_90 = arith.constant 0 : index
    %143 = vector.load %arg4[%c1_88, %c0_89, %c0_90] : memref<9x8x8xf32, #tpu.memory_space<vmem>>, vector<1x8x8xf32>
    %144 = vector.shape_cast %143 : vector<1x8x8xf32> to vector<8x8xf32>
    %cst_91 = arith.constant dense<0.000000e+00> : vector<256x8xf32>
    %145 = tpu.matmul %142, %144, %cst_91 {dimension_numbers = #tpu.dot_dimension_numbers<[1], [0], [0], [1], [0, 0, 1, 1], [], []>} : vector<256x8xf32>, vector<8x8xf32>, vector<256x8xf32> -> vector<256x8xf32>
    %146 = arith.addf %141, %145 : vector<256x8xf32>
    %c9_92 = arith.constant 9 : index
    %c0_93 = arith.constant 0 : index
    %147 = vector.load %arg13[%c9_92, %c0_93] : memref<304x8xf32, #tpu.memory_space<vmem>>, vector<256x8xf32>
    %c14_i32_94 = arith.constant 14 : i32
    %148 = vector.broadcast %c14_i32_94 : i32 to vector<256x1xi32>
    %149 = arith.cmpi sle, %18, %148 : vector<256x1xi32>
    %cst_95 = arith.constant 0.000000e+00 : f32
    %150 = vector.shape_cast %149 : vector<256x1xi1> to vector<256x1xi1>
    %151 = vector.broadcast %150 : vector<256x1xi1> to vector<256x8xi1>
    %152 = vector.broadcast %cst_95 : f32 to vector<256x8xf32>
    %153 = arith.select %151, %147, %152 : vector<256x8xi1>, vector<256x8xf32>
    %c2_96 = arith.constant 2 : index
    %c0_97 = arith.constant 0 : index
    %c0_98 = arith.constant 0 : index
    %154 = vector.load %arg4[%c2_96, %c0_97, %c0_98] : memref<9x8x8xf32, #tpu.memory_space<vmem>>, vector<1x8x8xf32>
    %155 = vector.shape_cast %154 : vector<1x8x8xf32> to vector<8x8xf32>
    %cst_99 = arith.constant dense<0.000000e+00> : vector<256x8xf32>
    %156 = tpu.matmul %153, %155, %cst_99 {dimension_numbers = #tpu.dot_dimension_numbers<[1], [0], [0], [1], [0, 0, 1, 1], [], []>} : vector<256x8xf32>, vector<8x8xf32>, vector<256x8xf32> -> vector<256x8xf32>
    %157 = arith.addf %146, %156 : vector<256x8xf32>
    %c23_100 = arith.constant 23 : index
    %c0_101 = arith.constant 0 : index
    %158 = vector.load %arg13[%c23_100, %c0_101] : memref<304x8xf32, #tpu.memory_space<vmem>>, vector<256x8xf32>
    %c1_i32_102 = arith.constant 1 : i32
    %159 = vector.broadcast %c1_i32_102 : i32 to vector<256x1xi32>
    %160 = arith.cmpi sge, %18, %159 : vector<256x1xi32>
    %cst_103 = arith.constant 0.000000e+00 : f32
    %161 = vector.shape_cast %160 : vector<256x1xi1> to vector<256x1xi1>
    %162 = vector.broadcast %161 : vector<256x1xi1> to vector<256x8xi1>
    %163 = vector.broadcast %cst_103 : f32 to vector<256x8xf32>
    %164 = arith.select %162, %158, %163 : vector<256x8xi1>, vector<256x8xf32>
    %c3_104 = arith.constant 3 : index
    %c0_105 = arith.constant 0 : index
    %c0_106 = arith.constant 0 : index
    %165 = vector.load %arg4[%c3_104, %c0_105, %c0_106] : memref<9x8x8xf32, #tpu.memory_space<vmem>>, vector<1x8x8xf32>
    %166 = vector.shape_cast %165 : vector<1x8x8xf32> to vector<8x8xf32>
    %cst_107 = arith.constant dense<0.000000e+00> : vector<256x8xf32>
    %167 = tpu.matmul %164, %166, %cst_107 {dimension_numbers = #tpu.dot_dimension_numbers<[1], [0], [0], [1], [0, 0, 1, 1], [], []>} : vector<256x8xf32>, vector<8x8xf32>, vector<256x8xf32> -> vector<256x8xf32>
    %168 = arith.addf %157, %167 : vector<256x8xf32>
    %c24_108 = arith.constant 24 : index
    %c0_109 = arith.constant 0 : index
    %169 = vector.load %arg13[%c24_108, %c0_109] : memref<304x8xf32, #tpu.memory_space<vmem>>, vector<256x8xf32>
    %c4_110 = arith.constant 4 : index
    %c0_111 = arith.constant 0 : index
    %c0_112 = arith.constant 0 : index
    %170 = vector.load %arg4[%c4_110, %c0_111, %c0_112] : memref<9x8x8xf32, #tpu.memory_space<vmem>>, vector<1x8x8xf32>
    %171 = vector.shape_cast %170 : vector<1x8x8xf32> to vector<8x8xf32>
    %cst_113 = arith.constant dense<0.000000e+00> : vector<256x8xf32>
    %172 = tpu.matmul %169, %171, %cst_113 {dimension_numbers = #tpu.dot_dimension_numbers<[1], [0], [0], [1], [0, 0, 1, 1], [], []>} : vector<256x8xf32>, vector<8x8xf32>, vector<256x8xf32> -> vector<256x8xf32>
    %173 = arith.addf %168, %172 : vector<256x8xf32>
    %c25_114 = arith.constant 25 : index
    %c0_115 = arith.constant 0 : index
    %174 = vector.load %arg13[%c25_114, %c0_115] : memref<304x8xf32, #tpu.memory_space<vmem>>, vector<256x8xf32>
    %c14_i32_116 = arith.constant 14 : i32
    %175 = vector.broadcast %c14_i32_116 : i32 to vector<256x1xi32>
    %176 = arith.cmpi sle, %18, %175 : vector<256x1xi32>
    %cst_117 = arith.constant 0.000000e+00 : f32
    %177 = vector.shape_cast %176 : vector<256x1xi1> to vector<256x1xi1>
    %178 = vector.broadcast %177 : vector<256x1xi1> to vector<256x8xi1>
    %179 = vector.broadcast %cst_117 : f32 to vector<256x8xf32>
    %180 = arith.select %178, %174, %179 : vector<256x8xi1>, vector<256x8xf32>
    %c5_118 = arith.constant 5 : index
    %c0_119 = arith.constant 0 : index
    %c0_120 = arith.constant 0 : index
    %181 = vector.load %arg4[%c5_118, %c0_119, %c0_120] : memref<9x8x8xf32, #tpu.memory_space<vmem>>, vector<1x8x8xf32>
    %182 = vector.shape_cast %181 : vector<1x8x8xf32> to vector<8x8xf32>
    %cst_121 = arith.constant dense<0.000000e+00> : vector<256x8xf32>
    %183 = tpu.matmul %180, %182, %cst_121 {dimension_numbers = #tpu.dot_dimension_numbers<[1], [0], [0], [1], [0, 0, 1, 1], [], []>} : vector<256x8xf32>, vector<8x8xf32>, vector<256x8xf32> -> vector<256x8xf32>
    %184 = arith.addf %173, %183 : vector<256x8xf32>
    %c39_122 = arith.constant 39 : index
    %c0_123 = arith.constant 0 : index
    %185 = vector.load %arg13[%c39_122, %c0_123] : memref<304x8xf32, #tpu.memory_space<vmem>>, vector<256x8xf32>
    %c1_i32_124 = arith.constant 1 : i32
    %186 = vector.broadcast %c1_i32_124 : i32 to vector<256x1xi32>
    %187 = arith.cmpi sge, %18, %186 : vector<256x1xi32>
    %cst_125 = arith.constant 0.000000e+00 : f32
    %188 = vector.shape_cast %187 : vector<256x1xi1> to vector<256x1xi1>
    %189 = vector.broadcast %188 : vector<256x1xi1> to vector<256x8xi1>
    %190 = vector.broadcast %cst_125 : f32 to vector<256x8xf32>
    %191 = arith.select %189, %185, %190 : vector<256x8xi1>, vector<256x8xf32>
    %c6_126 = arith.constant 6 : index
    %c0_127 = arith.constant 0 : index
    %c0_128 = arith.constant 0 : index
    %192 = vector.load %arg4[%c6_126, %c0_127, %c0_128] : memref<9x8x8xf32, #tpu.memory_space<vmem>>, vector<1x8x8xf32>
    %193 = vector.shape_cast %192 : vector<1x8x8xf32> to vector<8x8xf32>
    %cst_129 = arith.constant dense<0.000000e+00> : vector<256x8xf32>
    %194 = tpu.matmul %191, %193, %cst_129 {dimension_numbers = #tpu.dot_dimension_numbers<[1], [0], [0], [1], [0, 0, 1, 1], [], []>} : vector<256x8xf32>, vector<8x8xf32>, vector<256x8xf32> -> vector<256x8xf32>
    %195 = arith.addf %184, %194 : vector<256x8xf32>
    %c40_130 = arith.constant 40 : index
    %c0_131 = arith.constant 0 : index
    %196 = vector.load %arg13[%c40_130, %c0_131] : memref<304x8xf32, #tpu.memory_space<vmem>>, vector<256x8xf32>
    %c7_132 = arith.constant 7 : index
    %c0_133 = arith.constant 0 : index
    %c0_134 = arith.constant 0 : index
    %197 = vector.load %arg4[%c7_132, %c0_133, %c0_134] : memref<9x8x8xf32, #tpu.memory_space<vmem>>, vector<1x8x8xf32>
    %198 = vector.shape_cast %197 : vector<1x8x8xf32> to vector<8x8xf32>
    %cst_135 = arith.constant dense<0.000000e+00> : vector<256x8xf32>
    %199 = tpu.matmul %196, %198, %cst_135 {dimension_numbers = #tpu.dot_dimension_numbers<[1], [0], [0], [1], [0, 0, 1, 1], [], []>} : vector<256x8xf32>, vector<8x8xf32>, vector<256x8xf32> -> vector<256x8xf32>
    %200 = arith.addf %195, %199 : vector<256x8xf32>
    %c41_136 = arith.constant 41 : index
    %c0_137 = arith.constant 0 : index
    %201 = vector.load %arg13[%c41_136, %c0_137] : memref<304x8xf32, #tpu.memory_space<vmem>>, vector<256x8xf32>
    %c14_i32_138 = arith.constant 14 : i32
    %202 = vector.broadcast %c14_i32_138 : i32 to vector<256x1xi32>
    %203 = arith.cmpi sle, %18, %202 : vector<256x1xi32>
    %cst_139 = arith.constant 0.000000e+00 : f32
    %204 = vector.shape_cast %203 : vector<256x1xi1> to vector<256x1xi1>
    %205 = vector.broadcast %204 : vector<256x1xi1> to vector<256x8xi1>
    %206 = vector.broadcast %cst_139 : f32 to vector<256x8xf32>
    %207 = arith.select %205, %201, %206 : vector<256x8xi1>, vector<256x8xf32>
    %c8_140 = arith.constant 8 : index
    %c0_141 = arith.constant 0 : index
    %c0_142 = arith.constant 0 : index
    %208 = vector.load %arg4[%c8_140, %c0_141, %c0_142] : memref<9x8x8xf32, #tpu.memory_space<vmem>>, vector<1x8x8xf32>
    %209 = vector.shape_cast %208 : vector<1x8x8xf32> to vector<8x8xf32>
    %cst_143 = arith.constant dense<0.000000e+00> : vector<256x8xf32>
    %210 = tpu.matmul %207, %209, %cst_143 {dimension_numbers = #tpu.dot_dimension_numbers<[1], [0], [0], [1], [0, 0, 1, 1], [], []>} : vector<256x8xf32>, vector<8x8xf32>, vector<256x8xf32> -> vector<256x8xf32>
    %211 = arith.addf %200, %210 : vector<256x8xf32>
    %c0_144 = arith.constant 0 : index
    %c0_145 = arith.constant 0 : index
    %212 = vector.load %arg7[%c0_144, %c0_145] : memref<8x24xf32, #tpu.memory_space<vmem>>, vector<8x24xf32>
    %cst_146 = arith.constant dense<0.000000e+00> : vector<256x24xf32>
    %213 = tpu.matmul %211, %212, %cst_146 {dimension_numbers = #tpu.dot_dimension_numbers<[1], [0], [0], [1], [0, 0, 1, 1], [], []>} : vector<256x8xf32>, vector<8x24xf32>, vector<256x24xf32> -> vector<256x24xf32>
    %c0_147 = arith.constant 0 : index
    %c0_148 = arith.constant 0 : index
    %214 = vector.load %arg8[%c0_147, %c0_148] : memref<1x24xf32, #tpu.memory_space<vmem>>, vector<1x24xf32>
    %215 = vector.broadcast %214 : vector<1x24xf32> to vector<256x24xf32>
    %216 = arith.addf %213, %215 : vector<256x24xf32>
    %217 = vector.extract_strided_slice %216 {offsets = [0, 0], sizes = [256, 8], strides = [1, 1]} : vector<256x24xf32> to vector<256x8xf32>
    %218 = vector.extract_strided_slice %216 {offsets = [0, 8], sizes = [256, 8], strides = [1, 1]} : vector<256x24xf32> to vector<256x8xf32>
    %219 = vector.extract_strided_slice %216 {offsets = [0, 16], sizes = [256, 8], strides = [1, 1]} : vector<256x24xf32> to vector<256x8xf32>
    %cst_149 = arith.constant 0.000000e+00 : f32
    %220 = vector.broadcast %cst_149 : f32 to vector<256x8xf32>
    %221 = vector.extract_strided_slice %218 {offsets = [0, 0], sizes = [128, 8], strides = [1, 1]} : vector<256x8xf32> to vector<128x8xf32>
    %222 = vector.extract_strided_slice %219 {offsets = [0, 0], sizes = [128, 8], strides = [1, 1]} : vector<256x8xf32> to vector<128x8xf32>
    %cst_150 = arith.constant dense<0.000000e+00> : vector<256x128xf32>
    %223 = tpu.matmul %217, %221, %cst_150 {dimension_numbers = #tpu.dot_dimension_numbers<[1], [1], [0], [0], [0, 0, 1, 0], [], []>} : vector<256x8xf32>, vector<128x8xf32>, vector<256x128xf32> -> vector<256x128xf32>
    %cst_151 = arith.constant 0.353553385 : f32
    %224 = vector.broadcast %cst_151 : f32 to vector<256x128xf32>
    %225 = arith.mulf %223, %224 : vector<256x128xf32>
    %cst_152 = arith.constant dense<0xFF800000> : vector<128xf32>
    %226 = vector.multi_reduction <maximumf>, %225, %cst_152 [0] : vector<256x128xf32> to vector<128xf32>
    %227 = vector.shape_cast %226 : vector<128xf32> to vector<1x128xf32>
    %228 = vector.broadcast %227 : vector<1x128xf32> to vector<256x128xf32>
    %229 = arith.subf %225, %228 : vector<256x128xf32>
    %230 = math.exp %229 : vector<256x128xf32>
    %cst_153 = arith.constant dense<0.000000e+00> : vector<128xf32>
    %231 = vector.multi_reduction <add>, %230, %cst_153 [0] : vector<256x128xf32> to vector<128xf32>
    %232 = vector.shape_cast %231 : vector<128xf32> to vector<1x128xf32>
    %233 = tpu.reciprocal %232 {approx = true} : vector<1x128xf32> -> vector<1x128xf32>
    %234 = vector.broadcast %233 : vector<1x128xf32> to vector<256x128xf32>
    %235 = arith.mulf %230, %234 : vector<256x128xf32>
    %cst_154 = arith.constant dense<0.000000e+00> : vector<256x8xf32>
    %236 = tpu.matmul %235, %222, %cst_154 {dimension_numbers = #tpu.dot_dimension_numbers<[1], [0], [0], [1], [0, 0, 1, 1], [], []>} : vector<256x128xf32>, vector<128x8xf32>, vector<256x8xf32> -> vector<256x8xf32>
    %237 = arith.addf %220, %236 : vector<256x8xf32>
    %238 = vector.extract_strided_slice %218 {offsets = [128, 0], sizes = [128, 8], strides = [1, 1]} : vector<256x8xf32> to vector<128x8xf32>
    %239 = vector.extract_strided_slice %219 {offsets = [128, 0], sizes = [128, 8], strides = [1, 1]} : vector<256x8xf32> to vector<128x8xf32>
    %cst_155 = arith.constant dense<0.000000e+00> : vector<256x128xf32>
    %240 = tpu.matmul %217, %238, %cst_155 {dimension_numbers = #tpu.dot_dimension_numbers<[1], [1], [0], [0], [0, 0, 1, 0], [], []>} : vector<256x8xf32>, vector<128x8xf32>, vector<256x128xf32> -> vector<256x128xf32>
    %cst_156 = arith.constant 0.353553385 : f32
    %241 = vector.broadcast %cst_156 : f32 to vector<256x128xf32>
    %242 = arith.mulf %240, %241 : vector<256x128xf32>
    %cst_157 = arith.constant dense<0xFF800000> : vector<128xf32>
    %243 = vector.multi_reduction <maximumf>, %242, %cst_157 [0] : vector<256x128xf32> to vector<128xf32>
    %244 = vector.shape_cast %243 : vector<128xf32> to vector<1x128xf32>
    %245 = vector.broadcast %244 : vector<1x128xf32> to vector<256x128xf32>
    %246 = arith.subf %242, %245 : vector<256x128xf32>
    %247 = math.exp %246 : vector<256x128xf32>
    %cst_158 = arith.constant dense<0.000000e+00> : vector<128xf32>
    %248 = vector.multi_reduction <add>, %247, %cst_158 [0] : vector<256x128xf32> to vector<128xf32>
    %249 = vector.shape_cast %248 : vector<128xf32> to vector<1x128xf32>
    %250 = tpu.reciprocal %249 {approx = true} : vector<1x128xf32> -> vector<1x128xf32>
    %251 = vector.broadcast %250 : vector<1x128xf32> to vector<256x128xf32>
    %252 = arith.mulf %247, %251 : vector<256x128xf32>
    %cst_159 = arith.constant dense<0.000000e+00> : vector<256x8xf32>
    %253 = tpu.matmul %252, %239, %cst_159 {dimension_numbers = #tpu.dot_dimension_numbers<[1], [0], [0], [1], [0, 0, 1, 1], [], []>} : vector<256x128xf32>, vector<128x8xf32>, vector<256x8xf32> -> vector<256x8xf32>
    %254 = arith.addf %237, %253 : vector<256x8xf32>
    %255 = tpu.iota {dimensions = array<i32: 0>} : vector<8x8xi32>
    %256 = tpu.iota {dimensions = array<i32: 1>} : vector<8x8xi32>
    %257 = arith.cmpi eq, %255, %256 : vector<8x8xi32>
    %cst_160 = arith.constant 1.000000e+00 : f32
    %cst_161 = arith.constant 0.000000e+00 : f32
    %258 = vector.broadcast %cst_160 : f32 to vector<8x8xf32>
    %259 = vector.broadcast %cst_161 : f32 to vector<8x8xf32>
    %260 = arith.select %257, %258, %259 : vector<8x8xi1>, vector<8x8xf32>
    %cst_162 = arith.constant dense<0.000000e+00> : vector<8x256xf32>
    %261 = tpu.matmul %260, %211, %cst_162 {dimension_numbers = #tpu.dot_dimension_numbers<[1], [1], [0], [0], [0, 0, 1, 0], [], []>} : vector<8x8xf32>, vector<256x8xf32>, vector<8x256xf32> -> vector<8x256xf32>
    %c0_163 = arith.constant 0 : index
    %c0_164 = arith.constant 0 : index
    %262 = vector.load %arg9[%c0_163, %c0_164] : memref<8x8xf32, #tpu.memory_space<vmem>>, vector<8x8xf32>
    %cst_165 = arith.constant dense<0.000000e+00> : vector<8x256xf32>
    %263 = tpu.matmul %262, %254, %cst_165 {dimension_numbers = #tpu.dot_dimension_numbers<[1], [1], [0], [0], [0, 0, 1, 0], [], []>} : vector<8x8xf32>, vector<256x8xf32>, vector<8x256xf32> -> vector<8x256xf32>
    %c0_166 = arith.constant 0 : index
    %c0_167 = arith.constant 0 : index
    %264 = vector.load %arg10[%c0_166, %c0_167] : memref<8x1xf32, #tpu.memory_space<vmem>>, vector<8x1xf32>
    %265 = vector.broadcast %264 : vector<8x1xf32> to vector<8x256xf32>
    %266 = arith.addf %263, %265 : vector<8x256xf32>
    %267 = arith.addf %266, %261 : vector<8x256xf32>
    %c0_168 = arith.constant 0 : index
    %c0_169 = arith.constant 0 : index
    %c0_170 = arith.constant 0 : index
    %268 = vector.load %arg11[%c0_168, %c0_169, %c0_170] : memref<1x8x256xf32, #tpu.memory_space<vmem>>, vector<1x8x256xf32>
    %269 = vector.shape_cast %268 : vector<1x8x256xf32> to vector<8x256xf32>
    %270 = vector.shape_cast %267 : vector<8x256xf32> to vector<1x8x256xf32>
    tpu.vector_store %arg11[%c0_168, %c0_169, %c0_170], %270 {strides = array<i32>} : memref<1x8x256xf32, #tpu.memory_space<vmem>>, vector<1x8x256xf32>,
    return
  }
  func.func @transform_0(%arg0: i32) -> (i32, i32, i32) {
    %c0_i32 = arith.constant 0 : i32
    %c0_i32_0 = arith.constant 0 : i32
    %c0_i32_1 = arith.constant 0 : i32
    return %arg0, %c0_i32, %c0_i32_0 : i32, i32, i32
  }
  func.func @transform_1(%arg0: i32) -> (i32, i32, i32) {
    %c0_i32 = arith.constant 0 : i32
    %c0_i32_0 = arith.constant 0 : i32
    %c0_i32_1 = arith.constant 0 : i32
    %c0_i32_2 = arith.constant 0 : i32
    return %c0_i32, %c0_i32_0, %c0_i32_1 : i32, i32, i32
  }
  func.func @transform_2(%arg0: i32) -> (i32, i32) {
    %c0_i32 = arith.constant 0 : i32
    %c0_i32_0 = arith.constant 0 : i32
    %c0_i32_1 = arith.constant 0 : i32
    return %c0_i32, %c0_i32_0 : i32, i32
  }
  func.func @transform_3(%arg0: i32) -> (i32, i32, i32) {
    %c0_i32 = arith.constant 0 : i32
    %c0_i32_0 = arith.constant 0 : i32
    %c0_i32_1 = arith.constant 0 : i32
    %c0_i32_2 = arith.constant 0 : i32
    return %c0_i32, %c0_i32_0, %c0_i32_1 : i32, i32, i32
  }
  func.func @transform_4(%arg0: i32) -> (i32, i32) {
    %c0_i32 = arith.constant 0 : i32
    %c0_i32_0 = arith.constant 0 : i32
    %c0_i32_1 = arith.constant 0 : i32
    return %c0_i32, %c0_i32_0 : i32, i32
  }
  func.func @transform_5(%arg0: i32) -> (i32, i32) {
    %c0_i32 = arith.constant 0 : i32
    %c0_i32_0 = arith.constant 0 : i32
    %c0_i32_1 = arith.constant 0 : i32
    return %c0_i32, %c0_i32_0 : i32, i32
  }
  func.func @transform_6(%arg0: i32) -> (i32, i32) {
    %c0_i32 = arith.constant 0 : i32
    %c0_i32_0 = arith.constant 0 : i32
    %c0_i32_1 = arith.constant 0 : i32
    return %c0_i32, %c0_i32_0 : i32, i32
  }
  func.func @transform_7(%arg0: i32) -> (i32, i32) {
    %c0_i32 = arith.constant 0 : i32
    %c0_i32_0 = arith.constant 0 : i32
    %c0_i32_1 = arith.constant 0 : i32
    return %c0_i32, %c0_i32_0 : i32, i32
  }
  func.func @transform_8(%arg0: i32) -> (i32, i32) {
    %c0_i32 = arith.constant 0 : i32
    %c0_i32_0 = arith.constant 0 : i32
    %c0_i32_1 = arith.constant 0 : i32
    return %c0_i32, %c0_i32_0 : i32, i32
  }
  func.func @transform_9(%arg0: i32) -> (i32, i32) {
    %c0_i32 = arith.constant 0 : i32
    %c0_i32_0 = arith.constant 0 : i32
    %c0_i32_1 = arith.constant 0 : i32
    return %c0_i32, %c0_i32_0 : i32, i32
  }
  func.func @transform_10(%arg0: i32) -> (i32, i32, i32) {
    %c0_i32 = arith.constant 0 : i32
    %c0_i32_0 = arith.constant 0 : i32
    %c0_i32_1 = arith.constant 0 : i32
    return %arg0, %c0_i32, %c0_i32_0 : i32, i32, i32
  }
}

</mosaic_0001>

<bundles_post_ra>
// kernel: tpu_custom_call.1
= control target key start
LH: loop header
LB: loop body
LE: loop exit
PB: predicated region body
PF: predicated region fallthrough
CT: control target
= control target key end

     0   :  { %15 = vsyncpa [#allocation5], 0  ;;  %s20374_s0 = inlined_call_operand.vmem [shape: f32[2,256,4], index: 0, kind: input, shape index: {}]   ;;  %s20375_s1 = inlined_call_operand.vmem [shape: f32[9,4,8], index: 1, kind: input, shape index: {}]   ;;  %s20376_s2 = inlined_call_operand.vmem [shape: f32[1,8], index: 2, kind: input, shape index: {}]   ;;  %s20377_s3 = inlined_call_operand.vmem [shape: f32[9,8,8], index: 3, kind: input, shape index: {}]   ;;  %s20378_s4 = inlined_call_operand.vmem [shape: f32[4,8], index: 4, kind: input, shape index: {}]   ;;  %s20379_s5 = inlined_call_operand.vmem [shape: f32[1,8], index: 5, kind: input, shape index: {}]   ;;  %s20380_s6 = inlined_call_operand.vmem [shape: f32[8,24], index: 6, kind: input, shape index: {}]   ;;  %s20381_s7 = inlined_call_operand.vmem [shape: f32[1,24], index: 7, kind: input, shape index: {}]   ;;  %s20382_s8 = inlined_call_operand.vmem [shape: f32[8,8], index: 8, kind: input, shape index: {}]   ;;  %s20383_s9 = inlined_call_operand.vmem [shape: f32[8,1], index: 9, kind: input, shape index: {}]   ;;  %s20384_s10 = inlined_call_operand.hbm [shape: f32[2,8,256], index: 10, kind: output, shape index: {}]  }
   0x1   :  { %17 = vsyncpa [#allocation5 + $0x1], 0  ;;  %s16071_s13 = smov 0   ;;  %s16073_s14 = smov 0  }
   0x2   :  { %s16075_s15 = smov 0   ;;  %s16077_s16 = smov 0  }
   0x3 LB: > { %s16092_s17 = sadd.s32 4294967295, %s16009_s16   ;;  %s11497_s18 = sadd.s32 4294967294, %s16009_s16   ;;  %s16009_s16 = sphi %s16077_s16, %s21444_s16   ;;  %s16005_s15 = sphi %s16075_s15, %s21443_s15   ;;  %s16001_s14 = sphi %s16073_s14, %s21442_s14   ;;  %s15997_s13 = sphi %s16071_s13, %s21441_s13  }
   0x4   : > { %s16096_s19 = sadd.s32 1, %s16009_s16   ;;  %s245_s20 = sadd.s32 1, %s16005_s15 }
   0x5   : > { %s242_s21 = ssub.s32 %s16009_s16, %s16096_s19  ;;  %p255_p0 = scmp.ne.s32.totalorder %s16005_s15, %s16001_s14 }
   0x6   : > { %p243_p1 = scmp.eq.s32.totalorder %s242_s21, 0  ;;  %p256_p2 = scmp.eq.s32.totalorder %s16092_s17, 1 }
   0x7   : > { %p261_p3 = scmp.ne.s32.totalorder %s16001_s14, %s15997_s13  ;;  %p262_p4 = scmp.eq.s32.totalorder %s11497_s18, 1 }
   0x8   : > { %s16107_s22 = scalar_select %p243_p1, %s16005_s15, %s245_s20  }
   0x9   : > { %p16109_p5 = por %p256_p2, %p255_p0  ;;  %p16113_p6 = por %p262_p4, %p261_p3 }
   0xa   : > { %p11500_p7 = scmp.ge.s32.totalorder %s16009_s16, 1  ;;  %p315_p8 = scmp.lt.s32.totalorder %s16009_s16, 3 }
   0xc   : > { %p316_p9 = pnand %p11500_p7, %p315_p8 }
   0xe   : > { %319 = sbr.rel (%p316_p9) target bundleno = 2935 (0xb77), region = 60 }
  0x15   : > { %v11504_v0 = vld [vmem:[%s20375_s1 + $0x4] sm:$0xf]  ;;  %vm20385_vm0 = vcmask 1043456   ;;  %vm968_vm1 = vcmask 31744   ;;  %p353_p10 = scmp.lt.s32.totalorder %s16092_s17, 1  ;;  %v20393_v1 = vmov 0.0  }
  0x16   : > { %13262 = vmatprep.subr.msk.mxu0 %vm20385_vm0, %v11504_v0  ;;  %970 = vst.msk [vmem:[#allocation2 + $0x8] sm:$0xff] %vm968_vm1, %v20393_v1  ;;  %969 = vst.msk [vmem:[#allocation2] sm:$0xff] %vm968_vm1, %v20393_v1  ;;  %v1199_v2 = vld [vmem:[%s20375_s1] sm:$0xf]  ;;  %14838 = vmatprep.subr.msk.mxu1 %vm20385_vm0, %v11504_v0  ;;  %v16221_v8 = vld [vmem:[%s20375_s1 + $0x8] sm:$0xf] }
  0x17   : > { %971 = vst.msk [vmem:[#allocation2 + $0x10] sm:$0xff] %vm968_vm1, %v20393_v1  ;;  %972 = vst.msk [vmem:[#allocation2 + $0x18] sm:$0xff] %vm968_vm1, %v20393_v1  ;;  %13263 = vmatpush3.msk.msra.mxu0 %vm20385_vm0, %v11504_v0  ;;  %s354_s29 = scalar_select %p353_p10, %s16092_s17, 1  ;;  %14839 = vmatpush3.msk.msra.mxu1 %vm20385_vm0, %v11504_v0 }
  0x18   : > { %973 = vst.msk [vmem:[#allocation2 + $0x20] sm:$0xff] %vm968_vm1, %v20393_v1  ;;  %974 = vst.msk [vmem:[#allocation2 + $0x28] sm:$0xff] %vm968_vm1, %v20393_v1  ;;  %13312 = vmatprep.subr.msk.mxu0 %vm20385_vm0, %v1199_v2  ;;  %s16012_s12 = smov 120   ;;  %s16013_s20 = smov 112  }
  0x19   : > { %975 = vst.msk [vmem:[#allocation2 + $0x30] sm:$0xff] %vm968_vm1, %v20393_v1  ;;  %976 = vst.msk [vmem:[#allocation2 + $0x38] sm:$0xff] %vm968_vm1, %v20393_v1  ;;  %s12340_s30 = sshll.u32 %s354_s29, 8  ;;  %s350_s28 = sand.u32 1, %s16001_s14  }
  0x1a   : > { %977 = vst.msk [vmem:[#allocation2 + $0x40] sm:$0xff] %vm968_vm1, %v20393_v1  ;;  %978 = vst.msk [vmem:[#allocation2 + $0x48] sm:$0xff] %vm968_vm1, %v20393_v1  ;;  %s16213_s18 = scalar_lea.vmem %s20374_s0, %s12340_s30  ;;  %s11501_s29 = sshll.u32 %s350_s28, 4 }
  0x1b   : > { %979 = vst.msk [vmem:[#allocation2 + $0x50] sm:$0xff] %vm968_vm1, %v20393_v1  ;;  %980 = vst.msk [vmem:[#allocation2 + $0x58] sm:$0xff] %vm968_vm1, %v20393_v1  ;;  %v358_v3 = vld [vmem:[%s16213_s18] sm:$0xff]  ;;  %v359_v4 = vld [vmem:[%s16213_s18 + $0x8] sm:$0xff]  ;;  %s12341_s30 = sshll.u32 %s16092_s17, 8  ;;  %s11424_s25 = scalar_lea.sflag [#allocation5], %s350_s28 }
  0x1c   : > { %981 = vst.msk [vmem:[#allocation2 + $0x60] sm:$0xff] %vm968_vm1, %v20393_v1  ;;  %982 = vst.msk [vmem:[#allocation2 + $0x68] sm:$0xff] %vm968_vm1, %v20393_v1  ;;  %v360_v5 = vld [vmem:[%s16213_s18 + $0x10] sm:$0xff]  ;;  %v840_v6 = vmul.f32 0.70710677, %v358_v3  ;;  %v361_v12 = vld [vmem:[%s16213_s18 + $0x18] sm:$0xff]  ;;  %s20332_s21 = scalar_lea.hbm %s20384_s10, %s12341_s30 }
  0x1d   : > { %983 = vst.msk [vmem:[#allocation2 + $0x70] sm:$0xff] %vm968_vm1, %v20393_v1  ;;  %984 = vst.msk [vmem:[#allocation2 + $0x78] sm:$0xff] %vm968_vm1, %v20393_v1  ;;  %v841_v7 = vmul.f32 0.70710677, %v359_v4  ;;  %v1200_v9 = vld [vmem:[#allocation2 + $0x8] sm:$0xff]  ;;  %v362_v14 = vld [vmem:[%s16213_s18 + $0x20] sm:$0xff] }
  0x1e   : > { %985 = vst.msk [vmem:[#allocation2 + $0x80] sm:$0xff] %vm968_vm1, %v20393_v1  ;;  %986 = vst.msk [vmem:[#allocation2 + $0x88] sm:$0xff] %vm968_vm1, %v20393_v1  ;;  %v1201_v10 = vld [vmem:[#allocation2 + $0x10] sm:$0xff]  ;;  %v842_v11 = vmul.f32 0.70710677, %v360_v5  ;;  %13264 = vmatprep.mubr.msk.f32.mxu0 %vm968_vm1, %v1200_v9  ;;  %15656 = verf.f32 %v840_v6  ;;  %v363_v15 = vld [vmem:[%s16213_s18 + $0x28] sm:$0xff] }
  0x1f   : > { %987 = vst.msk [vmem:[#allocation2 + $0x90] sm:$0xff] %vm968_vm1, %v20393_v1  ;;  %988 = vst.msk [vmem:[#allocation2 + $0x98] sm:$0xff] %vm968_vm1, %v20393_v1  ;;  %v843_v13 = vmul.f32 0.70710677, %v361_v12  ;;  %v364_v16 = vld [vmem:[%s16213_s18 + $0x30] sm:$0xff]  ;;  %13265 = vmatmul.mubr.msk.f32.vlgmr.msra.gmra.mrb[0].mxu0 %vm968_vm1, %v1201_v10  ;;  %15658 = verf.f32 %v841_v7  ;;  %v365_v18 = vld [vmem:[%s16213_s18 + $0x38] sm:$0xff] }
  0x20   : > { %989 = vst.msk [vmem:[#allocation2 + $0xa0] sm:$0xff] %vm968_vm1, %v20393_v1  ;;  %990 = vst.msk [vmem:[#allocation2 + $0xa8] sm:$0xff] %vm968_vm1, %v20393_v1  ;;  %v844_v17 = vmul.f32 0.70710677, %v362_v14  ;;  %v16231_v19 = vld [vmem:[%s16213_s18 + $0x40] sm:$0xff]  ;;  %13313 = vmatpush3.msk.msra.mxu0 %vm20385_vm0, %v1199_v2  ;;  %15660 = verf.f32 %v842_v11  ;;  %v16235_v22 = vld [vmem:[%s16213_s18 + $0x48] sm:$0xff] }
  0x21   : > { %991 = vst.msk [vmem:[#allocation2 + $0xb0] sm:$0xff] %vm968_vm1, %v20393_v1  ;;  %992 = vst.msk [vmem:[#allocation2 + $0xb8] sm:$0xff] %vm968_vm1, %v20393_v1  ;;  %v845_v20 = vmul.f32 0.70710677, %v363_v15  ;;  %v846_v21 = vmul.f32 0.70710677, %v364_v16  ;;  %15662 = verf.f32 %v843_v13  ;;  %13362 = vmatprep.subr.msk.mxu0 %vm20385_vm0, %v16221_v8 }
  0x22   : > { %993 = vst.msk [vmem:[#allocation2 + $0xc0] sm:$0xff] %vm968_vm1, %v20393_v1  ;;  %994 = vst.msk [vmem:[#allocation2 + $0xc8] sm:$0xff] %vm968_vm1, %v20393_v1  ;;  %v847_v23 = vmul.f32 0.70710677, %v365_v18  ;;  %v16238_v24 = vld [vmem:[%s16213_s18 + $0x50] sm:$0xff]  ;;  %15664 = verf.f32 %v844_v17  ;;  %v16244_v26 = vld [vmem:[%s16213_s18 + $0x58] sm:$0xff] }
  0x23   : > { %995 = vst.msk [vmem:[#allocation2 + $0xd0] sm:$0xff] %vm968_vm1, %v20393_v1  ;;  %996 = vst.msk [vmem:[#allocation2 + $0xd8] sm:$0xff] %vm968_vm1, %v20393_v1  ;;  %v848_v25 = vmul.f32 0.70710677, %v16231_v19  ;;  %15666 = verf.f32 %v845_v20  ;;  %v849_v27 = vmul.f32 0.70710677, %v16235_v22 }
  0x24   : > { %997 = vst.msk [vmem:[#allocation2 + $0xe0] sm:$0xff] %vm968_vm1, %v20393_v1  ;;  %998 = vst.msk [vmem:[#allocation2 + $0xe8] sm:$0xff] %vm968_vm1, %v20393_v1  ;;  %v16248_v28 = vld [vmem:[%s16213_s18 + $0x60] sm:$0xff]  ;;  %15668 = verf.f32 %v846_v21  ;;  %v850_v29 = vmul.f32 0.70710677, %v16238_v24  ;;  %v16252_v30 = vld [vmem:[%s16213_s18 + $0x68] sm:$0xff] }
  0x25   : > { %999 = vst.msk [vmem:[#allocation2 + $0xf0] sm:$0xff] %vm968_vm1, %v20393_v1  ;;  %1000 = vst.msk [vmem:[#allocation2 + $0xf8] sm:$0xff] %vm968_vm1, %v20393_v1  ;;  %15670 = verf.f32 %v847_v23  ;;  %v851_v31 = vmul.f32 0.70710677, %v16244_v26  ;;  %v16256_v32 = vld [vmem:[%s16213_s18 + $0x70] sm:$0xff]  ;;  %v16260_v34 = vld [vmem:[%s16213_s18 + $0x78] sm:$0xff] }
  0x26   : > { %1001 = vst.msk [vmem:[#allocation2 + $0x100] sm:$0xff] %vm968_vm1, %v20393_v1  ;;  %1002 = vst.msk [vmem:[#allocation2 + $0x108] sm:$0xff] %vm968_vm1, %v20393_v1  ;;  %15672 = verf.f32 %v848_v25  ;;  %v852_v33 = vmul.f32 0.70710677, %v16248_v28  ;;  %v807_v35 = vmul.f32 0.5, %v358_v3  ;;  %v808_v38 = vmul.f32 0.5, %v359_v4 }
  0x27   : > { %1003 = vst.msk [vmem:[#allocation2 + $0x110] sm:$0xff] %vm968_vm1, %v20393_v1  ;;  %1004 = vst.msk [vmem:[#allocation2 + $0x118] sm:$0xff] %vm968_vm1, %v20393_v1  ;;  %15674 = verf.f32 %v849_v27  ;;  %v853_v36 = vmul.f32 0.70710677, %v16252_v30  ;;  %v854_v39 = vmul.f32 0.70710677, %v16256_v32 }
  0x28   : > { %1005 = vst.msk [vmem:[#allocation2 + $0x120] sm:$0xff] %vm968_vm1, %v20393_v1  ;;  %1006 = vst.msk [vmem:[#allocation2 + $0x128] sm:$0xff] %vm968_vm1, %v20393_v1  ;;  %v15657_v37 = vpop.eup %15656  ;;  %15676 = verf.f32 %v850_v29  ;;  %v809_v42 = vmul.f32 0.5, %v360_v5  ;;  %v855_v43 = vmul.f32 0.70710677, %v16260_v34  ;;  %v810_v46 = vmul.f32 0.5, %v361_v12 }
  0x29   : > { %v15659_v40 = vpop.eup %15658  ;;  %v904_v41 = vadd.f32 1.0, %v15657_v37  ;;  %15678 = verf.f32 %v851_v31  ;;  %v811_v50 = vmul.f32 0.5, %v362_v14  ;;  %v812_v54 = vmul.f32 0.5, %v363_v15  ;;  %v16266_v55 = vld [vmem:[%s16213_s18 + $0x80] sm:$0xff]  ;;  %v16276_v11 = vld [vmem:[%s16213_s18 + $0x88] sm:$0xff]  ;;  %s16015_s26 = smov [#allocation4]  }
  0x2a   : > { %v15661_v44 = vpop.eup %15660  ;;  %v905_v45 = vadd.f32 1.0, %v15659_v40  ;;  %15680 = verf.f32 %v852_v33  ;;  %v813_v59 = vmul.f32 0.5, %v364_v16  ;;  %v814_v63 = vmul.f32 0.5, %v365_v18  ;;  %v16281_v16 = vld [vmem:[%s16213_s18 + $0x90] sm:$0xff]  ;;  %v16295_v40 = vld [vmem:[%s16213_s18 + $0x98] sm:$0xff]  ;;  %s15951_s27 = sshll.u32 %s16015_s26, 4  ;;  %s15952_s27 = int_to_ptr.vmem [resolvable:$false] %s15951_s27 }
  0x2b   : > { %v15663_v47 = vpop.eup %15662  ;;  %v936_v48 = vmul.f32 %v904_v41, %v807_v35  ;;  %v906_v49 = vadd.f32 1.0, %v15661_v44  ;;  %15682 = verf.f32 %v853_v36  ;;  %v815_v4 = vmul.f32 0.5, %v16231_v19  ;;  %v16674_v1 = vld [vmem:[%s20375_s1 + $0x10] sm:$0xf] }
  0x2c   : > { %v15665_v51 = vpop.eup %15664  ;;  %v937_v52 = vmul.f32 %v905_v45, %v808_v38  ;;  %v907_v53 = vadd.f32 1.0, %v15663_v47  ;;  %15684 = verf.f32 %v854_v39  ;;  %v856_v5 = vmul.f32 0.70710677, %v16266_v55 }
  0x2d   : > { %v15667_v56 = vpop.eup %15666  ;;  %1007 = vst.msk [vmem:[#allocation2 + $0x18] sm:$0xff] %vm968_vm1, %v936_v48  ;;  %v938_v57 = vmul.f32 %v906_v49, %v809_v42  ;;  %v908_v58 = vadd.f32 1.0, %v15665_v51  ;;  %15686 = verf.f32 %v855_v43  ;;  %v816_v10 = vmul.f32 0.5, %v16235_v22  ;;  %v16303_v48 = vld [vmem:[%s16213_s18 + $0xa0] sm:$0xff] }
  0x2e   : > { %v15669_v60 = vpop.eup %15668  ;;  %1008 = vst.msk [vmem:[#allocation2 + $0x20] sm:$0xff] %vm968_vm1, %v937_v52  ;;  %v939_v61 = vmul.f32 %v907_v53, %v810_v46  ;;  %v909_v62 = vadd.f32 1.0, %v15667_v56  ;;  %v817_v15 = vmul.f32 0.5, %v16238_v24  ;;  %15688 = verf.f32 %v856_v5 }
  0x2f   : > { %v15671_v0 = vpop.eup %15670  ;;  %1009 = vst.msk [vmem:[#allocation2 + $0x28] sm:$0xff] %vm968_vm1, %v938_v57  ;;  %v940_v2 = vmul.f32 %v908_v58, %v811_v50  ;;  %v910_v3 = vadd.f32 1.0, %v15669_v60  ;;  %v818_v20 = vmul.f32 0.5, %v16244_v26  ;;  %v819_v25 = vmul.f32 0.5, %v16248_v28  ;;  %v16316_v58 = vld [vmem:[%s16213_s18 + $0xb0] sm:$0xff] }
  0x30   : > { %v15673_v6 = vpop.eup %15672  ;;  %1010 = vst.msk [vmem:[#allocation2 + $0x30] sm:$0xff] %vm968_vm1, %v939_v61  ;;  %v941_v7 = vmul.f32 %v909_v62, %v812_v54  ;;  %v911_v9 = vadd.f32 1.0, %v15671_v0  ;;  %v857_v27 = vmul.f32 0.70710677, %v16276_v11  ;;  %v820_v35 = vmul.f32 0.5, %v16252_v30  ;;  %v16322_v62 = vld [vmem:[%s16213_s18 + $0xb8] sm:$0xff] }
  0x31   : > { %v15675_v12 = vpop.eup %15674  ;;  %1011 = vst.msk [vmem:[#allocation2 + $0x38] sm:$0xff] %vm968_vm1, %v940_v2  ;;  %v942_v13 = vmul.f32 %v910_v3, %v813_v59  ;;  %v912_v14 = vadd.f32 1.0, %v15673_v6  ;;  %v858_v26 = vmul.f32 0.70710677, %v16281_v16  ;;  %v821_v39 = vmul.f32 0.5, %v16256_v32  ;;  %v16327_v2 = vld [vmem:[%s16213_s18 + $0xc0] sm:$0xff] }
  0x32   : > { %v15677_v17 = vpop.eup %15676  ;;  %1012 = vst.msk [vmem:[#allocation2 + $0x40] sm:$0xff] %vm968_vm1, %v941_v7  ;;  %v943_v18 = vmul.f32 %v911_v9, %v814_v63  ;;  %v913_v19 = vadd.f32 1.0, %v15675_v12  ;;  %15690 = verf.f32 %v857_v27  ;;  %v822_v44 = vmul.f32 0.5, %v16260_v34  ;;  %v16308_v34 = vld [vmem:[%s16213_s18 + $0xa8] sm:$0xff]  ;;  %v16353_v27 = vld [vmem:[%s16213_s18 + $0xe0] sm:$0xff] }
  0x33   : > { %v15679_v21 = vpop.eup %15678  ;;  %1013 = vst.msk [vmem:[#allocation2 + $0x48] sm:$0xff] %vm968_vm1, %v942_v13  ;;  %v944_v22 = vmul.f32 %v912_v14, %v815_v4  ;;  %v914_v23 = vadd.f32 1.0, %v15677_v17  ;;  %15692 = verf.f32 %v858_v26  ;;  %v859_v52 = vmul.f32 0.70710677, %v16295_v40  ;;  %v16335_v12 = vld [vmem:[%s16213_s18 + $0xc8] sm:$0xff] }
  0x34   : > { %v15681_v24 = vpop.eup %15680  ;;  %v1202_v29 = vld [vmem:[#allocation2 + $0x18] sm:$0xff]  ;;  %1014 = vst.msk [vmem:[#allocation2 + $0x50] sm:$0xff] %vm968_vm1, %v943_v18  ;;  %v945_v31 = vmul.f32 %v913_v19, %v816_v10  ;;  %v915_v33 = vadd.f32 1.0, %v15679_v21  ;;  %v823_v56 = vmul.f32 0.5, %v16266_v55  ;;  %v860_v57 = vmul.f32 0.70710677, %v16303_v48 }
  0x35   : > { %v15683_v36 = vpop.eup %15682  ;;  %13267 = vmatprep.mubr.msk.f32.mxu0 %vm968_vm1, %v1202_v29  ;;  %v1203_v37 = vld [vmem:[#allocation2 + $0x20] sm:$0xff]  ;;  %1015 = vst.msk [vmem:[#allocation2 + $0x58] sm:$0xff] %vm968_vm1, %v944_v22  ;;  %v946_v28 = vmul.f32 %v914_v23, %v817_v15  ;;  %v916_v38 = vadd.f32 1.0, %v15681_v24  ;;  %15694 = verf.f32 %v859_v52  ;;  %v861_v61 = vmul.f32 0.70710677, %v16308_v34  ;;  %v16340_v18 = vld [vmem:[%s16213_s18 + $0xd0] sm:$0xff] }
  0x36   : > { %v15685_v41 = vpop.eup %15684  ;;  %13268 = vmatmul.mubr.msk.f32.gmra.mrb[2].mxu0 %vm968_vm1, %v1203_v37  ;;  %v1204_v30 = vld [vmem:[#allocation2 + $0x28] sm:$0xff]  ;;  %1016 = vst.msk [vmem:[#allocation2 + $0x60] sm:$0xff] %vm968_vm1, %v945_v31  ;;  %v947_v42 = vmul.f32 %v915_v33, %v818_v20  ;;  %v917_v43 = vadd.f32 1.0, %v15683_v36  ;;  %15696 = verf.f32 %v860_v57  ;;  %v862_v0 = vmul.f32 0.70710677, %v16316_v58  ;;  %v16345_v20 = vld [vmem:[%s16213_s18 + $0xd8] sm:$0xff] }
  0x37   : > { %v15687_v45 = vpop.eup %15686  ;;  %13270 = vmatprep.mubr.msk.f32.mxu0 %vm968_vm1, %v1204_v30  ;;  %v1205_v32 = vld [vmem:[#allocation2 + $0x30] sm:$0xff]  ;;  %1017 = vst.msk [vmem:[#allocation2 + $0x68] sm:$0xff] %vm968_vm1, %v946_v28  ;;  %v948_v46 = vmul.f32 %v916_v38, %v819_v25  ;;  %v918_v47 = vadd.f32 1.0, %v15685_v41  ;;  %15698 = verf.f32 %v861_v61  ;;  %v824_v4 = vmul.f32 0.5, %v16276_v11  ;;  %v16361_v36 = vld [vmem:[%s16213_s18 + $0xe8] sm:$0xff] }
  0x38   : > { %v1206_v49 = vld [vmem:[#allocation2 + $0x38] sm:$0xff]  ;;  %1018 = vst.msk [vmem:[#allocation2 + $0x70] sm:$0xff] %vm968_vm1, %v947_v42  ;;  %v949_v50 = vmul.f32 %v917_v43, %v820_v35  ;;  %v919_v51 = vadd.f32 1.0, %v15687_v45  ;;  %v15689_v59 = vpop.eup %15688  ;;  %v863_v5 = vmul.f32 0.70710677, %v16322_v62  ;;  %v20392_v9 = vlaneseq  ;;  %v1039_v61 = vld [vmem:[#allocation2 + $0x7] sm:$0xff] }
  0x39   : > { %1019 = vst.msk [vmem:[#allocation2 + $0x78] sm:$0xff] %vm968_vm1, %v948_v46  ;;  %v950_v53 = vmul.f32 %v918_v47, %v821_v39  ;;  %v1207_v60 = vld [vmem:[#allocation2 + $0x40] sm:$0xff]  ;;  %v920_v55 = vadd.f32 1.0, %v15689_v59  ;;  %v825_v10 = vmul.f32 0.5, %v16281_v16  ;;  %15700 = verf.f32 %v862_v0 }
  0x3a   : > { %13271 = vmatmul.mubr.msk.f32.gmra.mrb[4].mxu0 %vm968_vm1, %v1205_v32  ;;  %1020 = vst.msk [vmem:[#allocation2 + $0x80] sm:$0xff] %vm968_vm1, %v949_v50  ;;  %v951_v54 = vmul.f32 %v919_v51, %v822_v44  ;;  %v1208_v63 = vld [vmem:[#allocation2 + $0x48] sm:$0xff]  ;;  %15702 = verf.f32 %v863_v5  ;;  %v864_v15 = vmul.f32 0.70710677, %v16327_v2  ;;  %v865_v16 = vmul.f32 0.70710677, %v16335_v12 }
  0x3b   : > { %13273 = vmatprep.mubr.msk.f32.mxu0 %vm968_vm1, %v1206_v49  ;;  %1021 = vst.msk [vmem:[#allocation2 + $0x88] sm:$0xff] %vm968_vm1, %v950_v53  ;;  %v952_v3 = vmul.f32 %v920_v55, %v823_v56  ;;  %v1209_v7 = vld [vmem:[#allocation2 + $0x50] sm:$0xff]  ;;  %v16349_v22 = vshrl.u32 %v20392_v9, 7  ;;  %v826_v25 = vmul.f32 0.5, %v16295_v40  ;;  %v866_v31 = vmul.f32 0.70710677, %v16340_v18 }
  0x3c   : > { %1022 = vst.msk [vmem:[#allocation2 + $0x90] sm:$0xff] %vm968_vm1, %v951_v54  ;;  %v15691_v6 = vpop.eup %15690  ;;  %v1210_v14 = vld [vmem:[#allocation2 + $0x58] sm:$0xff]  ;;  %15704 = verf.f32 %v864_v15  ;;  %v827_v35 = vmul.f32 0.5, %v16303_v48  ;;  %v867_v26 = vmul.f32 0.70710677, %v16345_v20  ;;  %v828_v28 = vmul.f32 0.5, %v16308_v34 }
  0x3d   : > { %v15693_v13 = vpop.eup %15692  ;;  %1023 = vst.msk [vmem:[#allocation2 + $0x98] sm:$0xff] %vm968_vm1, %v952_v3  ;;  %v921_v11 = vadd.f32 1.0, %v15691_v6  ;;  %v1211_v21 = vld [vmem:[#allocation2 + $0x60] sm:$0xff]  ;;  %20753 = vst [vmem:[#allocation7_spill] sm:$0xff] %v16349_v22  ;;  %15706 = verf.f32 %v865_v16  ;;  %v868_v38 = vmul.f32 0.70710677, %v16353_v27 }
  0x3e   : > { %13274 = vmatmul.mubr.msk.f32.gmra.mrb[6].mxu0 %vm968_vm1, %v1207_v60  ;;  %v922_v17 = vadd.f32 1.0, %v15693_v13  ;;  %v1212_v29 = vld [vmem:[#allocation2 + $0x68] sm:$0xff]  ;;  %15708 = verf.f32 %v866_v31  ;;  %v427_v41 = vand.u32 15, %v16349_v22  ;;  %v829_v45 = vmul.f32 0.5, %v16316_v58  ;;  %v16401_v15 = vld [vmem:[#allocation2 + $0x17] sm:$0xff] }
  0x3f   : > { %13276 = vmatprep.mubr.msk.f32.mxu0 %vm968_vm1, %v1208_v63  ;;  %v953_v19 = vmul.f32 %v921_v11, %v824_v4  ;;  %v15695_v24 = vpop.eup %15694  ;;  %v1213_v40 = vld [vmem:[#allocation2 + $0x70] sm:$0xff]  ;;  %15710 = verf.f32 %v867_v26  ;;  %v869_v32 = vmul.f32 0.70710677, %v16361_v36  ;;  %v393_v47 = vadd.s32 16, %v16349_v22  ;;  %v16418_v26 = vld [vmem:[#allocation2 + $0x27] sm:$0xff] }
  0x40   : > { %v954_v23 = vmul.f32 %v922_v17, %v825_v10  ;;  %v923_v33 = vadd.f32 1.0, %v15695_v24  ;;  %v15697_v37 = vpop.eup %15696  ;;  %v1214_v43 = vld [vmem:[#allocation2 + $0x78] sm:$0xff]  ;;  %15712 = verf.f32 %v868_v38  ;;  %v830_v49 = vmul.f32 0.5, %v16322_v62 }
  0x41   : > { %1024 = vst.msk [vmem:[#allocation2 + $0xa0] sm:$0xff] %vm968_vm1, %v953_v19  ;;  %v15699_v39 = vpop.eup %15698  ;;  %v924_v42 = vadd.f32 1.0, %v15697_v37  ;;  %15714 = verf.f32 %v869_v32  ;;  %v16375_v34 = vld [vmem:[#allocation2 + $0x80] sm:$0xff]  ;;  %v831_v54 = vmul.f32 0.5, %v16327_v2  ;;  %vm16381_vm2 = vcmp.ge.s32.totalorder %v427_v41, 1 }
  0x42   : > { %13277 = vmatmul.mubr.msk.f32.gmra.mrb[8].mxu0 %vm968_vm1, %v1209_v7  ;;  %1025 = vst.msk [vmem:[#allocation2 + $0xa8] sm:$0xff] %vm968_vm1, %v954_v23  ;;  %v955_v30 = vmul.f32 %v923_v33, %v826_v25  ;;  %v925_v44 = vadd.f32 1.0, %v15699_v39  ;;  %v16379_v57 = vld [vmem:[#allocation2 + $0x88] sm:$0xff]  ;;  %v20754_v58 = vmov 0  ;;  %v395_v59 = vadd.s32 32, %v16349_v22 }
  0x43   : > { %13279 = vmatprep.mubr.msk.f32.mxu0 %vm968_vm1, %v1210_v14  ;;  %v15701_v46 = vpop.eup %15700  ;;  %v956_v48 = vmul.f32 %v924_v42, %v827_v35  ;;  %v20755_v58 = vsel %vm16381_vm2, 4294967295, %v20754_v58  ;;  %v441_v62 = vand.u32 15, %v393_v47  ;;  %v832_v0 = vmul.f32 0.5, %v16335_v12  ;;  %v16393_v2 = vld [vmem:[#allocation2 + $0x90] sm:$0xff]  ;;  %v16460_v47 = vld [vmem:[#allocation2 + $0x47] sm:$0xff] }
  0x44   : > { %1026 = vst.msk [vmem:[#allocation2 + $0xb0] sm:$0xff] %vm968_vm1, %v955_v30  ;;  %v15703_v50 = vpop.eup %15702  ;;  %v957_v51 = vmul.f32 %v925_v44, %v828_v28  ;;  %v926_v52 = vadd.f32 1.0, %v15701_v46  ;;  %20756 = vst [vmem:[#allocation8_spill] sm:$0xff] %v20755_v58  ;;  %v833_v6 = vmul.f32 0.5, %v16340_v18  ;;  %v1167_v10 = vsel %vm16381_vm2, %v1039_v61, 0.0  ;;  %v16443_v42 = vld [vmem:[#allocation2 + $0x37] sm:$0xff] }
  0x45   : > { %1027 = vst.msk [vmem:[#allocation2 + $0xb8] sm:$0xff] %vm968_vm1, %v956_v48  ;;  %v927_v53 = vadd.f32 1.0, %v15703_v50  ;;  %v455_v12 = vand.u32 15, %v395_v59  ;;  %v397_v13 = vadd.s32 48, %v16349_v22  ;;  %v834_v14 = vmul.f32 0.5, %v16345_v20  ;;  %v1040_v20 = vld [vmem:[#allocation2 + $0xf] sm:$0xff] }
  0x46   : > { %13280 = vmatmul.mubr.msk.f32.gmra.mrb[10].mxu0 %vm968_vm1, %v1211_v21  ;;  %v15705_v56 = vpop.eup %15704  ;;  %1028 = vst.msk [vmem:[#allocation2 + $0xc0] sm:$0xff] %vm968_vm1, %v957_v51  ;;  %v958_v60 = vmul.f32 %v926_v52, %v829_v45  ;;  %vm16403_vm3 = vcmp.ge.s32.totalorder %v441_v62, 1  ;;  %v20757_v17 = vmov 0  ;;  %v835_v16 = vmul.f32 0.5, %v16353_v27  ;;  %v16454_v45 = vld [vmem:[#allocation2 + $0x2f] sm:$0xff]  ;;  %v16470_v51 = vld [vmem:[#allocation2 + $0x3f] sm:$0xff] }
  0x47   : > { %13282 = vmatprep.mubr.msk.f32.mxu0 %vm968_vm1, %v1212_v29  ;;  %v959_v63 = vmul.f32 %v927_v53, %v830_v49  ;;  %v928_v55 = vadd.f32 1.0, %v15705_v56  ;;  %v15707_v3 = vpop.eup %15706  ;;  %v20758_v17 = vsel %vm16403_vm3, 4294967295, %v20757_v17  ;;  %v836_v29 = vmul.f32 0.5, %v16361_v36  ;;  %v16428_v36 = vld [vmem:[%s20375_s1 + $0xc] sm:$0xf]  ;;  %v388_v46 = vld [vmem:[%s16213_s18 + $0xf0] sm:$0xff] }
  0x48   : > { %1029 = vst.msk [vmem:[#allocation2 + $0xc8] sm:$0xff] %vm968_vm1, %v958_v60  ;;  %v929_v5 = vadd.f32 1.0, %v15707_v3  ;;  %v15709_v7 = vpop.eup %15708  ;;  %20759 = vst [vmem:[#allocation9_spill] sm:$0xff] %v20758_v17  ;;  %v1169_v33 = vsel %vm16403_vm3, %v16401_v15, 0.0  ;;  %v399_v27 = vadd.s32 64, %v16349_v22  ;;  %vm16420_vm4 = vcmp.ge.s32.totalorder %v455_v12, 1 }
  0x49   : > { %1030 = vst.msk [vmem:[#allocation2 + $0xd0] sm:$0xff] %vm968_vm1, %v959_v63  ;;  %v960_v4 = vmul.f32 %v928_v55, %v831_v54  ;;  %v15711_v11 = vpop.eup %15710  ;;  %v930_v18 = vadd.f32 1.0, %v15709_v7  ;;  %v20760_v37 = vmov 0  ;;  %v469_v28 = vand.u32 15, %v397_v13  ;;  %v16475_v54 = vld [vmem:[#allocation2 + $0x57] sm:$0xff]  ;;  %v16485_v61 = vld [vmem:[#allocation2 + $0x4f] sm:$0xff] }
  0x4a   : > { %13283 = vmatmul.mubr.msk.f32.gmra.mrb[12].mxu0 %vm968_vm1, %v1213_v40  ;;  %v961_v19 = vmul.f32 %v929_v5, %v832_v0  ;;  %v15713_v21 = vpop.eup %15712  ;;  %v931_v23 = vadd.f32 1.0, %v15711_v11  ;;  %v20761_v37 = vsel %vm16420_vm4, 4294967295, %v20760_v37  ;;  %v16435_v40 = vld [vmem:[#allocation2 + $0x1f] sm:$0xff]  ;;  %v1171_v30 = vsel %vm16420_vm4, %v16418_v26, 0.0  ;;  %v16490_v63 = vld [vmem:[#allocation2 + $0x67] sm:$0xff]  ;;  %v16515_v11 = vld [vmem:[#allocation2 + $0x6f] sm:$0xff] }
  0x4b   : > { %13285 = vmatprep.mubr.msk.f32.mxu0 %vm968_vm1, %v1214_v43  ;;  %1031 = vst.msk [vmem:[#allocation2 + $0xd8] sm:$0xff] %vm968_vm1, %v960_v4  ;;  %v962_v25 = vmul.f32 %v930_v18, %v833_v6  ;;  %v932_v24 = vadd.f32 1.0, %v15713_v21  ;;  %v15715_v31 = vpop.eup %15714  ;;  %20762 = vst [vmem:[#allocation10_spill] sm:$0xff] %v20761_v37  ;;  %vm16445_vm5 = vcmp.ge.s32.totalorder %v469_v28, 1  ;;  %v20763_v43 = vmov 0  ;;  %v16500_v4 = vld [vmem:[#allocation2 + $0x5f] sm:$0xff] }
  0x4c   : > { %1032 = vst.msk [vmem:[#allocation2 + $0xe0] sm:$0xff] %vm968_vm1, %v961_v19  ;;  %v963_v35 = vmul.f32 %v931_v23, %v834_v14  ;;  %v933_v39 = vadd.f32 1.0, %v15715_v31  ;;  %v20764_v43 = vsel %vm16445_vm5, 4294967295, %v20763_v43  ;;  %v401_v44 = vadd.s32 80, %v16349_v22  ;;  %v16505_v6 = vld [vmem:[#allocation2 + $0x77] sm:$0xff]  ;;  %v16546_v28 = vld [vmem:[#allocation2 + $0x8f] sm:$0xff] }
  0x4d   : > { %1033 = vst.msk [vmem:[#allocation2 + $0xe8] sm:$0xff] %vm968_vm1, %v962_v25  ;;  %v964_v38 = vmul.f32 %v932_v24, %v835_v16  ;;  %20765 = vst [vmem:[#allocation11_spill] sm:$0xff] %v20764_v43  ;;  %v1173_v32 = vsel %vm16445_vm5, %v16443_v42, 0.0  ;;  %v20766_v48 = vmov 0  ;;  %v403_v50 = vadd.s32 96, %v16349_v22  ;;  %v16520_v16 = vld [vmem:[#allocation2 + $0x87] sm:$0xff] }
  0x4e   : > { %13286 = vmatmul.mubr.msk.f32.gmra.mrb[14].mxu0 %vm968_vm1, %v16375_v34  ;;  %1034 = vst.msk [vmem:[#allocation2 + $0xf0] sm:$0xff] %vm968_vm1, %v963_v35  ;;  %v965_v41 = vmul.f32 %v933_v39, %v836_v29  ;;  %v497_v49 = vand.u32 15, %v401_v44  ;;  %v870_v52 = vmul.f32 0.70710677, %v388_v46  ;;  %v20768_v56 = vmov 0  ;;  %v16530_v24 = vld [vmem:[#allocation2 + $0x7f] sm:$0xff] }
  0x4f   : > { %13288 = vmatprep.mubr.msk.f32.mxu0 %vm968_vm1, %v16379_v57  ;;  %1035 = vst.msk [vmem:[#allocation2 + $0xf8] sm:$0xff] %vm968_vm1, %v964_v38  ;;  %v511_v59 = vand.u32 15, %v403_v50  ;;  %v405_v60 = vadd.s32 112, %v16349_v22  ;;  %v20770_v55 = vmov 0  ;;  %v407_v3 = vadd.s32 128, %v16349_v22  ;;  %v16536_v31 = vld [vmem:[#allocation2 + $0x97] sm:$0xff] }
  0x50   : > { %1036 = vst.msk [vmem:[#allocation2 + $0x100] sm:$0xff] %vm968_vm1, %v965_v41  ;;  %vm16477_vm7 = vcmp.ge.s32.totalorder %v497_v49, 1  ;;  %15716 = verf.f32 %v870_v52  ;;  %v20772_v7 = vmov 0  ;;  %v409_v12 = vadd.s32 144, %v16349_v22  ;;  %v16551_v39 = vld [vmem:[#allocation2 + $0xa7] sm:$0xff]  ;;  %v16561_v44 = vld [vmem:[#allocation2 + $0x9f] sm:$0xff] }
  0x51   : > { %v20769_v56 = vsel %vm16477_vm7, 4294967295, %v20768_v56  ;;  %v1177_v62 = vsel %vm16477_vm7, %v16475_v54, 0.0  ;;  %vm16492_vm8 = vcmp.ge.s32.totalorder %v511_v59, 1  ;;  %v525_v0 = vand.u32 15, %v405_v60  ;;  %v16569_v49 = vld [vmem:[#allocation2 + $0xb7] sm:$0xff]  ;;  %v16580_v60 = vld [vmem:[#allocation2 + $0xaf] sm:$0xff] }
  0x52   : > { %13289 = vmatmul.mubr.msk.f32.gmra.mrb[16].mxu0 %vm968_vm1, %v16393_v2  ;;  %v20771_v55 = vsel %vm16492_vm8, 4294967295, %v20770_v55  ;;  %v1179_v5 = vsel %vm16492_vm8, %v16490_v63, 0.0  ;;  %v837_v13 = vmul.f32 0.5, %v388_v46  ;;  %v20774_v21 = vmov 0  ;;  %v16567_v46 = vld [vmem:[%s16213_s18 + $0xf8] sm:$0xff]  ;;  %v3643_v17 = vld [vmem:[#allocation2 + $0x67] sm:$0xff] }
  0x53   : > { %13314 = vmatprep.mubr.msk.f32.mxu0 %vm968_vm1, %v1167_v10  ;;  %vm16507_vm9 = vcmp.ge.s32.totalorder %v525_v0, 1  ;;  %v539_v10 = vand.u32 15, %v407_v3  ;;  %v553_v23 = vand.u32 15, %v409_v12  ;;  %v413_v35 = vadd.s32 176, %v16349_v22  ;;  %20780 = vst [vmem:[#allocation12_spill] sm:$0xff] %v16567_v46  ;;  %v16585_v0 = vld [vmem:[#allocation2 + $0xc7] sm:$0xff] }
  0x54   : > { %v20773_v7 = vsel %vm16507_vm9, 4294967295, %v20772_v7  ;;  %v1181_v19 = vsel %vm16507_vm9, %v16505_v6, 0.0  ;;  %v20778_v41 = vmov 0  ;;  %v20781_v50 = vmov 0  ;;  %v16595_v12 = vld [vmem:[#allocation2 + $0xbf] sm:$0xff]  ;;  %v3647_v43 = vld [vmem:[#allocation2 + $0x87] sm:$0xff] }
  0x55   : > { %vm16522_vm10 = vcmp.ge.s32.totalorder %v539_v10, 1  ;;  %vm16538_vm11 = vcmp.ge.s32.totalorder %v553_v23, 1  ;;  %v871_v59 = vmul.f32 0.70710677, %v16567_v46  ;;  %v20783_v3 = vmov 0 }
  0x56   : > { %13315 = vmatmul.mubr.msk.f32.vlgmr.msra.gmra.mrb[0].mxu0 %vm968_vm1, %v1040_v20  ;;  %v20775_v21 = vsel %vm16522_vm10, 4294967295, %v20774_v21  ;;  %v411_v20 = vadd.s32 160, %v16349_v22  ;;  %v1183_v29 = vsel %vm16522_vm10, %v16520_v16, 0.0  ;;  %v1185_v38 = vsel %vm16538_vm11, %v16536_v31, 0.0 }
  0x57   : > { %13363 = vmatpush3.msk.msra.mxu0 %vm20385_vm0, %v16221_v8  ;;  %13317 = vmatprep.mubr.msk.f32.mxu0 %vm968_vm1, %v1169_v33  ;;  %v483_v8 = vand.u32 15, %v399_v27  ;;  %v20776_v33 = vmov 0  ;;  %15718 = verf.f32 %v871_v59  ;;  %v419_v10 = vadd.s32 224, %v16349_v22 }
  0x58   : > { %13412 = vmatprep.subr.msk.mxu0 %vm20385_vm0, %v16428_v36  ;;  %v20777_v33 = vsel %vm16538_vm11, 4294967295, %v20776_v33  ;;  %v567_v27 = vand.u32 15, %v411_v20  ;;  %v421_v23 = vadd.s32 240, %v16349_v22  ;;  %v16610_v20 = vld [vmem:[#allocation2 + $0xcf] sm:$0xff] }
  0x59   : > { %vm16462_vm6 = vcmp.ge.s32.totalorder %v483_v8, 1  ;;  %v415_v8 = vadd.s32 192, %v16349_v22 }
  0x5a   : > { %13318 = vmatmul.mubr.msk.f32.gmra.mrb[2].mxu0 %vm968_vm1, %v16435_v40  ;;  %v20767_v48 = vsel %vm16462_vm6, 4294967295, %v20766_v48  ;;  %v1175_v53 = vsel %vm16462_vm6, %v16460_v47, 0.0  ;;  %v15717_v14 = vpop.eup %15716  ;;  %vm16553_vm12 = vcmp.ge.s32.totalorder %v567_v27, 1  ;;  %v16615_v27 = vld [vmem:[#allocation2 + $0xe7] sm:$0xff] }
  0x5b   : > { %13320 = vmatprep.mubr.msk.f32.mxu0 %vm968_vm1, %v1171_v30  ;;  %v934_v18 = vadd.f32 1.0, %v15717_v14  ;;  %v20779_v41 = vsel %vm16553_vm12, 4294967295, %v20778_v41  ;;  %v581_v30 = vand.u32 15, %v413_v35  ;;  %v595_v52 = vand.u32 15, %v415_v8  ;;  %v16600_v14 = vld [vmem:[#allocation2 + $0xd7] sm:$0xff] }
  0x5c   : > { %v20787_v35 = vmov 0 }
  0x5d   : > { %v966_v25 = vmul.f32 %v934_v18, %v837_v13  ;;  %vm16571_vm13 = vcmp.ge.s32.totalorder %v581_v30, 1  ;;  %vm16587_vm14 = vcmp.ge.s32.totalorder %v595_v52, 1  ;;  %v623_v18 = vand.u32 15, %v419_v10  ;;  %v16641_v10 = vld [vmem:[#allocation2 + $0xef] sm:$0xff] }
  0x5e   : > { %13321 = vmatmul.mubr.msk.f32.gmra.mrb[4].mxu0 %vm968_vm1, %v16454_v45  ;;  %v20782_v50 = vsel %vm16571_vm13, 4294967295, %v20781_v50  ;;  %v20784_v3 = vsel %vm16587_vm14, 4294967295, %v20783_v3  ;;  %v1191_v13 = vsel %vm16587_vm14, %v16585_v0, 0.0  ;;  %v838_v30 = vmul.f32 0.5, %v16567_v46 }
  0x5f   : > { %13323 = vmatprep.mubr.msk.f32.mxu0 %vm968_vm1, %v1173_v32  ;;  %1037 = vst.msk [vmem:[#allocation2 + $0x108] sm:$0xff] %vm968_vm1, %v966_v25  ;;  %v1187_v32 = vsel %vm16553_vm12, %v16551_v39, 0.0  ;;  %vm16617_vm0 = vcmp.ge.s32.totalorder %v623_v18, 1 }
  0x60   : > { %v20788_v35 = vsel %vm16617_vm0, 4294967295, %v20787_v35  ;;  %v1195_v52 = vsel %vm16617_vm0, %v16615_v27, 0.0 }
  0x62   : > { %13324 = vmatmul.mubr.msk.f32.gmra.mrb[6].mxu0 %vm968_vm1, %v16470_v51 }
  0x63   : > { %13326 = vmatprep.mubr.msk.f32.mxu0 %vm968_vm1, %v1175_v53  ;;  %v417_v53 = vadd.s32 208, %v16349_v22 }
  0x66   : > { %13327 = vmatmul.mubr.msk.f32.gmra.mrb[8].mxu0 %vm968_vm1, %v16485_v61 }
  0x67   : > { %13329 = vmatprep.mubr.msk.f32.mxu0 %vm968_vm1, %v1177_v62  ;;  %v1189_v62 = vsel %vm16571_vm13, %v16569_v49, 0.0 }
  0x6a   : > { %13330 = vmatmul.mubr.msk.f32.gmra.mrb[10].mxu0 %vm968_vm1, %v16500_v4 }
  0x6b   : > { %13332 = vmatprep.mubr.msk.f32.mxu0 %vm968_vm1, %v1179_v5  ;;  %v609_v5 = vand.u32 15, %v417_v53  ;;  %v392_v53 = vadd.s32 8, %v16349_v22 }
  0x6d   : > { %vm16602_vm15 = vcmp.ge.s32.totalorder %v609_v5, 1  ;;  %v20789_v5 = vmov 0  ;;  %v434_v18 = vand.u32 15, %v392_v53 }
  0x6e   : > { %13333 = vmatmul.mubr.msk.f32.gmra.mrb[12].mxu0 %vm968_vm1, %v16515_v11  ;;  %v1193_v25 = vsel %vm16602_vm15, %v16600_v14, 0.0 }
  0x6f   : > { %13335 = vmatprep.mubr.msk.f32.mxu0 %vm968_vm1, %v1181_v19  ;;  %v20785_v19 = vmov 0  ;;  %vm16652_vm0 = vcmp.le.s32.totalorder %v434_v18, 14  ;;  %v20796_v18 = vmov 0 }
  0x70   : > { %v20786_v19 = vsel %vm16602_vm15, 4294967295, %v20785_v19 }
  0x72   : > { %13336 = vmatmul.mubr.msk.f32.gmra.mrb[14].mxu0 %vm968_vm1, %v16530_v24 }
  0x73   : > { %13338 = vmatprep.mubr.msk.f32.mxu0 %vm968_vm1, %v1183_v29  ;;  %v15719_v29 = vpop.eup %15718 }
  0x74   : > { %v935_v8 = vadd.f32 1.0, %v15719_v29  ;;  %v1883_v29 = vld [vmem:[#allocation2 + $0x9] sm:$0xff] }
  0x76   : > { %13339 = vmatmul.mubr.msk.f32.gmra.mrb[16].mxu0 %vm968_vm1, %v16546_v28  ;;  %v967_v59 = vmul.f32 %v935_v8, %v838_v30  ;;  %v20791_v30 = vmov 0 }
  0x77   : > { %13341 = vmatprep.mubr.msk.f32.mxu0 %vm968_vm1, %v1185_v38  ;;  %v637_v38 = vand.u32 15, %v421_v23  ;;  %v394_v23 = vadd.s32 24, %v16349_v22  ;;  %v20792_v30 = vsel %vm16652_vm0, 4294967295, %v20791_v30 }
  0x78   : > { %1038 = vst.msk [vmem:[#allocation2 + $0x110] sm:$0xff] %vm968_vm1, %v967_v59  ;;  %20793 = vst [vmem:[#allocation13_spill] sm:$0xff] %v20792_v30  ;;  %v16662_v59 = vld [vmem:[#allocation2 + $0x19] sm:$0xff] }
  0x79   : > { %vm16633_vm15 = vcmp.ge.s32.totalorder %v637_v38, 1  ;;  %v1884_v38 = vld [vmem:[#allocation2 + $0x11] sm:$0xff]  ;;  %v448_v8 = vand.u32 15, %v394_v23  ;;  %20794 = vst [vmem:[#allocation14_spill] sm:$0xff] %v16662_v59  ;;  %v398_v23 = vadd.s32 56, %v16349_v22 }
  0x7a   : > { %13342 = vmatmul.mubr.msk.f32.gmra.mrb[18].mxu0 %vm968_vm1, %v16561_v44  ;;  %v20790_v5 = vsel %vm16633_vm15, 4294967295, %v20789_v5  ;;  %v2012_v53 = vsel %vm16652_vm0, %v1884_v38, 0.0  ;;  %vm20799_vm0 = vcmask 1043456   ;;  %v16684_v38 = vld [vmem:[#allocation2 + $0x29] sm:$0xff] }
  0x7b   : > { %13344 = vmatprep.mubr.msk.f32.mxu0 %vm968_vm1, %v1187_v32  ;;  %v16625_v32 = vld [vmem:[#allocation2 + $0xdf] sm:$0xff]  ;;  %20800 = vst [vmem:[#allocation17_spill] sm:$0xff] %v16684_v38  ;;  %v476_v46 = vand.u32 15, %v398_v23  ;;  %v20807_v23 = vmov 0 }
  0x7e   : > { %13345 = vmatmul.mubr.msk.f32.gmra.mrb[20].mxu0 %vm968_vm1, %v16580_v60 }
  0x7f   : > { %13347 = vmatprep.mubr.msk.f32.mxu0 %vm968_vm1, %v1189_v62  ;;  %v16631_v62 = vld [vmem:[#allocation2 + $0xf7] sm:$0xff] }
  0x82   : > { %13348 = vmatmul.mubr.msk.f32.gmra.mrb[22].mxu0 %vm968_vm1, %v16595_v12 }
  0x83   : > { %13350 = vmatprep.mubr.msk.f32.mxu0 %vm968_vm1, %v1191_v13  ;;  %v1197_v13 = vsel %vm16633_vm15, %v16631_v62, 0.0  ;;  %vm16666_vm15 = vcmp.le.s32.totalorder %v448_v8, 14  ;;  %v16686_v8 = vld [vmem:[#allocation2 + $0x31] sm:$0xff] }
  0x84   : > { %v20797_v18 = vsel %vm16666_vm15, 4294967295, %v20796_v18  ;;  %20801 = vst [vmem:[#allocation18_spill] sm:$0xff] %v16686_v8 }
  0x85   : > { %20798 = vst [vmem:[#allocation16_spill] sm:$0xff] %v20797_v18  ;;  %v16701_v18 = vld [vmem:[#allocation2 + $0x39] sm:$0xff] }
  0x86   : > { %13351 = vmatmul.mubr.msk.f32.gmra.mrb[24].mxu0 %vm968_vm1, %v16610_v20  ;;  %20805 = vst [vmem:[#allocation20_spill] sm:$0xff] %v16701_v18 }
  0x87   : > { %13353 = vmatprep.mubr.msk.f32.mxu0 %vm968_vm1, %v1193_v25  ;;  %v16650_v25 = vld [vmem:[#allocation2 + $0xff] sm:$0xff] }
  0x8a   : > { %13354 = vmatmul.mubr.msk.f32.gmra.mrb[26].mxu0 %vm968_vm1, %v16625_v32 }
  0x8b   : > { %13356 = vmatprep.mubr.msk.f32.mxu0 %vm968_vm1, %v1195_v52  ;;  %v396_v52 = vadd.s32 40, %v16349_v22 }
  0x8d   : > { %v462_v9 = vand.u32 15, %v396_v52  ;;  %v20802_v52 = vmov 0 }
  0x8e   : > { %13357 = vmatmul.mubr.msk.f32.gmra.mrb[28].mxu0 %vm968_vm1, %v16641_v10 }
  0x8f   : > { %13359 = vmatprep.mubr.msk.f32.mxu0 %vm968_vm1, %v1197_v13  ;;  %v16664_v13 = vld [vmem:[#allocation2 + $0x21] sm:$0xff]  ;;  %vm16688_vm14 = vcmp.le.s32.totalorder %v462_v9, 14 }
  0x90   : > { %20795 = vst [vmem:[#allocation15_spill] sm:$0xff] %v16664_v13  ;;  %v20803_v52 = vsel %vm16688_vm14, 4294967295, %v20802_v52  ;;  %v16703_v9 = vld [vmem:[#allocation2 + $0x41] sm:$0xff] }
  0x91   : > { %20804 = vst [vmem:[#allocation19_spill] sm:$0xff] %v20803_v52  ;;  %20806 = vst [vmem:[#allocation21_spill] sm:$0xff] %v16703_v9  ;;  %v16716_v52 = vld [vmem:[#allocation2 + $0x49] sm:$0xff] }
  0x92   : > { %13360 = vmatmul.mubr.msk.f32.gmra.mrb[30].mxu0 %vm968_vm1, %v16650_v25  ;;  %20810 = vst [vmem:[#allocation23_spill] sm:$0xff] %v16716_v52 }
  0x93   : > { %13364 = vmatprep.mubr.msk.f32.mxu0 %vm968_vm1, %v1883_v29  ;;  %v2014_v29 = vsel %vm16666_vm15, %v16664_v13, 0.0  ;;  %vm16705_vm15 = vcmp.le.s32.totalorder %v476_v46, 14  ;;  %v402_v13 = vadd.s32 88, %v16349_v22  ;;  %v20812_v46 = vmov 0 }
  0x94   : > { %v20808_v23 = vsel %vm16705_vm15, 4294967295, %v20807_v23 }
  0x95   : > { %20809 = vst [vmem:[#allocation22_spill] sm:$0xff] %v20808_v23  ;;  %v16731_v23 = vld [vmem:[#allocation2 + $0x59] sm:$0xff] }
  0x96   : > { %13365 = vmatmul.mubr.msk.f32.vlgmr.msra.gmra.mrb[0].mxu0 %vm968_vm1, %v2012_v53  ;;  %v400_v53 = vadd.s32 72, %v16349_v22  ;;  %20815 = vst [vmem:[#allocation26_spill] sm:$0xff] %v16731_v23 }
  0x97   : > { %13413 = vmatpush3.msk.msra.mxu0 %vm20799_vm0, %v16428_v36  ;;  %13367 = vmatprep.mubr.msk.f32.mxu0 %vm968_vm1, %v16662_v59  ;;  %v2016_v36 = vsel %vm16688_vm14, %v16686_v8, 0.0  ;;  %v16718_v8 = vld [vmem:[#allocation2 + $0x51] sm:$0xff] }
  0x98   : > { %13462 = vmatprep.subr.msk.mxu0 %vm20799_vm0, %v16674_v1  ;;  %v490_v30 = vand.u32 15, %v400_v53  ;;  %20811 = vst [vmem:[#allocation24_spill] sm:$0xff] %v16718_v8  ;;  %v504_v53 = vand.u32 15, %v402_v13  ;;  %v16822_v59 = vld [vmem:[#allocation2 + $0xb1] sm:$0xff] }
  0x99   : > { %20844 = vst [vmem:[#allocation45_spill] sm:$0xff] %v16822_v59 }
  0x9a   : > { %13368 = vmatmul.mubr.msk.f32.gmra.mrb[2].mxu0 %vm968_vm1, %v2014_v29  ;;  %v2018_v29 = vsel %vm16705_vm15, %v16703_v9, 0.0  ;;  %vm16720_vm0 = vcmp.le.s32.totalorder %v490_v30, 14  ;;  %v16733_v9 = vld [vmem:[#allocation2 + $0x61] sm:$0xff]  ;;  %vm16735_vm15 = vcmp.le.s32.totalorder %v504_v53, 14  ;;  %v20817_v30 = vmov 0 }
  0x9b   : > { %13370 = vmatprep.mubr.msk.f32.mxu0 %vm968_vm1, %v16684_v38  ;;  %v20813_v46 = vsel %vm16720_vm0, 4294967295, %v20812_v46  ;;  %v404_v38 = vadd.s32 104, %v16349_v22  ;;  %20816 = vst [vmem:[#allocation27_spill] sm:$0xff] %v16733_v9  ;;  %v20818_v30 = vsel %vm16735_vm15, 4294967295, %v20817_v30  ;;  %v20822_v53 = vmov 0 }
  0x9c   : > { %20814 = vst [vmem:[#allocation25_spill] sm:$0xff] %v20813_v46  ;;  %20819 = vst [vmem:[#allocation28_spill] sm:$0xff] %v20818_v30  ;;  %v16746_v46 = vld [vmem:[#allocation2 + $0x69] sm:$0xff]  ;;  %v16761_v30 = vld [vmem:[#allocation2 + $0x79] sm:$0xff] }
  0x9d   : > { %v518_v13 = vand.u32 15, %v404_v38  ;;  %20820 = vst [vmem:[#allocation29_spill] sm:$0xff] %v16746_v46  ;;  %20825 = vst [vmem:[#allocation32_spill] sm:$0xff] %v16761_v30 }
  0x9e   : > { %13371 = vmatmul.mubr.msk.f32.gmra.mrb[4].mxu0 %vm968_vm1, %v2016_v36  ;;  %v2020_v36 = vsel %vm16720_vm0, %v16718_v8, 0.0  ;;  %v16748_v8 = vld [vmem:[#allocation2 + $0x71] sm:$0xff] }
  0x9f   : > { %13373 = vmatprep.mubr.msk.f32.mxu0 %vm968_vm1, %v16701_v18  ;;  %v406_v18 = vadd.s32 120, %v16349_v22  ;;  %20821 = vst [vmem:[#allocation30_spill] sm:$0xff] %v16748_v8  ;;  %vm16750_vm0 = vcmp.le.s32.totalorder %v518_v13, 14  ;;  %v20827_v13 = vmov 0 }
  0xa0   : > { %v20823_v53 = vsel %vm16750_vm0, 4294967295, %v20822_v53 }
  0xa1   : > { %20824 = vst [vmem:[#allocation31_spill] sm:$0xff] %v20823_v53  ;;  %v532_v38 = vand.u32 15, %v406_v18  ;;  %v16776_v53 = vld [vmem:[#allocation2 + $0x89] sm:$0xff] }
  0xa2   : > { %13374 = vmatmul.mubr.msk.f32.gmra.mrb[6].mxu0 %vm968_vm1, %v2018_v29  ;;  %v2022_v29 = vsel %vm16735_vm15, %v16733_v9, 0.0  ;;  %v16763_v9 = vld [vmem:[#allocation2 + $0x81] sm:$0xff]  ;;  %20830 = vst [vmem:[#allocation35_spill] sm:$0xff] %v16776_v53 }
  0xa3   : > { %13376 = vmatprep.mubr.msk.f32.mxu0 %vm968_vm1, %v16716_v52  ;;  %v408_v52 = vadd.s32 136, %v16349_v22  ;;  %20826 = vst [vmem:[#allocation33_spill] sm:$0xff] %v16763_v9  ;;  %vm16765_vm15 = vcmp.le.s32.totalorder %v532_v38, 14  ;;  %v20832_v38 = vmov 0 }
  0xa4   : > { %v20828_v13 = vsel %vm16765_vm15, 4294967295, %v20827_v13 }
  0xa5   : > { %20829 = vst [vmem:[#allocation34_spill] sm:$0xff] %v20828_v13  ;;  %v546_v18 = vand.u32 15, %v408_v52 }
  0xa6   : > { %13377 = vmatmul.mubr.msk.f32.gmra.mrb[8].mxu0 %vm968_vm1, %v2020_v36  ;;  %v2024_v36 = vsel %vm16750_vm0, %v16748_v8, 0.0  ;;  %v16778_v8 = vld [vmem:[#allocation2 + $0x91] sm:$0xff] }
  0xa7   : > { %13379 = vmatprep.mubr.msk.f32.mxu0 %vm968_vm1, %v16731_v23  ;;  %v410_v23 = vadd.s32 152, %v16349_v22  ;;  %20831 = vst [vmem:[#allocation36_spill] sm:$0xff] %v16778_v8  ;;  %vm16780_vm0 = vcmp.le.s32.totalorder %v546_v18, 14  ;;  %v16797_v18 = vld [vmem:[#allocation2 + $0x99] sm:$0xff] }
  0xa8   : > { %v20833_v38 = vsel %vm16780_vm0, 4294967295, %v20832_v38  ;;  %v2028_v13 = vsel %vm16780_vm0, %v16778_v8, 0.0  ;;  %20836 = vst [vmem:[#allocation39_spill] sm:$0xff] %v16797_v18  ;;  %v16816_v8 = vld [vmem:[#allocation2 + $0xb0] sm:$0xff] }
  0xa9   : > { %20834 = vst [vmem:[#allocation37_spill] sm:$0xff] %v20833_v38  ;;  %v560_v52 = vand.u32 15, %v410_v23  ;;  %v16799_v23 = vld [vmem:[#allocation2 + $0xa1] sm:$0xff]  ;;  %20842 = vst [vmem:[#allocation43_spill] sm:$0xff] %v16816_v8 }
  0xaa   : > { %13380 = vmatmul.mubr.msk.f32.gmra.mrb[10].mxu0 %vm968_vm1, %v2022_v29  ;;  %v2026_v29 = vsel %vm16765_vm15, %v16763_v9, 0.0  ;;  %v16793_v9 = vld [vmem:[#allocation2 + $0xa0] sm:$0xff]  ;;  %20837 = vst [vmem:[#allocation40_spill] sm:$0xff] %v16799_v23  ;;  %v16809_v38 = vld [vmem:[#allocation2 + $0xa8] sm:$0xff] }
  0xab   : > { %13382 = vmatprep.mubr.msk.f32.mxu0 %vm968_vm1, %v16746_v46  ;;  %v412_v46 = vadd.s32 168, %v16349_v22  ;;  %20835 = vst [vmem:[#allocation38_spill] sm:$0xff] %v16793_v9  ;;  %vm16801_vm15 = vcmp.le.s32.totalorder %v560_v52, 14  ;;  %20841 = vst [vmem:[#allocation42_spill] sm:$0xff] %v16809_v38 }
  0xac   : > { %v2030_v52 = vsel %vm16801_vm15, %v16799_v23, 0.0  ;;  %v16839_v23 = vld [vmem:[#allocation2 + $0xc0] sm:$0xff] }
  0xad   : > { %20849 = vst [vmem:[#allocation48_spill] sm:$0xff] %v16839_v23 }
  0xae   : > { %13383 = vmatmul.mubr.msk.f32.gmra.mrb[12].mxu0 %vm968_vm1, %v2024_v36  ;;  %v16786_v36 = vld [vmem:[#allocation2 + $0x98] sm:$0xff] }
  0xaf   : > { %13385 = vmatprep.mubr.msk.f32.mxu0 %vm968_vm1, %v16761_v30  ;;  %13291 = vmatprep.mubr.msk.f32.mxu1 %vm968_vm1, %v16786_v36  ;;  %v574_v30 = vand.u32 15, %v412_v46  ;;  %v16820_v46 = vld [vmem:[#allocation2 + $0xa9] sm:$0xff] }
  0xb0   : > { %13292 = vmatmul.mubr.msk.f32.vlgmr.msra.gmra.mrb[0].mxu1 %vm968_vm1, %v16793_v9  ;;  %20843 = vst [vmem:[#allocation44_spill] sm:$0xff] %v16820_v46 }
  0xb1   : > { %13294 = vmatprep.mubr.msk.f32.mxu1 %vm968_vm1, %v16809_v38  ;;  %vm16824_vm0 = vcmp.le.s32.totalorder %v574_v30, 14  ;;  %v16845_v38 = vld [vmem:[#allocation2 + $0xc1] sm:$0xff] }
  0xb2   : > { %13386 = vmatmul.mubr.msk.f32.gmra.mrb[14].mxu0 %vm968_vm1, %v2026_v29  ;;  %v20838_v29 = vmov 0  ;;  %v2032_v30 = vsel %vm16824_vm0, %v16822_v59, 0.0  ;;  %20851 = vst [vmem:[#allocation50_spill] sm:$0xff] %v16845_v38  ;;  %v16862_v59 = vld [vmem:[#allocation2 + $0xd0] sm:$0xff] }
  0xb3   : > { %13388 = vmatprep.mubr.msk.f32.mxu0 %vm968_vm1, %v16776_v53  ;;  %v20839_v29 = vsel %vm16801_vm15, 4294967295, %v20838_v29  ;;  %v414_v53 = vadd.s32 184, %v16349_v22  ;;  %20856 = vst [vmem:[#allocation53_spill] sm:$0xff] %v16862_v59 }
  0xb4   : > { %20840 = vst [vmem:[#allocation41_spill] sm:$0xff] %v20839_v29  ;;  %13295 = vmatmul.mubr.msk.f32.gmra.mrb[2].mxu1 %vm968_vm1, %v16816_v8  ;;  %v16832_v29 = vld [vmem:[#allocation2 + $0xb8] sm:$0xff] }
  0xb5   : > { %v588_v9 = vand.u32 15, %v414_v53  ;;  %20848 = vst [vmem:[#allocation47_spill] sm:$0xff] %v16832_v29  ;;  %13297 = vmatprep.mubr.msk.f32.mxu1 %vm968_vm1, %v16832_v29  ;;  %v16843_v53 = vld [vmem:[#allocation2 + $0xb9] sm:$0xff]  ;;  %v16868_v29 = vld [vmem:[#allocation2 + $0xd1] sm:$0xff] }
  0xb6   : > { %13389 = vmatmul.mubr.msk.f32.gmra.mrb[16].mxu0 %vm968_vm1, %v2028_v13  ;;  %v20845_v13 = vmov 0  ;;  %20850 = vst [vmem:[#allocation49_spill] sm:$0xff] %v16843_v53  ;;  %20858 = vst [vmem:[#allocation55_spill] sm:$0xff] %v16868_v29 }
  0xb7   : > { %13391 = vmatprep.mubr.msk.f32.mxu0 %vm968_vm1, %v16797_v18  ;;  %v20846_v13 = vsel %vm16824_vm0, 4294967295, %v20845_v13  ;;  %v416_v18 = vadd.s32 200, %v16349_v22  ;;  %vm16847_vm15 = vcmp.le.s32.totalorder %v588_v9, 14 }
  0xb8   : > { %20847 = vst [vmem:[#allocation46_spill] sm:$0xff] %v20846_v13  ;;  %13298 = vmatmul.mubr.msk.f32.gmra.mrb[4].mxu1 %vm968_vm1, %v16839_v23  ;;  %v16855_v13 = vld [vmem:[#allocation2 + $0xc8] sm:$0xff]  ;;  %v2034_v9 = vsel %vm16847_vm15, %v16845_v38, 0.0  ;;  %v16885_v38 = vld [vmem:[#allocation2 + $0xe0] sm:$0xff] }
  0xb9   : > { %v602_v8 = vand.u32 15, %v416_v18  ;;  %20855 = vst [vmem:[#allocation52_spill] sm:$0xff] %v16855_v13  ;;  %13300 = vmatprep.mubr.msk.f32.mxu1 %vm968_vm1, %v16855_v13  ;;  %v16866_v18 = vld [vmem:[#allocation2 + $0xc9] sm:$0xff]  ;;  %20862 = vst [vmem:[#allocation57_spill] sm:$0xff] %v16885_v38  ;;  %v16891_v13 = vld [vmem:[#allocation2 + $0xe1] sm:$0xff] }
  0xba   : > { %13392 = vmatmul.mubr.msk.f32.gmra.mrb[18].mxu0 %vm968_vm1, %v2030_v52  ;;  %v20852_v52 = vmov 0  ;;  %20857 = vst [vmem:[#allocation54_spill] sm:$0xff] %v16866_v18  ;;  %20864 = vst [vmem:[#allocation59_spill] sm:$0xff] %v16891_v13 }
  0xbb   : > { %13394 = vmatprep.mubr.msk.f32.mxu0 %vm968_vm1, %v16820_v46  ;;  %v20853_v52 = vsel %vm16847_vm15, 4294967295, %v20852_v52  ;;  %v418_v46 = vadd.s32 216, %v16349_v22  ;;  %vm16870_vm0 = vcmp.le.s32.totalorder %v602_v8, 14 }
  0xbc   : > { %20854 = vst [vmem:[#allocation51_spill] sm:$0xff] %v20853_v52  ;;  %13301 = vmatmul.mubr.msk.f32.gmra.mrb[6].mxu1 %vm968_vm1, %v16862_v59  ;;  %v16878_v52 = vld [vmem:[#allocation2 + $0xd8] sm:$0xff]  ;;  %v2036_v8 = vsel %vm16870_vm0, %v16868_v29, 0.0  ;;  %v16908_v29 = vld [vmem:[#allocation2 + $0xf0] sm:$0xff] }
  0xbd   : > { %v616_v23 = vand.u32 15, %v418_v46  ;;  %13303 = vmatprep.mubr.msk.f32.mxu1 %vm968_vm1, %v16878_v52  ;;  %v16889_v46 = vld [vmem:[#allocation2 + $0xd9] sm:$0xff]  ;;  %20868 = vst [vmem:[#allocation61_spill] sm:$0xff] %v16908_v29 }
  0xbe   : > { %13395 = vmatmul.mubr.msk.f32.gmra.mrb[20].mxu0 %vm968_vm1, %v2032_v30  ;;  %v20859_v30 = vmov 0  ;;  %20863 = vst [vmem:[#allocation58_spill] sm:$0xff] %v16889_v46 }
  0xbf   : > { %13397 = vmatprep.mubr.msk.f32.mxu0 %vm968_vm1, %v16843_v53  ;;  %v20860_v30 = vsel %vm16870_vm0, 4294967295, %v20859_v30  ;;  %v420_v53 = vadd.s32 232, %v16349_v22  ;;  %vm16893_vm15 = vcmp.le.s32.totalorder %v616_v23, 14 }
  0xc0   : > { %20861 = vst [vmem:[#allocation56_spill] sm:$0xff] %v20860_v30  ;;  %13304 = vmatmul.mubr.msk.f32.gmra.mrb[8].mxu1 %vm968_vm1, %v16885_v38  ;;  %v16901_v30 = vld [vmem:[#allocation2 + $0xe8] sm:$0xff]  ;;  %v2038_v23 = vsel %vm16893_vm15, %v16891_v13, 0.0 }
  0xc1   : > { %v630_v59 = vand.u32 15, %v420_v53  ;;  %13306 = vmatprep.mubr.msk.f32.mxu1 %vm968_vm1, %v16901_v30  ;;  %v16912_v53 = vld [vmem:[#allocation2 + $0xe9] sm:$0xff] }
  0xc2   : > { %13398 = vmatmul.mubr.msk.f32.gmra.mrb[22].mxu0 %vm968_vm1, %v2034_v9  ;;  %v20865_v9 = vmov 0  ;;  %20869 = vst [vmem:[#allocation62_spill] sm:$0xff] %v16912_v53 }
  0xc3   : > { %13400 = vmatprep.mubr.msk.f32.mxu0 %vm968_vm1, %v16866_v18  ;;  %v20866_v9 = vsel %vm16893_vm15, 4294967295, %v20865_v9  ;;  %v422_v18 = vadd.s32 248, %v16349_v22  ;;  %v16914_v22 = vld [vmem:[#allocation2 + $0xf1] sm:$0xff]  ;;  %vm16916_vm0 = vcmp.le.s32.totalorder %v630_v59, 14  ;;  %v16934_v59 = vld [vmem:[#allocation2 + $0xf9] sm:$0xff] }
  0xc4   : > { %20867 = vst [vmem:[#allocation60_spill] sm:$0xff] %v20866_v9  ;;  %13307 = vmatmul.mubr.msk.f32.gmra.mrb[10].mxu1 %vm968_vm1, %v16908_v29  ;;  %v16923_v9 = vld [vmem:[#allocation2 + $0xf8] sm:$0xff]  ;;  %v2040_v13 = vsel %vm16916_vm0, %v16914_v22, 0.0  ;;  %20875 = vst [vmem:[#allocation66_spill] sm:$0xff] %v16934_v59 }
  0xc5   : > { %v644_v38 = vand.u32 15, %v422_v18  ;;  %20873 = vst [vmem:[#allocation64_spill] sm:$0xff] %v16923_v9  ;;  %13309 = vmatprep.mubr.msk.f32.mxu1 %vm968_vm1, %v16923_v9  ;;  %v16936_v18 = vld [vmem:[#allocation2 + $0x101] sm:$0xff] }
  0xc6   : > { %13401 = vmatmul.mubr.msk.f32.gmra.mrb[24].mxu0 %vm968_vm1, %v2036_v8  ;;  %v20870_v8 = vmov 0  ;;  %20876 = vst [vmem:[#allocation67_spill] sm:$0xff] %v16936_v18 }
  0xc7   : > { %13403 = vmatprep.mubr.msk.f32.mxu0 %vm968_vm1, %v16889_v46  ;;  %v20871_v8 = vsel %vm16916_vm0, 4294967295, %v20870_v8  ;;  %v16930_v46 = vld [vmem:[#allocation2 + $0x100] sm:$0xff]  ;;  %vm16938_vm15 = vcmp.le.s32.totalorder %v644_v38, 14  ;;  %v2433_v38 = vsel %vm16381_vm2, %v16401_v15, 0.0  ;;  %v2437_v15 = vsel %vm16420_vm4, %v16443_v42, 0.0 }
  0xc8   : > { %20872 = vst [vmem:[#allocation63_spill] sm:$0xff] %v20871_v8  ;;  %20874 = vst [vmem:[#allocation65_spill] sm:$0xff] %v16930_v46  ;;  %13310 = vmatmul.mubr.msk.f32.gmra.mrb[12].mxu1 %vm968_vm1, %v16930_v46  ;;  %v2042_v8 = vsel %vm16938_vm15, %v16936_v18, 0.0  ;;  %v2445_v42 = vsel %vm16492_vm8, %v16505_v6, 0.0 }
  0xca   : > { %13404 = vmatmul.mubr.msk.f32.gmra.mrb[26].mxu0 %vm968_vm1, %v2038_v23  ;;  %v20877_v23 = vmov 0 }
  0xcb   : > { %13406 = vmatprep.mubr.msk.f32.mxu0 %vm968_vm1, %v16912_v53  ;;  %v20878_v23 = vsel %vm16938_vm15, 4294967295, %v20877_v23  ;;  %v15916_v53 = vld [vmem:[%s16213_s18] sm:$0xff]  ;;  %vm20880_vm15 = vcmask 1043456  }
  0xcc   : > { %20879 = vst [vmem:[#allocation68_spill] sm:$0xff] %v20878_v23  ;;  %13714 = vmatprep.mubr.msk.f32.mxu1 %vm968_vm1, %v15916_v53  ;;  %v2435_v53 = vsel %vm16403_vm3, %v16418_v26, 0.0  ;;  %vm20881_vm2 = vmmov %vm20880_vm15  ;;  %v2439_v26 = vsel %vm16445_vm5, %v16460_v47, 0.0  ;;  %v2449_v47 = vsel %vm16522_vm10, %v16536_v31, 0.0  ;;  %v2823_v31 = vld [vmem:[#allocation2 + $0x18] sm:$0xff] }
  0xce   : > { %13407 = vmatmul.mubr.msk.f32.gmra.mrb[28].mxu0 %vm968_vm1, %v2040_v13  ;;  %v11673_v13 = vld [vmem:[%s20375_s1 + $0x14] sm:$0xf] }
  0xcf   : > { %13409 = vmatprep.mubr.msk.f32.mxu0 %vm968_vm1, %v16934_v59 }
  0xd2   : > { %13410 = vmatmul.mubr.msk.f32.gmra.mrb[30].mxu0 %vm968_vm1, %v2042_v8  ;;  %v17080_v8 = vld [vmem:[#allocation2 + $0x48] sm:$0xff] }
  0xd3   : > { %13414 = vmatprep.mubr.msk.f32.mxu0 %vm968_vm1, %v2433_v38  ;;  %v17086_v38 = vld [vmem:[#allocation2 + $0x50] sm:$0xff] }
  0xd6   : > { %13415 = vmatmul.mubr.msk.f32.vlgmr.msra.gmra.mrb[0].mxu0 %vm968_vm1, %v16435_v40  ;;  %v2443_v40 = vsel %vm16477_vm7, %v16490_v63, 0.0 }
  0xd7   : > { %13463 = vmatpush3.msk.msra.mxu0 %vm20880_vm15, %v16674_v1  ;;  %13417 = vmatprep.mubr.msk.f32.mxu0 %vm968_vm1, %v2435_v53  ;;  %v2441_v1 = vsel %vm16462_vm6, %v16475_v54, 0.0  ;;  %v2453_v54 = vsel %vm16553_vm12, %v16569_v49, 0.0  ;;  %vm20883_vm15 = vnez %v20786_v19  ;;  %v17069_v49 = vld [vmem:[#allocation2 + $0x30] sm:$0xff]  ;;  %v17088_v53 = vld [vmem:[#allocation2 + $0x58] sm:$0xff] }
  0xd8   : > { %13512 = vmatprep.subr.msk.mxu0 %vm20881_vm2, %v11673_v13  ;;  %vm20882_vm2 = vnez %v20784_v3 }
  0xd9   : > { %v2457_v63 = vsel %vm20882_vm2, %v16600_v14, 0.0  ;;  %vm20885_vm2 = vnez %v20790_v5 }
  0xda   : > { %13418 = vmatmul.mubr.msk.f32.gmra.mrb[2].mxu0 %vm968_vm1, %v16454_v45  ;;  %v2447_v45 = vsel %vm16507_vm9, %v16520_v16, 0.0 }
  0xdb   : > { %13420 = vmatprep.mubr.msk.f32.mxu0 %vm968_vm1, %v2437_v15  ;;  %v17096_v15 = vld [vmem:[#allocation2 + $0x68] sm:$0xff] }
  0xde   : > { %13421 = vmatmul.mubr.msk.f32.gmra.mrb[4].mxu0 %vm968_vm1, %v16470_v51  ;;  %v2451_v51 = vsel %vm16538_vm11, %v16551_v39, 0.0  ;;  %v17060_v39 = vld [vmem:[#allocation2 + $0x28] sm:$0xff] }
  0xdf   : > { %13423 = vmatprep.mubr.msk.f32.mxu0 %vm968_vm1, %v2439_v26  ;;  %v17102_v26 = vld [vmem:[#allocation2 + $0x70] sm:$0xff] }
  0xe2   : > { %13424 = vmatmul.mubr.msk.f32.gmra.mrb[6].mxu0 %vm968_vm1, %v16485_v61  ;;  %v2455_v61 = vsel %vm16571_vm13, %v16585_v0, 0.0  ;;  %vm20884_vm13 = vnez %v20788_v35 }
  0xe3   : > { %13426 = vmatprep.mubr.msk.f32.mxu0 %vm968_vm1, %v2441_v1  ;;  %v2461_v6 = vsel %vm20884_vm13, %v16631_v62, 0.0  ;;  %v17104_v1 = vld [vmem:[#allocation2 + $0x78] sm:$0xff] }
  0xe6   : > { %13427 = vmatmul.mubr.msk.f32.gmra.mrb[8].mxu0 %vm968_vm1, %v16500_v4  ;;  %v2459_v4 = vsel %vm20883_vm15, %v16615_v27, 0.0 }
  0xe7   : > { %13429 = vmatprep.mubr.msk.f32.mxu0 %vm968_vm1, %v2443_v40  ;;  %v20888_v40 = vld [vmem:[#allocation38_spill] sm:$0xff] }
  0xea   : > { %13430 = vmatmul.mubr.msk.f32.gmra.mrb[10].mxu0 %vm968_vm1, %v16515_v11  ;;  %v17044_v11 = vld [vmem:[#allocation2 + $0x107] sm:$0xff] }
  0xeb   : > { %13432 = vmatprep.mubr.msk.f32.mxu0 %vm968_vm1, %v2445_v42  ;;  %v2463_v16 = vsel %vm20885_vm2, %v17044_v11, 0.0  ;;  %vm20886_vm2 = vcmask 1043456   ;;  %v20889_v42 = vld [vmem:[#allocation42_spill] sm:$0xff] }
  0xec   : > { %vm20887_vm13 = vmmov %vm20886_vm2 }
  0xed   : > { %vm20906_vm12 = vmmov %vm20886_vm2 }
  0xee   : > { %13433 = vmatmul.mubr.msk.f32.gmra.mrb[12].mxu0 %vm968_vm1, %v16530_v24  ;;  %v17055_v24 = vld [vmem:[#allocation2 + $0x10f] sm:$0xff] }
  0xef   : > { %13435 = vmatprep.mubr.msk.f32.mxu0 %vm968_vm1, %v2447_v45  ;;  %v20890_v45 = vld [vmem:[#allocation43_spill] sm:$0xff] }
  0xf2   : > { %13436 = vmatmul.mubr.msk.f32.gmra.mrb[14].mxu0 %vm968_vm1, %v16546_v28  ;;  %v2824_v28 = vld [vmem:[#allocation2 + $0x20] sm:$0xff] }
  0xf3   : > { %13438 = vmatprep.mubr.msk.f32.mxu0 %vm968_vm1, %v2449_v47  ;;  %v20891_v47 = vld [vmem:[#allocation47_spill] sm:$0xff] }
  0xf6   : > { %13439 = vmatmul.mubr.msk.f32.gmra.mrb[16].mxu0 %vm968_vm1, %v16561_v44  ;;  %v11707_v44 = vld [vmem:[%s20375_s1 + $0x18] sm:$0xf] }
  0xf7   : > { %13441 = vmatprep.mubr.msk.f32.mxu0 %vm968_vm1, %v2451_v51  ;;  %v20895_v51 = vld [vmem:[#allocation57_spill] sm:$0xff] }
  0xfa   : > { %13442 = vmatmul.mubr.msk.f32.gmra.mrb[18].mxu0 %vm968_vm1, %v16580_v60  ;;  %v17071_v60 = vld [vmem:[#allocation2 + $0x38] sm:$0xff] }
  0xfb   : > { %13444 = vmatprep.mubr.msk.f32.mxu0 %vm968_vm1, %v2453_v54  ;;  %v17142_v54 = vld [vmem:[#allocation2 + $0x108] sm:$0xff] }
  0xfc   : > { %20896 = vst [vmem:[#allocation38_spill] sm:$0xff] %v17142_v54 }
  0xfe   : > { %13445 = vmatmul.mubr.msk.f32.gmra.mrb[20].mxu0 %vm968_vm1, %v16595_v12  ;;  %v17078_v12 = vld [vmem:[#allocation2 + $0x40] sm:$0xff] }
  0xff   : > { %13447 = vmatprep.mubr.msk.f32.mxu0 %vm968_vm1, %v2455_v61  ;;  %v17148_v61 = vld [vmem:[#allocation2 + $0x110] sm:$0xff] }
 0x100   : > { %20897 = vst [vmem:[#allocation42_spill] sm:$0xff] %v17148_v61 }
 0x102   : > { %13448 = vmatmul.mubr.msk.f32.gmra.mrb[22].mxu0 %vm968_vm1, %v16610_v20 }
 0x103   : > { %13450 = vmatprep.mubr.msk.f32.mxu0 %vm968_vm1, %v2457_v63  ;;  %v20898_v63 = vld [vmem:[#allocation14_spill] sm:$0xff] }
 0x106   : > { %13451 = vmatmul.mubr.msk.f32.gmra.mrb[24].mxu0 %vm968_vm1, %v16625_v32 }
 0x107   : > { %13453 = vmatprep.mubr.msk.f32.mxu0 %vm968_vm1, %v2459_v4  ;;  %v20899_v4 = vld [vmem:[#allocation15_spill] sm:$0xff] }
 0x10a   : > { %13454 = vmatmul.mubr.msk.f32.gmra.mrb[26].mxu0 %vm968_vm1, %v16641_v10 }
 0x10b   : > { %13456 = vmatprep.mubr.msk.f32.mxu0 %vm968_vm1, %v2461_v6  ;;  %v20900_v6 = vld [vmem:[#allocation13_spill] sm:$0xff] }
 0x10e   : > { %13457 = vmatmul.mubr.msk.f32.gmra.mrb[28].mxu0 %vm968_vm1, %v16650_v25 }
 0x10f   : > { %13459 = vmatprep.mubr.msk.f32.mxu0 %vm968_vm1, %v2463_v16 }
 0x112   : > { %13460 = vmatmul.mubr.msk.f32.gmra.mrb[30].mxu0 %vm968_vm1, %v17055_v24 }
 0x113   : > { %13464 = vmatprep.mubr.msk.f32.mxu0 %vm968_vm1, %v2823_v31  ;;  %v11741_v31 = vld [vmem:[%s20375_s1 + $0x1c] sm:$0xf] }
 0x116   : > { %13465 = vmatmul.mubr.msk.f32.vlgmr.msra.gmra.mrb[0].mxu0 %vm968_vm1, %v2824_v28  ;;  %v20902_v28 = vld [vmem:[#allocation17_spill] sm:$0xff] }
 0x117   : > { %13513 = vmatpush3.msk.msra.mxu0 %vm20886_vm2, %v11673_v13  ;;  %13467 = vmatprep.mubr.msk.f32.mxu0 %vm968_vm1, %v17060_v39  ;;  %v17094_v13 = vld [vmem:[#allocation2 + $0x60] sm:$0xff] }
 0x118   : > { %13562 = vmatprep.subr.msk.mxu0 %vm20887_vm13, %v11707_v44  ;;  %vm20901_vm13 = vnez %v20900_v6  ;;  %v20918_v6 = vld [vmem:[#allocation29_spill] sm:$0xff] }
 0x119   : > { %v3246_v16 = vsel %vm20901_vm13, %v20899_v4, 0.0  ;;  %v20908_v4 = vld [vmem:[#allocation21_spill] sm:$0xff] }
 0x11a   : > { %13468 = vmatmul.mubr.msk.f32.gmra.mrb[2].mxu0 %vm968_vm1, %v17069_v49 }
 0x11b   : > { %13470 = vmatprep.mubr.msk.f32.mxu0 %vm968_vm1, %v17071_v60 }
 0x11e   : > { %13471 = vmatmul.mubr.msk.f32.gmra.mrb[4].mxu0 %vm968_vm1, %v17078_v12 }
 0x11f   : > { %13473 = vmatprep.mubr.msk.f32.mxu0 %vm968_vm1, %v17080_v8 }
 0x122   : > { %13474 = vmatmul.mubr.msk.f32.gmra.mrb[6].mxu0 %vm968_vm1, %v17086_v38 }
 0x123   : > { %13476 = vmatprep.mubr.msk.f32.mxu0 %vm968_vm1, %v17088_v53 }
 0x126   : > { %13477 = vmatmul.mubr.msk.f32.gmra.mrb[8].mxu0 %vm968_vm1, %v17094_v13 }
 0x127   : > { %13479 = vmatprep.mubr.msk.f32.mxu0 %vm968_vm1, %v17096_v15 }
 0x12a   : > { %13480 = vmatmul.mubr.msk.f32.gmra.mrb[10].mxu0 %vm968_vm1, %v17102_v26 }
 0x12b   : > { %13482 = vmatprep.mubr.msk.f32.mxu0 %vm968_vm1, %v17104_v1 }
 0x12e   : > { %13483 = vmatmul.mubr.msk.f32.gmra.mrb[12].mxu0 %vm968_vm1, %v16375_v34  ;;  %v20892_v34 = vld [vmem:[#allocation48_spill] sm:$0xff] }
 0x12f   : > { %13485 = vmatprep.mubr.msk.f32.mxu0 %vm968_vm1, %v16379_v57  ;;  %v20893_v57 = vld [vmem:[#allocation52_spill] sm:$0xff] }
 0x132   : > { %13486 = vmatmul.mubr.msk.f32.gmra.mrb[14].mxu0 %vm968_vm1, %v16393_v2  ;;  %v20894_v2 = vld [vmem:[#allocation53_spill] sm:$0xff] }
 0x133   : > { %13488 = vmatprep.mubr.msk.f32.mxu0 %vm968_vm1, %v16786_v36 }
 0x136   : > { %13489 = vmatmul.mubr.msk.f32.gmra.mrb[16].mxu0 %vm968_vm1, %v20888_v40 }
 0x137   : > { %13491 = vmatprep.mubr.msk.f32.mxu0 %vm968_vm1, %v20889_v42 }
 0x13a   : > { %13492 = vmatmul.mubr.msk.f32.gmra.mrb[18].mxu0 %vm968_vm1, %v20890_v45 }
 0x13b   : > { %13494 = vmatprep.mubr.msk.f32.mxu0 %vm968_vm1, %v20891_v47 }
 0x13e   : > { %13495 = vmatmul.mubr.msk.f32.gmra.mrb[20].mxu0 %vm968_vm1, %v20892_v34 }
 0x13f   : > { %13497 = vmatprep.mubr.msk.f32.mxu0 %vm968_vm1, %v20893_v57 }
 0x142   : > { %13498 = vmatmul.mubr.msk.f32.gmra.mrb[22].mxu0 %vm968_vm1, %v20894_v2 }
 0x143   : > { %13500 = vmatprep.mubr.msk.f32.mxu0 %vm968_vm1, %v16878_v52 }
 0x146   : > { %13501 = vmatmul.mubr.msk.f32.gmra.mrb[24].mxu0 %vm968_vm1, %v20895_v51 }
 0x147   : > { %13503 = vmatprep.mubr.msk.f32.mxu0 %vm968_vm1, %v16901_v30 }
 0x14a   : > { %13504 = vmatmul.mubr.msk.f32.gmra.mrb[26].mxu0 %vm968_vm1, %v16908_v29 }
 0x14b   : > { %13506 = vmatprep.mubr.msk.f32.mxu0 %vm968_vm1, %v16923_v9  ;;  %v20912_v9 = vld [vmem:[#allocation22_spill] sm:$0xff] }
 0x14e   : > { %13507 = vmatmul.mubr.msk.f32.gmra.mrb[28].mxu0 %vm968_vm1, %v16930_v46 }
 0x14f   : > { %13509 = vmatprep.mubr.msk.f32.mxu0 %vm968_vm1, %v17142_v54  ;;  %v20903_v54 = vld [vmem:[#allocation18_spill] sm:$0xff] }
 0x152   : > { %13510 = vmatmul.mubr.msk.f32.gmra.mrb[30].mxu0 %vm968_vm1, %v17148_v61  ;;  %v20904_v61 = vld [vmem:[#allocation16_spill] sm:$0xff] }
 0x153   : > { %13514 = vmatprep.mubr.msk.f32.mxu0 %vm968_vm1, %v20898_v63  ;;  %vm20905_vm15 = vnez %v20904_v61  ;;  %v20907_v63 = vld [vmem:[#allocation20_spill] sm:$0xff] }
 0x154   : > { %v3248_v46 = vsel %vm20905_vm15, %v20903_v54, 0.0  ;;  %v20914_v54 = vld [vmem:[#allocation26_spill] sm:$0xff] }
 0x156   : > { %13515 = vmatmul.mubr.msk.f32.vlgmr.msra.gmra.mrb[0].mxu0 %vm968_vm1, %v3246_v16  ;;  %v3250_v16 = vsel %vm16688_vm14, %v20908_v4, 0.0 }
 0x157   : > { %13563 = vmatpush3.msk.msra.mxu0 %vm20886_vm2, %v11707_v44  ;;  %13517 = vmatprep.mubr.msk.f32.mxu0 %vm968_vm1, %v20902_v28  ;;  %v20910_v44 = vld [vmem:[#allocation23_spill] sm:$0xff]  ;;  %v20911_v28 = vld [vmem:[#allocation24_spill] sm:$0xff]  ;;  %vm20913_vm2 = vnez %v20912_v9 }
 0x158   : > { %13612 = vmatprep.subr.msk.mxu0 %vm20906_vm12, %v11741_v31  ;;  %v3252_v61 = vsel %vm20913_vm2, %v20911_v28, 0.0  ;;  %v20922_v9 = vld [vmem:[#allocation32_spill] sm:$0xff] }
 0x15a   : > { %13518 = vmatmul.mubr.msk.f32.gmra.mrb[2].mxu0 %vm968_vm1, %v3248_v46  ;;  %v20915_v46 = vld [vmem:[#allocation27_spill] sm:$0xff] }
 0x15b   : > { %13520 = vmatprep.mubr.msk.f32.mxu0 %vm968_vm1, %v20907_v63  ;;  %v20916_v63 = vld [vmem:[#allocation25_spill] sm:$0xff] }
 0x15c   : > { %vm20917_vm12 = vnez %v20916_v63  ;;  %v20926_v63 = vld [vmem:[#allocation35_spill] sm:$0xff] }
 0x15d   : > { %v3254_v29 = vsel %vm20917_vm12, %v20915_v46, 0.0 }
 0x15e   : > { %13521 = vmatmul.mubr.msk.f32.gmra.mrb[4].mxu0 %vm968_vm1, %v3250_v16  ;;  %v20919_v16 = vld [vmem:[#allocation30_spill] sm:$0xff] }
 0x15f   : > { %13523 = vmatprep.mubr.msk.f32.mxu0 %vm968_vm1, %v20910_v44  ;;  %v20920_v44 = vld [vmem:[#allocation28_spill] sm:$0xff] }
 0x160   : > { %vm20921_vm14 = vnez %v20920_v44  ;;  %v20930_v44 = vld [vmem:[#allocation39_spill] sm:$0xff] }
 0x161   : > { %v3256_v4 = vsel %vm20921_vm14, %v20919_v16, 0.0 }
 0x162   : > { %13524 = vmatmul.mubr.msk.f32.gmra.mrb[6].mxu0 %vm968_vm1, %v3252_v61  ;;  %v20923_v61 = vld [vmem:[#allocation33_spill] sm:$0xff] }
 0x163   : > { %13526 = vmatprep.mubr.msk.f32.mxu0 %vm968_vm1, %v20914_v54  ;;  %v20924_v54 = vld [vmem:[#allocation31_spill] sm:$0xff] }
 0x164   : > { %vm20925_vm2 = vnez %v20924_v54  ;;  %v20934_v54 = vld [vmem:[#allocation44_spill] sm:$0xff] }
 0x165   : > { %v3258_v28 = vsel %vm20925_vm2, %v20923_v61, 0.0 }
 0x166   : > { %13527 = vmatmul.mubr.msk.f32.gmra.mrb[8].mxu0 %vm968_vm1, %v3254_v29  ;;  %v20927_v29 = vld [vmem:[#allocation36_spill] sm:$0xff] }
 0x167   : > { %13529 = vmatprep.mubr.msk.f32.mxu0 %vm968_vm1, %v20918_v6  ;;  %v20928_v6 = vld [vmem:[#allocation34_spill] sm:$0xff] }
 0x168   : > { %vm20929_vm12 = vnez %v20928_v6  ;;  %v20938_v6 = vld [vmem:[#allocation49_spill] sm:$0xff] }
 0x169   : > { %v3260_v46 = vsel %vm20929_vm12, %v20927_v29, 0.0 }
 0x16a   : > { %13530 = vmatmul.mubr.msk.f32.gmra.mrb[10].mxu0 %vm968_vm1, %v3256_v4  ;;  %v20931_v4 = vld [vmem:[#allocation40_spill] sm:$0xff] }
 0x16b   : > { %13532 = vmatprep.mubr.msk.f32.mxu0 %vm968_vm1, %v20922_v9  ;;  %v20932_v9 = vld [vmem:[#allocation37_spill] sm:$0xff] }
 0x16c   : > { %vm20933_vm14 = vnez %v20932_v9  ;;  %v20942_v9 = vld [vmem:[#allocation54_spill] sm:$0xff] }
 0x16d   : > { %v3262_v16 = vsel %vm20933_vm14, %v20931_v4, 0.0 }
 0x16e   : > { %13533 = vmatmul.mubr.msk.f32.gmra.mrb[12].mxu0 %vm968_vm1, %v3258_v28  ;;  %v20935_v28 = vld [vmem:[#allocation45_spill] sm:$0xff] }
 0x16f   : > { %13535 = vmatprep.mubr.msk.f32.mxu0 %vm968_vm1, %v20926_v63  ;;  %v20936_v63 = vld [vmem:[#allocation41_spill] sm:$0xff] }
 0x170   : > { %vm20937_vm2 = vnez %v20936_v63  ;;  %v20946_v63 = vld [vmem:[#allocation58_spill] sm:$0xff] }
 0x171   : > { %v3264_v61 = vsel %vm20937_vm2, %v20935_v28, 0.0 }
 0x172   : > { %13536 = vmatmul.mubr.msk.f32.gmra.mrb[14].mxu0 %vm968_vm1, %v3260_v46  ;;  %v20939_v46 = vld [vmem:[#allocation50_spill] sm:$0xff] }
 0x173   : > { %13538 = vmatprep.mubr.msk.f32.mxu0 %vm968_vm1, %v20930_v44  ;;  %v20940_v44 = vld [vmem:[#allocation46_spill] sm:$0xff] }
 0x174   : > { %vm20941_vm12 = vnez %v20940_v44  ;;  %v20950_v44 = vld [vmem:[#allocation62_spill] sm:$0xff] }
 0x175   : > { %v3266_v29 = vsel %vm20941_vm12, %v20939_v46, 0.0 }
 0x176   : > { %13539 = vmatmul.mubr.msk.f32.gmra.mrb[16].mxu0 %vm968_vm1, %v3262_v16  ;;  %v20943_v16 = vld [vmem:[#allocation55_spill] sm:$0xff] }
 0x177   : > { %13541 = vmatprep.mubr.msk.f32.mxu0 %vm968_vm1, %v20934_v54  ;;  %v20944_v54 = vld [vmem:[#allocation51_spill] sm:$0xff] }
 0x178   : > { %vm20945_vm14 = vnez %v20944_v54  ;;  %v3274_v54 = vsel %vm16916_vm0, %v16936_v18, 0.0 }
 0x179   : > { %v3268_v4 = vsel %vm20945_vm14, %v20943_v16, 0.0 }
 0x17a   : > { %13542 = vmatmul.mubr.msk.f32.gmra.mrb[18].mxu0 %vm968_vm1, %v3264_v61  ;;  %v20947_v61 = vld [vmem:[#allocation59_spill] sm:$0xff] }
 0x17b   : > { %13544 = vmatprep.mubr.msk.f32.mxu0 %vm968_vm1, %v20938_v6  ;;  %v20948_v6 = vld [vmem:[#allocation56_spill] sm:$0xff] }
 0x17c   : > { %vm20949_vm2 = vnez %v20948_v6  ;;  %v17246_v6 = vld [vmem:[#allocation2 + $0x109] sm:$0xff] }
 0x17d   : > { %v3270_v28 = vsel %vm20949_vm2, %v20947_v61, 0.0  ;;  %20954 = vst [vmem:[#allocation43_spill] sm:$0xff] %v17246_v6  ;;  %v17248_v61 = vld [vmem:[#allocation2 + $0x111] sm:$0xff]  ;;  %vm20956_vm2 = vnez %v20755_v58 }
 0x17e   : > { %13545 = vmatmul.mubr.msk.f32.gmra.mrb[20].mxu0 %vm968_vm1, %v3266_v29  ;;  %v20951_v29 = vld [vmem:[#allocation60_spill] sm:$0xff] }
 0x17f   : > { %13547 = vmatprep.mubr.msk.f32.mxu0 %vm968_vm1, %v20942_v9  ;;  %vm20952_vm12 = vnez %v20951_v29 }
 0x180   : > { %v3272_v9 = vsel %vm20952_vm12, %v16914_v22, 0.0  ;;  %vm20955_vm12 = vnez %v20878_v23 }
 0x182   : > { %13548 = vmatmul.mubr.msk.f32.gmra.mrb[22].mxu0 %vm968_vm1, %v3268_v4  ;;  %v3636_v4 = vld [vmem:[#allocation2 + $0x2f] sm:$0xff] }
 0x183   : > { %13550 = vmatprep.mubr.msk.f32.mxu0 %vm968_vm1, %v20946_v63 }
 0x186   : > { %13551 = vmatmul.mubr.msk.f32.gmra.mrb[24].mxu0 %vm968_vm1, %v3270_v28  ;;  %v3635_v28 = vld [vmem:[#allocation2 + $0x27] sm:$0xff] }
 0x187   : > { %13553 = vmatprep.mubr.msk.f32.mxu0 %vm968_vm1, %v20950_v44  ;;  %v3667_v29 = vsel %vm20956_vm2, %v3635_v28, 0.0  ;;  %v3638_v28 = vld [vmem:[#allocation2 + $0x3f] sm:$0xff] }
 0x18a   : > { %13554 = vmatmul.mubr.msk.f32.gmra.mrb[26].mxu0 %vm968_vm1, %v3272_v9  ;;  %v3276_v9 = vsel %vm20955_vm12, %v17248_v61, 0.0  ;;  %vm20957_vm12 = vcmask 1043456  }
 0x18b   : > { %13556 = vmatprep.mubr.msk.f32.mxu0 %vm968_vm1, %v16934_v59  ;;  %v3637_v59 = vld [vmem:[#allocation2 + $0x37] sm:$0xff]  ;;  %vm20958_vm2 = vmmov %vm20957_vm12 }
 0x18c   : > { %v3669_v18 = vsel %vm16403_vm3, %v3637_v59, 0.0  ;;  %v3641_v59 = vld [vmem:[#allocation2 + $0x57] sm:$0xff] }
 0x18e   : > { %13557 = vmatmul.mubr.msk.f32.gmra.mrb[28].mxu0 %vm968_vm1, %v3274_v54  ;;  %v3639_v54 = vld [vmem:[#allocation2 + $0x47] sm:$0xff] }
 0x18f   : > { %13559 = vmatprep.mubr.msk.f32.mxu0 %vm968_vm1, %v17246_v6  ;;  %v17265_v6 = vld [vmem:[%s20375_s1 + $0x20] sm:$0xf] }
 0x192   : > { %13560 = vmatmul.mubr.msk.f32.gmra.mrb[30].mxu0 %vm968_vm1, %v3276_v9  ;;  %v3640_v9 = vld [vmem:[#allocation2 + $0x4f] sm:$0xff] }
 0x193   : > { %13564 = vmatprep.mubr.msk.f32.mxu0 %vm968_vm1, %v3667_v29  ;;  %v3671_v29 = vsel %vm16420_vm4, %v3639_v54, 0.0  ;;  %v3645_v54 = vld [vmem:[#allocation2 + $0x77] sm:$0xff] }
 0x196   : > { %13565 = vmatmul.mubr.msk.f32.vlgmr.msra.gmra.mrb[0].mxu0 %vm968_vm1, %v3636_v4  ;;  %v3673_v4 = vsel %vm16445_vm5, %v3641_v59, 0.0  ;;  %v3646_v59 = vld [vmem:[#allocation2 + $0x7f] sm:$0xff] }
 0x197   : > { %13613 = vmatpush3.msk.msra.mxu0 %vm20957_vm12, %v11741_v31  ;;  %13567 = vmatprep.mubr.msk.f32.mxu0 %vm968_vm1, %v3669_v18  ;;  %v3642_v18 = vld [vmem:[#allocation2 + $0x5f] sm:$0xff]  ;;  %v3675_v31 = vsel %vm16462_vm6, %v3643_v17, 0.0  ;;  %v3648_v17 = vld [vmem:[#allocation2 + $0x8f] sm:$0xff]  ;;  %vm20960_vm12 = vnez %v20782_v50 }
 0x198   : > { %13662 = vmatprep.subr.msk.mxu0 %vm20958_vm2, %v17265_v6  ;;  %vm20959_vm2 = vnez %v20779_v41 }
 0x19a   : > { %13568 = vmatmul.mubr.msk.f32.gmra.mrb[2].mxu0 %vm968_vm1, %v3638_v28  ;;  %v3644_v28 = vld [vmem:[#allocation2 + $0x6f] sm:$0xff] }
 0x19b   : > { %13570 = vmatprep.mubr.msk.f32.mxu0 %vm968_vm1, %v3671_v29  ;;  %v3677_v29 = vsel %vm16477_vm7, %v3645_v54, 0.0  ;;  %v3650_v54 = vld [vmem:[#allocation2 + $0x9f] sm:$0xff] }
 0x19e   : > { %13571 = vmatmul.mubr.msk.f32.gmra.mrb[4].mxu0 %vm968_vm1, %v3640_v9  ;;  %v3679_v9 = vsel %vm16492_vm8, %v3647_v43, 0.0  ;;  %v3652_v43 = vld [vmem:[#allocation2 + $0xaf] sm:$0xff] }
 0x19f   : > { %13573 = vmatprep.mubr.msk.f32.mxu0 %vm968_vm1, %v3673_v4  ;;  %v3649_v4 = vld [vmem:[#allocation2 + $0x97] sm:$0xff] }
 0x1a2   : > { %13574 = vmatmul.mubr.msk.f32.gmra.mrb[6].mxu0 %vm968_vm1, %v3642_v18  ;;  %v3681_v18 = vsel %vm16507_vm9, %v3649_v4, 0.0  ;;  %v3687_v4 = vsel %vm20959_vm2, %v16585_v0, 0.0  ;;  %vm20962_vm2 = vnez %v20786_v19 }
 0x1a3   : > { %13576 = vmatprep.mubr.msk.f32.mxu0 %vm968_vm1, %v3675_v31  ;;  %v3651_v31 = vld [vmem:[#allocation2 + $0xa7] sm:$0xff]  ;;  %v3693_v0 = vsel %vm20962_vm2, %v16631_v62, 0.0  ;;  %v4908_v62 = vld [vmem:[%s20378_s4] sm:$0xf] }
 0x1a6   : > { %13577 = vmatmul.mubr.msk.f32.gmra.mrb[8].mxu0 %vm968_vm1, %v3644_v28  ;;  %v3683_v28 = vsel %vm16522_vm10, %v3651_v31, 0.0  ;;  %v15927_v31 = vld [vmem:[%s16213_s18 + $0x58] sm:$0xff] }
 0x1a7   : > { %13579 = vmatprep.mubr.msk.f32.mxu0 %vm968_vm1, %v3677_v29  ;;  %v3653_v29 = vld [vmem:[#allocation2 + $0xb7] sm:$0xff] }
 0x1aa   : > { %13580 = vmatmul.mubr.msk.f32.gmra.mrb[10].mxu0 %vm968_vm1, %v3646_v59  ;;  %v3685_v59 = vsel %vm16538_vm11, %v3653_v29, 0.0  ;;  %vm20961_vm11 = vnez %v20784_v3  ;;  %v15932_v29 = vld [vmem:[%s16213_s18 + $0x80] sm:$0xff] }
 0x1ab   : > { %13582 = vmatprep.mubr.msk.f32.mxu0 %vm968_vm1, %v3679_v9  ;;  %v3654_v9 = vld [vmem:[#allocation2 + $0xbf] sm:$0xff] }
 0x1ae   : > { %13583 = vmatmul.mubr.msk.f32.gmra.mrb[12].mxu0 %vm968_vm1, %v3648_v17  ;;  %v3689_v17 = vsel %vm20960_vm12, %v16600_v14, 0.0  ;;  %vm20963_vm12 = vnez %v20788_v35 }
 0x1af   : > { %13585 = vmatprep.mubr.msk.f32.mxu0 %vm968_vm1, %v3681_v18  ;;  %v3691_v18 = vsel %vm20961_vm11, %v16615_v27, 0.0  ;;  %v3695_v14 = vsel %vm20963_vm12, %v17044_v11, 0.0  ;;  %vm20964_vm11 = vnez %v20790_v5  ;;  %v15918_v11 = vld [vmem:[%s16213_s18 + $0x10] sm:$0xff] }
 0x1b2   : > { %13586 = vmatmul.mubr.msk.f32.gmra.mrb[14].mxu0 %vm968_vm1, %v3650_v54  ;;  %v15929_v54 = vld [vmem:[%s16213_s18 + $0x68] sm:$0xff] }
 0x1b3   : > { %13588 = vmatprep.mubr.msk.f32.mxu0 %vm968_vm1, %v3683_v28  ;;  %v15931_v28 = vld [vmem:[%s16213_s18 + $0x78] sm:$0xff] }
 0x1b6   : > { %13589 = vmatmul.mubr.msk.f32.gmra.mrb[16].mxu0 %vm968_vm1, %v3652_v43  ;;  %v15933_v43 = vld [vmem:[%s16213_s18 + $0x88] sm:$0xff] }
 0x1b7   : > { %13591 = vmatprep.mubr.msk.f32.mxu0 %vm968_vm1, %v3685_v59  ;;  %v20968_v59 = vld [vmem:[#allocation61_spill] sm:$0xff] }
 0x1ba   : > { %13592 = vmatmul.mubr.msk.f32.gmra.mrb[18].mxu0 %vm968_vm1, %v3654_v9  ;;  %v20969_v9 = vld [vmem:[#allocation64_spill] sm:$0xff] }
 0x1bb   : > { %13594 = vmatprep.mubr.msk.f32.mxu0 %vm968_vm1, %v3687_v4  ;;  %v20970_v4 = vld [vmem:[#allocation65_spill] sm:$0xff] }
 0x1be   : > { %13595 = vmatmul.mubr.msk.f32.gmra.mrb[20].mxu0 %vm968_vm1, %v16610_v20  ;;  %v3665_v20 = vld [vmem:[#allocation2 + $0x117] sm:$0xff] }
 0x1bf   : > { %13597 = vmatprep.mubr.msk.f32.mxu0 %vm968_vm1, %v3689_v17  ;;  %v3697_v27 = vsel %vm20964_vm11, %v3665_v20, 0.0  ;;  %vm20965_vm11 = vcmask 1043456   ;;  %v20971_v17 = vld [vmem:[#allocation38_spill] sm:$0xff]  ;;  %v15946_v20 = vld [vmem:[%s16213_s18 + $0xf0] sm:$0xff] }
 0x1c0   : > { %13712 = vmatprep.subr.msk.mxu1 %vm20965_vm11, %v4908_v62  ;;  %vm20966_vm12 = vmmov %vm20965_vm11 }
 0x1c1   : > { %13713 = vmatpush3.msk.msra.mxu1 %vm20966_vm12, %v4908_v62  ;;  %vm20967_vm2 = vmmov %vm20965_vm11  ;;  %v20974_v62 = vld [vmem:[#allocation17_spill] sm:$0xff] }
 0x1c2   : > { %13598 = vmatmul.mubr.msk.f32.gmra.mrb[22].mxu0 %vm968_vm1, %v16625_v32  ;;  %v3666_v32 = vld [vmem:[#allocation2 + $0x11f] sm:$0xff] }
 0x1c3   : > { %13600 = vmatprep.mubr.msk.f32.mxu0 %vm968_vm1, %v3691_v18  ;;  %v4087_v18 = vld [vmem:[#allocation2 + $0x118] sm:$0xff] }
 0x1c6   : > { %13601 = vmatmul.mubr.msk.f32.gmra.mrb[24].mxu0 %vm968_vm1, %v16641_v10  ;;  %v5535_v10 = vld [vmem:[%s20377_s3] sm:$0xff] }
 0x1c7   : > { %13603 = vmatprep.mubr.msk.f32.mxu0 %vm968_vm1, %v3693_v0  ;;  %13762 = vmatprep.subr.mxu1 %v5535_v10  ;;  %v15945_v0 = vld [vmem:[%s16213_s18 + $0xe8] sm:$0xff] }
 0x1ca   : > { %13604 = vmatmul.mubr.msk.f32.gmra.mrb[26].mxu0 %vm968_vm1, %v16650_v25  ;;  %v15917_v25 = vld [vmem:[%s16213_s18 + $0x8] sm:$0xff] }
 0x1cb   : > { %13606 = vmatprep.mubr.msk.f32.mxu0 %vm968_vm1, %v3695_v14  ;;  %13715 = vmatmul.mubr.msk.f32.vlgmr.msra.gmra.mrb[14].mxu1 %vm968_vm1, %v15917_v25  ;;  %v20972_v14 = vld [vmem:[#allocation42_spill] sm:$0xff] }
 0x1cc   : > { %13717 = vmatprep.mubr.msk.f32.mxu1 %vm968_vm1, %v15918_v11  ;;  %13763 = vmatpush3.msra.mxu1 %v5535_v10  ;;  %v20975_v10 = vld [vmem:[#allocation18_spill] sm:$0xff] }
 0x1cd   : > { %v4480_v11 = vsel %vm20901_vm13, %v20975_v10, 0.0 }
 0x1ce   : > { %13607 = vmatmul.mubr.msk.f32.gmra.mrb[28].mxu0 %vm968_vm1, %v17055_v24  ;;  %v15919_v24 = vld [vmem:[%s16213_s18 + $0x18] sm:$0xff] }
 0x1cf   : > { %13609 = vmatprep.mubr.msk.f32.mxu0 %vm968_vm1, %v3697_v27  ;;  %13718 = vmatmul.mubr.msk.f32.gmra.mrb[16].mxu1 %vm968_vm1, %v15919_v24  ;;  %v4088_v27 = vld [vmem:[#allocation2 + $0x120] sm:$0xff]  ;;  %v20977_v24 = vld [vmem:[#allocation20_spill] sm:$0xff] }
 0x1d2   : > { %13610 = vmatmul.mubr.msk.f32.gmra.mrb[30].mxu0 %vm968_vm1, %v3666_v32  ;;  %v20973_v32 = vld [vmem:[#allocation12_spill] sm:$0xff] }
 0x1d3   : > { %13614 = vmatprep.mubr.msk.f32.mxu0 %vm968_vm1, %v17060_v39  ;;  %v15920_v39 = vld [vmem:[%s16213_s18 + $0x20] sm:$0xff] }
 0x1d4   : > { %13720 = vmatprep.mubr.msk.f32.mxu1 %vm968_vm1, %v15920_v39  ;;  %v20978_v39 = vld [vmem:[#allocation21_spill] sm:$0xff] }
 0x1d6   : > { %13615 = vmatmul.mubr.msk.f32.vlgmr.msra.gmra.mrb[0].mxu0 %vm968_vm1, %v17069_v49  ;;  %v15921_v49 = vld [vmem:[%s16213_s18 + $0x28] sm:$0xff] }
 0x1d7   : > { %13663 = vmatpush3.msk.msra.mxu0 %vm20967_vm2, %v17265_v6  ;;  %13617 = vmatprep.mubr.msk.f32.mxu0 %vm968_vm1, %v17071_v60  ;;  %v15922_v60 = vld [vmem:[%s16213_s18 + $0x30] sm:$0xff]  ;;  %v4069_v6 = vld [vmem:[#allocation2 + $0x88] sm:$0xff] }
 0x1d8   : > { %13721 = vmatmul.mubr.msk.f32.gmra.mrb[18].mxu1 %vm968_vm1, %v15921_v49 }
 0x1d9   : > { %13723 = vmatprep.mubr.msk.f32.mxu1 %vm968_vm1, %v15922_v60  ;;  %v4482_v60 = vsel %vm20905_vm15, %v20978_v39, 0.0 }
 0x1da   : > { %13618 = vmatmul.mubr.msk.f32.gmra.mrb[2].mxu0 %vm968_vm1, %v17078_v12  ;;  %v15923_v12 = vld [vmem:[%s16213_s18 + $0x38] sm:$0xff] }
 0x1db   : > { %13620 = vmatprep.mubr.msk.f32.mxu0 %vm968_vm1, %v17080_v8  ;;  %v15924_v8 = vld [vmem:[%s16213_s18 + $0x40] sm:$0xff] }
 0x1dc   : > { %13724 = vmatmul.mubr.msk.f32.gmra.mrb[20].mxu1 %vm968_vm1, %v15923_v12  ;;  %v20980_v12 = vld [vmem:[#allocation23_spill] sm:$0xff] }
 0x1dd   : > { %13726 = vmatprep.mubr.msk.f32.mxu1 %vm968_vm1, %v15924_v8  ;;  %v20981_v8 = vld [vmem:[#allocation24_spill] sm:$0xff] }
 0x1de   : > { %13621 = vmatmul.mubr.msk.f32.gmra.mrb[4].mxu0 %vm968_vm1, %v17086_v38  ;;  %v15925_v38 = vld [vmem:[%s16213_s18 + $0x48] sm:$0xff] }
 0x1df   : > { %13623 = vmatprep.mubr.msk.f32.mxu0 %vm968_vm1, %v17088_v53  ;;  %v15926_v53 = vld [vmem:[%s16213_s18 + $0x50] sm:$0xff] }
 0x1e0   : > { %13727 = vmatmul.mubr.msk.f32.gmra.mrb[22].mxu1 %vm968_vm1, %v15925_v38  ;;  %v20982_v38 = vld [vmem:[#allocation19_spill] sm:$0xff] }
 0x1e1   : > { %13729 = vmatprep.mubr.msk.f32.mxu1 %vm968_vm1, %v15926_v53  ;;  %vm20983_vm11 = vnez %v20982_v38 }
 0x1e2   : > { %13624 = vmatmul.mubr.msk.f32.gmra.mrb[6].mxu0 %vm968_vm1, %v17094_v13  ;;  %v4068_v13 = vld [vmem:[#allocation2 + $0x80] sm:$0xff]  ;;  %v4484_v53 = vsel %vm20983_vm11, %v20981_v8, 0.0 }
 0x1e3   : > { %13626 = vmatprep.mubr.msk.f32.mxu0 %vm968_vm1, %v17096_v15  ;;  %v15928_v15 = vld [vmem:[%s16213_s18 + $0x60] sm:$0xff] }
 0x1e4   : > { %13730 = vmatmul.mubr.msk.f32.gmra.mrb[24].mxu1 %vm968_vm1, %v15927_v31  ;;  %v20986_v31 = vld [vmem:[#allocation22_spill] sm:$0xff] }
 0x1e5   : > { %13732 = vmatprep.mubr.msk.f32.mxu1 %vm968_vm1, %v15928_v15  ;;  %vm20987_vm2 = vnez %v20986_v31  ;;  %v4477_v8 = vld [vmem:[#allocation2 + $0x119] sm:$0xff] }
 0x1e6   : > { %13627 = vmatmul.mubr.msk.f32.gmra.mrb[8].mxu0 %vm968_vm1, %v17102_v26  ;;  %v4070_v26 = vld [vmem:[#allocation2 + $0x90] sm:$0xff] }
 0x1e7   : > { %13629 = vmatprep.mubr.msk.f32.mxu0 %vm968_vm1, %v17104_v1  ;;  %v15930_v1 = vld [vmem:[%s16213_s18 + $0x70] sm:$0xff] }
 0x1e8   : > { %13733 = vmatmul.mubr.msk.f32.gmra.mrb[26].mxu1 %vm968_vm1, %v15929_v54  ;;  %v20989_v54 = vld [vmem:[#allocation30_spill] sm:$0xff] }
 0x1e9   : > { %13735 = vmatprep.mubr.msk.f32.mxu1 %vm968_vm1, %v15930_v1  ;;  %v20990_v1 = vld [vmem:[#allocation25_spill] sm:$0xff] }
 0x1ea   : > { %13630 = vmatmul.mubr.msk.f32.gmra.mrb[10].mxu0 %vm968_vm1, %v4068_v13  ;;  %v20984_v13 = vld [vmem:[#allocation26_spill] sm:$0xff]  ;;  %vm20991_vm12 = vnez %v20990_v1 }
 0x1eb   : > { %13632 = vmatprep.mubr.msk.f32.mxu0 %vm968_vm1, %v4069_v6  ;;  %v20985_v6 = vld [vmem:[#allocation27_spill] sm:$0xff] }
 0x1ec   : > { %13736 = vmatmul.mubr.msk.f32.gmra.mrb[28].mxu1 %vm968_vm1, %v15931_v28  ;;  %v4486_v15 = vsel %vm20987_vm2, %v20985_v6, 0.0  ;;  %v4488_v28 = vsel %vm20991_vm12, %v20989_v54, 0.0 }
 0x1ed   : > { %13738 = vmatprep.mubr.msk.f32.mxu1 %vm968_vm1, %v15932_v29  ;;  %v20992_v29 = vld [vmem:[#allocation32_spill] sm:$0xff] }
 0x1ee   : > { %13633 = vmatmul.mubr.msk.f32.gmra.mrb[12].mxu0 %vm968_vm1, %v4070_v26  ;;  %v20988_v26 = vld [vmem:[#allocation29_spill] sm:$0xff] }
 0x1ef   : > { %13635 = vmatprep.mubr.msk.f32.mxu0 %vm968_vm1, %v16786_v36  ;;  %v15934_v36 = vld [vmem:[%s16213_s18 + $0x90] sm:$0xff] }
 0x1f0   : > { %13739 = vmatmul.mubr.msk.f32.gmra.mrb[30].mxu1 %vm968_vm1, %v15933_v43  ;;  %v20993_v43 = vld [vmem:[#allocation33_spill] sm:$0xff] }
 0x1f1   : > { %13741 = vmatprep.mubr.msk.f32.mxu1 %vm968_vm1, %v15934_v36  ;;  %v20994_v36 = vld [vmem:[#allocation28_spill] sm:$0xff] }
 0x1f2   : > { %13636 = vmatmul.mubr.msk.f32.gmra.mrb[14].mxu0 %vm968_vm1, %v20888_v40  ;;  %v15935_v40 = vld [vmem:[%s16213_s18 + $0x98] sm:$0xff]  ;;  %vm20995_vm11 = vnez %v20994_v36 }
 0x1f3   : > { %13638 = vmatprep.mubr.msk.f32.mxu0 %vm968_vm1, %v20889_v42  ;;  %v15936_v42 = vld [vmem:[%s16213_s18 + $0xa0] sm:$0xff] }
 0x1f4   : > { %13742 = vmatmul.mubr.msk.f32.gmra.mrb[32].mxu1 %vm968_vm1, %v15935_v40  ;;  %v4490_v40 = vsel %vm20995_vm11, %v20993_v43, 0.0 }
 0x1f5   : > { %13744 = vmatprep.mubr.msk.f32.mxu1 %vm968_vm1, %v15936_v42  ;;  %v20996_v42 = vld [vmem:[#allocation35_spill] sm:$0xff] }
 0x1f6   : > { %13639 = vmatmul.mubr.msk.f32.gmra.mrb[16].mxu0 %vm968_vm1, %v20890_v45  ;;  %v15937_v45 = vld [vmem:[%s16213_s18 + $0xa8] sm:$0xff] }
 0x1f7   : > { %13641 = vmatprep.mubr.msk.f32.mxu0 %vm968_vm1, %v20891_v47  ;;  %v15938_v47 = vld [vmem:[%s16213_s18 + $0xb0] sm:$0xff] }
 0x1f8   : > { %13745 = vmatmul.mubr.msk.f32.gmra.mrb[34].mxu1 %vm968_vm1, %v15937_v45  ;;  %v20997_v45 = vld [vmem:[#allocation36_spill] sm:$0xff] }
 0x1f9   : > { %13747 = vmatprep.mubr.msk.f32.mxu1 %vm968_vm1, %v15938_v47  ;;  %v20998_v47 = vld [vmem:[#allocation31_spill] sm:$0xff] }
 0x1fa   : > { %13642 = vmatmul.mubr.msk.f32.gmra.mrb[18].mxu0 %vm968_vm1, %v20892_v34  ;;  %v15939_v34 = vld [vmem:[%s16213_s18 + $0xb8] sm:$0xff]  ;;  %vm20999_vm2 = vnez %v20998_v47 }
 0x1fb   : > { %13644 = vmatprep.mubr.msk.f32.mxu0 %vm968_vm1, %v20893_v57  ;;  %v15940_v57 = vld [vmem:[%s16213_s18 + $0xc0] sm:$0xff] }
 0x1fc   : > { %13748 = vmatmul.mubr.msk.f32.gmra.mrb[36].mxu1 %vm968_vm1, %v15939_v34  ;;  %v4492_v34 = vsel %vm20999_vm2, %v20997_v45, 0.0 }
 0x1fd   : > { %13750 = vmatprep.mubr.msk.f32.mxu1 %vm968_vm1, %v15940_v57  ;;  %v21000_v57 = vld [vmem:[#allocation39_spill] sm:$0xff] }
 0x1fe   : > { %13645 = vmatmul.mubr.msk.f32.gmra.mrb[20].mxu0 %vm968_vm1, %v20894_v2  ;;  %v15941_v2 = vld [vmem:[%s16213_s18 + $0xc8] sm:$0xff] }
 0x1ff   : > { %13647 = vmatprep.mubr.msk.f32.mxu0 %vm968_vm1, %v16878_v52  ;;  %v15942_v52 = vld [vmem:[%s16213_s18 + $0xd0] sm:$0xff] }
 0x200   : > { %13751 = vmatmul.mubr.msk.f32.gmra.mrb[38].mxu1 %vm968_vm1, %v15941_v2  ;;  %v21001_v2 = vld [vmem:[#allocation40_spill] sm:$0xff] }
 0x201   : > { %13753 = vmatprep.mubr.msk.f32.mxu1 %vm968_vm1, %v15942_v52 }
 0x202   : > { %13648 = vmatmul.mubr.msk.f32.gmra.mrb[22].mxu0 %vm968_vm1, %v20895_v51  ;;  %v15943_v51 = vld [vmem:[%s16213_s18 + $0xd8] sm:$0xff] }
 0x203   : > { %13650 = vmatprep.mubr.msk.f32.mxu0 %vm968_vm1, %v16901_v30  ;;  %v15944_v30 = vld [vmem:[%s16213_s18 + $0xe0] sm:$0xff]  ;;  %s352_s18 = scalar_lea.vmem [#allocation4], %s11501_s29  ;;  %s15953_s29 = scalar_lea.vmem %s15952_s27, 512 }
 0x204   : > { %13754 = vmatmul.mubr.msk.f32.gmra.mrb[40].mxu1 %vm968_vm1, %v15943_v51  ;;  %v21005_v51 = vld [vmem:[#allocation45_spill] sm:$0xff]  ;;  %s11438_s11 = sshll.u32 %s352_s18, 4  ;;  %s20334_s11 = int_to_ptr.vmem [resolvable:$true] %s11438_s11 }
 0x205   : > { %13756 = vmatprep.mubr.msk.f32.mxu1 %vm968_vm1, %v15944_v30  ;;  %s15947_s17 = scalar_lea.vmem %s20334_s11, 256  ;;  %p15954_p0 = scmp.lt.s32.totalorder %s20334_s11, %s15952_s27 }
 0x206   : > { %13651 = vmatmul.mubr.msk.f32.gmra.mrb[24].mxu0 %vm968_vm1, %v20968_v59  ;;  %v21002_v59 = vld [vmem:[#allocation34_spill] sm:$0xff]  ;;  %p15948_p11 = scmp.ne.s32.totalorder %s20334_s11, %s15947_s17  ;;  %p15955_p1 = scmp.lt.s32.totalorder %s15953_s29, %s15947_s17 }
 0x207   : > { %13653 = vmatprep.mubr.msk.f32.mxu0 %vm968_vm1, %v20969_v9  ;;  %vm21003_vm12 = vnez %v21002_v59  ;;  %v21004_v9 = vld [vmem:[#allocation44_spill] sm:$0xff] }
 0x208   : > { %13757 = vmatmul.mubr.msk.f32.gmra.mrb[42].mxu1 %vm968_vm1, %v15945_v0  ;;  %v4494_v52 = vsel %vm21003_vm12, %v21001_v2, 0.0  ;;  %p15949_p12 = pnand %p15948_p11, %p16109_p5  ;;  %p15956_p2 = por %p15955_p1, %p15954_p0 }
 0x209   : > { %13759 = vmatprep.mubr.msk.f32.mxu1 %vm968_vm1, %v15946_v20  ;;  %v21012_v20 = vld [vmem:[#allocation46_spill] sm:$0xff] }
 0x20a   : > { %13654 = vmatmul.mubr.msk.f32.gmra.mrb[26].mxu0 %vm968_vm1, %v20970_v4  ;;  %v21006_v4 = vld [vmem:[#allocation37_spill] sm:$0xff]  ;;  %vm21013_vm12 = vnez %v21012_v20  ;;  %p15950_p13 = pneg %p15949_p12 }
 0x20b   : > { %13656 = vmatprep.mubr.msk.f32.mxu0 %vm968_vm1, %v20971_v17  ;;  %vm21007_vm11 = vnez %v21006_v4  ;;  %v21008_v17 = vld [vmem:[#allocation49_spill] sm:$0xff] }
 0x20c   : > { %13760 = vmatmul.mubr.msk.f32.gmra.mrb[44].mxu1 %vm968_vm1, %v20973_v32  ;;  %v4496_v30 = vsel %vm21007_vm11, %v21005_v51, 0.0  ;;  %v21014_v32 = vld [vmem:[#allocation59_spill] sm:$0xff]  ;;  %p15957_p3 = pnand %p15956_p2, %p15950_p13 }
 0x20d   : > { %v4502_v10 = vsel %vm20945_vm14, %v21014_v32, 0.0 }
 0x20e   : > { %13657 = vmatmul.mubr.msk.f32.gmra.mrb[28].mxu0 %vm968_vm1, %v20972_v14  ;;  %v21011_v14 = vld [vmem:[#allocation54_spill] sm:$0xff] }
 0x20f   : > { %13659 = vmatprep.mubr.msk.f32.mxu0 %vm968_vm1, %v4087_v18  ;;  %v21009_v18 = vld [vmem:[#allocation41_spill] sm:$0xff] }
 0x210   : > { %vm21010_vm2 = vnez %v21009_v18 }
 0x211   : > { %v4498_v0 = vsel %vm21010_vm2, %v20939_v46, 0.0  ;;  %v21016_v46 = vld [vmem:[#allocation56_spill] sm:$0xff] }
 0x212   : > { %13660 = vmatmul.mubr.msk.f32.gmra.mrb[30].mxu0 %vm968_vm1, %v4088_v27  ;;  %v4500_v27 = vsel %vm21013_vm12, %v20943_v16, 0.0  ;;  %vm21017_vm2 = vnez %v21016_v46  ;;  %v21018_v16 = vld [vmem:[#allocation66_spill] sm:$0xff] }
 0x213   : > { %13664 = vmatprep.mubr.msk.f32.mxu0 %vm968_vm1, %v20974_v62 }
 0x216   : > { %13665 = vmatmul.mubr.msk.f32.vlgmr.msra.gmra.mrb[0].mxu0 %vm968_vm1, %v4480_v11  ;;  %v4504_v11 = vsel %vm21017_vm2, %v16914_v22, 0.0  ;;  %v4478_v22 = vld [vmem:[#allocation2 + $0x121] sm:$0xff]  ;;  %vm21024_vm2 = vnez %v20878_v23 }
 0x217   : > { %13667 = vmatprep.mubr.msk.f32.mxu0 %vm968_vm1, %v20977_v24  ;;  %v21019_v24 = vld [vmem:[#allocation67_spill] sm:$0xff] }
 0x21a   : > { %13668 = vmatmul.mubr.msk.f32.gmra.mrb[2].mxu0 %vm968_vm1, %v4482_v60  ;;  %v21022_v60 = vld [vmem:[#allocation43_spill] sm:$0xff] }
 0x21b   : > { %13670 = vmatprep.mubr.msk.f32.mxu0 %vm968_vm1, %v20980_v12  ;;  %v4508_v12 = vsel %vm16916_vm0, %v17248_v61, 0.0 }
 0x21e   : > { %13671 = vmatmul.mubr.msk.f32.gmra.mrb[4].mxu0 %vm968_vm1, %v4484_v53  ;;  %v4510_v53 = vsel %vm21024_vm2, %v4478_v22, 0.0 }
 0x21f   : > { %13673 = vmatprep.mubr.msk.f32.mxu0 %vm968_vm1, %v20984_v13  ;;  %v21025_v13 = vmov 0.0  }
 0x222   : > { %13674 = vmatmul.mubr.msk.f32.gmra.mrb[6].mxu0 %vm968_vm1, %v4486_v15 }
 0x223   : > { %13676 = vmatprep.mubr.msk.f32.mxu0 %vm968_vm1, %v20988_v26  ;;  %v17644_v26 = vpop.f32.mrb[0].mxu1 }
 0x224   : > { %v17646_v54 = vpop.f32.mrb[1].mxu1 }
 0x226   : > { %13677 = vmatmul.mubr.msk.f32.gmra.mrb[8].mxu0 %vm968_vm1, %v4488_v28  ;;  %v17648_v28 = vpop.f32.mrb[2].mxu1 }
 0x227   : > { %13679 = vmatprep.mubr.msk.f32.mxu0 %vm968_vm1, %v20992_v29  ;;  %v17650_v29 = vpop.f32.mrb[3].mxu1 }
 0x228   : > { %v17652_v43 = vpop.f32.mrb[4].mxu1 }
 0x22a   : > { %13680 = vmatmul.mubr.msk.f32.gmra.mrb[10].mxu0 %vm968_vm1, %v4490_v40  ;;  %v17654_v40 = vpop.f32.mrb[5].mxu1 }
 0x22b   : > { %13682 = vmatprep.mubr.msk.f32.mxu0 %vm968_vm1, %v20996_v42  ;;  %v11876_v42 = vld [vmem:[%s20377_s3 + $0x8] sm:$0xff]  ;;  %v17659_v45 = vpop.f32.mrb[6].mxu1 }
 0x22c   : > { %13812 = vmatprep.subr.mxu1 %v11876_v42 }
 0x22e   : > { %13683 = vmatmul.mubr.msk.f32.gmra.mrb[12].mxu0 %vm968_vm1, %v4492_v34  ;;  %v17661_v34 = vpop.f32.mrb[7].mxu1 }
 0x22f   : > { %13685 = vmatprep.mubr.msk.f32.mxu0 %vm968_vm1, %v21000_v57  ;;  %v17663_v57 = vpop.f32.mrb[8].mxu1 }
 0x230   : > { %v17665_v2 = vpop.f32.mrb[9].mxu1 }
 0x232   : > { %13686 = vmatmul.mubr.msk.f32.gmra.mrb[14].mxu0 %vm968_vm1, %v4494_v52  ;;  %v17667_v52 = vpop.f32.mrb[10].mxu1 }
 0x233   : > { %13688 = vmatprep.mubr.msk.f32.mxu0 %vm968_vm1, %v21004_v9  ;;  %v17669_v9 = vpop.f32.mrb[11].mxu1 }
 0x234   : > { %v17671_v51 = vpop.f32.mrb[12].mxu1 }
 0x236   : > { %13689 = vmatmul.mubr.msk.f32.gmra.mrb[16].mxu0 %vm968_vm1, %v4496_v30  ;;  %v17673_v30 = vpop.f32.mrb[13].mxu1 }
 0x237   : > { %13691 = vmatprep.mubr.msk.f32.mxu0 %vm968_vm1, %v21008_v17  ;;  %v17678_v17 = vld [vmem:[%s20377_s3 + $0x10] sm:$0xff] }
 0x23a   : > { %13692 = vmatmul.mubr.msk.f32.gmra.mrb[18].mxu0 %vm968_vm1, %v4498_v0  ;;  %v17684_v0 = vld [vmem:[%s20376_s2] ss:$0 sm:$0xff] }
 0x23b   : > { %13694 = vmatprep.mubr.msk.f32.mxu0 %vm968_vm1, %v21011_v14 }
 0x23e   : > { %13695 = vmatmul.mubr.msk.f32.gmra.mrb[20].mxu0 %vm968_vm1, %v4500_v27 }
 0x23f   : > { %13697 = vmatprep.mubr.msk.f32.mxu0 %vm968_vm1, %v20946_v63  ;;  %v21020_v63 = vld [vmem:[#allocation60_spill] sm:$0xff] }
 0x240   : > { %vm21021_vm12 = vnez %v21020_v63 }
 0x241   : > { %v4506_v39 = vsel %vm21021_vm12, %v21019_v24, 0.0  ;;  %vm5400_vm12 = vcmask 64512  }
 0x242   : > { %13698 = vmatmul.mubr.msk.f32.gmra.mrb[22].mxu0 %vm968_vm1, %v4502_v10  ;;  %5405 = vst.msk [vmem:[#allocation3 + $0x20] sm:$0xff] %vm5400_vm12, %v21025_v13  ;;  %5401 = vst.msk [vmem:[#allocation3] sm:$0xff] %vm5400_vm12, %v21025_v13 }
 0x243   : > { %13700 = vmatprep.mubr.msk.f32.mxu0 %vm968_vm1, %v20950_v44  ;;  %5402 = vst.msk [vmem:[#allocation3 + $0x8] sm:$0xff] %vm5400_vm12, %v21025_v13  ;;  %5403 = vst.msk [vmem:[#allocation3 + $0x10] sm:$0xff] %vm5400_vm12, %v21025_v13 }
 0x244   : > { %5404 = vst.msk [vmem:[#allocation3 + $0x18] sm:$0xff] %vm5400_vm12, %v21025_v13  ;;  %5406 = vst.msk [vmem:[#allocation3 + $0x28] sm:$0xff] %vm5400_vm12, %v21025_v13 }
 0x245   : > { %5407 = vst.msk [vmem:[#allocation3 + $0x30] sm:$0xff] %vm5400_vm12, %v21025_v13  ;;  %5408 = vst.msk [vmem:[#allocation3 + $0x38] sm:$0xff] %vm5400_vm12, %v21025_v13 }
 0x246   : > { %13701 = vmatmul.mubr.msk.f32.gmra.mrb[24].mxu0 %vm968_vm1, %v4504_v11  ;;  %5409 = vst.msk [vmem:[#allocation3 + $0x40] sm:$0xff] %vm5400_vm12, %v21025_v13  ;;  %5410 = vst.msk [vmem:[#allocation3 + $0x48] sm:$0xff] %vm5400_vm12, %v21025_v13 }
 0x247   : > { %13703 = vmatprep.mubr.msk.f32.mxu0 %vm968_vm1, %v21018_v16  ;;  %5411 = vst.msk [vmem:[#allocation3 + $0x50] sm:$0xff] %vm5400_vm12, %v21025_v13  ;;  %5412 = vst.msk [vmem:[#allocation3 + $0x58] sm:$0xff] %vm5400_vm12, %v21025_v13 }
 0x248   : > { %5413 = vst.msk [vmem:[#allocation3 + $0x60] sm:$0xff] %vm5400_vm12, %v21025_v13  ;;  %5414 = vst.msk [vmem:[#allocation3 + $0x68] sm:$0xff] %vm5400_vm12, %v21025_v13 }
 0x249   : > { %5415 = vst.msk [vmem:[#allocation3 + $0x70] sm:$0xff] %vm5400_vm12, %v21025_v13  ;;  %5416 = vst.msk [vmem:[#allocation3 + $0x78] sm:$0xff] %vm5400_vm12, %v21025_v13 }
 0x24a   : > { %13704 = vmatmul.mubr.msk.f32.gmra.mrb[26].mxu0 %vm968_vm1, %v4506_v39  ;;  %5417 = vst.msk [vmem:[#allocation3 + $0x80] sm:$0xff] %vm5400_vm12, %v21025_v13  ;;  %5418 = vst.msk [vmem:[#allocation3 + $0x88] sm:$0xff] %vm5400_vm12, %v21025_v13  ;;  %v5471_v61 = vld [vmem:[#allocation3 + $0x7] sm:$0xff]  ;;  %v5472_v15 = vld [vmem:[#allocation3 + $0xf] sm:$0xff] }
 0x24b   : > { %13706 = vmatprep.mubr.msk.f32.mxu0 %vm968_vm1, %v21022_v60  ;;  %5419 = vst.msk [vmem:[#allocation3 + $0x90] sm:$0xff] %vm5400_vm12, %v21025_v13  ;;  %5420 = vst.msk [vmem:[#allocation3 + $0x98] sm:$0xff] %vm5400_vm12, %v21025_v13 }
 0x24c   : > { %5421 = vst.msk [vmem:[#allocation3 + $0xa0] sm:$0xff] %vm5400_vm12, %v21025_v13  ;;  %5422 = vst.msk [vmem:[#allocation3 + $0xa8] sm:$0xff] %vm5400_vm12, %v21025_v13 }
 0x24d   : > { %5423 = vst.msk [vmem:[#allocation3 + $0xb0] sm:$0xff] %vm5400_vm12, %v21025_v13  ;;  %5424 = vst.msk [vmem:[#allocation3 + $0xb8] sm:$0xff] %vm5400_vm12, %v21025_v13 }
 0x24e   : > { %13707 = vmatmul.mubr.msk.f32.gmra.mrb[28].mxu0 %vm968_vm1, %v4508_v12  ;;  %5425 = vst.msk [vmem:[#allocation3 + $0xc0] sm:$0xff] %vm5400_vm12, %v21025_v13  ;;  %5426 = vst.msk [vmem:[#allocation3 + $0xc8] sm:$0xff] %vm5400_vm12, %v21025_v13 }
 0x24f   : > { %13709 = vmatprep.mubr.msk.f32.mxu0 %vm968_vm1, %v4477_v8  ;;  %5427 = vst.msk [vmem:[#allocation3 + $0xd0] sm:$0xff] %vm5400_vm12, %v21025_v13  ;;  %5428 = vst.msk [vmem:[#allocation3 + $0xd8] sm:$0xff] %vm5400_vm12, %v21025_v13 }
 0x250   : > { %5429 = vst.msk [vmem:[#allocation3 + $0xe0] sm:$0xff] %vm5400_vm12, %v21025_v13  ;;  %5430 = vst.msk [vmem:[#allocation3 + $0xe8] sm:$0xff] %vm5400_vm12, %v21025_v13 }
 0x251   : > { %5431 = vst.msk [vmem:[#allocation3 + $0xf0] sm:$0xff] %vm5400_vm12, %v21025_v13  ;;  %5432 = vst.msk [vmem:[#allocation3 + $0xf8] sm:$0xff] %vm5400_vm12, %v21025_v13 }
 0x252   : > { %13710 = vmatmul.mubr.msk.f32.gmra.mrb[30].mxu0 %vm968_vm1, %v4510_v53  ;;  %5433 = vst.msk [vmem:[#allocation3 + $0x100] sm:$0xff] %vm5400_vm12, %v21025_v13  ;;  %5434 = vst.msk [vmem:[#allocation3 + $0x108] sm:$0xff] %vm5400_vm12, %v21025_v13  ;;  %vm21026_vm1 = vnez %v20755_v58 }
 0x253   : > { %5435 = vst.msk [vmem:[#allocation3 + $0x110] sm:$0xff] %vm5400_vm12, %v21025_v13  ;;  %5436 = vst.msk [vmem:[#allocation3 + $0x118] sm:$0xff] %vm5400_vm12, %v21025_v13  ;;  %v5503_v6 = vsel %vm21026_vm1, %v5471_v61, 0.0 }
 0x254   : > { %5437 = vst.msk [vmem:[#allocation3 + $0x120] sm:$0xff] %vm5400_vm12, %v21025_v13  ;;  %5438 = vst.msk [vmem:[#allocation3 + $0x128] sm:$0xff] %vm5400_vm12, %v21025_v13  ;;  %13764 = vmatprep.mubr.msk.f32.mxu1 %vm5400_vm12, %v5503_v6 }
 0x255   : > { %13765 = vmatmul.mubr.msk.f32.vlgmr.msra.gmra.mrb[14].mxu1 %vm5400_vm12, %v5472_v15 }
 0x256   : > { %13813 = vmatpush3.msra.mxu1 %v11876_v42 }
 0x257   : > { %13862 = vmatprep.subr.mxu1 %v17678_v17 }
 0x2e9   : > { %v13666_v14 = vpop.f32.mrb[0].mxu0 }
 0x2ea   : > { %v4877_v27 = vadd.f32 %v13666_v14, %v17684_v0  ;;  %v4678_v32 = vpop.f32.mrb[1].mxu0 }
 0x2eb   : > { %v4876_v10 = vadd.f32 %v17684_v0, %v4678_v32 }
 0x2ec   : > { %v5273_v11 = vmul.f32 0.70710677, %v4877_v27 }
 0x2ed   : > { %v5272_v16 = vmul.f32 0.70710677, %v4876_v10  ;;  %v13669_v24 = vpop.f32.mrb[2].mxu0 }
 0x2ee   : > { %15720 = verf.f32 %v5273_v11  ;;  %v4879_v39 = vadd.f32 %v13669_v24, %v17684_v0  ;;  %v4688_v60 = vpop.f32.mrb[3].mxu0 }
 0x2ef   : > { %15722 = verf.f32 %v5272_v16  ;;  %v4878_v12 = vadd.f32 %v17684_v0, %v4688_v60 }
 0x2f0   : > { %v5275_v8 = vmul.f32 0.70710677, %v4879_v39 }
 0x2f1   : > { %v5274_v22 = vmul.f32 0.70710677, %v4878_v12  ;;  %v13672_v53 = vpop.f32.mrb[4].mxu0 }
 0x2f2   : > { %15724 = verf.f32 %v5275_v8  ;;  %v4881_v61 = vadd.f32 %v13672_v53, %v17684_v0  ;;  %v4698_v6 = vpop.f32.mrb[5].mxu0  ;;  %v5241_v8 = vmul.f32 0.5, %v4877_v27 }
 0x2f3   : > { %15726 = verf.f32 %v5274_v22  ;;  %v4880_v15 = vadd.f32 %v17684_v0, %v4698_v6  ;;  %v5240_v22 = vmul.f32 0.5, %v4876_v10 }
 0x2f4   : > { %v5277_v42 = vmul.f32 0.70710677, %v4881_v61 }
 0x2f5   : > { %v5276_v14 = vmul.f32 0.70710677, %v4880_v15  ;;  %v13675_v32 = vpop.f32.mrb[6].mxu0 }
 0x2f6   : > { %15728 = verf.f32 %v5277_v42  ;;  %v4883_v11 = vadd.f32 %v13675_v32, %v17684_v0  ;;  %v4708_v24 = vpop.f32.mrb[7].mxu0 }
 0x2f7   : > { %15730 = verf.f32 %v5276_v14  ;;  %v4882_v16 = vadd.f32 %v17684_v0, %v4708_v24 }
 0x2f8   : > { %v15721_v60 = vpop.eup %15720  ;;  %v5279_v13 = vmul.f32 0.70710677, %v4883_v11 }
 0x2f9   : > { %v15723_v58 = vpop.eup %15722  ;;  %v5337_v23 = vadd.f32 1.0, %v15721_v60  ;;  %v5278_v53 = vmul.f32 0.70710677, %v4882_v16  ;;  %v13678_v44 = vpop.f32.mrb[8].mxu0  ;;  %v5243_v60 = vmul.f32 0.5, %v4879_v39 }
 0x2fa   : > { %v5336_v63 = vadd.f32 1.0, %v15723_v58  ;;  %15732 = verf.f32 %v5279_v13  ;;  %v17695_v6 = vadd.f32 %v13678_v44, %v17684_v0  ;;  %v4718_v42 = vpop.f32.mrb[9].mxu0  ;;  %v5242_v44 = vmul.f32 0.5, %v4878_v12 }
 0x2fb   : > { %v5369_v46 = vmul.f32 %v5337_v23, %v5241_v8  ;;  %15734 = verf.f32 %v5278_v53  ;;  %v17698_v14 = vadd.f32 %v17684_v0, %v4718_v42 }
 0x2fc   : > { %v15725_v32 = vpop.eup %15724  ;;  %v5368_v24 = vmul.f32 %v5336_v63, %v5240_v22  ;;  %v5281_v62 = vmul.f32 0.70710677, %v17695_v6 }
 0x2fd   : > { %v15727_v27 = vpop.eup %15726  ;;  %5440 = vst.msk [vmem:[#allocation3 + $0x20] sm:$0xff] %vm5400_vm12, %v5369_v46  ;;  %v5339_v10 = vadd.f32 1.0, %v15725_v32  ;;  %v5280_v58 = vmul.f32 0.70710677, %v17698_v14  ;;  %v13681_v13 = vpop.f32.mrb[10].mxu0 }
 0x2fe   : > { %5439 = vst.msk [vmem:[#allocation3 + $0x18] sm:$0xff] %vm5400_vm12, %v5368_v24  ;;  %v5338_v23 = vadd.f32 1.0, %v15727_v27  ;;  %15736 = verf.f32 %v5281_v62  ;;  %v17705_v8 = vadd.f32 %v13681_v13, %v17684_v0  ;;  %v4728_v53 = vpop.f32.mrb[11].mxu0  ;;  %v5245_v24 = vmul.f32 0.5, %v4881_v61 }
 0x2ff   : > { %v5371_v63 = vmul.f32 %v5339_v10, %v5243_v60  ;;  %15738 = verf.f32 %v5280_v58  ;;  %v17708_v22 = vadd.f32 %v17684_v0, %v4728_v53  ;;  %v5244_v13 = vmul.f32 0.5, %v4880_v15 }
 0x300   : > { %v15729_v46 = vpop.eup %15728  ;;  %v5370_v39 = vmul.f32 %v5338_v23, %v5242_v44  ;;  %v5283_v42 = vmul.f32 0.70710677, %v17705_v8 }
 0x301   : > { %v15731_v32 = vpop.eup %15730  ;;  %5442 = vst.msk [vmem:[#allocation3 + $0x30] sm:$0xff] %vm5400_vm12, %v5371_v63  ;;  %v5341_v12 = vadd.f32 1.0, %v15729_v46  ;;  %v5282_v62 = vmul.f32 0.70710677, %v17708_v22  ;;  %v13684_v27 = vpop.f32.mrb[12].mxu0  ;;  %v5247_v63 = vmul.f32 0.5, %v4883_v11 }
 0x302   : > { %5441 = vst.msk [vmem:[#allocation3 + $0x28] sm:$0xff] %vm5400_vm12, %v5370_v39  ;;  %v5340_v60 = vadd.f32 1.0, %v15731_v32  ;;  %15740 = verf.f32 %v5283_v42  ;;  %v17715_v10 = vadd.f32 %v13684_v27, %v17684_v0  ;;  %v4738_v58 = vpop.f32.mrb[13].mxu0  ;;  %v5246_v39 = vmul.f32 0.5, %v4882_v16 }
 0x303   : > { %v5373_v44 = vmul.f32 %v5341_v12, %v5245_v24  ;;  %15742 = verf.f32 %v5282_v62  ;;  %v17718_v23 = vadd.f32 %v17684_v0, %v4738_v58 }
 0x304   : > { %v15733_v53 = vpop.eup %15732  ;;  %v5372_v61 = vmul.f32 %v5340_v60, %v5244_v13  ;;  %v5285_v46 = vmul.f32 0.70710677, %v17715_v10 }
 0x305   : > { %v15735_v20 = vpop.eup %15734  ;;  %5444 = vst.msk [vmem:[#allocation3 + $0x40] sm:$0xff] %vm5400_vm12, %v5373_v44  ;;  %v5343_v15 = vadd.f32 1.0, %v15733_v53  ;;  %v5284_v42 = vmul.f32 0.70710677, %v17718_v23  ;;  %v13687_v32 = vpop.f32.mrb[14].mxu0  ;;  %v17723_v27 = vld [vmem:[#allocation3 + $0x17] sm:$0xff] }
 0x306   : > { %5443 = vst.msk [vmem:[#allocation3 + $0x38] sm:$0xff] %vm5400_vm12, %v5372_v61  ;;  %v5342_v24 = vadd.f32 1.0, %v15735_v20  ;;  %15744 = verf.f32 %v5285_v46  ;;  %v17727_v12 = vadd.f32 %v13687_v32, %v17684_v0  ;;  %v4748_v11 = vpop.f32.mrb[15].mxu0  ;;  %v5505_v13 = vsel %vm16403_vm3, %v17723_v27, 0.0  ;;  %v17736_v58 = vld [vmem:[#allocation3 + $0x1f] sm:$0xff] }
 0x307   : > { %v5375_v60 = vmul.f32 %v5343_v15, %v5247_v63  ;;  %15746 = verf.f32 %v5284_v42  ;;  %v17733_v16 = vadd.f32 %v17684_v0, %v4748_v11  ;;  %13767 = vmatprep.mubr.msk.f32.mxu1 %vm5400_vm12, %v5505_v13  ;;  %21028 = vst [vmem:[#allocation47_spill] sm:$0xff] %v17736_v58  ;;  %v5249_v53 = vmul.f32 0.5, %v17695_v6 }
 0x308   : > { %v15737_v44 = vpop.eup %15736  ;;  %v5374_v20 = vmul.f32 %v5342_v24, %v5246_v39  ;;  %v5287_v61 = vmul.f32 0.70710677, %v17727_v12  ;;  %13768 = vmatmul.mubr.msk.f32.gmra.mrb[16].mxu1 %vm5400_vm12, %v17736_v58  ;;  %v5248_v15 = vmul.f32 0.5, %v17698_v14 }
 0x309   : > { %v15739_v46 = vpop.eup %15738  ;;  %5446 = vst.msk [vmem:[#allocation3 + $0x50] sm:$0xff] %vm5400_vm12, %v5375_v60  ;;  %v5345_v63 = vadd.f32 1.0, %v15737_v44  ;;  %v5286_v42 = vmul.f32 0.70710677, %v17733_v16  ;;  %v13690_v32 = vpop.f32.mrb[16].mxu0  ;;  %v17745_v11 = vld [vmem:[#allocation3 + $0x27] sm:$0xff] }
 0x30a   : > { %21029 = vst [vmem:[#allocation48_spill] sm:$0xff] %v17745_v11  ;;  %5445 = vst.msk [vmem:[#allocation3 + $0x48] sm:$0xff] %vm5400_vm12, %v5374_v20  ;;  %v5344_v39 = vadd.f32 1.0, %v15739_v46  ;;  %15748 = verf.f32 %v5287_v61  ;;  %v17749_v6 = vadd.f32 %v13690_v32, %v17684_v0  ;;  %v4758_v24 = vpop.f32.mrb[17].mxu0  ;;  %v5507_v13 = vsel %vm16420_vm4, %v17745_v11, 0.0  ;;  %v17758_v44 = vld [vmem:[#allocation3 + $0x2f] sm:$0xff] }
 0x30b   : > { %v5377_v60 = vmul.f32 %v5345_v63, %v5249_v53  ;;  %15750 = verf.f32 %v5286_v42  ;;  %v17755_v14 = vadd.f32 %v17684_v0, %v4758_v24  ;;  %13770 = vmatprep.mubr.msk.f32.mxu1 %vm5400_vm12, %v5507_v13  ;;  %21030 = vst [vmem:[#allocation52_spill] sm:$0xff] %v17758_v44  ;;  %v5251_v61 = vmul.f32 0.5, %v17705_v8 }
 0x30c   : > { %v15741_v20 = vpop.eup %15740  ;;  %v5376_v46 = vmul.f32 %v5344_v39, %v5248_v15  ;;  %v5289_v32 = vmul.f32 0.70710677, %v17749_v6  ;;  %13771 = vmatmul.mubr.msk.f32.gmra.mrb[18].mxu1 %vm5400_vm12, %v17758_v44  ;;  %v5250_v63 = vmul.f32 0.5, %v17708_v22 }
 0x30d   : > { %v15743_v37 = vpop.eup %15742  ;;  %5448 = vst.msk [vmem:[#allocation3 + $0x60] sm:$0xff] %vm5400_vm12, %v5377_v60  ;;  %v5347_v53 = vadd.f32 1.0, %v15741_v20  ;;  %v5288_v42 = vmul.f32 0.70710677, %v17755_v14  ;;  %v13693_v24 = vpop.f32.mrb[18].mxu0  ;;  %v17767_v13 = vld [vmem:[#allocation3 + $0x37] sm:$0xff] }
 0x30e   : > { %5447 = vst.msk [vmem:[#allocation3 + $0x58] sm:$0xff] %vm5400_vm12, %v5376_v46  ;;  %v5346_v15 = vadd.f32 1.0, %v15743_v37  ;;  %15752 = verf.f32 %v5289_v32  ;;  %v14840_v8 = vadd.f32 %v13693_v24, %v17644_v26  ;;  %v4768_v39 = vpop.f32.mrb[19].mxu0  ;;  %v5509_v62 = vsel %vm16445_vm5, %v17767_v13, 0.0  ;;  %v17776_v20 = vld [vmem:[#allocation3 + $0x3f] sm:$0xff] }
 0x30f   : > { %v5379_v60 = vmul.f32 %v5347_v53, %v5251_v61  ;;  %15754 = verf.f32 %v5288_v42  ;;  %v14841_v22 = vadd.f32 %v4768_v39, %v17646_v54  ;;  %13773 = vmatprep.mubr.msk.f32.mxu1 %vm5400_vm12, %v5509_v62  ;;  %v5253_v46 = vmul.f32 0.5, %v17715_v10 }
 0x310   : > { %v15745_v11 = vpop.eup %15744  ;;  %v5378_v58 = vmul.f32 %v5346_v15, %v5250_v63  ;;  %v17779_v37 = vadd.f32 %v14840_v8, %v17684_v0  ;;  %13774 = vmatmul.mubr.msk.f32.gmra.mrb[20].mxu1 %vm5400_vm12, %v17776_v20  ;;  %v5252_v53 = vmul.f32 0.5, %v17718_v23 }
 0x311   : > { %v15747_v26 = vpop.eup %15746  ;;  %5450 = vst.msk [vmem:[#allocation3 + $0x70] sm:$0xff] %vm5400_vm12, %v5379_v60  ;;  %v5349_v61 = vadd.f32 1.0, %v15745_v11  ;;  %v17786_v54 = vadd.f32 %v14841_v22, %v17684_v0  ;;  %v13696_v62 = vpop.f32.mrb[20].mxu0  ;;  %v17788_v32 = vld [vmem:[#allocation3 + $0x47] sm:$0xff] }
 0x312   : > { %5449 = vst.msk [vmem:[#allocation3 + $0x68] sm:$0xff] %vm5400_vm12, %v5378_v58  ;;  %v5348_v63 = vadd.f32 1.0, %v15747_v26  ;;  %v5291_v42 = vmul.f32 0.70710677, %v17779_v37  ;;  %v14842_v24 = vadd.f32 %v13696_v62, %v17648_v28  ;;  %v4778_v15 = vpop.f32.mrb[21].mxu0  ;;  %v5511_v23 = vsel %vm16462_vm6, %v17788_v32, 0.0 }
 0x313   : > { %v5381_v8 = vmul.f32 %v5349_v61, %v5253_v46  ;;  %v5290_v10 = vmul.f32 0.70710677, %v17786_v54  ;;  %v14843_v11 = vadd.f32 %v4778_v15, %v17650_v29  ;;  %v5255_v28 = vmul.f32 0.5, %v17727_v12  ;;  %13776 = vmatprep.mubr.msk.f32.mxu1 %vm5400_vm12, %v5511_v23  ;;  %v17808_v29 = vld [vmem:[#allocation3 + $0x4f] sm:$0xff] }
 0x314   : > { %v15749_v39 = vpop.eup %15748  ;;  %v5380_v60 = vmul.f32 %v5348_v63, %v5252_v53  ;;  %15756 = verf.f32 %v5291_v42  ;;  %v17797_v22 = vadd.f32 %v14842_v24, %v17684_v0  ;;  %v5254_v53 = vmul.f32 0.5, %v17733_v16  ;;  %13777 = vmatmul.mubr.msk.f32.gmra.mrb[22].mxu1 %vm5400_vm12, %v17808_v29  ;;  %v18172_v49 = vld [vmem:[#allocation3 + $0x49] sm:$0xff] }
 0x315   : > { %v15751_v58 = vpop.eup %15750  ;;  %5452 = vst.msk [vmem:[#allocation3 + $0x80] sm:$0xff] %vm5400_vm12, %v5381_v8  ;;  %v5351_v26 = vadd.f32 1.0, %v15749_v39  ;;  %15758 = verf.f32 %v5290_v10  ;;  %v17805_v46 = vadd.f32 %v14843_v11, %v17684_v0  ;;  %v13699_v61 = vpop.f32.mrb[22].mxu0  ;;  %v17810_v62 = vld [vmem:[#allocation3 + $0x57] sm:$0xff]  ;;  %21068 = vst [vmem:[#allocation36_spill] sm:$0xff] %v18172_v49 }
 0x316   : > { %5451 = vst.msk [vmem:[#allocation3 + $0x78] sm:$0xff] %vm5400_vm12, %v5380_v60  ;;  %v5350_v63 = vadd.f32 1.0, %v15751_v58  ;;  %v5293_v42 = vmul.f32 0.70710677, %v17797_v22  ;;  %v14844_v12 = vadd.f32 %v13699_v61, %v17652_v43  ;;  %v4788_v24 = vpop.f32.mrb[23].mxu0  ;;  %v5513_v16 = vsel %vm16477_vm7, %v17810_v62, 0.0 }
 0x317   : > { %v5383_v15 = vmul.f32 %v5351_v26, %v5255_v28  ;;  %v5292_v8 = vmul.f32 0.70710677, %v17805_v46  ;;  %v14845_v10 = vadd.f32 %v4788_v24, %v17654_v40  ;;  %v5257_v43 = vmul.f32 0.5, %v17749_v6  ;;  %13779 = vmatprep.mubr.msk.f32.mxu1 %vm5400_vm12, %v5513_v16  ;;  %v17832_v40 = vld [vmem:[#allocation3 + $0x5f] sm:$0xff] }
 0x318   : > { %v15753_v11 = vpop.eup %15752  ;;  %v5382_v39 = vmul.f32 %v5350_v63, %v5254_v53  ;;  %15760 = verf.f32 %v5293_v42  ;;  %v17821_v60 = vadd.f32 %v14844_v12, %v17684_v0  ;;  %v5256_v53 = vmul.f32 0.5, %v17755_v14  ;;  %13780 = vmatmul.mubr.msk.f32.gmra.mrb[24].mxu1 %vm5400_vm12, %v17832_v40 }
 0x319   : > { %v15755_v23 = vpop.eup %15754  ;;  %5454 = vst.msk [vmem:[#allocation3 + $0x90] sm:$0xff] %vm5400_vm12, %v5383_v15  ;;  %v5353_v58 = vadd.f32 1.0, %v15753_v11  ;;  %15762 = verf.f32 %v5292_v8  ;;  %v17829_v28 = vadd.f32 %v14845_v10, %v17684_v0  ;;  %v13702_v26 = vpop.f32.mrb[24].mxu0  ;;  %v17834_v61 = vld [vmem:[#allocation3 + $0x67] sm:$0xff] }
 0x31a   : > { %5453 = vst.msk [vmem:[#allocation3 + $0x88] sm:$0xff] %vm5400_vm12, %v5382_v39  ;;  %v5352_v63 = vadd.f32 1.0, %v15755_v23  ;;  %v5295_v42 = vmul.f32 0.70710677, %v17821_v60  ;;  %v14846_v6 = vadd.f32 %v13702_v26, %v17659_v45  ;;  %v4798_v12 = vpop.f32.mrb[25].mxu0  ;;  %v5515_v14 = vsel %vm16492_vm8, %v17834_v61, 0.0 }
 0x31b   : > { %v5385_v24 = vmul.f32 %v5353_v58, %v5257_v43  ;;  %v5294_v15 = vmul.f32 0.70710677, %v17829_v28  ;;  %v14847_v8 = vadd.f32 %v4798_v12, %v17661_v34  ;;  %13782 = vmatprep.mubr.msk.f32.mxu1 %vm5400_vm12, %v5515_v14  ;;  %v17855_v39 = vld [vmem:[#allocation3 + $0x6f] sm:$0xff] }
 0x31c   : > { %v5384_v10 = vmul.f32 %v5352_v63, %v5256_v53  ;;  %15764 = verf.f32 %v5295_v42  ;;  %v17845_v11 = vadd.f32 %v14846_v6, %v17684_v0  ;;  %13783 = vmatmul.mubr.msk.f32.gmra.mrb[26].mxu1 %vm5400_vm12, %v17855_v39  ;;  %v5259_v42 = vmul.f32 0.5, %v17779_v37 }
 0x31d   : > { %5456 = vst.msk [vmem:[#allocation3 + $0xa0] sm:$0xff] %vm5400_vm12, %v5385_v24  ;;  %15766 = verf.f32 %v5294_v15  ;;  %v17852_v45 = vadd.f32 %v14847_v8, %v17684_v0  ;;  %v13705_v34 = vpop.f32.mrb[26].mxu0  ;;  %v17857_v16 = vld [vmem:[#allocation3 + $0x77] sm:$0xff]  ;;  %v5258_v15 = vmul.f32 0.5, %v17786_v54  ;;  %v17878_v37 = vld [vmem:[#allocation3 + $0x7f] sm:$0xff] }
 0x31e   : > { %v15757_v23 = vpop.eup %15756  ;;  %5455 = vst.msk [vmem:[#allocation3 + $0x98] sm:$0xff] %vm5400_vm12, %v5384_v10  ;;  %v5297_v43 = vmul.f32 0.70710677, %v17845_v11  ;;  %v14848_v58 = vadd.f32 %v13705_v34, %v17663_v57  ;;  %v4808_v26 = vpop.f32.mrb[27].mxu0  ;;  %v5517_v53 = vsel %vm16507_vm9, %v17857_v16, 0.0  ;;  %vm21037_vm9 = vnez %v20788_v35 }
 0x31f   : > { %v15759_v63 = vpop.eup %15758  ;;  %v5355_v6 = vadd.f32 1.0, %v15757_v23  ;;  %v5296_v12 = vmul.f32 0.70710677, %v17852_v45  ;;  %v14849_v24 = vadd.f32 %v4808_v26, %v17665_v2  ;;  %13785 = vmatprep.mubr.msk.f32.mxu1 %vm5400_vm12, %v5517_v53  ;;  %v5261_v53 = vmul.f32 0.5, %v17797_v22 }
 0x320   : > { %v5354_v8 = vadd.f32 1.0, %v15759_v63  ;;  %15768 = verf.f32 %v5297_v43  ;;  %v17873_v57 = vadd.f32 %v14848_v58, %v17684_v0  ;;  %13786 = vmatmul.mubr.msk.f32.gmra.mrb[28].mxu1 %vm5400_vm12, %v17878_v37 }
 0x321   : > { %v5387_v10 = vmul.f32 %v5355_v6, %v5259_v42  ;;  %15770 = verf.f32 %v5296_v12  ;;  %v17876_v14 = vadd.f32 %v14849_v24, %v17684_v0  ;;  %v13708_v34 = vpop.f32.mrb[28].mxu0  ;;  %v17880_v23 = vld [vmem:[#allocation3 + $0x87] sm:$0xff]  ;;  %v5260_v6 = vmul.f32 0.5, %v17805_v46  ;;  %v17902_v46 = vld [vmem:[#allocation3 + $0x8f] sm:$0xff] }
 0x322   : > { %v15761_v2 = vpop.eup %15760  ;;  %v5386_v26 = vmul.f32 %v5354_v8, %v5258_v15  ;;  %v5299_v54 = vmul.f32 0.70710677, %v17873_v57  ;;  %v14850_v43 = vadd.f32 %v13708_v34, %v17667_v52  ;;  %v4818_v58 = vpop.f32.mrb[29].mxu0  ;;  %v5519_v52 = vsel %vm16522_vm10, %v17880_v23, 0.0 }
 0x323   : > { %v15763_v63 = vpop.eup %15762  ;;  %5458 = vst.msk [vmem:[#allocation3 + $0xb0] sm:$0xff] %vm5400_vm12, %v5387_v10  ;;  %v5357_v42 = vadd.f32 1.0, %v15761_v2  ;;  %v5298_v12 = vmul.f32 0.70710677, %v17876_v14  ;;  %v14851_v24 = vadd.f32 %v4818_v58, %v17669_v9  ;;  %13788 = vmatprep.mubr.msk.f32.mxu1 %vm5400_vm12, %v5519_v52  ;;  %vm21032_vm10 = vnez %v20777_v33 }
 0x324   : > { %5457 = vst.msk [vmem:[#allocation3 + $0xa8] sm:$0xff] %vm5400_vm12, %v5386_v26  ;;  %v5356_v22 = vadd.f32 1.0, %v15763_v63  ;;  %15772 = verf.f32 %v5299_v54  ;;  %v17893_v15 = vadd.f32 %v14850_v43, %v17684_v0  ;;  %v5263_v54 = vmul.f32 0.5, %v17821_v60  ;;  %13789 = vmatmul.mubr.msk.f32.gmra.mrb[30].mxu1 %vm5400_vm12, %v17902_v46 }
 0x325   : > { %v5389_v8 = vmul.f32 %v5357_v42, %v5261_v53  ;;  %15774 = verf.f32 %v5298_v12  ;;  %v17899_v10 = vadd.f32 %v14851_v24, %v17684_v0  ;;  %v13711_v9 = vpop.f32.mrb[30].mxu0  ;;  %v17904_v34 = vld [vmem:[#allocation3 + $0x97] sm:$0xff]  ;;  %v5262_v12 = vmul.f32 0.5, %v17829_v28  ;;  %v17922_v28 = vld [vmem:[#allocation3 + $0x9f] sm:$0xff] }
 0x326   : > { %v15765_v2 = vpop.eup %15764  ;;  %v5388_v26 = vmul.f32 %v5356_v22, %v5260_v6  ;;  %v5301_v43 = vmul.f32 0.70710677, %v17893_v15  ;;  %v14852_v53 = vadd.f32 %v13711_v9, %v17671_v51  ;;  %v4828_v58 = vpop.f32.mrb[31].mxu0  ;;  %v5521_v51 = vsel %vm21032_vm10, %v17904_v34, 0.0 }
 0x327   : > { %v15767_v63 = vpop.eup %15766  ;;  %5460 = vst.msk [vmem:[#allocation3 + $0xc0] sm:$0xff] %vm5400_vm12, %v5389_v8  ;;  %v5359_v42 = vadd.f32 1.0, %v15765_v2  ;;  %v5300_v24 = vmul.f32 0.70710677, %v17899_v10  ;;  %v14853_v6 = vadd.f32 %v4828_v58, %v17673_v30  ;;  %13791 = vmatprep.mubr.msk.f32.mxu1 %vm5400_vm12, %v5521_v51  ;;  %vm21033_vm10 = vnez %v20779_v41 }
 0x328   : > { %5459 = vst.msk [vmem:[#allocation3 + $0xb8] sm:$0xff] %vm5400_vm12, %v5388_v26  ;;  %v5358_v60 = vadd.f32 1.0, %v15767_v63  ;;  %15776 = verf.f32 %v5301_v43  ;;  %v4907_v22 = vadd.f32 %v14852_v53, %v17684_v0  ;;  %13792 = vmatmul.mubr.msk.f32.gmra.mrb[32].mxu1 %vm5400_vm12, %v17922_v28  ;;  %v5265_v43 = vmul.f32 0.5, %v17845_v11 }
 0x329   : > { %v5391_v52 = vmul.f32 %v5359_v42, %v5263_v54  ;;  %15778 = verf.f32 %v5300_v24  ;;  %v4906_v8 = vadd.f32 %v14853_v6, %v17684_v0  ;;  %v5264_v0 = vmul.f32 0.5, %v17852_v45 }
 0x32a   : > { %v15769_v9 = vpop.eup %15768  ;;  %v5390_v30 = vmul.f32 %v5358_v60, %v5262_v12  ;;  %v5303_v2 = vmul.f32 0.70710677, %v4907_v22  ;;  %v5267_v45 = vmul.f32 0.5, %v17873_v57 }
 0x32b   : > { %v15771_v26 = vpop.eup %15770  ;;  %5462 = vst.msk [vmem:[#allocation3 + $0xd0] sm:$0xff] %vm5400_vm12, %v5391_v52  ;;  %v5361_v53 = vadd.f32 1.0, %v15769_v9  ;;  %v5302_v54 = vmul.f32 0.70710677, %v4906_v8  ;;  %v17928_v58 = vld [vmem:[#allocation3 + $0xa7] sm:$0xff]  ;;  %v17936_v24 = vld [vmem:[#allocation3 + $0xaf] sm:$0xff] }
 0x32c   : > { %5461 = vst.msk [vmem:[#allocation3 + $0xc8] sm:$0xff] %vm5400_vm12, %v5390_v30  ;;  %v5360_v63 = vadd.f32 1.0, %v15771_v26  ;;  %15780 = verf.f32 %v5303_v2  ;;  %v5523_v42 = vsel %vm21033_vm10, %v17928_v58, 0.0  ;;  %v5266_v9 = vmul.f32 0.5, %v17876_v14 }
 0x32d   : > { %v5393_v12 = vmul.f32 %v5361_v53, %v5265_v43  ;;  %15782 = verf.f32 %v5302_v54  ;;  %13794 = vmatprep.mubr.msk.f32.mxu1 %vm5400_vm12, %v5523_v42  ;;  %vm21034_vm10 = vnez %v20782_v50  ;;  %v5269_v14 = vmul.f32 0.5, %v17893_v15 }
 0x32e   : > { %v15773_v11 = vpop.eup %15772  ;;  %v5392_v6 = vmul.f32 %v5360_v63, %v5264_v0  ;;  %13795 = vmatmul.mubr.msk.f32.gmra.mrb[34].mxu1 %vm5400_vm12, %v17936_v24  ;;  %v5268_v42 = vmul.f32 0.5, %v17899_v10 }
 0x32f   : > { %v15775_v60 = vpop.eup %15774  ;;  %5464 = vst.msk [vmem:[#allocation3 + $0xe0] sm:$0xff] %vm5400_vm12, %v5393_v12  ;;  %v5363_v51 = vadd.f32 1.0, %v15773_v11  ;;  %v17942_v52 = vld [vmem:[#allocation3 + $0xb7] sm:$0xff]  ;;  %v17950_v43 = vld [vmem:[#allocation3 + $0xbf] sm:$0xff] }
 0x330   : > { %5463 = vst.msk [vmem:[#allocation3 + $0xd8] sm:$0xff] %vm5400_vm12, %v5392_v6  ;;  %v5362_v30 = vadd.f32 1.0, %v15775_v60  ;;  %v5525_v2 = vsel %vm21034_vm10, %v17942_v52, 0.0  ;;  %vm21035_vm10 = vnez %v20784_v3 }
 0x331   : > { %v5395_v26 = vmul.f32 %v5363_v51, %v5267_v45  ;;  %13797 = vmatprep.mubr.msk.f32.mxu1 %vm5400_vm12, %v5525_v2  ;;  %v5270_v2 = vmul.f32 0.5, %v4906_v8 }
 0x332   : > { %v15777_v53 = vpop.eup %15776  ;;  %v5394_v54 = vmul.f32 %v5362_v30, %v5266_v9  ;;  %13798 = vmatmul.mubr.msk.f32.gmra.mrb[36].mxu1 %vm5400_vm12, %v17950_v43  ;;  %v5271_v9 = vmul.f32 0.5, %v4907_v22 }
 0x333   : > { %v15779_v57 = vpop.eup %15778  ;;  %5466 = vst.msk [vmem:[#allocation3 + $0xf0] sm:$0xff] %vm5400_vm12, %v5395_v26  ;;  %v5365_v0 = vadd.f32 1.0, %v15777_v53  ;;  %v17956_v63 = vld [vmem:[#allocation3 + $0xc7] sm:$0xff]  ;;  %v17964_v60 = vld [vmem:[#allocation3 + $0xcf] sm:$0xff] }
 0x334   : > { %5465 = vst.msk [vmem:[#allocation3 + $0xe8] sm:$0xff] %vm5400_vm12, %v5394_v54  ;;  %v5364_v12 = vadd.f32 1.0, %v15779_v57  ;;  %v5527_v11 = vsel %vm21035_vm10, %v17956_v63, 0.0  ;;  %vm21036_vm10 = vnez %v20786_v19 }
 0x335   : > { %v5397_v6 = vmul.f32 %v5365_v0, %v5269_v14  ;;  %13800 = vmatprep.mubr.msk.f32.mxu1 %vm5400_vm12, %v5527_v11  ;;  %v5889_v11 = vld [vmem:[#allocation3 + $0x8] sm:$0xff] }
 0x336   : > { %v15781_v45 = vpop.eup %15780  ;;  %v5396_v51 = vmul.f32 %v5364_v12, %v5268_v42  ;;  %13801 = vmatmul.mubr.msk.f32.gmra.mrb[38].mxu1 %vm5400_vm12, %v17964_v60 }
 0x337   : > { %v15783_v15 = vpop.eup %15782  ;;  %5468 = vst.msk [vmem:[#allocation3 + $0x100] sm:$0xff] %vm5400_vm12, %v5397_v6  ;;  %v5367_v10 = vadd.f32 1.0, %v15781_v45  ;;  %v17969_v30 = vld [vmem:[#allocation3 + $0xd7] sm:$0xff]  ;;  %v17976_v57 = vld [vmem:[#allocation3 + $0xdf] sm:$0xff] }
 0x338   : > { %5467 = vst.msk [vmem:[#allocation3 + $0xf8] sm:$0xff] %vm5400_vm12, %v5396_v51  ;;  %v5366_v26 = vadd.f32 1.0, %v15783_v15  ;;  %v5529_v53 = vsel %vm21036_vm10, %v17969_v30, 0.0  ;;  %vm21038_vm10 = vnez %v20790_v5  ;;  %v5890_v45 = vld [vmem:[#allocation3 + $0x10] sm:$0xff]  ;;  %v18006_v51 = vld [vmem:[%s20377_s3 + $0x18] sm:$0xff]  ;;  %v18009_v15 = vld [vmem:[#allocation3 + $0x18] sm:$0xff] }
 0x339   : > { %v5399_v54 = vmul.f32 %v5367_v10, %v5271_v9  ;;  %13803 = vmatprep.mubr.msk.f32.mxu1 %vm5400_vm12, %v5529_v53  ;;  %v18015_v9 = vld [vmem:[#allocation3 + $0x20] sm:$0xff]  ;;  %v18019_v10 = vld [vmem:[#allocation3 + $0x28] sm:$0xff] }
 0x33a   : > { %v5398_v14 = vmul.f32 %v5366_v26, %v5270_v2  ;;  %13804 = vmatmul.mubr.msk.f32.gmra.mrb[40].mxu1 %vm5400_vm12, %v17976_v57  ;;  %v18023_v2 = vld [vmem:[#allocation3 + $0x30] sm:$0xff]  ;;  %v18027_v26 = vld [vmem:[#allocation3 + $0x38] sm:$0xff]  ;;  %v18035_v53 = vld [vmem:[#allocation3 + $0x48] sm:$0xff] }
 0x33b   : > { %5470 = vst.msk [vmem:[#allocation3 + $0x110] sm:$0xff] %vm5400_vm12, %v5399_v54  ;;  %v17981_v22 = vld [vmem:[#allocation3 + $0xe7] sm:$0xff]  ;;  %v17988_v0 = vld [vmem:[#allocation3 + $0xef] sm:$0xff]  ;;  %21039 = vst [vmem:[#allocation53_spill] sm:$0xff] %v18035_v53 }
 0x33c   : > { %5469 = vst.msk [vmem:[#allocation3 + $0x108] sm:$0xff] %vm5400_vm12, %v5398_v14  ;;  %v5531_v8 = vsel %vm21037_vm9, %v17981_v22, 0.0  ;;  %v18039_v54 = vld [vmem:[#allocation3 + $0x50] sm:$0xff]  ;;  %v18043_v14 = vld [vmem:[#allocation3 + $0x58] sm:$0xff] }
 0x33d   : > { %13806 = vmatprep.mubr.msk.f32.mxu1 %vm5400_vm12, %v5531_v8  ;;  %21040 = vst [vmem:[#allocation57_spill] sm:$0xff] %v18039_v54  ;;  %21041 = vst [vmem:[#allocation14_spill] sm:$0xff] %v18043_v14  ;;  %v18047_v8 = vld [vmem:[#allocation3 + $0x60] sm:$0xff] }
 0x33e   : > { %13807 = vmatmul.mubr.msk.f32.gmra.mrb[42].mxu1 %vm5400_vm12, %v17988_v0  ;;  %21042 = vst [vmem:[#allocation15_spill] sm:$0xff] %v18047_v8 }
 0x33f   : > { %v17992_v42 = vld [vmem:[#allocation3 + $0xf7] sm:$0xff]  ;;  %v17998_v6 = vld [vmem:[#allocation3 + $0xff] sm:$0xff] }
 0x340   : > { %v5533_v12 = vsel %vm21038_vm10, %v17992_v42, 0.0 }
 0x341   : > { %13809 = vmatprep.mubr.msk.f32.mxu1 %vm5400_vm12, %v5533_v12  ;;  %v18051_v12 = vld [vmem:[#allocation3 + $0x68] sm:$0xff] }
 0x342   : > { %13810 = vmatmul.mubr.msk.f32.gmra.mrb[44].mxu1 %vm5400_vm12, %v17998_v6  ;;  %21043 = vst [vmem:[#allocation50_spill] sm:$0xff] %v18051_v12 }
 0x343   : > { %13814 = vmatprep.mubr.msk.f32.mxu1 %vm5400_vm12, %v5889_v11  ;;  %v18055_v11 = vld [vmem:[#allocation3 + $0x70] sm:$0xff] }
 0x344   : > { %21044 = vst [vmem:[#allocation55_spill] sm:$0xff] %v18055_v11 }
 0x346   : > { %13815 = vmatmul.mubr.msk.f32.vlgmr.msra.gmra.mrb[14].mxu1 %vm5400_vm12, %v5890_v45  ;;  %v18059_v45 = vld [vmem:[#allocation3 + $0x78] sm:$0xff] }
 0x347   : > { %13817 = vmatprep.mubr.msk.f32.mxu1 %vm5400_vm12, %v18009_v15  ;;  %13863 = vmatpush3.msra.mxu1 %v17678_v17  ;;  %v18031_v17 = vld [vmem:[#allocation3 + $0x40] sm:$0xff]  ;;  %21045 = vst [vmem:[#allocation58_spill] sm:$0xff] %v18059_v45 }
 0x348   : > { %13912 = vmatprep.subr.mxu1 %v18006_v51 }
 0x34a   : > { %13818 = vmatmul.mubr.msk.f32.gmra.mrb[16].mxu1 %vm5400_vm12, %v18015_v9 }
 0x34b   : > { %13820 = vmatprep.mubr.msk.f32.mxu1 %vm5400_vm12, %v18019_v10 }
 0x34e   : > { %13821 = vmatmul.mubr.msk.f32.gmra.mrb[18].mxu1 %vm5400_vm12, %v18023_v2 }
 0x34f   : > { %13823 = vmatprep.mubr.msk.f32.mxu1 %vm5400_vm12, %v18027_v26 }
 0x352   : > { %13824 = vmatmul.mubr.msk.f32.gmra.mrb[20].mxu1 %vm5400_vm12, %v18031_v17 }
 0x353   : > { %13826 = vmatprep.mubr.msk.f32.mxu1 %vm5400_vm12, %v18035_v53  ;;  %v18142_v53 = vld [vmem:[#allocation3 + $0x21] sm:$0xff] }
 0x356   : > { %13827 = vmatmul.mubr.msk.f32.gmra.mrb[22].mxu1 %vm5400_vm12, %v18039_v54  ;;  %v18127_v54 = vld [vmem:[#allocation3 + $0x100] sm:$0xff] }
 0x357   : > { %13829 = vmatprep.mubr.msk.f32.mxu1 %vm5400_vm12, %v18043_v14  ;;  %v18063_v14 = vld [vmem:[#allocation3 + $0x80] sm:$0xff]  ;;  %21062 = vst [vmem:[#allocation30_spill] sm:$0xff] %v18127_v54 }
 0x358   : > { %21046 = vst [vmem:[#allocation62_spill] sm:$0xff] %v18063_v14 }
 0x35a   : > { %13830 = vmatmul.mubr.msk.f32.gmra.mrb[24].mxu1 %vm5400_vm12, %v18047_v8  ;;  %v18067_v8 = vld [vmem:[#allocation3 + $0x88] sm:$0xff] }
 0x35b   : > { %13832 = vmatprep.mubr.msk.f32.mxu1 %vm5400_vm12, %v18051_v12  ;;  %21047 = vst [vmem:[#allocation61_spill] sm:$0xff] %v18067_v8  ;;  %v18071_v12 = vld [vmem:[#allocation3 + $0x90] sm:$0xff] }
 0x35c   : > { %21048 = vst [vmem:[#allocation64_spill] sm:$0xff] %v18071_v12 }
 0x35e   : > { %13833 = vmatmul.mubr.msk.f32.gmra.mrb[26].mxu1 %vm5400_vm12, %v18055_v11  ;;  %v18075_v11 = vld [vmem:[#allocation3 + $0x98] sm:$0xff] }
 0x35f   : > { %13835 = vmatprep.mubr.msk.f32.mxu1 %vm5400_vm12, %v18059_v45  ;;  %21049 = vst [vmem:[#allocation65_spill] sm:$0xff] %v18075_v11  ;;  %v18079_v45 = vld [vmem:[#allocation3 + $0xa0] sm:$0xff] }
 0x360   : > { %21050 = vst [vmem:[#allocation38_spill] sm:$0xff] %v18079_v45 }
 0x362   : > { %13836 = vmatmul.mubr.msk.f32.gmra.mrb[28].mxu1 %vm5400_vm12, %v18063_v14  ;;  %v18083_v14 = vld [vmem:[#allocation3 + $0xa8] sm:$0xff] }
 0x363   : > { %13838 = vmatprep.mubr.msk.f32.mxu1 %vm5400_vm12, %v18067_v8  ;;  %21051 = vst [vmem:[#allocation42_spill] sm:$0xff] %v18083_v14  ;;  %v18087_v8 = vld [vmem:[#allocation3 + $0xb0] sm:$0xff] }
 0x364   : > { %21052 = vst [vmem:[#allocation12_spill] sm:$0xff] %v18087_v8 }
 0x366   : > { %13839 = vmatmul.mubr.msk.f32.gmra.mrb[30].mxu1 %vm5400_vm12, %v18071_v12  ;;  %v18091_v12 = vld [vmem:[#allocation3 + $0xb8] sm:$0xff] }
 0x367   : > { %13841 = vmatprep.mubr.msk.f32.mxu1 %vm5400_vm12, %v18075_v11  ;;  %21053 = vst [vmem:[#allocation17_spill] sm:$0xff] %v18091_v12  ;;  %v18095_v11 = vld [vmem:[#allocation3 + $0xc0] sm:$0xff] }
 0x368   : > { %21054 = vst [vmem:[#allocation18_spill] sm:$0xff] %v18095_v11 }
 0x36a   : > { %13842 = vmatmul.mubr.msk.f32.gmra.mrb[32].mxu1 %vm5400_vm12, %v18079_v45  ;;  %v18099_v45 = vld [vmem:[#allocation3 + $0xc8] sm:$0xff] }
 0x36b   : > { %13844 = vmatprep.mubr.msk.f32.mxu1 %vm5400_vm12, %v18083_v14  ;;  %21055 = vst [vmem:[#allocation20_spill] sm:$0xff] %v18099_v45  ;;  %v18103_v14 = vld [vmem:[#allocation3 + $0xd0] sm:$0xff] }
 0x36c   : > { %21056 = vst [vmem:[#allocation21_spill] sm:$0xff] %v18103_v14 }
 0x36e   : > { %13845 = vmatmul.mubr.msk.f32.gmra.mrb[34].mxu1 %vm5400_vm12, %v18087_v8  ;;  %v18107_v8 = vld [vmem:[#allocation3 + $0xd8] sm:$0xff] }
 0x36f   : > { %13847 = vmatprep.mubr.msk.f32.mxu1 %vm5400_vm12, %v18091_v12  ;;  %21057 = vst [vmem:[#allocation23_spill] sm:$0xff] %v18107_v8  ;;  %v18111_v12 = vld [vmem:[#allocation3 + $0xe0] sm:$0xff] }
 0x370   : > { %21058 = vst [vmem:[#allocation24_spill] sm:$0xff] %v18111_v12 }
 0x372   : > { %13848 = vmatmul.mubr.msk.f32.gmra.mrb[36].mxu1 %vm5400_vm12, %v18095_v11  ;;  %v18115_v11 = vld [vmem:[#allocation3 + $0xe8] sm:$0xff] }
 0x373   : > { %13850 = vmatprep.mubr.msk.f32.mxu1 %vm5400_vm12, %v18099_v45  ;;  %21059 = vst [vmem:[#allocation26_spill] sm:$0xff] %v18115_v11  ;;  %v18119_v45 = vld [vmem:[#allocation3 + $0xf0] sm:$0xff] }
 0x374   : > { %21060 = vst [vmem:[#allocation27_spill] sm:$0xff] %v18119_v45 }
 0x376   : > { %13851 = vmatmul.mubr.msk.f32.gmra.mrb[38].mxu1 %vm5400_vm12, %v18103_v14  ;;  %v18123_v14 = vld [vmem:[#allocation3 + $0xf8] sm:$0xff] }
 0x377   : > { %13853 = vmatprep.mubr.msk.f32.mxu1 %vm5400_vm12, %v18107_v8  ;;  %21061 = vst [vmem:[#allocation29_spill] sm:$0xff] %v18123_v14  ;;  %v6276_v8 = vld [vmem:[#allocation3 + $0x9] sm:$0xff] }
 0x37a   : > { %13854 = vmatmul.mubr.msk.f32.gmra.mrb[40].mxu1 %vm5400_vm12, %v18111_v12  ;;  %v6277_v12 = vld [vmem:[#allocation3 + $0x11] sm:$0xff] }
 0x37b   : > { %13856 = vmatprep.mubr.msk.f32.mxu1 %vm5400_vm12, %v18115_v11  ;;  %v6309_v11 = vsel %vm20901_vm13, %v6277_v12, 0.0  ;;  %v18152_v12 = vld [vmem:[#allocation3 + $0x29] sm:$0xff]  ;;  %vm21065_vm13 = vnez %v20982_v38  ;;  %v18182_v38 = vld [vmem:[#allocation3 + $0x59] sm:$0xff] }
 0x37c   : > { %21064 = vst [vmem:[#allocation33_spill] sm:$0xff] %v18152_v12  ;;  %21070 = vst [vmem:[#allocation39_spill] sm:$0xff] %v18182_v38 }
 0x37e   : > { %13857 = vmatmul.mubr.msk.f32.gmra.mrb[42].mxu1 %vm5400_vm12, %v18119_v45  ;;  %v18137_v45 = vld [vmem:[%s20377_s3 + $0x20] sm:$0xff] }
 0x37f   : > { %13859 = vmatprep.mubr.msk.f32.mxu1 %vm5400_vm12, %v18123_v14  ;;  %v18140_v14 = vld [vmem:[#allocation3 + $0x19] sm:$0xff] }
 0x380   : > { %21063 = vst [vmem:[#allocation32_spill] sm:$0xff] %v18140_v14 }
 0x382   : > { %13860 = vmatmul.mubr.msk.f32.gmra.mrb[44].mxu1 %vm5400_vm12, %v18127_v54 }
 0x383   : > { %13864 = vmatprep.mubr.msk.f32.mxu1 %vm5400_vm12, %v6276_v8  ;;  %v6311_v8 = vsel %vm20905_vm15, %v18142_v53, 0.0  ;;  %vm21067_vm15 = vnez %v20986_v31  ;;  %v18192_v31 = vld [vmem:[#allocation3 + $0x69] sm:$0xff] }
 0x384   : > { %21073 = vst [vmem:[#allocation44_spill] sm:$0xff] %v18192_v31 }
 0x386   : > { %13865 = vmatmul.mubr.msk.f32.vlgmr.msra.gmra.mrb[14].mxu1 %vm5400_vm12, %v6309_v11  ;;  %v18154_v11 = vld [vmem:[#allocation3 + $0x31] sm:$0xff] }
 0x387   : > { %13867 = vmatprep.mubr.msk.f32.mxu1 %vm5400_vm12, %v18140_v14  ;;  %13913 = vmatpush3.msra.mxu1 %v18006_v51  ;;  %v6313_v25 = vsel %vm21065_vm13, %v18154_v11, 0.0  ;;  %v18162_v51 = vld [vmem:[#allocation3 + $0x39] sm:$0xff]  ;;  %v18164_v14 = vld [vmem:[#allocation3 + $0x41] sm:$0xff]  ;;  %vm21069_vm13 = vnez %v20990_v1 }
 0x388   : > { %13962 = vmatprep.subr.mxu1 %v18137_v45  ;;  %21066 = vst [vmem:[#allocation35_spill] sm:$0xff] %v18162_v51  ;;  %v18202_v1 = vld [vmem:[#allocation3 + $0x79] sm:$0xff] }
 0x389   : > { %21076 = vst [vmem:[#allocation49_spill] sm:$0xff] %v18202_v1 }
 0x38a   : > { %13868 = vmatmul.mubr.msk.f32.gmra.mrb[16].mxu1 %vm5400_vm12, %v6311_v8  ;;  %v6315_v8 = vsel %vm21067_vm15, %v18164_v14, 0.0  ;;  %vm21072_vm15 = vnez %v20994_v36  ;;  %v18212_v36 = vld [vmem:[#allocation3 + $0x89] sm:$0xff] }
 0x38b   : > { %13870 = vmatprep.mubr.msk.f32.mxu1 %vm5400_vm12, %v18152_v12  ;;  %v18174_v12 = vld [vmem:[#allocation3 + $0x51] sm:$0xff]  ;;  %21079 = vst [vmem:[#allocation59_spill] sm:$0xff] %v18212_v36 }
 0x38e   : > { %13871 = vmatmul.mubr.msk.f32.gmra.mrb[18].mxu1 %vm5400_vm12, %v6313_v25  ;;  %v6317_v25 = vsel %vm21069_vm13, %v18174_v12, 0.0  ;;  %vm21075_vm13 = vnez %v20998_v47  ;;  %v18222_v47 = vld [vmem:[#allocation3 + $0x99] sm:$0xff] }
 0x38f   : > { %13873 = vmatprep.mubr.msk.f32.mxu1 %vm5400_vm12, %v18162_v51  ;;  %v18184_v51 = vld [vmem:[#allocation3 + $0x61] sm:$0xff]  ;;  %21081 = vst [vmem:[#allocation67_spill] sm:$0xff] %v18222_v47 }
 0x390   : > { %21071 = vst [vmem:[#allocation40_spill] sm:$0xff] %v18184_v51 }
 0x392   : > { %13874 = vmatmul.mubr.msk.f32.gmra.mrb[20].mxu1 %vm5400_vm12, %v6315_v8  ;;  %v6319_v8 = vsel %vm21072_vm15, %v18184_v51, 0.0  ;;  %vm21078_vm15 = vnez %v21002_v59  ;;  %v18232_v59 = vld [vmem:[#allocation3 + $0xa9] sm:$0xff] }
 0x393   : > { %13876 = vmatprep.mubr.msk.f32.mxu1 %vm5400_vm12, %v18172_v49  ;;  %v18194_v49 = vld [vmem:[#allocation3 + $0x71] sm:$0xff]  ;;  %21084 = vst [vmem:[#allocation11_spill] sm:$0xff] %v18232_v59 }
 0x394   : > { %21074 = vst [vmem:[#allocation45_spill] sm:$0xff] %v18194_v49 }
 0x396   : > { %13877 = vmatmul.mubr.msk.f32.gmra.mrb[22].mxu1 %vm5400_vm12, %v6317_v25  ;;  %v6321_v25 = vsel %vm21075_vm13, %v18194_v49, 0.0 }
 0x397   : > { %13879 = vmatprep.mubr.msk.f32.mxu1 %vm5400_vm12, %v18182_v38  ;;  %v18204_v38 = vld [vmem:[#allocation3 + $0x81] sm:$0xff] }
 0x398   : > { %21077 = vst [vmem:[#allocation54_spill] sm:$0xff] %v18204_v38 }
 0x39a   : > { %13880 = vmatmul.mubr.msk.f32.gmra.mrb[24].mxu1 %vm5400_vm12, %v6319_v8  ;;  %v6323_v8 = vsel %vm21078_vm15, %v18204_v38, 0.0  ;;  %vm21083_vm15 = vnez %v21009_v18 }
 0x39b   : > { %13882 = vmatprep.mubr.msk.f32.mxu1 %vm5400_vm12, %v18192_v31  ;;  %v18214_v31 = vld [vmem:[#allocation3 + $0x91] sm:$0xff] }
 0x39c   : > { %21080 = vst [vmem:[#allocation66_spill] sm:$0xff] %v18214_v31 }
 0x39e   : > { %13883 = vmatmul.mubr.msk.f32.gmra.mrb[26].mxu1 %vm5400_vm12, %v6321_v25  ;;  %v6325_v25 = vsel %vm21007_vm11, %v18214_v31, 0.0  ;;  %v18244_v31 = vld [vmem:[#allocation3 + $0xc1] sm:$0xff] }
 0x39f   : > { %13885 = vmatprep.mubr.msk.f32.mxu1 %vm5400_vm12, %v18202_v1  ;;  %v18224_v1 = vld [vmem:[#allocation3 + $0xa1] sm:$0xff]  ;;  %21089 = vst [vmem:[#allocation71_spill] sm:$0xff] %v18244_v31  ;;  %v6331_v18 = vsel %vm20945_vm14, %v18244_v31, 0.0  ;;  %v18274_v31 = vld [vmem:[#allocation3 + $0xf1] sm:$0xff] }
 0x3a0   : > { %21082 = vst [vmem:[#allocation43_spill] sm:$0xff] %v18224_v1  ;;  %21100 = vst [vmem:[#allocation77_spill] sm:$0xff] %v18274_v31 }
 0x3a2   : > { %13886 = vmatmul.mubr.msk.f32.gmra.mrb[28].mxu1 %vm5400_vm12, %v6323_v8  ;;  %v6327_v8 = vsel %vm21083_vm15, %v18224_v1, 0.0  ;;  %v18254_v1 = vld [vmem:[#allocation3 + $0xd1] sm:$0xff] }
 0x3a3   : > { %13888 = vmatprep.mubr.msk.f32.mxu1 %vm5400_vm12, %v18212_v36  ;;  %v18234_v36 = vld [vmem:[#allocation3 + $0xb1] sm:$0xff]  ;;  %21092 = vst [vmem:[#allocation73_spill] sm:$0xff] %v18254_v1 }
 0x3a4   : > { %21085 = vst [vmem:[#allocation69_spill] sm:$0xff] %v18234_v36 }
 0x3a6   : > { %13889 = vmatmul.mubr.msk.f32.gmra.mrb[30].mxu1 %vm5400_vm12, %v6325_v25  ;;  %v21086_v25 = vld [vmem:[#allocation46_spill] sm:$0xff] }
 0x3a7   : > { %13891 = vmatprep.mubr.msk.f32.mxu1 %vm5400_vm12, %v18222_v47  ;;  %vm21087_vm11 = vnez %v21086_v25  ;;  %v18242_v47 = vld [vmem:[#allocation3 + $0xb9] sm:$0xff] }
 0x3a8   : > { %v6329_v4 = vsel %vm21087_vm11, %v18234_v36, 0.0  ;;  %21088 = vst [vmem:[#allocation70_spill] sm:$0xff] %v18242_v47  ;;  %v18264_v36 = vld [vmem:[#allocation3 + $0xe1] sm:$0xff] }
 0x3a9   : > { %21096 = vst [vmem:[#allocation75_spill] sm:$0xff] %v18264_v36 }
 0x3aa   : > { %13892 = vmatmul.mubr.msk.f32.gmra.mrb[32].mxu1 %vm5400_vm12, %v6327_v8 }
 0x3ab   : > { %13894 = vmatprep.mubr.msk.f32.mxu1 %vm5400_vm12, %v18232_v59  ;;  %v18252_v59 = vld [vmem:[#allocation3 + $0xc9] sm:$0xff] }
 0x3ac   : > { %21091 = vst [vmem:[#allocation72_spill] sm:$0xff] %v18252_v59 }
 0x3ae   : > { %13895 = vmatmul.mubr.msk.f32.gmra.mrb[34].mxu1 %vm5400_vm12, %v6329_v4  ;;  %v21093_v4 = vld [vmem:[#allocation56_spill] sm:$0xff] }
 0x3af   : > { %13897 = vmatprep.mubr.msk.f32.mxu1 %vm5400_vm12, %v18242_v47  ;;  %vm21094_vm11 = vnez %v21093_v4  ;;  %v18262_v47 = vld [vmem:[#allocation3 + $0xd9] sm:$0xff]  ;;  %v6337_v4 = vsel %vm16916_vm0, %v18274_v31, 0.0  ;;  %v21106_v31 = vld [vmem:[#allocation47_spill] sm:$0xff] }
 0x3b0   : > { %v6333_v25 = vsel %vm21094_vm11, %v18254_v1, 0.0  ;;  %21095 = vst [vmem:[#allocation74_spill] sm:$0xff] %v18262_v47  ;;  %v18284_v1 = vld [vmem:[#allocation3 + $0x101] sm:$0xff] }
 0x3b1   : > { %21103 = vst [vmem:[#allocation79_spill] sm:$0xff] %v18284_v1 }
 0x3b2   : > { %13898 = vmatmul.mubr.msk.f32.gmra.mrb[36].mxu1 %vm5400_vm12, %v6331_v18  ;;  %v21097_v18 = vld [vmem:[#allocation60_spill] sm:$0xff] }
 0x3b3   : > { %13900 = vmatprep.mubr.msk.f32.mxu1 %vm5400_vm12, %v18252_v59  ;;  %vm21098_vm14 = vnez %v21097_v18  ;;  %v18272_v59 = vld [vmem:[#allocation3 + $0xe9] sm:$0xff]  ;;  %v6339_v18 = vsel %vm21024_vm2, %v18284_v1, 0.0 }
 0x3b4   : > { %v6335_v8 = vsel %vm21098_vm14, %v18264_v36, 0.0  ;;  %21099 = vst [vmem:[#allocation76_spill] sm:$0xff] %v18272_v59  ;;  %v7928_v36 = vld [vmem:[#allocation3 + $0x67] sm:$0xff] }
 0x3b6   : > { %13901 = vmatmul.mubr.msk.f32.gmra.mrb[38].mxu1 %vm5400_vm12, %v6333_v25  ;;  %v6727_v25 = vsel %vm21026_vm1, %v17723_v27, 0.0  ;;  %v7929_v27 = vld [vmem:[#allocation3 + $0x6f] sm:$0xff] }
 0x3b7   : > { %13903 = vmatprep.mubr.msk.f32.mxu1 %vm5400_vm12, %v18262_v47  ;;  %v18282_v47 = vld [vmem:[#allocation3 + $0xf9] sm:$0xff] }
 0x3b8   : > { %21102 = vst [vmem:[#allocation78_spill] sm:$0xff] %v18282_v47 }
 0x3ba   : > { %13904 = vmatmul.mubr.msk.f32.gmra.mrb[40].mxu1 %vm5400_vm12, %v6335_v8 }
 0x3bb   : > { %13906 = vmatprep.mubr.msk.f32.mxu1 %vm5400_vm12, %v18272_v59  ;;  %v7923_v59 = vld [vmem:[#allocation3 + $0x3f] sm:$0xff] }
 0x3be   : > { %13907 = vmatmul.mubr.msk.f32.gmra.mrb[42].mxu1 %vm5400_vm12, %v6337_v4  ;;  %v12008_v4 = vld [vmem:[%s20377_s3 + $0x28] sm:$0xff] }
 0x3bf   : > { %13909 = vmatprep.mubr.msk.f32.mxu1 %vm5400_vm12, %v18282_v47  ;;  %v21107_v47 = vld [vmem:[#allocation48_spill] sm:$0xff] }
 0x3c0   : > { %v6729_v8 = vsel %vm16403_vm3, %v21107_v47, 0.0  ;;  %v6735_v47 = vsel %vm16462_vm6, %v17810_v62, 0.0  ;;  %vm21111_vm6 = vnez %v20773_v7 }
 0x3c2   : > { %13910 = vmatmul.mubr.msk.f32.gmra.mrb[44].mxu1 %vm5400_vm12, %v6339_v18  ;;  %v21109_v18 = vld [vmem:[#allocation52_spill] sm:$0xff] }
 0x3c3   : > { %13914 = vmatprep.mubr.msk.f32.mxu1 %vm5400_vm12, %v6727_v25  ;;  %v6731_v25 = vsel %vm16420_vm4, %v17767_v13, 0.0  ;;  %v6737_v13 = vsel %vm16477_vm7, %v17834_v61, 0.0  ;;  %vm21112_vm7 = vnez %v20775_v21 }
 0x3c6   : > { %13915 = vmatmul.mubr.msk.f32.vlgmr.msra.gmra.mrb[14].mxu1 %vm5400_vm12, %v21106_v31  ;;  %v6733_v31 = vsel %vm16445_vm5, %v17788_v32, 0.0  ;;  %v6741_v32 = vsel %vm21111_vm6, %v17880_v23, 0.0  ;;  %vm21114_vm6 = vnez %v20779_v41 }
 0x3c7   : > { %13917 = vmatprep.mubr.msk.f32.mxu1 %vm5400_vm12, %v6729_v8  ;;  %13963 = vmatpush3.msra.mxu1 %v18137_v45  ;;  %v6755_v8 = vsel %vm21037_vm9, %v17992_v42, 0.0 }
 0x3c8   : > { %14012 = vmatprep.subr.mxu1 %v12008_v4 }
 0x3ca   : > { %13918 = vmatmul.mubr.msk.f32.gmra.mrb[16].mxu1 %vm5400_vm12, %v21109_v18  ;;  %v18384_v18 = vld [vmem:[#allocation3 + $0x107] sm:$0xff] }
 0x3cb   : > { %13920 = vmatprep.mubr.msk.f32.mxu1 %vm5400_vm12, %v6731_v25  ;;  %v6757_v25 = vsel %vm21038_vm10, %v18384_v18, 0.0 }
 0x3ce   : > { %13921 = vmatmul.mubr.msk.f32.gmra.mrb[18].mxu1 %vm5400_vm12, %v17776_v20  ;;  %v6739_v20 = vsel %vm16492_vm8, %v17857_v16, 0.0  ;;  %vm21113_vm8 = vnez %v20777_v33 }
 0x3cf   : > { %13923 = vmatprep.mubr.msk.f32.mxu1 %vm5400_vm12, %v6733_v31  ;;  %v6745_v62 = vsel %vm21113_vm8, %v17928_v58, 0.0  ;;  %vm21116_vm8 = vnez %v20784_v3  ;;  %v18392_v31 = vld [vmem:[#allocation3 + $0x10f] sm:$0xff]  ;;  %v7950_v3 = vld [vmem:[#allocation3 + $0x117] sm:$0xff] }
 0x3d2   : > { %13924 = vmatmul.mubr.msk.f32.gmra.mrb[20].mxu1 %vm5400_vm12, %v17808_v29  ;;  %v6743_v29 = vsel %vm21112_vm7, %v17904_v34, 0.0  ;;  %vm21115_vm7 = vnez %v20782_v50 }
 0x3d3   : > { %13926 = vmatprep.mubr.msk.f32.mxu1 %vm5400_vm12, %v6735_v47  ;;  %v6749_v61 = vsel %vm21115_vm7, %v17956_v63, 0.0  ;;  %v12041_v47 = vld [vmem:[%s20377_s3 + $0x30] sm:$0xff] }
 0x3d6   : > { %13927 = vmatmul.mubr.msk.f32.gmra.mrb[22].mxu1 %vm5400_vm12, %v17832_v40  ;;  %v6747_v40 = vsel %vm21114_vm6, %v17942_v52, 0.0  ;;  %vm21117_vm6 = vnez %v20786_v19 }
 0x3d7   : > { %13929 = vmatprep.mubr.msk.f32.mxu1 %vm5400_vm12, %v6737_v13  ;;  %v6753_v45 = vsel %vm21117_vm6, %v17981_v22, 0.0  ;;  %v21119_v13 = vld [vmem:[#allocation57_spill] sm:$0xff] }
 0x3da   : > { %13930 = vmatmul.mubr.msk.f32.gmra.mrb[24].mxu1 %vm5400_vm12, %v17855_v39  ;;  %v6751_v39 = vsel %vm21116_vm8, %v17969_v30, 0.0 }
 0x3db   : > { %13932 = vmatprep.mubr.msk.f32.mxu1 %vm5400_vm12, %v6739_v20  ;;  %v21122_v20 = vld [vmem:[#allocation50_spill] sm:$0xff] }
 0x3de   : > { %13933 = vmatmul.mubr.msk.f32.gmra.mrb[26].mxu1 %vm5400_vm12, %v17878_v37 }
 0x3df   : > { %13935 = vmatprep.mubr.msk.f32.mxu1 %vm5400_vm12, %v6741_v32  ;;  %v21123_v32 = vld [vmem:[#allocation55_spill] sm:$0xff] }
 0x3e2   : > { %13936 = vmatmul.mubr.msk.f32.gmra.mrb[28].mxu1 %vm5400_vm12, %v17902_v46 }
 0x3e3   : > { %13938 = vmatprep.mubr.msk.f32.mxu1 %vm5400_vm12, %v6743_v29  ;;  %v21124_v29 = vld [vmem:[#allocation58_spill] sm:$0xff] }
 0x3e6   : > { %13939 = vmatmul.mubr.msk.f32.gmra.mrb[30].mxu1 %vm5400_vm12, %v17922_v28 }
 0x3e7   : > { %13941 = vmatprep.mubr.msk.f32.mxu1 %vm5400_vm12, %v6745_v62  ;;  %v21125_v62 = vld [vmem:[#allocation62_spill] sm:$0xff] }
 0x3ea   : > { %13942 = vmatmul.mubr.msk.f32.gmra.mrb[32].mxu1 %vm5400_vm12, %v17936_v24 }
 0x3eb   : > { %13944 = vmatprep.mubr.msk.f32.mxu1 %vm5400_vm12, %v6747_v40  ;;  %v21126_v40 = vld [vmem:[#allocation61_spill] sm:$0xff] }
 0x3ee   : > { %13945 = vmatmul.mubr.msk.f32.gmra.mrb[34].mxu1 %vm5400_vm12, %v17950_v43 }
 0x3ef   : > { %13947 = vmatprep.mubr.msk.f32.mxu1 %vm5400_vm12, %v6749_v61  ;;  %v21127_v61 = vld [vmem:[#allocation64_spill] sm:$0xff] }
 0x3f2   : > { %13948 = vmatmul.mubr.msk.f32.gmra.mrb[36].mxu1 %vm5400_vm12, %v17964_v60 }
 0x3f3   : > { %13950 = vmatprep.mubr.msk.f32.mxu1 %vm5400_vm12, %v6751_v39  ;;  %v21128_v39 = vld [vmem:[#allocation65_spill] sm:$0xff] }
 0x3f6   : > { %13951 = vmatmul.mubr.msk.f32.gmra.mrb[38].mxu1 %vm5400_vm12, %v17976_v57 }
 0x3f7   : > { %13953 = vmatprep.mubr.msk.f32.mxu1 %vm5400_vm12, %v6753_v45  ;;  %v21129_v45 = vld [vmem:[#allocation38_spill] sm:$0xff] }
 0x3fa   : > { %13954 = vmatmul.mubr.msk.f32.gmra.mrb[40].mxu1 %vm5400_vm12, %v17988_v0 }
 0x3fb   : > { %13956 = vmatprep.mubr.msk.f32.mxu1 %vm5400_vm12, %v6755_v8  ;;  %v21130_v8 = vld [vmem:[#allocation42_spill] sm:$0xff] }
 0x3fe   : > { %13957 = vmatmul.mubr.msk.f32.gmra.mrb[42].mxu1 %vm5400_vm12, %v17998_v6 }
 0x3ff   : > { %13959 = vmatprep.mubr.msk.f32.mxu1 %vm5400_vm12, %v6757_v25  ;;  %v21131_v25 = vld [vmem:[#allocation12_spill] sm:$0xff] }
 0x402   : > { %13960 = vmatmul.mubr.msk.f32.gmra.mrb[44].mxu1 %vm5400_vm12, %v18392_v31 }
 0x403   : > { %13964 = vmatprep.mubr.msk.f32.mxu1 %vm5400_vm12, %v18009_v15  ;;  %v21118_v15 = vld [vmem:[#allocation53_spill] sm:$0xff] }
 0x406   : > { %13965 = vmatmul.mubr.msk.f32.vlgmr.msra.gmra.mrb[14].mxu1 %vm5400_vm12, %v18015_v9  ;;  %v21120_v9 = vld [vmem:[#allocation14_spill] sm:$0xff] }
 0x407   : > { %13967 = vmatprep.mubr.msk.f32.mxu1 %vm5400_vm12, %v18019_v10  ;;  %14013 = vmatpush3.msra.mxu1 %v12008_v4  ;;  %v21121_v4 = vld [vmem:[#allocation15_spill] sm:$0xff] }
 0x408   : > { %14062 = vmatprep.subr.mxu1 %v12041_v47 }
 0x40a   : > { %13968 = vmatmul.mubr.msk.f32.gmra.mrb[16].mxu1 %vm5400_vm12, %v18023_v2 }
 0x40b   : > { %13970 = vmatprep.mubr.msk.f32.mxu1 %vm5400_vm12, %v18027_v26 }
 0x40e   : > { %13971 = vmatmul.mubr.msk.f32.gmra.mrb[18].mxu1 %vm5400_vm12, %v18031_v17 }
 0x40f   : > { %13973 = vmatprep.mubr.msk.f32.mxu1 %vm5400_vm12, %v21118_v15 }
 0x412   : > { %13974 = vmatmul.mubr.msk.f32.gmra.mrb[20].mxu1 %vm5400_vm12, %v21119_v13 }
 0x413   : > { %13976 = vmatprep.mubr.msk.f32.mxu1 %vm5400_vm12, %v21120_v9 }
 0x416   : > { %13977 = vmatmul.mubr.msk.f32.gmra.mrb[22].mxu1 %vm5400_vm12, %v21121_v4 }
 0x417   : > { %13979 = vmatprep.mubr.msk.f32.mxu1 %vm5400_vm12, %v21122_v20 }
 0x41a   : > { %13980 = vmatmul.mubr.msk.f32.gmra.mrb[24].mxu1 %vm5400_vm12, %v21123_v32 }
 0x41b   : > { %13982 = vmatprep.mubr.msk.f32.mxu1 %vm5400_vm12, %v21124_v29  ;;  %v21132_v29 = vld [vmem:[#allocation17_spill] sm:$0xff] }
 0x41e   : > { %13983 = vmatmul.mubr.msk.f32.gmra.mrb[26].mxu1 %vm5400_vm12, %v21125_v62  ;;  %v21133_v62 = vld [vmem:[#allocation18_spill] sm:$0xff] }
 0x41f   : > { %13985 = vmatprep.mubr.msk.f32.mxu1 %vm5400_vm12, %v21126_v40  ;;  %v21134_v40 = vld [vmem:[#allocation20_spill] sm:$0xff] }
 0x422   : > { %13986 = vmatmul.mubr.msk.f32.gmra.mrb[28].mxu1 %vm5400_vm12, %v21127_v61  ;;  %v21135_v61 = vld [vmem:[#allocation21_spill] sm:$0xff] }
 0x423   : > { %13988 = vmatprep.mubr.msk.f32.mxu1 %vm5400_vm12, %v21128_v39  ;;  %v21136_v39 = vld [vmem:[#allocation23_spill] sm:$0xff] }
 0x426   : > { %13989 = vmatmul.mubr.msk.f32.gmra.mrb[30].mxu1 %vm5400_vm12, %v21129_v45  ;;  %v21137_v45 = vld [vmem:[#allocation24_spill] sm:$0xff] }
 0x427   : > { %13991 = vmatprep.mubr.msk.f32.mxu1 %vm5400_vm12, %v21130_v8  ;;  %v21138_v8 = vld [vmem:[#allocation26_spill] sm:$0xff] }
 0x42a   : > { %13992 = vmatmul.mubr.msk.f32.gmra.mrb[32].mxu1 %vm5400_vm12, %v21131_v25  ;;  %v21139_v25 = vld [vmem:[#allocation27_spill] sm:$0xff] }
 0x42b   : > { %13994 = vmatprep.mubr.msk.f32.mxu1 %vm5400_vm12, %v21132_v29  ;;  %v21140_v29 = vld [vmem:[#allocation29_spill] sm:$0xff] }
 0x42e   : > { %13995 = vmatmul.mubr.msk.f32.gmra.mrb[34].mxu1 %vm5400_vm12, %v21133_v62 }
 0x42f   : > { %13997 = vmatprep.mubr.msk.f32.mxu1 %vm5400_vm12, %v21134_v40  ;;  %v18459_v40 = vld [vmem:[#allocation3 + $0x108] sm:$0xff] }
 0x430   : > { %21141 = vst [vmem:[#allocation8_spill] sm:$0xff] %v18459_v40 }
 0x432   : > { %13998 = vmatmul.mubr.msk.f32.gmra.mrb[36].mxu1 %vm5400_vm12, %v21135_v61 }
 0x433   : > { %14000 = vmatprep.mubr.msk.f32.mxu1 %vm5400_vm12, %v21136_v39  ;;  %v18463_v39 = vld [vmem:[#allocation3 + $0x110] sm:$0xff] }
 0x434   : > { %21142 = vst [vmem:[#allocation47_spill] sm:$0xff] %v18463_v39 }
 0x436   : > { %14001 = vmatmul.mubr.msk.f32.gmra.mrb[38].mxu1 %vm5400_vm12, %v21137_v45  ;;  %v21146_v45 = vld [vmem:[#allocation33_spill] sm:$0xff] }
 0x437   : > { %14003 = vmatprep.mubr.msk.f32.mxu1 %vm5400_vm12, %v21138_v8  ;;  %v21143_v8 = vld [vmem:[#allocation32_spill] sm:$0xff] }
 0x43a   : > { %14004 = vmatmul.mubr.msk.f32.gmra.mrb[40].mxu1 %vm5400_vm12, %v21139_v25  ;;  %v21144_v25 = vld [vmem:[#allocation13_spill] sm:$0xff] }
 0x43b   : > { %14006 = vmatprep.mubr.msk.f32.mxu1 %vm5400_vm12, %v21140_v29  ;;  %vm21145_vm10 = vnez %v21144_v25 }
 0x43c   : > { %v7534_v29 = vsel %vm21145_vm10, %v18142_v53, 0.0  ;;  %v21150_v53 = vld [vmem:[#allocation19_spill] sm:$0xff] }
 0x43d   : > { %vm21151_vm10 = vnez %v21150_v53  ;;  %v21158_v53 = vld [vmem:[#allocation44_spill] sm:$0xff] }
 0x43e   : > { %14007 = vmatmul.mubr.msk.f32.gmra.mrb[42].mxu1 %vm5400_vm12, %v18127_v54  ;;  %v12074_v54 = vld [vmem:[%s20377_s3 + $0x38] sm:$0xff]  ;;  %v7538_v25 = vsel %vm21151_vm10, %v18164_v14, 0.0 }
 0x43f   : > { %14009 = vmatprep.mubr.msk.f32.mxu1 %vm5400_vm12, %v18459_v40 }
 0x442   : > { %14010 = vmatmul.mubr.msk.f32.gmra.mrb[44].mxu1 %vm5400_vm12, %v18463_v39  ;;  %v21147_v39 = vld [vmem:[#allocation16_spill] sm:$0xff] }
 0x443   : > { %14014 = vmatprep.mubr.msk.f32.mxu1 %vm5400_vm12, %v21143_v8  ;;  %vm21148_vm9 = vnez %v21147_v39  ;;  %v21149_v8 = vld [vmem:[#allocation35_spill] sm:$0xff] }
 0x444   : > { %v7536_v40 = vsel %vm21148_vm9, %v18154_v11, 0.0  ;;  %v21155_v39 = vld [vmem:[#allocation39_spill] sm:$0xff] }
 0x446   : > { %14015 = vmatmul.mubr.msk.f32.vlgmr.msra.gmra.mrb[14].mxu1 %vm5400_vm12, %v7534_v29  ;;  %v21152_v29 = vld [vmem:[#allocation36_spill] sm:$0xff] }
 0x447   : > { %14017 = vmatprep.mubr.msk.f32.mxu1 %vm5400_vm12, %v21146_v45  ;;  %14063 = vmatpush3.msra.mxu1 %v12041_v47  ;;  %v21153_v47 = vld [vmem:[#allocation22_spill] sm:$0xff] }
 0x448   : > { %14112 = vmatprep.subr.mxu1 %v12074_v54  ;;  %vm21154_vm6 = vnez %v21153_v47  ;;  %v21161_v47 = vld [vmem:[#allocation49_spill] sm:$0xff] }
 0x449   : > { %v7540_v45 = vsel %vm21154_vm6, %v18174_v12, 0.0 }
 0x44a   : > { %14018 = vmatmul.mubr.msk.f32.gmra.mrb[16].mxu1 %vm5400_vm12, %v7536_v40  ;;  %v21156_v40 = vld [vmem:[#allocation25_spill] sm:$0xff] }
 0x44b   : > { %14020 = vmatprep.mubr.msk.f32.mxu1 %vm5400_vm12, %v21149_v8  ;;  %vm21157_vm9 = vnez %v21156_v40  ;;  %v21163_v40 = vld [vmem:[#allocation59_spill] sm:$0xff] }
 0x44c   : > { %v7542_v8 = vsel %vm21157_vm9, %v18184_v51, 0.0 }
 0x44e   : > { %14021 = vmatmul.mubr.msk.f32.gmra.mrb[18].mxu1 %vm5400_vm12, %v7538_v25  ;;  %v21159_v25 = vld [vmem:[#allocation28_spill] sm:$0xff] }
 0x44f   : > { %14023 = vmatprep.mubr.msk.f32.mxu1 %vm5400_vm12, %v21152_v29  ;;  %vm21160_vm10 = vnez %v21159_v25  ;;  %v21167_v25 = vld [vmem:[#allocation67_spill] sm:$0xff] }
 0x450   : > { %v7544_v29 = vsel %vm21160_vm10, %v18194_v49, 0.0 }
 0x452   : > { %14024 = vmatmul.mubr.msk.f32.gmra.mrb[20].mxu1 %vm5400_vm12, %v7540_v45  ;;  %v21171_v45 = vld [vmem:[#allocation11_spill] sm:$0xff] }
 0x453   : > { %14026 = vmatprep.mubr.msk.f32.mxu1 %vm5400_vm12, %v21155_v39  ;;  %v7546_v39 = vsel %vm21075_vm13, %v18204_v38, 0.0 }
 0x456   : > { %14027 = vmatmul.mubr.msk.f32.gmra.mrb[22].mxu1 %vm5400_vm12, %v7542_v8  ;;  %v21164_v8 = vld [vmem:[#allocation66_spill] sm:$0xff] }
 0x457   : > { %14029 = vmatprep.mubr.msk.f32.mxu1 %vm5400_vm12, %v21158_v53  ;;  %v21165_v53 = vld [vmem:[#allocation34_spill] sm:$0xff] }
 0x458   : > { %vm21166_vm9 = vnez %v21165_v53  ;;  %v21174_v53 = vld [vmem:[#allocation70_spill] sm:$0xff] }
 0x459   : > { %v7548_v51 = vsel %vm21166_vm9, %v21164_v8, 0.0 }
 0x45a   : > { %14030 = vmatmul.mubr.msk.f32.gmra.mrb[24].mxu1 %vm5400_vm12, %v7544_v29  ;;  %v21168_v29 = vld [vmem:[#allocation43_spill] sm:$0xff] }
 0x45b   : > { %14032 = vmatprep.mubr.msk.f32.mxu1 %vm5400_vm12, %v21161_v47  ;;  %v21169_v47 = vld [vmem:[#allocation37_spill] sm:$0xff] }
 0x45c   : > { %vm21170_vm10 = vnez %v21169_v47  ;;  %v21178_v47 = vld [vmem:[#allocation72_spill] sm:$0xff] }
 0x45d   : > { %v7550_v49 = vsel %vm21170_vm10, %v21168_v29, 0.0 }
 0x45e   : > { %14033 = vmatmul.mubr.msk.f32.gmra.mrb[26].mxu1 %vm5400_vm12, %v7546_v39  ;;  %v21172_v39 = vld [vmem:[#allocation69_spill] sm:$0xff] }
 0x45f   : > { %14035 = vmatprep.mubr.msk.f32.mxu1 %vm5400_vm12, %v21163_v40  ;;  %v7552_v38 = vsel %vm21083_vm15, %v21172_v39, 0.0  ;;  %v21182_v40 = vld [vmem:[#allocation74_spill] sm:$0xff] }
 0x462   : > { %14036 = vmatmul.mubr.msk.f32.gmra.mrb[28].mxu1 %vm5400_vm12, %v7548_v51  ;;  %v21175_v51 = vld [vmem:[#allocation71_spill] sm:$0xff] }
 0x463   : > { %14038 = vmatprep.mubr.msk.f32.mxu1 %vm5400_vm12, %v21167_v25  ;;  %v21176_v25 = vld [vmem:[#allocation46_spill] sm:$0xff] }
 0x464   : > { %vm21177_vm9 = vnez %v21176_v25  ;;  %v21185_v25 = vld [vmem:[#allocation76_spill] sm:$0xff] }
 0x465   : > { %v7554_v8 = vsel %vm21177_vm9, %v21175_v51, 0.0 }
 0x466   : > { %14039 = vmatmul.mubr.msk.f32.gmra.mrb[30].mxu1 %vm5400_vm12, %v7550_v49  ;;  %v21179_v49 = vld [vmem:[#allocation73_spill] sm:$0xff] }
 0x467   : > { %14041 = vmatprep.mubr.msk.f32.mxu1 %vm5400_vm12, %v21171_v45  ;;  %v21180_v45 = vld [vmem:[#allocation51_spill] sm:$0xff] }
 0x468   : > { %vm21181_vm10 = vnez %v21180_v45  ;;  %v21188_v45 = vld [vmem:[#allocation78_spill] sm:$0xff] }
 0x469   : > { %v7556_v29 = vsel %vm21181_vm10, %v21179_v49, 0.0 }
 0x46a   : > { %14042 = vmatmul.mubr.msk.f32.gmra.mrb[32].mxu1 %vm5400_vm12, %v7552_v38  ;;  %v21183_v38 = vld [vmem:[#allocation75_spill] sm:$0xff] }
 0x46b   : > { %14044 = vmatprep.mubr.msk.f32.mxu1 %vm5400_vm12, %v21174_v53  ;;  %v7558_v39 = vsel %vm21094_vm11, %v21183_v38, 0.0  ;;  %v18560_v53 = vld [vmem:[#allocation3 + $0x109] sm:$0xff] }
 0x46e   : > { %14045 = vmatmul.mubr.msk.f32.gmra.mrb[34].mxu1 %vm5400_vm12, %v7554_v8  ;;  %v21186_v8 = vld [vmem:[#allocation77_spill] sm:$0xff] }
 0x46f   : > { %14047 = vmatprep.mubr.msk.f32.mxu1 %vm5400_vm12, %v21178_v47  ;;  %v7560_v51 = vsel %vm21098_vm14, %v21186_v8, 0.0  ;;  %v7920_v47 = vld [vmem:[#allocation3 + $0x27] sm:$0xff] }
 0x472   : > { %14048 = vmatmul.mubr.msk.f32.gmra.mrb[36].mxu1 %vm5400_vm12, %v7556_v29  ;;  %v7952_v29 = vsel %vm21026_vm1, %v7920_v47, 0.0  ;;  %vm21195_vm1 = vnez %v20773_v7 }
 0x473   : > { %14050 = vmatprep.mubr.msk.f32.mxu1 %vm5400_vm12, %v21182_v40  ;;  %v7562_v40 = vsel %vm16916_vm0, %v18284_v1, 0.0  ;;  %v7921_v1 = vld [vmem:[#allocation3 + $0x2f] sm:$0xff] }
 0x476   : > { %14051 = vmatmul.mubr.msk.f32.gmra.mrb[38].mxu1 %vm5400_vm12, %v7558_v39  ;;  %v18562_v39 = vld [vmem:[#allocation3 + $0x111] sm:$0xff] }
 0x477   : > { %14053 = vmatprep.mubr.msk.f32.mxu1 %vm5400_vm12, %v21185_v25  ;;  %21190 = vst [vmem:[#allocation48_spill] sm:$0xff] %v18562_v39 }
 0x47a   : > { %14054 = vmatmul.mubr.msk.f32.gmra.mrb[40].mxu1 %vm5400_vm12, %v7560_v51  ;;  %v7564_v51 = vsel %vm21024_vm2, %v18562_v39, 0.0  ;;  %v7925_v39 = vld [vmem:[#allocation3 + $0x4f] sm:$0xff] }
 0x47b   : > { %14056 = vmatprep.mubr.msk.f32.mxu1 %vm5400_vm12, %v21188_v45  ;;  %v18576_v45 = vld [vmem:[%s20377_s3 + $0x40] sm:$0xff] }
 0x47e   : > { %14057 = vmatmul.mubr.msk.f32.gmra.mrb[42].mxu1 %vm5400_vm12, %v7562_v40  ;;  %v7922_v40 = vld [vmem:[#allocation3 + $0x37] sm:$0xff] }
 0x47f   : > { %14059 = vmatprep.mubr.msk.f32.mxu1 %vm5400_vm12, %v18560_v53  ;;  %v7954_v8 = vsel %vm16403_vm3, %v7922_v40, 0.0  ;;  %vm21192_vm3 = vnez %v20767_v48  ;;  %v7966_v48 = vsel %vm21195_vm1, %v17904_v34, 0.0  ;;  %vm21199_vm1 = vnez %v20786_v19  ;;  %v7951_v19 = vld [vmem:[#allocation3 + $0x11f] sm:$0xff] }
 0x480   : > { %v21206_v34 = vld [vmem:[#allocation65_spill] sm:$0xff] }
 0x481   : > { %v21234_v40 = vld [vmem:[#allocation25_spill] sm:$0xff] }
 0x482   : > { %14060 = vmatmul.mubr.msk.f32.gmra.mrb[44].mxu1 %vm5400_vm12, %v7564_v51  ;;  %v7924_v51 = vld [vmem:[#allocation3 + $0x47] sm:$0xff] }
 0x483   : > { %14064 = vmatprep.mubr.msk.f32.mxu1 %vm5400_vm12, %v7952_v29  ;;  %v7956_v47 = vsel %vm16420_vm4, %v7924_v51, 0.0  ;;  %v7926_v29 = vld [vmem:[#allocation3 + $0x57] sm:$0xff]  ;;  %vm21193_vm4 = vnez %v20769_v56 }
 0x486   : > { %14065 = vmatmul.mubr.msk.f32.vlgmr.msra.gmra.mrb[14].mxu1 %vm5400_vm12, %v7921_v1  ;;  %v7958_v1 = vsel %vm16445_vm5, %v7926_v29, 0.0  ;;  %vm21194_vm5 = vnez %v20771_v55 }
 0x487   : > { %14067 = vmatprep.mubr.msk.f32.mxu1 %vm5400_vm12, %v7954_v8  ;;  %14113 = vmatpush3.msra.mxu1 %v12074_v54  ;;  %v7927_v54 = vld [vmem:[#allocation3 + $0x5f] sm:$0xff]  ;;  %v7960_v8 = vsel %vm21192_vm3, %v7928_v36, 0.0  ;;  %v7964_v44 = vsel %vm21194_vm5, %v17880_v23, 0.0  ;;  %vm21196_vm3 = vnez %v20775_v21  ;;  %vm21198_vm5 = vnez %v20779_v41  ;;  %v21241_v36 = vld [vmem:[#allocation66_spill] sm:$0xff] }
 0x488   : > { %14162 = vmatprep.subr.mxu1 %v18576_v45  ;;  %v7968_v56 = vsel %vm21196_vm3, %v17928_v58, 0.0  ;;  %v7972_v7 = vsel %vm21198_vm5, %v17956_v63, 0.0  ;;  %v7974_v21 = vsel %vm21115_vm7, %v17969_v30, 0.0  ;;  %v7978_v41 = vsel %vm21199_vm1, %v17992_v42, 0.0  ;;  %v21204_v23 = vld [vmem:[#allocation61_spill] sm:$0xff]  ;;  %v21208_v58 = vld [vmem:[#allocation42_spill] sm:$0xff] }
 0x489   : > { %vm21200_vm7 = vnez %v20788_v35  ;;  %v21202_v35 = vld [vmem:[#allocation58_spill] sm:$0xff]  ;;  %v21212_v63 = vld [vmem:[#allocation23_spill] sm:$0xff]  ;;  %v21218_v42 = vld [vmem:[#allocation8_spill] sm:$0xff]  ;;  %vm21235_vm1 = vnez %v21234_v40 }
 0x48a   : > { %14068 = vmatmul.mubr.msk.f32.gmra.mrb[16].mxu1 %vm5400_vm12, %v7923_v59  ;;  %v7980_v50 = vsel %vm21200_vm7, %v18384_v18, 0.0  ;;  %v21214_v30 = vld [vmem:[#allocation26_spill] sm:$0xff] }
 0x48b   : > { %14070 = vmatprep.mubr.msk.f32.mxu1 %vm5400_vm12, %v7956_v47  ;;  %v21237_v59 = vld [vmem:[#allocation54_spill] sm:$0xff]  ;;  %v21238_v47 = vld [vmem:[#allocation28_spill] sm:$0xff] }
 0x48c   : > { %vm21239_vm7 = vnez %v21238_v47 }
 0x48d   : > { %v8769_v29 = vsel %vm21239_vm7, %v21237_v59, 0.0 }
 0x48e   : > { %14071 = vmatmul.mubr.msk.f32.gmra.mrb[18].mxu1 %vm5400_vm12, %v7925_v39  ;;  %v7962_v39 = vsel %vm21193_vm4, %v17857_v16, 0.0  ;;  %vm21197_vm4 = vnez %v20777_v33  ;;  %v7976_v33 = vsel %vm21116_vm8, %v17981_v22, 0.0  ;;  %vm21201_vm8 = vnez %v20790_v5  ;;  %v21203_v5 = vld [vmem:[#allocation62_spill] sm:$0xff]  ;;  %v21216_v22 = vld [vmem:[#allocation29_spill] sm:$0xff] }
 0x48f   : > { %14073 = vmatprep.mubr.msk.f32.mxu1 %vm5400_vm12, %v7958_v1  ;;  %v7970_v55 = vsel %vm21197_vm4, %v17942_v52, 0.0  ;;  %v7982_v16 = vsel %vm21201_vm8, %v7950_v3, 0.0  ;;  %v21210_v52 = vld [vmem:[#allocation17_spill] sm:$0xff]  ;;  %v21240_v1 = vld [vmem:[#allocation59_spill] sm:$0xff] }
 0x492   : > { %14074 = vmatmul.mubr.msk.f32.gmra.mrb[20].mxu1 %vm5400_vm12, %v7927_v54 }
 0x493   : > { %14076 = vmatprep.mubr.msk.f32.mxu1 %vm5400_vm12, %v7960_v8  ;;  %v8771_v8 = vsel %vm21075_vm13, %v21241_v36, 0.0 }
 0x496   : > { %14077 = vmatmul.mubr.msk.f32.gmra.mrb[22].mxu1 %vm5400_vm12, %v7929_v27  ;;  %v21243_v27 = vld [vmem:[#allocation67_spill] sm:$0xff] }
 0x497   : > { %14079 = vmatprep.mubr.msk.f32.mxu1 %vm5400_vm12, %v7962_v39  ;;  %v21244_v39 = vld [vmem:[#allocation43_spill] sm:$0xff] }
 0x49a   : > { %14080 = vmatmul.mubr.msk.f32.gmra.mrb[24].mxu1 %vm5400_vm12, %v17878_v37  ;;  %v9145_v37 = vld [vmem:[%s20380_s6] sm:$0xff] }
 0x49b   : > { %14082 = vmatprep.mubr.msk.f32.mxu1 %vm5400_vm12, %v7964_v44  ;;  %14212 = vmatprep.subr.mxu0 %v9145_v37  ;;  %v21245_v44 = vld [vmem:[#allocation34_spill] sm:$0xff] }
 0x49c   : > { %14213 = vmatpush3.msra.mxu0 %v9145_v37  ;;  %v8779_v37 = vsel %vm21177_vm9, %v21179_v49, 0.0  ;;  %v21260_v49 = vld [vmem:[#allocation78_spill] sm:$0xff]  ;;  %vm19175_vm9 = vmpackc.low %vm5400_vm12, %vm5400_vm12 }
 0x49e   : > { %14083 = vmatmul.mubr.msk.f32.gmra.mrb[26].mxu1 %vm5400_vm12, %v17902_v46  ;;  %v21205_v46 = vld [vmem:[#allocation64_spill] sm:$0xff] }
 0x49f   : > { %14085 = vmatprep.mubr.msk.f32.mxu1 %vm5400_vm12, %v7966_v48 }
 0x4a2   : > { %14086 = vmatmul.mubr.msk.f32.gmra.mrb[28].mxu1 %vm5400_vm12, %v17922_v28  ;;  %v21207_v28 = vld [vmem:[#allocation38_spill] sm:$0xff] }
 0x4a3   : > { %14088 = vmatprep.mubr.msk.f32.mxu1 %vm5400_vm12, %v7968_v56  ;;  %v21247_v56 = vld [vmem:[#allocation11_spill] sm:$0xff] }
 0x4a6   : > { %14089 = vmatmul.mubr.msk.f32.gmra.mrb[30].mxu1 %vm5400_vm12, %v17936_v24  ;;  %v21209_v24 = vld [vmem:[#allocation12_spill] sm:$0xff] }
 0x4a7   : > { %14091 = vmatprep.mubr.msk.f32.mxu1 %vm5400_vm12, %v7970_v55  ;;  %v21248_v55 = vld [vmem:[#allocation69_spill] sm:$0xff] }
 0x4aa   : > { %14092 = vmatmul.mubr.msk.f32.gmra.mrb[32].mxu1 %vm5400_vm12, %v17950_v43  ;;  %v21211_v43 = vld [vmem:[#allocation20_spill] sm:$0xff] }
 0x4ab   : > { %14094 = vmatprep.mubr.msk.f32.mxu1 %vm5400_vm12, %v7972_v7  ;;  %v21249_v7 = vld [vmem:[#allocation37_spill] sm:$0xff] }
 0x4ac   : > { %vm21250_vm8 = vnez %v21249_v7 }
 0x4ae   : > { %14095 = vmatmul.mubr.msk.f32.gmra.mrb[34].mxu1 %vm5400_vm12, %v17964_v60  ;;  %v21213_v60 = vld [vmem:[#allocation24_spill] sm:$0xff] }
 0x4af   : > { %14097 = vmatprep.mubr.msk.f32.mxu1 %vm5400_vm12, %v7974_v21  ;;  %v8775_v21 = vsel %vm21250_vm8, %v21248_v55, 0.0 }
 0x4b2   : > { %14098 = vmatmul.mubr.msk.f32.gmra.mrb[36].mxu1 %vm5400_vm12, %v17976_v57  ;;  %v21215_v57 = vld [vmem:[#allocation27_spill] sm:$0xff] }
 0x4b3   : > { %14100 = vmatprep.mubr.msk.f32.mxu1 %vm5400_vm12, %v7976_v33  ;;  %v21251_v33 = vld [vmem:[#allocation70_spill] sm:$0xff] }
 0x4b6   : > { %14101 = vmatmul.mubr.msk.f32.gmra.mrb[38].mxu1 %vm5400_vm12, %v17988_v0  ;;  %v21217_v0 = vld [vmem:[#allocation30_spill] sm:$0xff] }
 0x4b7   : > { %14103 = vmatprep.mubr.msk.f32.mxu1 %vm5400_vm12, %v7978_v41  ;;  %v21252_v41 = vld [vmem:[#allocation71_spill] sm:$0xff] }
 0x4b8   : > { %v8777_v3 = vsel %vm21083_vm15, %v21252_v41, 0.0 }
 0x4ba   : > { %14104 = vmatmul.mubr.msk.f32.gmra.mrb[40].mxu1 %vm5400_vm12, %v17998_v6  ;;  %v8369_v6 = vld [vmem:[#allocation3 + $0x118] sm:$0xff] }
 0x4bb   : > { %14106 = vmatprep.mubr.msk.f32.mxu1 %vm5400_vm12, %v7980_v50 }
 0x4be   : > { %14107 = vmatmul.mubr.msk.f32.gmra.mrb[42].mxu1 %vm5400_vm12, %v18392_v31  ;;  %v21223_v31 = vld [vmem:[#allocation35_spill] sm:$0xff] }
 0x4bf   : > { %14109 = vmatprep.mubr.msk.f32.mxu1 %vm5400_vm12, %v7982_v16  ;;  %v21254_v16 = vld [vmem:[#allocation72_spill] sm:$0xff] }
 0x4c2   : > { %14110 = vmatmul.mubr.msk.f32.gmra.mrb[44].mxu1 %vm5400_vm12, %v7951_v19 }
 0x4c3   : > { %14114 = vmatprep.mubr.msk.f32.mxu1 %vm5400_vm12, %v18019_v10  ;;  %v21219_v10 = vld [vmem:[#allocation47_spill] sm:$0xff] }
 0x4c6   : > { %14115 = vmatmul.mubr.msk.f32.vlgmr.msra.gmra.mrb[14].mxu1 %vm5400_vm12, %v18023_v2  ;;  %v8370_v2 = vld [vmem:[#allocation3 + $0x120] sm:$0xff] }
 0x4c7   : > { %14117 = vmatprep.mubr.msk.f32.mxu1 %vm5400_vm12, %v18027_v26  ;;  %14163 = vmatpush3.msra.mxu1 %v18576_v45  ;;  %v21220_v26 = vld [vmem:[#allocation33_spill] sm:$0xff] }
 0x4c8   : > { %v21233_v45 = vld [vmem:[#allocation45_spill] sm:$0xff] }
 0x4c9   : > { %v8767_v51 = vsel %vm21235_vm1, %v21233_v45, 0.0 }
 0x4ca   : > { %14118 = vmatmul.mubr.msk.f32.gmra.mrb[16].mxu1 %vm5400_vm12, %v18031_v17  ;;  %v21221_v17 = vld [vmem:[#allocation13_spill] sm:$0xff] }
 0x4cb   : > { %14120 = vmatprep.mubr.msk.f32.mxu1 %vm5400_vm12, %v21118_v15  ;;  %vm21222_vm3 = vnez %v21221_v17  ;;  %v21224_v15 = vld [vmem:[#allocation16_spill] sm:$0xff] }
 0x4cc   : > { %v8759_v18 = vsel %vm21222_vm3, %v18154_v11, 0.0  ;;  %vm21225_vm4 = vnez %v21224_v15  ;;  %v21229_v11 = vld [vmem:[#allocation39_spill] sm:$0xff] }
 0x4ce   : > { %14121 = vmatmul.mubr.msk.f32.gmra.mrb[18].mxu1 %vm5400_vm12, %v21119_v13  ;;  %v8761_v13 = vsel %vm21225_vm4, %v18164_v14, 0.0  ;;  %v21232_v14 = vld [vmem:[#allocation44_spill] sm:$0xff] }
 0x4cf   : > { %14123 = vmatprep.mubr.msk.f32.mxu1 %vm5400_vm12, %v21120_v9  ;;  %v21226_v9 = vld [vmem:[#allocation36_spill] sm:$0xff] }
 0x4d2   : > { %14124 = vmatmul.mubr.msk.f32.gmra.mrb[20].mxu1 %vm5400_vm12, %v21121_v4  ;;  %v21227_v4 = vld [vmem:[#allocation19_spill] sm:$0xff] }
 0x4d3   : > { %14126 = vmatprep.mubr.msk.f32.mxu1 %vm5400_vm12, %v21122_v20  ;;  %vm21228_vm5 = vnez %v21227_v4 }
 0x4d4   : > { %v8763_v20 = vsel %vm21228_vm5, %v18174_v12, 0.0  ;;  %v21236_v12 = vld [vmem:[#allocation49_spill] sm:$0xff] }
 0x4d6   : > { %14127 = vmatmul.mubr.msk.f32.gmra.mrb[22].mxu1 %vm5400_vm12, %v21123_v32  ;;  %v21230_v32 = vld [vmem:[#allocation40_spill] sm:$0xff] }
 0x4d7   : > { %14129 = vmatprep.mubr.msk.f32.mxu1 %vm5400_vm12, %v21202_v35  ;;  %v21256_v35 = vld [vmem:[#allocation74_spill] sm:$0xff] }
 0x4da   : > { %14130 = vmatmul.mubr.msk.f32.gmra.mrb[24].mxu1 %vm5400_vm12, %v21203_v5 }
 0x4db   : > { %14132 = vmatprep.mubr.msk.f32.mxu1 %vm5400_vm12, %v21204_v23  ;;  %v8781_v23 = vsel %vm21181_vm10, %v21183_v38, 0.0  ;;  %v8756_v38 = vld [vmem:[#allocation3 + $0x119] sm:$0xff] }
 0x4de   : > { %14133 = vmatmul.mubr.msk.f32.gmra.mrb[26].mxu1 %vm5400_vm12, %v21205_v46  ;;  %v21258_v46 = vld [vmem:[#allocation77_spill] sm:$0xff] }
 0x4df   : > { %14135 = vmatprep.mubr.msk.f32.mxu1 %vm5400_vm12, %v21206_v34 }
 0x4e2   : > { %14136 = vmatmul.mubr.msk.f32.gmra.mrb[28].mxu1 %vm5400_vm12, %v21207_v28  ;;  %v8783_v28 = vsel %vm21094_vm11, %v21258_v46, 0.0 }
 0x4e3   : > { %14138 = vmatprep.mubr.msk.f32.mxu1 %vm5400_vm12, %v21208_v58  ;;  %v21261_v58 = vld [vmem:[#allocation79_spill] sm:$0xff] }
 0x4e6   : > { %14139 = vmatmul.mubr.msk.f32.gmra.mrb[30].mxu1 %vm5400_vm12, %v21209_v24 }
 0x4e7   : > { %14141 = vmatprep.mubr.msk.f32.mxu1 %vm5400_vm12, %v21210_v52  ;;  %v8785_v52 = vsel %vm21098_vm14, %v21261_v58, 0.0 }
 0x4ea   : > { %14142 = vmatmul.mubr.msk.f32.gmra.mrb[32].mxu1 %vm5400_vm12, %v21133_v62 }
 0x4eb   : > { %14144 = vmatprep.mubr.msk.f32.mxu1 %vm5400_vm12, %v21211_v43  ;;  %v21263_v43 = vld [vmem:[#allocation48_spill] sm:$0xff] }
 0x4ee   : > { %14145 = vmatmul.mubr.msk.f32.gmra.mrb[34].mxu1 %vm5400_vm12, %v21135_v61  ;;  %v8765_v61 = vsel %vm21154_vm6, %v21230_v32, 0.0  ;;  %vm21246_vm6 = vnez %v21245_v44 }
 0x4ef   : > { %14147 = vmatprep.mubr.msk.f32.mxu1 %vm5400_vm12, %v21212_v63  ;;  %v8773_v48 = vsel %vm21246_vm6, %v21244_v39, 0.0 }
 0x4f2   : > { %14148 = vmatmul.mubr.msk.f32.gmra.mrb[36].mxu1 %vm5400_vm12, %v21213_v60  ;;  %v8787_v60 = vsel %vm16916_vm0, %v21263_v43, 0.0 }
 0x4f3   : > { %14150 = vmatprep.mubr.msk.f32.mxu1 %vm5400_vm12, %v21214_v30 }
 0x4f6   : > { %14151 = vmatmul.mubr.msk.f32.gmra.mrb[38].mxu1 %vm5400_vm12, %v21215_v57 }
 0x4f7   : > { %14153 = vmatprep.mubr.msk.f32.mxu1 %vm5400_vm12, %v21216_v22  ;;  %v18823_v22 = vld [vmem:[%s20379_s5] ss:$0 sm:$0xff] }
 0x4fa   : > { %14154 = vmatmul.mubr.msk.f32.gmra.mrb[40].mxu1 %vm5400_vm12, %v21217_v0 }
 0x4fb   : > { %14156 = vmatprep.mubr.msk.f32.mxu1 %vm5400_vm12, %v21218_v42 }
 0x4fe   : > { %14157 = vmatmul.mubr.msk.f32.gmra.mrb[42].mxu1 %vm5400_vm12, %v21219_v10 }
 0x4ff   : > { %14159 = vmatprep.mubr.msk.f32.mxu1 %vm5400_vm12, %v8369_v6 }
 0x502   : > { %14160 = vmatmul.mubr.msk.f32.gmra.mrb[44].mxu1 %vm5400_vm12, %v8370_v2 }
 0x503   : > { %14164 = vmatprep.mubr.msk.f32.mxu1 %vm5400_vm12, %v21220_v26 }
 0x506   : > { %14165 = vmatmul.mubr.msk.f32.vlgmr.msra.gmra.mrb[14].mxu1 %vm5400_vm12, %v8759_v18 }
 0x507   : > { %14167 = vmatprep.mubr.msk.f32.mxu1 %vm5400_vm12, %v21223_v31 }
 0x50a   : > { %14168 = vmatmul.mubr.msk.f32.gmra.mrb[16].mxu1 %vm5400_vm12, %v8761_v13 }
 0x50b   : > { %14170 = vmatprep.mubr.msk.f32.mxu1 %vm5400_vm12, %v21226_v9 }
 0x50e   : > { %14171 = vmatmul.mubr.msk.f32.gmra.mrb[18].mxu1 %vm5400_vm12, %v8763_v20 }
 0x50f   : > { %14173 = vmatprep.mubr.msk.f32.mxu1 %vm5400_vm12, %v21229_v11 }
 0x512   : > { %14174 = vmatmul.mubr.msk.f32.gmra.mrb[20].mxu1 %vm5400_vm12, %v8765_v61 }
 0x513   : > { %14176 = vmatprep.mubr.msk.f32.mxu1 %vm5400_vm12, %v21232_v14 }
 0x516   : > { %14177 = vmatmul.mubr.msk.f32.gmra.mrb[22].mxu1 %vm5400_vm12, %v8767_v51 }
 0x517   : > { %14179 = vmatprep.mubr.msk.f32.mxu1 %vm5400_vm12, %v21236_v12 }
 0x51a   : > { %14180 = vmatmul.mubr.msk.f32.gmra.mrb[24].mxu1 %vm5400_vm12, %v8769_v29 }
 0x51b   : > { %14182 = vmatprep.mubr.msk.f32.mxu1 %vm5400_vm12, %v21240_v1 }
 0x51e   : > { %14183 = vmatmul.mubr.msk.f32.gmra.mrb[26].mxu1 %vm5400_vm12, %v8771_v8 }
 0x51f   : > { %14185 = vmatprep.mubr.msk.f32.mxu1 %vm5400_vm12, %v21243_v27 }
 0x522   : > { %14186 = vmatmul.mubr.msk.f32.gmra.mrb[28].mxu1 %vm5400_vm12, %v8773_v48 }
 0x523   : > { %14188 = vmatprep.mubr.msk.f32.mxu1 %vm5400_vm12, %v21247_v56 }
 0x526   : > { %14189 = vmatmul.mubr.msk.f32.gmra.mrb[30].mxu1 %vm5400_vm12, %v8775_v21 }
 0x527   : > { %14191 = vmatprep.mubr.msk.f32.mxu1 %vm5400_vm12, %v21251_v33 }
 0x52a   : > { %14192 = vmatmul.mubr.msk.f32.gmra.mrb[32].mxu1 %vm5400_vm12, %v8777_v3 }
 0x52b   : > { %14194 = vmatprep.mubr.msk.f32.mxu1 %vm5400_vm12, %v21254_v16 }
 0x52e   : > { %14195 = vmatmul.mubr.msk.f32.gmra.mrb[34].mxu1 %vm5400_vm12, %v8779_v37 }
 0x52f   : > { %14197 = vmatprep.mubr.msk.f32.mxu1 %vm5400_vm12, %v21256_v35 }
 0x532   : > { %14198 = vmatmul.mubr.msk.f32.gmra.mrb[36].mxu1 %vm5400_vm12, %v8781_v23 }
 0x533   : > { %14200 = vmatprep.mubr.msk.f32.mxu1 %vm5400_vm12, %v21185_v25  ;;  %v8757_v25 = vld [vmem:[#allocation3 + $0x121] sm:$0xff] }
 0x534   : > { %v8789_v57 = vsel %vm21024_vm2, %v8757_v25, 0.0 }
 0x536   : > { %14201 = vmatmul.mubr.msk.f32.gmra.mrb[38].mxu1 %vm5400_vm12, %v8783_v28 }
 0x537   : > { %14203 = vmatprep.mubr.msk.f32.mxu1 %vm5400_vm12, %v21260_v49 }
 0x53a   : > { %14204 = vmatmul.mubr.msk.f32.gmra.mrb[40].mxu1 %vm5400_vm12, %v8785_v52 }
 0x53b   : > { %14206 = vmatprep.mubr.msk.f32.mxu1 %vm5400_vm12, %v18560_v53 }
 0x53e   : > { %14207 = vmatmul.mubr.msk.f32.gmra.mrb[42].mxu1 %vm5400_vm12, %v8787_v60 }
 0x53f   : > { %14209 = vmatprep.mubr.msk.f32.mxu1 %vm5400_vm12, %v8756_v38 }
 0x542   : > { %14210 = vmatmul.mubr.msk.f32.gmra.mrb[44].mxu1 %vm5400_vm12, %v8789_v57 }
 0x5d9   : > { %v14166_v53 = vpop.f32.mrb[14].mxu1 }
 0x5da   : > { %v18826_v0 = vadd.f32 %v14166_v53, %v18823_v22  ;;  %v8954_v42 = vpop.f32.mrb[15].mxu1 }
 0x5db   : > { %v18829_v6 = vadd.f32 %v18823_v22, %v8954_v42 }
 0x5dd   : > { %v14169_v2 = vpop.f32.mrb[16].mxu1  ;;  %14214 = vmatprep.mubr.msk.f32.mxu0 %vm5400_vm12, %v18829_v6 }
 0x5de   : > { %v18836_v26 = vadd.f32 %v14169_v2, %v18823_v22  ;;  %v8964_v17 = vpop.f32.mrb[17].mxu1  ;;  %14215 = vmatmul.mubr.msk.f32.vlgmr.msra.gmra.mrb[32].mxu0 %vm5400_vm12, %v18826_v0 }
 0x5df   : > { %v18841_v18 = vadd.f32 %v18823_v22, %v8964_v17 }
 0x5e1   : > { %v14172_v15 = vpop.f32.mrb[18].mxu1  ;;  %14217 = vmatprep.mubr.msk.f32.mxu0 %vm5400_vm12, %v18841_v18 }
 0x5e2   : > { %v18848_v13 = vadd.f32 %v14172_v15, %v18823_v22  ;;  %v8974_v9 = vpop.f32.mrb[19].mxu1  ;;  %14218 = vmatmul.mubr.msk.f32.gmra.mrb[34].mxu0 %vm5400_vm12, %v18836_v26 }
 0x5e3   : > { %v18853_v4 = vadd.f32 %v18823_v22, %v8974_v9 }
 0x5e5   : > { %v14175_v11 = vpop.f32.mrb[20].mxu1  ;;  %14220 = vmatprep.mubr.msk.f32.mxu0 %vm5400_vm12, %v18853_v4 }
 0x5e6   : > { %v18860_v32 = vadd.f32 %v14175_v11, %v18823_v22  ;;  %v8984_v62 = vpop.f32.mrb[21].mxu1  ;;  %14221 = vmatmul.mubr.msk.f32.gmra.mrb[36].mxu0 %vm5400_vm12, %v18848_v13 }
 0x5e7   : > { %v18865_v61 = vadd.f32 %v18823_v22, %v8984_v62 }
 0x5e9   : > { %v14178_v45 = vpop.f32.mrb[22].mxu1  ;;  %14223 = vmatprep.mubr.msk.f32.mxu0 %vm5400_vm12, %v18865_v61 }
 0x5ea   : > { %v18872_v40 = vadd.f32 %v14178_v45, %v18823_v22  ;;  %v8994_v51 = vpop.f32.mrb[23].mxu1  ;;  %14224 = vmatmul.mubr.msk.f32.gmra.mrb[38].mxu0 %vm5400_vm12, %v18860_v32 }
 0x5eb   : > { %v18877_v12 = vadd.f32 %v18823_v22, %v8994_v51 }
 0x5ed   : > { %v14181_v47 = vpop.f32.mrb[24].mxu1  ;;  %14226 = vmatprep.mubr.msk.f32.mxu0 %vm5400_vm12, %v18877_v12 }
 0x5ee   : > { %v18884_v29 = vadd.f32 %v14181_v47, %v18823_v22  ;;  %v9004_v1 = vpop.f32.mrb[25].mxu1  ;;  %14227 = vmatmul.mubr.msk.f32.gmra.mrb[40].mxu0 %vm5400_vm12, %v18872_v40 }
 0x5ef   : > { %v18889_v36 = vadd.f32 %v18823_v22, %v9004_v1 }
 0x5f1   : > { %v14184_v8 = vpop.f32.mrb[26].mxu1  ;;  %14229 = vmatprep.mubr.msk.f32.mxu0 %vm5400_vm12, %v18889_v36 }
 0x5f2   : > { %v18896_v27 = vadd.f32 %v14184_v8, %v18823_v22  ;;  %v9014_v39 = vpop.f32.mrb[27].mxu1  ;;  %14230 = vmatmul.mubr.msk.f32.gmra.mrb[42].mxu0 %vm5400_vm12, %v18884_v29 }
 0x5f3   : > { %v18901_v44 = vadd.f32 %v18823_v22, %v9014_v39 }
 0x5f4   : > { %21266 = vst [vmem:[#allocation9_spill] sm:$0xff] %v18896_v27 }
 0x5f5   : > { %21267 = vst [vmem:[#allocation52_spill] sm:$0xff] %v18901_v44  ;;  %v14187_v56 = vpop.f32.mrb[28].mxu1  ;;  %14232 = vmatprep.mubr.msk.f32.mxu0 %vm5400_vm12, %v18901_v44 }
 0x5f6   : > { %v18908_v55 = vadd.f32 %v14187_v56, %v18823_v22  ;;  %v9024_v7 = vpop.f32.mrb[29].mxu1  ;;  %14233 = vmatmul.mubr.msk.f32.gmra.mrb[44].mxu0 %vm5400_vm12, %v18896_v27 }
 0x5f7   : > { %v18913_v21 = vadd.f32 %v18823_v22, %v9024_v7 }
 0x5f8   : > { %21268 = vst [vmem:[#allocation10_spill] sm:$0xff] %v18908_v55 }
 0x5f9   : > { %21269 = vst [vmem:[#allocation53_spill] sm:$0xff] %v18913_v21  ;;  %v14190_v41 = vpop.f32.mrb[30].mxu1  ;;  %14235 = vmatprep.mubr.msk.f32.mxu0 %vm5400_vm12, %v18913_v21 }
 0x5fa   : > { %v18920_v50 = vadd.f32 %v14190_v41, %v18823_v22  ;;  %v9034_v3 = vpop.f32.mrb[31].mxu1  ;;  %14236 = vmatmul.mubr.msk.f32.gmra.mrb[46].mxu0 %vm5400_vm12, %v18908_v55 }
 0x5fb   : > { %v18925_v16 = vadd.f32 %v18823_v22, %v9034_v3  ;;  %v19020_v3 = vld [vmem:[%s20381_s7] ss:$0 sm:$0xff] }
 0x5fd   : > { %v14193_v37 = vpop.f32.mrb[32].mxu1  ;;  %14238 = vmatprep.mubr.msk.f32.mxu0 %vm5400_vm12, %v18925_v16 }
 0x5fe   : > { %v18932_v35 = vadd.f32 %v14193_v37, %v18823_v22  ;;  %v9044_v5 = vpop.f32.mrb[33].mxu1  ;;  %14239 = vmatmul.mubr.msk.f32.gmra.mrb[48].mxu0 %vm5400_vm12, %v18920_v50 }
 0x5ff   : > { %v18937_v23 = vadd.f32 %v18823_v22, %v9044_v5 }
 0x601   : > { %v14196_v34 = vpop.f32.mrb[34].mxu1  ;;  %14241 = vmatprep.mubr.msk.f32.mxu0 %vm5400_vm12, %v18937_v23 }
 0x602   : > { %v18944_v28 = vadd.f32 %v14196_v34, %v18823_v22  ;;  %v9054_v49 = vpop.f32.mrb[35].mxu1  ;;  %14242 = vmatmul.mubr.msk.f32.gmra.mrb[50].mxu0 %vm5400_vm12, %v18932_v35 }
 0x603   : > { %v18949_v58 = vadd.f32 %v18823_v22, %v9054_v49 }
 0x605   : > { %v14199_v52 = vpop.f32.mrb[36].mxu1  ;;  %14244 = vmatprep.mubr.msk.f32.mxu0 %vm5400_vm12, %v18949_v58 }
 0x606   : > { %v18956_v38 = vadd.f32 %v14199_v52, %v18823_v22  ;;  %v9064_v25 = vpop.f32.mrb[37].mxu1  ;;  %14245 = vmatmul.mubr.msk.f32.gmra.mrb[52].mxu0 %vm5400_vm12, %v18944_v28 }
 0x607   : > { %v18961_v43 = vadd.f32 %v18823_v22, %v9064_v25 }
 0x609   : > { %v14202_v60 = vpop.f32.mrb[38].mxu1  ;;  %14247 = vmatprep.mubr.msk.f32.mxu0 %vm5400_vm12, %v18961_v43 }
 0x60a   : > { %v18968_v30 = vadd.f32 %v14202_v60, %v18823_v22  ;;  %v9074_v57 = vpop.f32.mrb[39].mxu1  ;;  %14248 = vmatmul.mubr.msk.f32.gmra.mrb[54].mxu0 %vm5400_vm12, %v18956_v38 }
 0x60b   : > { %v18973_v53 = vadd.f32 %v18823_v22, %v9074_v57 }
 0x60d   : > { %v14205_v2 = vpop.f32.mrb[40].mxu1  ;;  %14250 = vmatprep.mubr.msk.f32.mxu0 %vm5400_vm12, %v18973_v53 }
 0x60e   : > { %v18980_v17 = vadd.f32 %v14205_v2, %v18823_v22  ;;  %v9084_v15 = vpop.f32.mrb[41].mxu1  ;;  %14251 = vmatmul.mubr.msk.f32.gmra.mrb[56].mxu0 %vm5400_vm12, %v18968_v30 }
 0x60f   : > { %v18985_v9 = vadd.f32 %v18823_v22, %v9084_v15 }
 0x611   : > { %v14208_v62 = vpop.f32.mrb[42].mxu1  ;;  %14253 = vmatprep.mubr.msk.f32.mxu0 %vm5400_vm12, %v18985_v9 }
 0x612   : > { %v18992_v45 = vadd.f32 %v14208_v62, %v18823_v22  ;;  %v9094_v51 = vpop.f32.mrb[43].mxu1  ;;  %14254 = vmatmul.mubr.msk.f32.gmra.mrb[58].mxu0 %vm5400_vm12, %v18980_v17 }
 0x613   : > { %v18997_v47 = vadd.f32 %v18823_v22, %v9094_v51 }
 0x614   : > { %21270 = vst [vmem:[#allocation57_spill] sm:$0xff] %v18992_v45 }
 0x615   : > { %21271 = vst [vmem:[#allocation14_spill] sm:$0xff] %v18997_v47  ;;  %v14211_v8 = vpop.f32.mrb[44].mxu1  ;;  %14256 = vmatprep.mubr.msk.f32.mxu0 %vm5400_vm12, %v18997_v47 }
 0x616   : > { %v19004_v39 = vadd.f32 %v14211_v8, %v18823_v22  ;;  %v9104_v56 = vpop.f32.mrb[45].mxu1  ;;  %14257 = vmatmul.mubr.msk.f32.gmra.mrb[60].mxu0 %vm5400_vm12, %v18992_v45 }
 0x617   : > { %v19009_v7 = vadd.f32 %v18823_v22, %v9104_v56 }
 0x618   : > { %21272 = vst [vmem:[#allocation15_spill] sm:$0xff] %v19004_v39 }
 0x619   : > { %21273 = vst [vmem:[#allocation50_spill] sm:$0xff] %v19009_v7  ;;  %14259 = vmatprep.mubr.msk.f32.mxu0 %vm5400_vm12, %v19009_v7 }
 0x61a   : > { %14260 = vmatmul.mubr.msk.f32.gmra.mrb[62].mxu0 %vm5400_vm12, %v19004_v39 }
 0x6b1   : > { %v19022_v37 = vpop.f32.mrb[32].mxu0 }
 0x6b2   : > { %v9315_v5 = vpop.f32.mrb[33].mxu0 }
 0x6b3   : > { %v19025_v22 = vadd.f32 %v19020_v3, %v9315_v5 }
 0x6b5   : > { %v14219_v34 = vpop.f32.mrb[34].mxu0  ;;  %14294 = vmatprep.mubr.msk.f32.mxu0 %vm5400_vm12, %v19025_v22  ;;  %14374 = vmatprep.mubr.msk.f32.mxu1 %vm5400_vm12, %v19025_v22 }
 0x6b6   : > { %v19032_v49 = vadd.f32 %v14219_v34, %v19020_v3  ;;  %v9325_v52 = vpop.f32.mrb[35].mxu0 }
 0x6b7   : > { %v19035_v25 = vadd.f32 %v19020_v3, %v9325_v52 }
 0x6b9   : > { %v14222_v60 = vpop.f32.mrb[36].mxu0 }
 0x6ba   : > { %v19038_v57 = vadd.f32 %v14222_v60, %v19020_v3  ;;  %v9335_v2 = vpop.f32.mrb[37].mxu0 }
 0x6bb   : > { %v19041_v15 = vadd.f32 %v19020_v3, %v9335_v2 }
 0x6bd   : > { %v14225_v62 = vpop.f32.mrb[38].mxu0 }
 0x6be   : > { %v19044_v51 = vadd.f32 %v14225_v62, %v19020_v3  ;;  %v9345_v8 = vpop.f32.mrb[39].mxu0 }
 0x6bf   : > { %v19047_v56 = vadd.f32 %v19020_v3, %v9345_v8 }
 0x6c1   : > { %v14228_v5 = vpop.f32.mrb[40].mxu0 }
 0x6c2   : > { %v19050_v34 = vadd.f32 %v14228_v5, %v19020_v3  ;;  %v9355_v52 = vpop.f32.mrb[41].mxu0 }
 0x6c3   : > { %v19053_v60 = vadd.f32 %v19020_v3, %v9355_v52 }
 0x6c5   : > { %v14231_v33 = vpop.f32.mrb[42].mxu0 }
 0x6c6   : > { %v19056_v2 = vadd.f32 %v14231_v33, %v19020_v3  ;;  %v9365_v41 = vpop.f32.mrb[43].mxu0 }
 0x6c7   : > { %v19059_v62 = vadd.f32 %v19020_v3, %v9365_v41 }
 0x6c9   : > { %v14234_v48 = vpop.f32.mrb[44].mxu0 }
 0x6ca   : > { %v19062_v8 = vadd.f32 %v14234_v48, %v19020_v3  ;;  %v9375_v1 = vpop.f32.mrb[45].mxu0 }
 0x6cb   : > { %v19065_v5 = vadd.f32 %v19020_v3, %v9375_v1 }
 0x6cd   : > { %v14237_v54 = vpop.f32.mrb[46].mxu0 }
 0x6ce   : > { %v19068_v52 = vadd.f32 %v14237_v54, %v19020_v3  ;;  %v9385_v11 = vpop.f32.mrb[47].mxu0 }
 0x6cf   : > { %v19071_v33 = vadd.f32 %v19020_v3, %v9385_v11 }
 0x6d1   : > { %v14240_v59 = vpop.f32.mrb[48].mxu0 }
 0x6d2   : > { %v19074_v41 = vadd.f32 %v14240_v59, %v19020_v3  ;;  %v9395_v42 = vpop.f32.mrb[49].mxu0 }
 0x6d3   : > { %v19077_v48 = vadd.f32 %v19020_v3, %v9395_v42 }
 0x6d5   : > { %v14243_v14 = vpop.f32.mrb[50].mxu0  ;;  %v15495_v1 = vpack.i.bf16 %v19074_v41, %v19077_v48 }
 0x6d6   : > { %v19082_v63 = vadd.f32 %v14243_v14, %v19020_v3  ;;  %v9405_v54 = vpop.f32.mrb[51].mxu0 }
 0x6d7   : > { %v19085_v20 = vadd.f32 %v19020_v3, %v9405_v54  ;;  %15496 = vrot.lane.b32.xlu0 %v15495_v1, %s16012_s12 }
 0x6d9   : > { %v14246_v59 = vpop.f32.mrb[52].mxu0  ;;  %v15500_v11 = vpack.i.bf16 %v19082_v63, %v19085_v20 }
 0x6da   : > { %v19091_v42 = vadd.f32 %v14246_v59, %v19020_v3  ;;  %v9415_v24 = vpop.f32.mrb[53].mxu0 }
 0x6db   : > { %v19094_v31 = vadd.f32 %v19020_v3, %v9415_v24  ;;  %15501 = vrot.lane.b32.xlu0 %v15500_v11, %s16012_s12 }
 0x6dd   : > { %v14249_v14 = vpop.f32.mrb[54].mxu0  ;;  %v15505_v54 = vpack.i.bf16 %v19091_v42, %v19094_v31 }
 0x6de   : > { %v19100_v46 = vadd.f32 %v14249_v14, %v19020_v3  ;;  %v9425_v10 = vpop.f32.mrb[55].mxu0 }
 0x6df   : > { %v19103_v19 = vadd.f32 %v19020_v3, %v9425_v10  ;;  %15506 = vrot.lane.b32.xlu1 %v15505_v54, %s16012_s12 }
 0x6e0   : > { %21274 = vst [vmem:[#allocation55_spill] sm:$0xff] %v19100_v46 }
 0x6e1   : > { %v14252_v59 = vpop.f32.mrb[56].mxu0  ;;  %v15510_v24 = vpack.i.bf16 %v19100_v46, %v19103_v19 }
 0x6e2   : > { %v19109_v21 = vadd.f32 %v14252_v59, %v19020_v3  ;;  %v9435_v55 = vpop.f32.mrb[57].mxu0 }
 0x6e3   : > { %v19112_v7 = vadd.f32 %v19020_v3, %v9435_v55  ;;  %15511 = vrot.lane.b32.xlu1 %v15510_v24, %s16012_s12 }
 0x6e4   : > { %21275 = vst [vmem:[#allocation18_spill] sm:$0xff] %v19109_v21 }
 0x6e5   : > { %21276 = vst [vmem:[#allocation21_spill] sm:$0xff] %v19112_v7  ;;  %v14255_v14 = vpop.f32.mrb[58].mxu0  ;;  %v15515_v10 = vpack.i.bf16 %v19109_v21, %v19112_v7 }
 0x6e6   : > { %v19118_v39 = vadd.f32 %v14255_v14, %v19020_v3  ;;  %v9445_v44 = vpop.f32.mrb[59].mxu0  ;;  %v19135_v14 = vadd.f32 %v19022_v37, %v19020_v3 }
 0x6e7   : > { %v19121_v27 = vadd.f32 %v19020_v3, %v9445_v44  ;;  %15516 = vrot.lane.b32.xlu0 %v15515_v10, %s16012_s12 }
 0x6e8   : > { %21277 = vst [vmem:[#allocation32_spill] sm:$0xff] %v19118_v39 }
 0x6e9   : > { %21278 = vst [vmem:[#allocation73_spill] sm:$0xff] %v19121_v27  ;;  %v14258_v59 = vpop.f32.mrb[60].mxu0  ;;  %v15520_v55 = vpack.i.bf16 %v19118_v39, %v19121_v27 }
 0x6ea   : > { %v19127_v46 = vadd.f32 %v14258_v59, %v19020_v3  ;;  %v9455_v47 = vpop.f32.mrb[61].mxu0 }
 0x6eb   : > { %v19130_v45 = vadd.f32 %v19020_v3, %v9455_v47  ;;  %15521 = vrot.lane.b32.xlu1 %v15520_v55, %s16012_s12  ;;  %v15535_v47 = vpack.i.bf16 %v19135_v14, %v19025_v22  ;;  %v15565_v22 = vpack.i.bf16 %v19062_v8, %v19065_v5 }
 0x6ec   : > { %21279 = vst [vmem:[#allocation75_spill] sm:$0xff] %v19127_v46 }
 0x6ed   : > { %21280 = vst [vmem:[#allocation76_spill] sm:$0xff] %v19130_v45  ;;  %v14261_v44 = vpop.f32.mrb[62].mxu0  ;;  %v15525_v21 = vpack.i.bf16 %v19127_v46, %v19130_v45  ;;  %v15540_v46 = vpack.i.bf16 %v19032_v49, %v19035_v25 }
 0x6ee   : > { %v19140_v7 = vadd.f32 %v14261_v44, %v19020_v3  ;;  %v9465_v39 = vpop.f32.mrb[63].mxu0  ;;  %v15545_v44 = vpack.i.bf16 %v19038_v57, %v19041_v15 }
 0x6ef   : > { %v19143_v59 = vadd.f32 %v19020_v3, %v9465_v39  ;;  %15526 = vrot.lane.b32.xlu0 %v15525_v21, %s16012_s12  ;;  %v15555_v39 = vpack.i.bf16 %v19050_v34, %v19053_v60  ;;  %v15550_v3 = vpack.i.bf16 %v19044_v51, %v19047_v56 }
 0x6f0   : > { %21281 = vst [vmem:[#allocation58_spill] sm:$0xff] %v19140_v7 }
 0x6f1   : > { %21282 = vst [vmem:[#allocation62_spill] sm:$0xff] %v19143_v59  ;;  %v15530_v37 = vpack.i.bf16 %v19140_v7, %v19143_v59  ;;  %v15560_v7 = vpack.i.bf16 %v19056_v2, %v19059_v62  ;;  %v15570_v59 = vpack.i.bf16 %v19068_v52, %v19071_v33 }
 0x6f3   : > { %15536 = vrot.lane.b32.xlu0 %v15535_v47, %s16012_s12  ;;  %15531 = vrot.lane.b32.xlu1 %v15530_v37, %s16012_s12 }
 0x6f7   : > { %15546 = vrot.lane.b32.xlu0 %v15545_v44, %s16012_s12  ;;  %15541 = vrot.lane.b32.xlu1 %v15540_v46, %s16012_s12 }
 0x6fb   : > { %15556 = vrot.lane.b32.xlu0 %v15555_v39, %s16012_s12  ;;  %15551 = vrot.lane.b32.xlu1 %v15550_v3, %s16012_s12 }
 0x6ff   : > { %15566 = vrot.lane.b32.xlu0 %v15565_v22, %s16012_s12  ;;  %15561 = vrot.lane.b32.xlu1 %v15560_v7, %s16012_s12 }
 0x703   : > { %15576 = vrot.lane.b32.xlu0 %v15495_v1, %s16013_s20  ;;  %15571 = vrot.lane.b32.xlu1 %v15570_v59, %s16012_s12 }
 0x707   : > { %15586 = vrot.lane.b32.xlu0 %v15505_v54, %s16013_s20  ;;  %15581 = vrot.lane.b32.xlu1 %v15500_v11, %s16013_s20  ;;  %v21283_v11 = vmov 0 }
 0x708   : > { %v21284_v11 = vsel %vm19175_vm9, 4294967295, %v21283_v11 }
 0x709   : > { %21285 = vst [vmem:[#allocation61_spill] sm:$0xff] %v21284_v11 }
 0x70b   : > { %15596 = vrot.lane.b32.xlu0 %v15515_v10, %s16013_s20  ;;  %15591 = vrot.lane.b32.xlu1 %v15510_v24, %s16013_s20 }
 0x70f   : > { %15606 = vrot.lane.b32.xlu0 %v15525_v21, %s16013_s20  ;;  %15601 = vrot.lane.b32.xlu1 %v15520_v55, %s16013_s20 }
 0x713   : > { %15616 = vrot.lane.b32.xlu0 %v15535_v47, %s16013_s20  ;;  %15611 = vrot.lane.b32.xlu1 %v15530_v37, %s16013_s20 }
 0x717   : > { %15626 = vrot.lane.b32.xlu0 %v15545_v44, %s16013_s20  ;;  %15621 = vrot.lane.b32.xlu1 %v15540_v46, %s16013_s20 }
 0x71b   : > { %15636 = vrot.lane.b32.xlu0 %v15555_v39, %s16013_s20  ;;  %15631 = vrot.lane.b32.xlu1 %v15550_v3, %s16013_s20 }
 0x71f   : > { %15646 = vrot.lane.b32.xlu0 %v15565_v22, %s16013_s20  ;;  %15641 = vrot.lane.b32.xlu1 %v15560_v7, %s16013_s20 }
 0x723   : > { %15651 = vrot.lane.b32.xlu1 %v15570_v59, %s16013_s20 }
 0x749   : > { %v15497_v45 = vpop.permute.xlu0 %15496 }
 0x74a   : > { %v15499_v27 = vunpack.i.h.bf16 %v15497_v45  ;;  %v15498_v1 = vunpack.i.l.bf16 %v15497_v45 }
 0x74c   : > { %v14630_v21 = vpack.c.bf16 %v15499_v27, %v15498_v1 }
 0x74d   : > { %v15502_v54 = vpop.permute.xlu0 %15501 }
 0x74e   : > { %v15504_v24 = vunpack.i.h.bf16 %v15502_v54  ;;  %v15503_v10 = vunpack.i.l.bf16 %v15502_v54  ;;  %14632 = vmatprep.subr.msk.bf16.mxu1 %vm19175_vm9, %v14630_v21 }
 0x74f   : > { %14635 = vmatpush3.bf16.xpose.msk.msra.mxu1 %vm19175_vm9, %v14630_v21 }
 0x750   : > { %v14636_v46 = vpack.c.bf16 %v15504_v24, %v15503_v10 }
 0x751   : > { %v15507_v7 = vpop.permute.xlu1 %15506 }
 0x752   : > { %v15509_v55 = vunpack.i.h.bf16 %v15507_v7  ;;  %v15508_v45 = vunpack.i.l.bf16 %v15507_v7  ;;  %14638 = vmatprep.subr.msk.bf16.mxu1 %vm19175_vm9, %v14636_v46 }
 0x754   : > { %v14642_v59 = vpack.c.bf16 %v15509_v55, %v15508_v45 }
 0x755   : > { %v15512_v47 = vpop.permute.xlu1 %15511 }
 0x756   : > { %v15514_v27 = vunpack.i.h.bf16 %v15512_v47  ;;  %v15513_v37 = vunpack.i.l.bf16 %v15512_v47 }
 0x757   : > { %14641 = vmatpush3.bf16.xpose.msk.msra.mxu1 %vm19175_vm9, %v14636_v46 }
 0x758   : > { %14644 = vmatprep.subr.msk.bf16.mxu1 %vm19175_vm9, %v14642_v59  ;;  %v14648_v39 = vpack.c.bf16 %v15514_v27, %v15513_v37 }
 0x759   : > { %v15517_v44 = vpop.permute.xlu0 %15516 }
 0x75a   : > { %v15519_v1 = vunpack.i.h.bf16 %v15517_v44  ;;  %v15518_v21 = vunpack.i.l.bf16 %v15517_v44 }
 0x75c   : > { %v14654_v10 = vpack.c.bf16 %v15519_v1, %v15518_v21 }
 0x75d   : > { %v15522_v3 = vpop.permute.xlu1 %15521 }
 0x75e   : > { %v15523_v47 = vunpack.i.l.bf16 %v15522_v3 }
 0x75f   : > { %14647 = vmatpush3.bf16.xpose.msk.msra.mxu1 %vm19175_vm9, %v14642_v59  ;;  %v15524_v59 = vunpack.i.h.bf16 %v15522_v3 }
 0x760   : > { %14650 = vmatprep.subr.msk.bf16.mxu1 %vm19175_vm9, %v14648_v39 }
 0x761   : > { %v15527_v22 = vpop.permute.xlu0 %15526  ;;  %v14660_v21 = vpack.c.bf16 %v15524_v59, %v15523_v47 }
 0x762   : > { %v15529_v3 = vunpack.i.h.bf16 %v15527_v22 }
 0x765   : > { %v15537_v54 = vpop.permute.xlu0 %15536  ;;  %v15532_v24 = vpop.permute.xlu1 %15531 }
 0x766   : > { %v15539_v46 = vunpack.i.h.bf16 %v15537_v54  ;;  %v15538_v7 = vunpack.i.l.bf16 %v15537_v54 }
 0x767   : > { %14653 = vmatpush3.bf16.xpose.msk.msra.mxu1 %vm19175_vm9, %v14648_v39 }
 0x768   : > { %v14582_v55 = vpack.c.bf16 %v15539_v46, %v15538_v7  ;;  %14656 = vmatprep.subr.msk.bf16.mxu1 %vm19175_vm9, %v14654_v10  ;;  %v15528_v46 = vunpack.i.l.bf16 %v15527_v22 }
 0x769   : > { %v15542_v45 = vpop.permute.xlu1 %15541  ;;  %v15547_v44 = vpop.permute.xlu0 %15546 }
 0x76a   : > { %v15544_v27 = vunpack.i.h.bf16 %v15542_v45  ;;  %v15543_v37 = vunpack.i.l.bf16 %v15542_v45  ;;  %14584 = vmatprep.subr.msk.bf16.mxu0 %vm19175_vm9, %v14582_v55  ;;  %v15549_v54 = vunpack.i.h.bf16 %v15547_v44  ;;  %v15548_v39 = vunpack.i.l.bf16 %v15547_v44 }
 0x76b   : > { %14587 = vmatpush3.bf16.xpose.msk.msra.mxu0 %vm19175_vm9, %v14582_v55  ;;  %v14666_v55 = vpack.c.bf16 %v15529_v3, %v15528_v46  ;;  %v21286_v46 = vpack.c.bf16 %v18920_v50, %v18925_v16  ;;  %v21287_v50 = vpack.c.bf16 %v18826_v0, %v18829_v6  ;;  %v21288_v16 = vpack.c.bf16 %v18932_v35, %v18937_v23 }
 0x76c   : > { %v14588_v1 = vpack.c.bf16 %v15544_v27, %v15543_v37  ;;  %v14594_v7 = vpack.c.bf16 %v15549_v54, %v15548_v39  ;;  %v15533_v27 = vunpack.i.l.bf16 %v15532_v24  ;;  %v21289_v35 = vpack.c.bf16 %v18836_v26, %v18841_v18 }
 0x76d   : > { %v15552_v45 = vpop.permute.xlu1 %15551  ;;  %v15557_v37 = vpop.permute.xlu0 %15556  ;;  %v21290_v23 = vpack.c.bf16 %v18944_v28, %v18949_v58  ;;  %v21291_v28 = vpack.c.bf16 %v18848_v13, %v18853_v4  ;;  %v21292_v58 = vpack.c.bf16 %v18956_v38, %v18961_v43  ;;  %v21293_v43 = vpack.c.bf16 %v18860_v32, %v18865_v61 }
 0x76e   : > { %14590 = vmatprep.subr.msk.bf16.mxu0 %vm19175_vm9, %v14588_v1  ;;  %v15554_v59 = vunpack.i.h.bf16 %v15552_v45  ;;  %v15553_v47 = vunpack.i.l.bf16 %v15552_v45  ;;  %v15558_v54 = vunpack.i.l.bf16 %v15557_v37 }
 0x76f   : > { %14659 = vmatpush3.bf16.xpose.msk.msra.mxu1 %vm19175_vm9, %v14654_v10  ;;  %v15534_v10 = vunpack.i.h.bf16 %v15532_v24 }
 0x770   : > { %14662 = vmatprep.subr.msk.bf16.mxu1 %vm19175_vm9, %v14660_v21  ;;  %v14600_v22 = vpack.c.bf16 %v15554_v59, %v15553_v47 }
 0x771   : > { %v14672_v44 = vpack.c.bf16 %v15534_v10, %v15533_v27  ;;  %v15562_v39 = vpop.permute.xlu1 %15561  ;;  %v15567_v45 = vpop.permute.xlu0 %15566 }
 0x772   : > { %v15564_v24 = vunpack.i.h.bf16 %v15562_v39  ;;  %v15563_v3 = vunpack.i.l.bf16 %v15562_v39  ;;  %v15568_v59 = vunpack.i.l.bf16 %v15567_v45 }
 0x773   : > { %14593 = vmatpush3.bf16.xpose.msk.msra.mxu0 %vm19175_vm9, %v14588_v1  ;;  %v15559_v1 = vunpack.i.h.bf16 %v15557_v37 }
 0x774   : > { %14596 = vmatprep.subr.msk.bf16.mxu0 %vm19175_vm9, %v14594_v7 }
 0x775   : > { %v15572_v10 = vpop.permute.xlu1 %15571 }
 0x776   : > { %v15574_v0 = vunpack.i.h.bf16 %v15572_v10  ;;  %v15573_v6 = vunpack.i.l.bf16 %v15572_v10  ;;  %v21304_v10 = vld [vmem:[#allocation73_spill] sm:$0xff] }
 0x777   : > { %14665 = vmatpush3.bf16.xpose.msk.msra.mxu1 %vm19175_vm9, %v14660_v21  ;;  %v14606_v21 = vpack.c.bf16 %v15559_v1, %v15558_v54  ;;  %v21294_v1 = vpack.c.bf16 %v18968_v30, %v18973_v53 }
 0x778   : > { %14668 = vmatprep.subr.msk.bf16.mxu1 %vm19175_vm9, %v14666_v55  ;;  %v14624_v27 = vpack.c.bf16 %v15574_v0, %v15573_v6  ;;  %v21305_v0 = vld [vmem:[#allocation9_spill] sm:$0xff]  ;;  %v21306_v6 = vld [vmem:[#allocation52_spill] sm:$0xff] }
 0x779   : > { %v15582_v13 = vpop.permute.xlu1 %15581 }
 0x77a   : > { %v15584_v4 = vunpack.i.h.bf16 %v15582_v13  ;;  %v15583_v38 = vunpack.i.l.bf16 %v15582_v13  ;;  %v21317_v13 = vld [vmem:[#allocation53_spill] sm:$0xff] }
 0x77b   : > { %14599 = vmatpush3.bf16.xpose.msk.msra.mxu0 %vm19175_vm9, %v14594_v7  ;;  %v14612_v7 = vpack.c.bf16 %v15564_v24, %v15563_v3 }
 0x77c   : > { %14602 = vmatprep.subr.msk.bf16.mxu0 %vm19175_vm9, %v14600_v22  ;;  %v14682_v39 = vpack.c.bf16 %v15584_v4, %v15583_v38 }
 0x77d   : > { %v15592_v32 = vpop.permute.xlu1 %15591 }
 0x77e   : > { %v15594_v30 = vunpack.i.h.bf16 %v15592_v32  ;;  %v15593_v53 = vunpack.i.l.bf16 %v15592_v32 }
 0x77f   : > { %14671 = vmatpush3.bf16.xpose.msk.msra.mxu1 %vm19175_vm9, %v14666_v55  ;;  %v15569_v55 = vunpack.i.h.bf16 %v15567_v45 }
 0x780   : > { %14674 = vmatprep.subr.msk.bf16.mxu1 %vm19175_vm9, %v14672_v44  ;;  %v14690_v3 = vpack.c.bf16 %v15594_v30, %v15593_v53 }
 0x781   : > { %v14618_v47 = vpack.c.bf16 %v15569_v55, %v15568_v59 }
 0x783   : > { %14605 = vmatpush3.bf16.xpose.msk.msra.mxu0 %vm19175_vm9, %v14600_v22  ;;  %v15577_v22 = vpop.permute.xlu0 %15576 }
 0x784   : > { %14608 = vmatprep.subr.msk.bf16.mxu0 %vm19175_vm9, %v14606_v21  ;;  %v15579_v26 = vunpack.i.h.bf16 %v15577_v22  ;;  %v15578_v18 = vunpack.i.l.bf16 %v15577_v22 }
 0x786   : > { %v14678_v37 = vpack.c.bf16 %v15579_v26, %v15578_v18 }
 0x787   : > { %14677 = vmatpush3.bf16.xpose.msk.msra.mxu1 %vm19175_vm9, %v14672_v44  ;;  %v15587_v44 = vpop.permute.xlu0 %15586 }
 0x788   : > { %14744 = vmatprep.subr.msk.bf16.mxu1 %vm19175_vm9, %v21286_v46  ;;  %v15589_v54 = vunpack.i.h.bf16 %v15587_v44  ;;  %v21299_v46 = vld [vmem:[#allocation14_spill] sm:$0xff] }
 0x78b   : > { %14611 = vmatpush3.bf16.xpose.msk.msra.mxu0 %vm19175_vm9, %v14606_v21  ;;  %v15588_v21 = vunpack.i.l.bf16 %v15587_v44 }
 0x78c   : > { %14614 = vmatprep.subr.msk.bf16.mxu0 %vm19175_vm9, %v14612_v7 }
 0x78d   : > { %v14686_v61 = vpack.c.bf16 %v15589_v54, %v15588_v21 }
 0x78e   : > { %14375 = vmatmul.mubr.msk.f32.vlgmr.msra.gmra.mrb[46].mxu1 %vm5400_vm12, %v19135_v14 }
 0x78f   : > { %14377 = vmatprep.mubr.msk.f32.mxu1 %vm5400_vm12, %v19035_v25  ;;  %14747 = vmatpush3.bf16.xpose.msk.msra.mxu1 %vm19175_vm9, %v21287_v50  ;;  %v21303_v50 = vld [vmem:[#allocation18_spill] sm:$0xff] }
 0x790   : > { %14750 = vmatprep.subr.msk.bf16.mxu1 %vm19175_vm9, %v21288_v16 }
 0x792   : > { %14378 = vmatmul.mubr.msk.f32.gmra.mrb[48].mxu1 %vm5400_vm12, %v19032_v49 }
 0x793   : > { %14617 = vmatpush3.bf16.xpose.msk.msra.mxu0 %vm19175_vm9, %v14612_v7  ;;  %14380 = vmatprep.mubr.msk.f32.mxu1 %vm5400_vm12, %v19041_v15 }
 0x794   : > { %14620 = vmatprep.subr.msk.bf16.mxu0 %vm19175_vm9, %v14618_v47 }
 0x796   : > { %14381 = vmatmul.mubr.msk.f32.gmra.mrb[50].mxu1 %vm5400_vm12, %v19038_v57 }
 0x797   : > { %14383 = vmatprep.mubr.msk.f32.mxu1 %vm5400_vm12, %v19047_v56  ;;  %14753 = vmatpush3.bf16.xpose.msk.msra.mxu1 %vm19175_vm9, %v21289_v35  ;;  %v21307_v35 = vpack.c.bf16 %v21305_v0, %v21306_v6 }
 0x798   : > { %14756 = vmatprep.subr.msk.bf16.mxu1 %vm19175_vm9, %v21290_v23  ;;  %v21309_v23 = vld [vmem:[#allocation50_spill] sm:$0xff] }
 0x79a   : > { %14384 = vmatmul.mubr.msk.f32.gmra.mrb[52].mxu1 %vm5400_vm12, %v19044_v51 }
 0x79b   : > { %14623 = vmatpush3.bf16.xpose.msk.msra.mxu0 %vm19175_vm9, %v14618_v47  ;;  %14386 = vmatprep.mubr.msk.f32.mxu1 %vm5400_vm12, %v19053_v60 }
 0x79c   : > { %14626 = vmatprep.subr.msk.bf16.mxu0 %vm19175_vm9, %v14624_v27 }
 0x79e   : > { %14387 = vmatmul.mubr.msk.f32.gmra.mrb[54].mxu1 %vm5400_vm12, %v19050_v34 }
 0x79f   : > { %14389 = vmatprep.mubr.msk.f32.mxu1 %vm5400_vm12, %v19059_v62  ;;  %14759 = vmatpush3.bf16.xpose.msk.msra.mxu1 %vm19175_vm9, %v21291_v28  ;;  %v21312_v28 = vld [vmem:[#allocation76_spill] sm:$0xff] }
 0x7a0   : > { %14762 = vmatprep.subr.msk.bf16.mxu1 %vm19175_vm9, %v21292_v58  ;;  %v21313_v58 = vld [vmem:[#allocation75_spill] sm:$0xff] }
 0x7a2   : > { %14390 = vmatmul.mubr.msk.f32.gmra.mrb[56].mxu1 %vm5400_vm12, %v19056_v2 }
 0x7a3   : > { %14629 = vmatpush3.bf16.xpose.msk.msra.mxu0 %vm19175_vm9, %v14624_v27  ;;  %14392 = vmatprep.mubr.msk.f32.mxu1 %vm5400_vm12, %v19065_v5 }
 0x7a4   : > { %14679 = vmatprep.subr.bf16.mxu0 %v14678_v37 }
 0x7a6   : > { %14393 = vmatmul.mubr.msk.f32.gmra.mrb[58].mxu1 %vm5400_vm12, %v19062_v8 }
 0x7a7   : > { %14395 = vmatprep.mubr.msk.f32.mxu1 %vm5400_vm12, %v19071_v33  ;;  %14765 = vmatpush3.bf16.xpose.msk.msra.mxu1 %vm19175_vm9, %v21293_v43 }
 0x7a8   : > { %14768 = vmatprep.subr.msk.bf16.mxu1 %vm19175_vm9, %v21294_v1 }
 0x7aa   : > { %14295 = vmatmul.mubr.msk.f32.vlgmr.msra.gmra.mrb[64].mxu0 %vm5400_vm12, %v19135_v14  ;;  %14396 = vmatmul.mubr.msk.f32.gmra.mrb[60].mxu1 %vm5400_vm12, %v19068_v52  ;;  %v21295_v14 = vpack.c.bf16 %v18872_v40, %v18877_v12  ;;  %v15602_v40 = vpop.permute.xlu1 %15601 }
 0x7ab   : > { %14297 = vmatprep.mubr.msk.f32.mxu0 %vm5400_vm12, %v19035_v25  ;;  %14398 = vmatprep.mubr.msk.f32.mxu1 %vm5400_vm12, %v19077_v48  ;;  %v15597_v25 = vpop.permute.xlu0 %15596 }
 0x7ac   : > { %14681 = vmatpush3.bf16.msra.mxu0 %v14678_v37  ;;  %v15598_v24 = vunpack.i.l.bf16 %v15597_v25  ;;  %v21315_v37 = vld [vmem:[#allocation62_spill] sm:$0xff] }
 0x7ad   : > { %14683 = vmatprep.subr.bf16.mxu0 %v14682_v39 }
 0x7ae   : > { %14298 = vmatmul.mubr.msk.f32.gmra.mrb[66].mxu0 %vm5400_vm12, %v19032_v49  ;;  %14399 = vmatmul.mubr.msk.f32.gmra.mrb[62].mxu1 %vm5400_vm12, %v19074_v41  ;;  %v21296_v49 = vpack.c.bf16 %v18980_v17, %v18985_v9  ;;  %v15604_v17 = vunpack.i.h.bf16 %v15602_v40  ;;  %v15603_v9 = vunpack.i.l.bf16 %v15602_v40 }
 0x7af   : > { %14300 = vmatprep.mubr.msk.f32.mxu0 %vm5400_vm12, %v19041_v15  ;;  %14401 = vmatprep.mubr.msk.f32.mxu1 %vm5400_vm12, %v19085_v20  ;;  %v15599_v15 = vunpack.i.h.bf16 %v15597_v25 }
 0x7b0   : > { %14685 = vmatpush3.bf16.msra.mxu0 %v14682_v39  ;;  %14771 = vmatpush3.bf16.xpose.msk.msra.mxu1 %vm19175_vm9, %v21295_v14  ;;  %v14698_v59 = vpack.c.bf16 %v15604_v17, %v15603_v9 }
 0x7b1   : > { %14687 = vmatprep.subr.bf16.mxu0 %v14686_v61  ;;  %14774 = vmatprep.subr.msk.bf16.mxu1 %vm19175_vm9, %v21296_v49  ;;  %v14694_v12 = vpack.c.bf16 %v15599_v15, %v15598_v24 }
 0x7b2   : > { %14301 = vmatmul.mubr.msk.f32.gmra.mrb[68].mxu0 %vm5400_vm12, %v19038_v57  ;;  %14402 = vmatmul.mubr.msk.f32.gmra.mrb[64].mxu1 %vm5400_vm12, %v19082_v63  ;;  %v15607_v57 = vpop.permute.xlu0 %15606 }
 0x7b3   : > { %14303 = vmatprep.mubr.msk.f32.mxu0 %vm5400_vm12, %v19047_v56  ;;  %14404 = vmatprep.mubr.msk.f32.mxu1 %vm5400_vm12, %v19094_v31  ;;  %v21297_v56 = vpack.c.bf16 %v18884_v29, %v18889_v36  ;;  %v15609_v45 = vunpack.i.h.bf16 %v15607_v57  ;;  %v15608_v55 = vunpack.i.l.bf16 %v15607_v57  ;;  %v21302_v29 = vld [vmem:[#allocation21_spill] sm:$0xff]  ;;  %v15612_v36 = vpop.permute.xlu1 %15611 }
 0x7b4   : > { %14689 = vmatpush3.bf16.msra.mxu0 %v14686_v61  ;;  %v15614_v16 = vunpack.i.h.bf16 %v15612_v36  ;;  %v15613_v47 = vunpack.i.l.bf16 %v15612_v36 }
 0x7b5   : > { %14691 = vmatprep.subr.bf16.mxu0 %v14690_v3 }
 0x7b6   : > { %14304 = vmatmul.mubr.msk.f32.gmra.mrb[70].mxu0 %vm5400_vm12, %v19044_v51  ;;  %14405 = vmatmul.mubr.msk.f32.gmra.mrb[66].mxu1 %vm5400_vm12, %v19091_v42  ;;  %v21298_v51 = vld [vmem:[#allocation57_spill] sm:$0xff]  ;;  %v14706_v18 = vpack.c.bf16 %v15614_v16, %v15613_v47 }
 0x7b7   : > { %14306 = vmatprep.mubr.msk.f32.mxu0 %vm5400_vm12, %v19053_v60  ;;  %14407 = vmatprep.mubr.msk.f32.mxu1 %vm5400_vm12, %v19103_v19  ;;  %v21300_v7 = vpack.c.bf16 %v21298_v51, %v21299_v46  ;;  %v21301_v60 = vld [vmem:[#allocation55_spill] sm:$0xff] }
 0x7b8   : > { %14693 = vmatpush3.bf16.msra.mxu0 %v14690_v3  ;;  %14777 = vmatpush3.bf16.xpose.msk.msra.mxu1 %vm19175_vm9, %v21297_v56 }
 0x7b9   : > { %14695 = vmatprep.subr.bf16.mxu0 %v14694_v12  ;;  %14780 = vmatprep.subr.msk.bf16.mxu1 %vm19175_vm9, %v21300_v7 }
 0x7ba   : > { %14307 = vmatmul.mubr.msk.f32.gmra.mrb[72].mxu0 %vm5400_vm12, %v19050_v34  ;;  %14408 = vmatmul.mubr.msk.f32.gmra.mrb[68].mxu1 %vm5400_vm12, %v21301_v60  ;;  %v14702_v34 = vpack.c.bf16 %v15609_v45, %v15608_v55 }
 0x7bb   : > { %14309 = vmatprep.mubr.msk.f32.mxu0 %vm5400_vm12, %v19059_v62  ;;  %14410 = vmatprep.mubr.msk.f32.mxu1 %vm5400_vm12, %v21302_v29  ;;  %v15617_v62 = vpop.permute.xlu0 %15616 }
 0x7bc   : > { %14697 = vmatpush3.bf16.msra.mxu0 %v14694_v12  ;;  %v15619_v22 = vunpack.i.h.bf16 %v15617_v62  ;;  %v15618_v26 = vunpack.i.l.bf16 %v15617_v62 }
 0x7bd   : > { %14699 = vmatprep.subr.bf16.mxu0 %v14698_v59 }
 0x7be   : > { %14310 = vmatmul.mubr.msk.f32.gmra.mrb[74].mxu0 %vm5400_vm12, %v19056_v2  ;;  %14411 = vmatmul.mubr.msk.f32.gmra.mrb[70].mxu1 %vm5400_vm12, %v21303_v50  ;;  %v21308_v2 = vld [vmem:[#allocation15_spill] sm:$0xff] }
 0x7bf   : > { %14312 = vmatprep.mubr.msk.f32.mxu0 %vm5400_vm12, %v19065_v5  ;;  %14413 = vmatprep.mubr.msk.f32.mxu1 %vm5400_vm12, %v21304_v10  ;;  %v21310_v27 = vpack.c.bf16 %v21308_v2, %v21309_v23  ;;  %v21311_v5 = vld [vmem:[#allocation32_spill] sm:$0xff] }
 0x7c0   : > { %14701 = vmatpush3.bf16.msra.mxu0 %v14698_v59  ;;  %14783 = vmatpush3.bf16.xpose.msk.msra.mxu1 %vm19175_vm9, %v21307_v35 }
 0x7c1   : > { %14703 = vmatprep.subr.bf16.mxu0 %v14702_v34  ;;  %14786 = vmatprep.subr.msk.bf16.mxu1 %vm19175_vm9, %v21310_v27 }
 0x7c2   : > { %14313 = vmatmul.mubr.msk.f32.gmra.mrb[76].mxu0 %vm5400_vm12, %v19062_v8  ;;  %14414 = vmatmul.mubr.msk.f32.gmra.mrb[72].mxu1 %vm5400_vm12, %v21311_v5  ;;  %v19406_v8 = vpack.c.bf16 %v15619_v22, %v15618_v26 }
 0x7c3   : > { %14315 = vmatprep.mubr.msk.f32.mxu0 %vm5400_vm12, %v19071_v33  ;;  %14416 = vmatprep.mubr.msk.f32.mxu1 %vm5400_vm12, %v21312_v28  ;;  %v21316_v33 = vld [vmem:[#allocation10_spill] sm:$0xff] }
 0x7c4   : > { %14705 = vmatpush3.bf16.msra.mxu0 %v14702_v34  ;;  %21314 = vst [vmem:[#allocation64_spill] sm:$0xff] %v19406_v8  ;;  %v21318_v4 = vpack.c.bf16 %v21316_v33, %v21317_v13 }
 0x7c5   : > { %14707 = vmatprep.subr.bf16.mxu0 %v14706_v18 }
 0x7c6   : > { %14316 = vmatmul.mubr.msk.f32.gmra.mrb[78].mxu0 %vm5400_vm12, %v19068_v52  ;;  %14417 = vmatmul.mubr.msk.f32.gmra.mrb[74].mxu1 %vm5400_vm12, %v21313_v58  ;;  %v21319_v52 = vld [vmem:[#allocation58_spill] sm:$0xff] }
 0x7c7   : > { %14318 = vmatprep.mubr.msk.f32.mxu0 %vm5400_vm12, %v19077_v48  ;;  %14419 = vmatprep.mubr.msk.f32.mxu1 %vm5400_vm12, %v21315_v37 }
 0x7c8   : > { %14709 = vmatpush3.bf16.msra.mxu0 %v14706_v18  ;;  %14789 = vmatpush3.bf16.xpose.msk.msra.mxu1 %vm19175_vm9, %v21318_v4 }
 0x7c9   : > { %14711 = vmatprep.subr.bf16.mxu0 %v19406_v8 }
 0x7ca   : > { %14319 = vmatmul.mubr.msk.f32.gmra.mrb[80].mxu0 %vm5400_vm12, %v19074_v41  ;;  %14420 = vmatmul.mubr.msk.f32.gmra.mrb[76].mxu1 %vm5400_vm12, %v21319_v52 }
 0x7cb   : > { %14321 = vmatprep.mubr.msk.f32.mxu0 %vm5400_vm12, %v19085_v20 }
 0x7ce   : > { %14322 = vmatmul.mubr.msk.f32.gmra.mrb[82].mxu0 %vm5400_vm12, %v19082_v63 }
 0x7cf   : > { %14324 = vmatprep.mubr.msk.f32.mxu0 %vm5400_vm12, %v19094_v31 }
 0x7d2   : > { %14325 = vmatmul.mubr.msk.f32.gmra.mrb[84].mxu0 %vm5400_vm12, %v19091_v42 }
 0x7d3   : > { %14327 = vmatprep.mubr.msk.f32.mxu0 %vm5400_vm12, %v19103_v19 }
 0x7d6   : > { %14328 = vmatmul.mubr.msk.f32.gmra.mrb[86].mxu0 %vm5400_vm12, %v21301_v60 }
 0x7d7   : > { %14330 = vmatprep.mubr.msk.f32.mxu0 %vm5400_vm12, %v21302_v29 }
 0x7da   : > { %14331 = vmatmul.mubr.msk.f32.gmra.mrb[88].mxu0 %vm5400_vm12, %v21303_v50 }
 0x7db   : > { %14333 = vmatprep.mubr.msk.f32.mxu0 %vm5400_vm12, %v21304_v10 }
 0x7de   : > { %14334 = vmatmul.mubr.msk.f32.gmra.mrb[90].mxu0 %vm5400_vm12, %v21311_v5 }
 0x7df   : > { %14336 = vmatprep.mubr.msk.f32.mxu0 %vm5400_vm12, %v21312_v28 }
 0x7e2   : > { %14337 = vmatmul.mubr.msk.f32.gmra.mrb[92].mxu0 %vm5400_vm12, %v21313_v58 }
 0x7e3   : > { %14339 = vmatprep.mubr.msk.f32.mxu0 %vm5400_vm12, %v21315_v37 }
 0x7e6   : > { %14340 = vmatmul.mubr.msk.f32.gmra.mrb[94].mxu0 %vm5400_vm12, %v21319_v52 }
 0x861   : > { %v14376_v31 = vpop.f32.mrb[46].mxu1 }
 0x862   : > { %v10224_v20 = vpop.f32.mrb[47].mxu1  ;;  %v19450_v48 = vmul.f32 0.35355338, %v14376_v31 }
 0x863   : > { %v19454_v43 = vmul.f32 0.35355338, %v10224_v20 }
 0x865   : > { %v14379_v19 = vpop.f32.mrb[48].mxu1 }
 0x866   : > { %v10234_v63 = vpop.f32.mrb[49].mxu1  ;;  %v19462_v39 = vmul.f32 0.35355338, %v14379_v19 }
 0x867   : > { %v19466_v30 = vmul.f32 0.35355338, %v10234_v63 }
 0x869   : > { %v14382_v41 = vpop.f32.mrb[50].mxu1 }
 0x86a   : > { %v19452_v42 = vmul.f32 0.35355338, %v14382_v41  ;;  %v10244_v38 = vpop.f32.mrb[51].mxu1 }
 0x86b   : > { %v19456_v44 = vmul.f32 0.35355338, %v10244_v38 }
 0x86c   : > { %v10416_v1 = vmax.f32 %v19450_v48, %v19452_v42 }
 0x86d   : > { %v10415_v54 = vmax.f32 %v19454_v43, %v19456_v44  ;;  %v14385_v21 = vpop.f32.mrb[52].mxu1 }
 0x86e   : > { %v19464_v32 = vmul.f32 0.35355338, %v14385_v21  ;;  %v10254_v61 = vpop.f32.mrb[53].mxu1 }
 0x86f   : > { %v19468_v53 = vmul.f32 0.35355338, %v10254_v61 }
 0x870   : > { %v10418_v25 = vmax.f32 %v19462_v39, %v19464_v32 }
 0x871   : > { %v10417_v14 = vmax.f32 %v19466_v30, %v19468_v53  ;;  %v14388_v49 = vpop.f32.mrb[54].mxu1 }
 0x872   : > { %v19474_v15 = vmul.f32 0.35355338, %v14388_v49  ;;  %v10264_v24 = vpop.f32.mrb[55].mxu1 }
 0x873   : > { %v19476_v3 = vmul.f32 0.35355338, %v10264_v24 }
 0x874   : > { %v10420_v40 = vmax.f32 %v10416_v1, %v19474_v15 }
 0x875   : > { %v10419_v12 = vmax.f32 %v10415_v54, %v19476_v3  ;;  %v14391_v17 = vpop.f32.mrb[56].mxu1 }
 0x876   : > { %v19480_v9 = vmul.f32 0.35355338, %v14391_v17  ;;  %v10274_v57 = vpop.f32.mrb[57].mxu1 }
 0x877   : > { %v19482_v56 = vmul.f32 0.35355338, %v10274_v57 }
 0x878   : > { %v10422_v51 = vmax.f32 %v10418_v25, %v19480_v9 }
 0x879   : > { %v10421_v46 = vmax.f32 %v10417_v14, %v19482_v56  ;;  %v14394_v7 = vpop.f32.mrb[58].mxu1 }
 0x87a   : > { %v19486_v60 = vmul.f32 0.35355338, %v14394_v7  ;;  %v10284_v45 = vpop.f32.mrb[59].mxu1 }
 0x87b   : > { %v19488_v55 = vmul.f32 0.35355338, %v10284_v45 }
 0x87c   : > { %v10424_v59 = vmax.f32 %v10420_v40, %v19486_v60 }
 0x87d   : > { %v10423_v29 = vmax.f32 %v10419_v12, %v19488_v55  ;;  %v14296_v36 = vpop.f32.mrb[64].mxu0  ;;  %v14397_v50 = vpop.f32.mrb[60].mxu1 }
 0x87e   : > { %v19492_v34 = vmul.f32 0.35355338, %v14397_v50  ;;  %v9700_v16 = vpop.f32.mrb[65].mxu0  ;;  %v10294_v47 = vpop.f32.mrb[61].mxu1  ;;  %v19503_v26 = vmul.f32 0.35355338, %v14296_v36 }
 0x87f   : > { %v19494_v10 = vmul.f32 0.35355338, %v10294_v47  ;;  %v19510_v52 = vmul.f32 0.35355338, %v9700_v16 }
 0x880   : > { %v10426_v62 = vmax.f32 %v10422_v51, %v19492_v34 }
 0x881   : > { %v10425_v0 = vmax.f32 %v10421_v46, %v19494_v10  ;;  %v14299_v6 = vpop.f32.mrb[66].mxu0  ;;  %v14400_v35 = vpop.f32.mrb[62].mxu1 }
 0x882   : > { %v19498_v2 = vmul.f32 0.35355338, %v14400_v35  ;;  %v9710_v23 = vpop.f32.mrb[67].mxu0  ;;  %v10304_v27 = vpop.f32.mrb[63].mxu1  ;;  %v19519_v41 = vmul.f32 0.35355338, %v14299_v6 }
 0x883   : > { %v19500_v5 = vmul.f32 0.35355338, %v10304_v27  ;;  %v19528_v24 = vmul.f32 0.35355338, %v9710_v23 }
 0x884   : > { %v10428_v22 = vmax.f32 %v10424_v59, %v19498_v2 }
 0x885   : > { %v10427_v18 = vmax.f32 %v10423_v29, %v19500_v5  ;;  %v14302_v28 = vpop.f32.mrb[68].mxu0  ;;  %v14403_v58 = vpop.f32.mrb[64].mxu1 }
 0x886   : > { %v19506_v37 = vmul.f32 0.35355338, %v14302_v28  ;;  %v19508_v33 = vmul.f32 0.35355338, %v14403_v58  ;;  %v9720_v13 = vpop.f32.mrb[69].mxu0  ;;  %v10314_v4 = vpop.f32.mrb[65].mxu1 }
 0x887   : > { %v19512_v31 = vmul.f32 0.35355338, %v9720_v13  ;;  %v19514_v20 = vmul.f32 0.35355338, %v10314_v4 }
 0x888   : > { %v9892_v19 = vmax.f32 %v19503_v26, %v19506_v37  ;;  %v10430_v63 = vmax.f32 %v10426_v62, %v19508_v33 }
 0x889   : > { %v9891_v38 = vmax.f32 %v19510_v52, %v19512_v31  ;;  %v10429_v1 = vmax.f32 %v10425_v0, %v19514_v20  ;;  %v14305_v54 = vpop.f32.mrb[70].mxu0  ;;  %v14406_v21 = vpop.f32.mrb[66].mxu1 }
 0x88a   : > { %v19524_v61 = vmul.f32 0.35355338, %v14305_v54  ;;  %v19526_v25 = vmul.f32 0.35355338, %v14406_v21  ;;  %v9730_v14 = vpop.f32.mrb[71].mxu0  ;;  %v10324_v49 = vpop.f32.mrb[67].mxu1 }
 0x88b   : > { %v19530_v40 = vmul.f32 0.35355338, %v9730_v14  ;;  %v19532_v12 = vmul.f32 0.35355338, %v10324_v49 }
 0x88c   : > { %v9894_v17 = vmax.f32 %v19519_v41, %v19524_v61  ;;  %v10432_v57 = vmax.f32 %v10428_v22, %v19526_v25 }
 0x88d   : > { %v9893_v51 = vmax.f32 %v19528_v24, %v19530_v40  ;;  %v10431_v46 = vmax.f32 %v10427_v18, %v19532_v12  ;;  %v14308_v7 = vpop.f32.mrb[72].mxu0  ;;  %v14409_v45 = vpop.f32.mrb[68].mxu1 }
 0x88e   : > { %v19540_v59 = vmul.f32 0.35355338, %v14308_v7  ;;  %v19542_v29 = vmul.f32 0.35355338, %v14409_v45  ;;  %v9740_v36 = vpop.f32.mrb[73].mxu0  ;;  %v10334_v50 = vpop.f32.mrb[69].mxu1 }
 0x88f   : > { %v19544_v16 = vmul.f32 0.35355338, %v9740_v36  ;;  %v19546_v47 = vmul.f32 0.35355338, %v10334_v50 }
 0x890   : > { %v9896_v62 = vmax.f32 %v9892_v19, %v19540_v59  ;;  %v10434_v0 = vmax.f32 %v10430_v63, %v19542_v29 }
 0x891   : > { %v9895_v6 = vmax.f32 %v9891_v38, %v19544_v16  ;;  %v10433_v35 = vmax.f32 %v10429_v1, %v19546_v47  ;;  %v14311_v23 = vpop.f32.mrb[74].mxu0  ;;  %v14412_v27 = vpop.f32.mrb[70].mxu1 }
 0x892   : > { %v19552_v22 = vmul.f32 0.35355338, %v14311_v23  ;;  %v19554_v18 = vmul.f32 0.35355338, %v14412_v27  ;;  %v9750_v28 = vpop.f32.mrb[75].mxu0  ;;  %v10344_v58 = vpop.f32.mrb[71].mxu1 }
 0x893   : > { %v19556_v13 = vmul.f32 0.35355338, %v9750_v28  ;;  %v19558_v4 = vmul.f32 0.35355338, %v10344_v58 }
 0x894   : > { %21320 = vst [vmem:[#allocation65_spill] sm:$0xff] %v19552_v22  ;;  %21321 = vst [vmem:[#allocation38_spill] sm:$0xff] %v19554_v18  ;;  %v9898_v19 = vmax.f32 %v9894_v17, %v19552_v22  ;;  %v10436_v63 = vmax.f32 %v10432_v57, %v19554_v18 }
 0x895   : > { %21322 = vst [vmem:[#allocation42_spill] sm:$0xff] %v19556_v13  ;;  %21323 = vst [vmem:[#allocation12_spill] sm:$0xff] %v19558_v4  ;;  %v9897_v38 = vmax.f32 %v9893_v51, %v19556_v13  ;;  %v10435_v1 = vmax.f32 %v10431_v46, %v19558_v4  ;;  %v14314_v54 = vpop.f32.mrb[76].mxu0  ;;  %v14415_v21 = vpop.f32.mrb[72].mxu1 }
 0x896   : > { %v19564_v14 = vmul.f32 0.35355338, %v14314_v54  ;;  %v19566_v49 = vmul.f32 0.35355338, %v14415_v21  ;;  %v9760_v7 = vpop.f32.mrb[77].mxu0  ;;  %v10354_v45 = vpop.f32.mrb[73].mxu1 }
 0x897   : > { %v19568_v36 = vmul.f32 0.35355338, %v9760_v7  ;;  %v19570_v50 = vmul.f32 0.35355338, %v10354_v45 }
 0x898   : > { %21324 = vst [vmem:[#allocation17_spill] sm:$0xff] %v19564_v14  ;;  %v9900_v17 = vmax.f32 %v9896_v62, %v19564_v14  ;;  %v10438_v57 = vmax.f32 %v10434_v0, %v19566_v49 }
 0x899   : > { %21325 = vst [vmem:[#allocation20_spill] sm:$0xff] %v19568_v36  ;;  %21326 = vst [vmem:[#allocation23_spill] sm:$0xff] %v19570_v50  ;;  %v9899_v51 = vmax.f32 %v9895_v6, %v19568_v36  ;;  %v10437_v46 = vmax.f32 %v10433_v35, %v19570_v50  ;;  %v14317_v23 = vpop.f32.mrb[78].mxu0  ;;  %v14418_v27 = vpop.f32.mrb[74].mxu1 }
 0x89a   : > { %v19576_v28 = vmul.f32 0.35355338, %v14317_v23  ;;  %v19578_v58 = vmul.f32 0.35355338, %v14418_v27  ;;  %v9770_v54 = vpop.f32.mrb[79].mxu0  ;;  %v10364_v21 = vpop.f32.mrb[75].mxu1 }
 0x89b   : > { %v19580_v7 = vmul.f32 0.35355338, %v9770_v54  ;;  %v19582_v45 = vmul.f32 0.35355338, %v10364_v21 }
 0x89c   : > { %21327 = vst [vmem:[#allocation24_spill] sm:$0xff] %v19576_v28  ;;  %21328 = vst [vmem:[#allocation26_spill] sm:$0xff] %v19578_v58  ;;  %v9902_v62 = vmax.f32 %v9898_v19, %v19576_v28  ;;  %v10440_v0 = vmax.f32 %v10436_v63, %v19578_v58 }
 0x89d   : > { %21329 = vst [vmem:[#allocation27_spill] sm:$0xff] %v19580_v7  ;;  %21330 = vst [vmem:[#allocation29_spill] sm:$0xff] %v19582_v45  ;;  %v9901_v6 = vmax.f32 %v9897_v38, %v19580_v7  ;;  %v10439_v35 = vmax.f32 %v10435_v1, %v19582_v45  ;;  %v14320_v11 = vpop.f32.mrb[80].mxu0  ;;  %v14421_v8 = vpop.f32.mrb[76].mxu1 }
 0x89e   : > { %v19588_v23 = vmul.f32 0.35355338, %v14320_v11  ;;  %v19590_v27 = vmul.f32 0.35355338, %v14421_v8  ;;  %v9780_v14 = vpop.f32.mrb[81].mxu0  ;;  %v10374_v36 = vpop.f32.mrb[77].mxu1 }
 0x89f   : > { %v10443_v54 = vmax.f32 %v10439_v35, %v10440_v0  ;;  %v19592_v22 = vmul.f32 0.35355338, %v9780_v14  ;;  %v19594_v21 = vmul.f32 0.35355338, %v10374_v36 }
 0x8a0   : > { %21331 = vst [vmem:[#allocation30_spill] sm:$0xff] %v19588_v23  ;;  %v9904_v19 = vmax.f32 %v9900_v17, %v19588_v23  ;;  %v10442_v63 = vmax.f32 %v10438_v57, %v19590_v27 }
 0x8a1   : > { %v9903_v38 = vmax.f32 %v9899_v51, %v19592_v22  ;;  %v10441_v1 = vmax.f32 %v10437_v46, %v19594_v21  ;;  %v14323_v28 = vpop.f32.mrb[82].mxu0 }
 0x8a2   : > { %v19600_v11 = vmul.f32 0.35355338, %v14323_v28  ;;  %v9790_v8 = vpop.f32.mrb[83].mxu0 }
 0x8a3   : > { %v10444_v7 = vmax.f32 %v10441_v1, %v10442_v63  ;;  %v19602_v13 = vmul.f32 0.35355338, %v9790_v8 }
 0x8a4   : > { %21332 = vst [vmem:[#allocation8_spill] sm:$0xff] %v19600_v11  ;;  %v19605_v14 = vmax.f32 %v9902_v62, %v19600_v11 }
 0x8a5   : > { %21333 = vst [vmem:[#allocation47_spill] sm:$0xff] %v19602_v13  ;;  %v10445_v36 = vmax.f32 %v10443_v54, %v10444_v7  ;;  %v19608_v0 = vmax.f32 %v9901_v6, %v19602_v13  ;;  %v14326_v17 = vpop.f32.mrb[84].mxu0 }
 0x8a6   : > { %v19610_v57 = vmul.f32 0.35355338, %v14326_v17  ;;  %v9800_v51 = vpop.f32.mrb[85].mxu0 }
 0x8a7   : > { %v10446_v35 = vrot.slane %v10445_v36, 4  ;;  %v19612_v46 = vmul.f32 0.35355338, %v9800_v51 }
 0x8a8   : > { %v9908_v28 = vmax.f32 %v9904_v19, %v19610_v57 }
 0x8a9   : > { %v10447_v23 = vmax.f32 %v10445_v36, %v10446_v35  ;;  %v9907_v63 = vmax.f32 %v9903_v38, %v19612_v46  ;;  %v14329_v1 = vpop.f32.mrb[86].mxu0 }
 0x8aa   : > { %v19616_v8 = vmul.f32 0.35355338, %v14329_v1  ;;  %v9810_v62 = vpop.f32.mrb[87].mxu0 }
 0x8ab   : > { %v10448_v7 = vrot.slane %v10447_v23, 2  ;;  %v19618_v54 = vmul.f32 0.35355338, %v9810_v62 }
 0x8ac   : > { %v9910_v6 = vmax.f32 %v19605_v14, %v19616_v8 }
 0x8ad   : > { %v10449_v17 = vmax.f32 %v10447_v23, %v10448_v7  ;;  %v14332_v11 = vpop.f32.mrb[88].mxu0 }
 0x8ae   : > { %v19624_v13 = vmul.f32 0.35355338, %v14332_v11  ;;  %v9820_v19 = vpop.f32.mrb[89].mxu0 }
 0x8af   : > { %v10450_v36 = vrot.slane %v10449_v17, 1  ;;  %v19626_v38 = vmul.f32 0.35355338, %v9820_v19 }
 0x8b0   : > { %21334 = vst [vmem:[#allocation33_spill] sm:$0xff] %v19624_v13  ;;  %v19629_v35 = vmax.f32 %v9908_v28, %v19624_v13 }
 0x8b1   : > { %21335 = vst [vmem:[#allocation13_spill] sm:$0xff] %v19626_v38  ;;  %v19631_v1 = vmax.f32 %v10449_v17, %v10450_v36  ;;  %v19634_v62 = vmax.f32 %v9907_v63, %v19626_v38  ;;  %v14335_v14 = vpop.f32.mrb[90].mxu0 }
 0x8b2   : > { %v19636_v23 = vmul.f32 0.35355338, %v14335_v14  ;;  %v9830_v7 = vpop.f32.mrb[91].mxu0 }
 0x8b3   : > { %v10452_v11 = vsub.f32 %v19454_v43, %v19631_v1  ;;  %v10453_v51 = vsub.f32 %v19450_v48, %v19631_v1  ;;  %v10454_v19 = vsub.f32 %v19466_v30, %v19631_v1  ;;  %v10455_v28 = vsub.f32 %v19462_v39, %v19631_v1 }
 0x8b4   : > { %v10456_v63 = vsub.f32 %v19456_v44, %v19631_v1  ;;  %v10457_v17 = vsub.f32 %v19452_v42, %v19631_v1  ;;  %v10458_v36 = vsub.f32 %v19468_v53, %v19631_v1  ;;  %v10459_v43 = vsub.f32 %v19464_v32, %v19631_v1 }
 0x8b5   : > { %v10460_v48 = vsub.f32 %v19476_v3, %v19631_v1  ;;  %v10461_v30 = vsub.f32 %v19474_v15, %v19631_v1  ;;  %v14338_v14 = vpop.f32.mrb[92].mxu0  ;;  %v10484_v18 = vmul.f32 1.442695, %v10452_v11  ;;  %v10486_v4 = vmul.f32 1.442695, %v10453_v51 }
 0x8b6   : > { %v9840_v15 = vpop.f32.mrb[93].mxu0  ;;  %v9914_v42 = vmax.f32 %v9910_v6, %v19636_v23  ;;  %v10488_v50 = vmul.f32 1.442695, %v10454_v19  ;;  %v10490_v53 = vmul.f32 1.442695, %v10455_v28 }
 0x8b7   : > { %15784 = vpow2.f32 %v10484_v18  ;;  %v10492_v32 = vmul.f32 1.442695, %v10456_v63  ;;  %v10494_v45 = vmul.f32 1.442695, %v10457_v17  ;;  %v10496_v3 = vmul.f32 1.442695, %v10458_v36 }
 0x8b8   : > { %15786 = vpow2.f32 %v10486_v4  ;;  %v10498_v58 = vmul.f32 1.442695, %v10459_v43  ;;  %v19703_v39 = vmul.f32 0.35355338, %v9830_v7  ;;  %v19705_v44 = vmul.f32 0.35355338, %v14338_v14 }
 0x8b9   : > { %v14341_v38 = vpop.f32.mrb[94].mxu0  ;;  %15788 = vpow2.f32 %v10488_v50  ;;  %v19707_v11 = vmul.f32 0.35355338, %v9840_v15  ;;  %v10500_v18 = vmul.f32 1.442695, %v10460_v48  ;;  %v21336_v4 = vmax.f32 %v19608_v0, %v19618_v54 }
 0x8ba   : > { %v9850_v13 = vpop.f32.mrb[95].mxu0  ;;  %15790 = vpow2.f32 %v10490_v53  ;;  %v19709_v51 = vmul.f32 0.35355338, %v14341_v38 }
 0x8bb   : > { %15792 = vpow2.f32 %v10492_v32  ;;  %v9913_v50 = vmax.f32 %v21336_v4, %v19703_v39  ;;  %v19717_v19 = vmul.f32 0.35355338, %v9850_v13  ;;  %v9915_v38 = vmax.f32 %v19634_v62, %v19707_v11 }
 0x8bc   : > { %15794 = vpow2.f32 %v10494_v45  ;;  %v9916_v45 = vmax.f32 %v19629_v35, %v19705_v44  ;;  %v9918_v7 = vmax.f32 %v9914_v42, %v19709_v51  ;;  %v10502_v13 = vmul.f32 1.442695, %v10461_v30 }
 0x8bd   : > { %15796 = vpow2.f32 %v10496_v3  ;;  %v9917_v17 = vmax.f32 %v9913_v50, %v19717_v19  ;;  %v21337_v35 = vsub.f32 %v19482_v56, %v19631_v1  ;;  %v21340_v56 = vsub.f32 %v19488_v55, %v19631_v1 }
 0x8be   : > { %15798 = vpow2.f32 %v10498_v58  ;;  %v9919_v36 = vmax.f32 %v9915_v38, %v9916_v45  ;;  %v21338_v58 = vsub.f32 %v19480_v9, %v19631_v1  ;;  %v21341_v50 = vsub.f32 %v19486_v60, %v19631_v1 }
 0x8bf   : > { %v9920_v48 = vmax.f32 %v9917_v17, %v9918_v7  ;;  %15800 = vpow2.f32 %v10500_v18  ;;  %v10504_v62 = vmul.f32 1.442695, %v21337_v35  ;;  %v10508_v18 = vmul.f32 1.442695, %v21340_v56 }
 0x8c0   : > { %15802 = vpow2.f32 %v10502_v13  ;;  %v10506_v30 = vmul.f32 1.442695, %v21338_v58  ;;  %v10510_v45 = vmul.f32 1.442695, %v21341_v50  ;;  %v21343_v9 = vsub.f32 %v19494_v10, %v19631_v1 }
 0x8c1   : > { %v19711_v6 = vpop.eup %15784  ;;  %v9921_v53 = vmax.f32 %v9919_v36, %v9920_v48  ;;  %15804 = vpow2.f32 %v10504_v62  ;;  %v21344_v13 = vsub.f32 %v19492_v34, %v19631_v1  ;;  %v21346_v60 = vsub.f32 %v19500_v5, %v19631_v1 }
 0x8c2   : > { %v19719_v28 = vpop.eup %15786  ;;  %15806 = vpow2.f32 %v10506_v30  ;;  %v10512_v17 = vmul.f32 1.442695, %v21343_v9  ;;  %v21347_v62 = vsub.f32 %v19498_v2, %v19631_v1  ;;  %v21349_v58 = vsub.f32 %v19514_v20, %v19631_v1 }
 0x8c3   : > { %v10548_v63 = vadd.f32 %v19719_v28, %v19711_v6  ;;  %v19729_v0 = vpop.eup %15788  ;;  %v9922_v15 = vrot.slane %v9921_v53, 4  ;;  %v10514_v36 = vmul.f32 1.442695, %v21344_v13  ;;  %15808 = vpow2.f32 %v10508_v18 }
 0x8c4   : > { %v19732_v14 = vpop.eup %15790  ;;  %v10516_v35 = vmul.f32 1.442695, %v21346_v60  ;;  %15810 = vpow2.f32 %v10510_v45  ;;  %v10518_v10 = vmul.f32 1.442695, %v21347_v62  ;;  %v10520_v30 = vmul.f32 1.442695, %v21349_v58 }
 0x8c5   : > { %v10549_v43 = vadd.f32 %v19729_v0, %v10548_v63  ;;  %v19738_v32 = vpop.eup %15792  ;;  %v9923_v7 = vmax.f32 %v9921_v53, %v9922_v15  ;;  %15812 = vpow2.f32 %v10512_v17  ;;  %v21350_v5 = vsub.f32 %v19508_v33, %v19631_v1  ;;  %v21360_v58 = vld [vmem:[#allocation20_spill] sm:$0xff] }
 0x8c6   : > { %v19744_v4 = vpop.eup %15794  ;;  %15814 = vpow2.f32 %v10514_v36  ;;  %v21352_v18 = vsub.f32 %v19532_v12, %v19631_v1  ;;  %v21354_v33 = vsub.f32 %v19526_v25, %v19631_v1  ;;  %v21355_v9 = vsub.f32 %v19546_v47, %v19631_v1 }
 0x8c7   : > { %v10550_v42 = vadd.f32 %v19732_v14, %v10549_v43  ;;  %21339 = vst [vmem:[#allocation35_spill] sm:$0xff] %v19744_v4  ;;  %v19753_v63 = vpop.eup %15796  ;;  %v9924_v43 = vrot.slane %v9923_v7, 2  ;;  %15816 = vpow2.f32 %v10516_v35  ;;  %v21368_v35 = vld [vmem:[#allocation33_spill] sm:$0xff] }
 0x8c8   : > { %21342 = vst [vmem:[#allocation16_spill] sm:$0xff] %v19753_v63  ;;  %v19762_v48 = vpop.eup %15798  ;;  %v10524_v50 = vmul.f32 1.442695, %v21352_v18  ;;  %15818 = vpow2.f32 %v10518_v10  ;;  %v10528_v17 = vmul.f32 1.442695, %v21355_v9  ;;  %v21364_v9 = vld [vmem:[#allocation30_spill] sm:$0xff] }
 0x8c9   : > { %v10551_v3 = vadd.f32 %v19738_v32, %v10550_v42  ;;  %21345 = vst [vmem:[#allocation36_spill] sm:$0xff] %v19762_v48  ;;  %v9925_v53 = vmax.f32 %v9923_v7, %v9924_v43  ;;  %v19771_v34 = vpop.eup %15800  ;;  %15820 = vpow2.f32 %v10520_v30  ;;  %v10526_v7 = vmul.f32 1.442695, %v21354_v33 }
 0x8ca   : > { %21348 = vst [vmem:[#allocation19_spill] sm:$0xff] %v19771_v34  ;;  %v19780_v2 = vpop.eup %15802 }
 0x8cb   : > { %v10552_v38 = vadd.f32 %v19744_v4, %v10551_v3  ;;  %v10522_v3 = vmul.f32 1.442695, %v21350_v5  ;;  %v9926_v56 = vrot.slane %v9925_v53, 1  ;;  %21351 = vst [vmem:[#allocation39_spill] sm:$0xff] %v19780_v2  ;;  %v21361_v5 = vld [vmem:[#allocation17_spill] sm:$0xff] }
 0x8cd   : > { %v10553_v55 = vadd.f32 %v19753_v63, %v10552_v38  ;;  %v19786_v20 = vmax.f32 %v9925_v53, %v9926_v56  ;;  %v19788_v38 = vpop.eup %15804  ;;  %15822 = vpow2.f32 %v10522_v3  ;;  %v21366_v56 = vld [vmem:[#allocation8_spill] sm:$0xff] }
 0x8ce   : > { %21353 = vst [vmem:[#allocation40_spill] sm:$0xff] %v19788_v38  ;;  %15824 = vpow2.f32 %v10524_v50  ;;  %v21363_v50 = vld [vmem:[#allocation24_spill] sm:$0xff] }
 0x8cf   : > { %v10554_v42 = vadd.f32 %v19762_v48, %v10553_v55  ;;  %v9928_v13 = vsub.f32 %v19510_v52, %v19786_v20  ;;  %v9929_v36 = vsub.f32 %v19503_v26, %v19786_v20  ;;  %v19801_v55 = vpop.eup %15806  ;;  %v9930_v25 = vsub.f32 %v19528_v24, %v19786_v20  ;;  %v21367_v24 = vld [vmem:[#allocation13_spill] sm:$0xff] }
 0x8d0   : > { %21356 = vst [vmem:[#allocation22_spill] sm:$0xff] %v19801_v55  ;;  %v9931_v43 = vsub.f32 %v19519_v41, %v19786_v20  ;;  %v9932_v47 = vsub.f32 %v19512_v31, %v19786_v20  ;;  %v9933_v52 = vsub.f32 %v19506_v37, %v19786_v20  ;;  %v9934_v26 = vsub.f32 %v19530_v40, %v19786_v20  ;;  %v19816_v62 = vpop.eup %15808  ;;  %v21358_v31 = vld [vmem:[#allocation42_spill] sm:$0xff] }
 0x8d1   : > { %v10555_v15 = vadd.f32 %v19771_v34, %v10554_v42  ;;  %21357 = vst [vmem:[#allocation44_spill] sm:$0xff] %v19816_v62  ;;  %v21359_v42 = vld [vmem:[#allocation65_spill] sm:$0xff]  ;;  %v19826_v53 = vpop.eup %15810  ;;  %15826 = vpow2.f32 %v10526_v7  ;;  %v9964_v34 = vmul.f32 1.442695, %v9930_v25  ;;  %v21369_v48 = vsub.f32 %v19542_v29, %v19631_v1  ;;  %v21372_v25 = vld [vmem:[#allocation38_spill] sm:$0xff] }
 0x8d2   : > { %v19835_v18 = vpop.eup %15812  ;;  %v9966_v63 = vmul.f32 1.442695, %v9931_v43  ;;  %v21373_v4 = vsub.f32 %v21372_v25, %v19631_v1 }
 0x8d3   : > { %v10556_v45 = vadd.f32 %v19780_v2, %v10555_v15  ;;  %v21362_v15 = vld [vmem:[#allocation27_spill] sm:$0xff]  ;;  %v19845_v37 = vpop.eup %15814 }
 0x8d4   : > { %v19854_v33 = vpop.eup %15816  ;;  %v10534_v29 = vmul.f32 1.442695, %v21373_v4 }
 0x8d5   : > { %v10557_v12 = vadd.f32 %v19788_v38, %v10556_v45  ;;  %v9960_v38 = vmul.f32 1.442695, %v9928_v13  ;;  %v9962_v45 = vmul.f32 1.442695, %v9929_v36  ;;  %v21370_v13 = vld [vmem:[#allocation12_spill] sm:$0xff] }
 0x8d6   : > { %v9968_v36 = vmul.f32 1.442695, %v9932_v47 }
 0x8d7   : > { %v10558_v60 = vadd.f32 %v19801_v55, %v10557_v12  ;;  %15828 = vpow2.f32 %v9960_v38  ;;  %v9970_v38 = vmul.f32 1.442695, %v9933_v52 }
 0x8d8   : > { %15830 = vpow2.f32 %v9962_v45 }
 0x8d9   : > { %v10559_v40 = vadd.f32 %v19816_v62, %v10558_v60  ;;  %v21365_v60 = vld [vmem:[#allocation47_spill] sm:$0xff]  ;;  %v19864_v62 = vpop.eup %15818  ;;  %15832 = vpow2.f32 %v10528_v17 }
 0x8da   : > { %v19873_v30 = vpop.eup %15820  ;;  %15834 = vpow2.f32 %v9964_v34  ;;  %v21376_v34 = vsub.f32 %v19566_v49, %v19631_v1 }
 0x8db   : > { %v10560_v3 = vadd.f32 %v19826_v53, %v10559_v40  ;;  %v19881_v2 = vpop.eup %15822  ;;  %v10530_v40 = vmul.f32 1.442695, %v21369_v48 }
 0x8dc   : > { %v19884_v12 = vpop.eup %15824  ;;  %v10538_v47 = vmul.f32 1.442695, %v21376_v34  ;;  %v21384_v34 = vsub.f32 %v19594_v21, %v19631_v1 }
 0x8dd   : > { %v10561_v41 = vadd.f32 %v19835_v18, %v10560_v3  ;;  %v21371_v3 = vsub.f32 %v21370_v13, %v19631_v1  ;;  %15836 = vpow2.f32 %v10530_v40  ;;  %v19905_v40 = vpop.eup %15826  ;;  %v21378_v13 = vld [vmem:[#allocation29_spill] sm:$0xff] }
 0x8de   : > { %15838 = vpow2.f32 %v9966_v63  ;;  %v21377_v63 = vsub.f32 %v19524_v61, %v19786_v20  ;;  %v21381_v61 = vld [vmem:[#allocation26_spill] sm:$0xff] }
 0x8df   : > { %v10562_v55 = vadd.f32 %v19845_v37, %v10561_v41  ;;  %v10532_v7 = vmul.f32 1.442695, %v21371_v3 }
 0x8e0   : > { %v9974_v52 = vmul.f32 1.442695, %v21377_v63 }
 0x8e1   : > { %v10563_v10 = vadd.f32 %v19854_v33, %v10562_v55  ;;  %15840 = vpow2.f32 %v10532_v7  ;;  %v21374_v55 = vld [vmem:[#allocation23_spill] sm:$0xff]  ;;  %v19911_v3 = vpop.eup %15828 }
 0x8e2   : > { %v21375_v17 = vsub.f32 %v21374_v55, %v19631_v1  ;;  %15842 = vpow2.f32 %v9968_v36  ;;  %v21380_v36 = vsub.f32 %v19544_v16, %v19786_v20 }
 0x8e3   : > { %v10564_v41 = vadd.f32 %v19864_v62, %v10563_v10  ;;  %v9972_v10 = vmul.f32 1.442695, %v9934_v26  ;;  %15844 = vpow2.f32 %v10534_v29  ;;  %v21379_v26 = vsub.f32 %v21378_v13, %v19631_v1 }
 0x8e4   : > { %v10536_v43 = vmul.f32 1.442695, %v21375_v17  ;;  %15846 = vpow2.f32 %v9970_v38  ;;  %v9976_v25 = vmul.f32 1.442695, %v21380_v36 }
 0x8e5   : > { %v10565_v48 = vadd.f32 %v19873_v30, %v10564_v41  ;;  %v10540_v7 = vmul.f32 1.442695, %v21379_v26  ;;  %v19916_v41 = vpop.eup %15830 }
 0x8e6   : > { %15848 = vpow2.f32 %v10536_v43  ;;  %v19922_v29 = vpop.eup %15832  ;;  %v10024_v55 = vadd.f32 %v19916_v41, %v19911_v3 }
 0x8e7   : > { %v10566_v45 = vadd.f32 %v19881_v2, %v10565_v48  ;;  %15850 = vpow2.f32 %v9972_v10  ;;  %v21382_v48 = vsub.f32 %v21381_v61, %v19631_v1  ;;  %v19929_v17 = vpop.eup %15834 }
 0x8e8   : > { %15852 = vpow2.f32 %v10538_v47  ;;  %v19935_v10 = vpop.eup %15836  ;;  %v10544_v47 = vmul.f32 1.442695, %v21384_v34 }
 0x8e9   : > { %v10567_v4 = vadd.f32 %v19884_v12, %v10566_v45  ;;  %v10542_v38 = vmul.f32 1.442695, %v21382_v48  ;;  %15854 = vpow2.f32 %v9974_v52  ;;  %v21383_v45 = vsub.f32 %v19540_v59, %v19786_v20  ;;  %v19941_v63 = vpop.eup %15838 }
 0x8ea   : > { %15856 = vpow2.f32 %v10540_v7  ;;  %21385 = vst [vmem:[#allocation45_spill] sm:$0xff] %v19941_v63  ;;  %v21386_v52 = vsub.f32 %v21358_v31, %v19786_v20  ;;  %v21387_v7 = vsub.f32 %v19590_v27, %v19631_v1  ;;  %v21391_v1 = vsub.f32 %v21360_v58, %v19786_v20 }
 0x8eb   : > { %v10568_v49 = vadd.f32 %v19905_v40, %v10567_v4  ;;  %v9978_v16 = vmul.f32 1.442695, %v21383_v45  ;;  %v10025_v4 = vadd.f32 %v19929_v17, %v10024_v55  ;;  %15858 = vpow2.f32 %v9976_v25  ;;  %v19947_v59 = vpop.eup %15840 }
 0x8ec   : > { %v9980_v26 = vmul.f32 1.442695, %v21386_v52  ;;  %15860 = vpow2.f32 %v10542_v38  ;;  %v19953_v36 = vpop.eup %15842  ;;  %v21389_v25 = vsub.f32 %v21359_v42, %v19786_v20 }
 0x8ed   : > { %v10569_v43 = vadd.f32 %v19922_v29, %v10568_v49  ;;  %v10546_v49 = vmul.f32 1.442695, %v21387_v7  ;;  %v10026_v21 = vadd.f32 %v19941_v63, %v10025_v4  ;;  %21388 = vst [vmem:[#allocation25_spill] sm:$0xff] %v19953_v36  ;;  %15862 = vpow2.f32 %v9978_v16  ;;  %v19959_v31 = vpop.eup %15844 }
 0x8ee   : > { %v9982_v48 = vmul.f32 1.442695, %v21389_v25  ;;  %15864 = vpow2.f32 %v10544_v47  ;;  %v19962_v55 = vpop.eup %15846  ;;  %v21393_v47 = vsub.f32 %v21361_v5, %v19786_v20  ;;  %v21395_v7 = vsub.f32 %v21362_v15, %v19786_v20 }
 0x8ef   : > { %v10570_v13 = vadd.f32 %v19935_v10, %v10569_v43  ;;  %v10027_v38 = vadd.f32 %v19953_v36, %v10026_v21  ;;  %21390 = vst [vmem:[#allocation49_spill] sm:$0xff] %v19962_v55  ;;  %15866 = vpow2.f32 %v9980_v26  ;;  %v9984_v43 = vmul.f32 1.442695, %v21391_v1 }
 0x8f0   : > { %v19968_v45 = vpop.eup %15848  ;;  %15868 = vpow2.f32 %v10546_v49  ;;  %v9986_v4 = vmul.f32 1.442695, %v21393_v47  ;;  %v9988_v49 = vmul.f32 1.442695, %v21395_v7 }
 0x8f1   : > { %v10571_v61 = vadd.f32 %v19947_v59, %v10570_v13  ;;  %v10028_v42 = vadd.f32 %v19962_v55, %v10027_v38  ;;  %v19971_v16 = vpop.eup %15850  ;;  %15870 = vpow2.f32 %v9982_v48  ;;  %v21397_v48 = vsub.f32 %v21363_v50, %v19786_v20 }
 0x8f2   : > { %21392 = vst [vmem:[#allocation54_spill] sm:$0xff] %v19971_v16  ;;  %v19977_v13 = vpop.eup %15852  ;;  %15872 = vpow2.f32 %v9984_v43 }
 0x8f3   : > { %v10572_v27 = vadd.f32 %v19959_v31, %v10571_v61  ;;  %v10029_v52 = vadd.f32 %v19971_v16, %v10028_v42  ;;  %v19980_v58 = vpop.eup %15854  ;;  %15874 = vpow2.f32 %v9986_v4  ;;  %v9990_v38 = vmul.f32 1.442695, %v21397_v48 }
 0x8f4   : > { %21394 = vst [vmem:[#allocation28_spill] sm:$0xff] %v19980_v58  ;;  %v19986_v21 = vpop.eup %15856  ;;  %15876 = vpow2.f32 %v9988_v49  ;;  %v21399_v42 = vsub.f32 %v19592_v22, %v19786_v20  ;;  %v21403_v48 = vsub.f32 %v21365_v60, %v19786_v20  ;;  %v21406_v60 = vsub.f32 %v19612_v46, %v19786_v20 }
 0x8f5   : > { %v10573_v34 = vadd.f32 %v19968_v45, %v10572_v27  ;;  %v10030_v61 = vadd.f32 %v19980_v58, %v10029_v52  ;;  %v19989_v25 = vpop.eup %15858  ;;  %15878 = vpow2.f32 %v9990_v38  ;;  %v21408_v46 = vsub.f32 %v19618_v54, %v19786_v20 }
 0x8f6   : > { %21396 = vst [vmem:[#allocation59_spill] sm:$0xff] %v19989_v25  ;;  %v19995_v27 = vpop.eup %15860  ;;  %v21410_v54 = vsub.f32 %v21367_v24, %v19786_v20 }
 0x8f7   : > { %v10574_v26 = vadd.f32 %v19977_v13, %v10573_v34  ;;  %v10031_v1 = vadd.f32 %v19989_v25, %v10030_v61  ;;  %v19998_v43 = vpop.eup %15862  ;;  %v9992_v34 = vmul.f32 1.442695, %v21399_v42 }
 0x8f8   : > { %21398 = vst [vmem:[#allocation66_spill] sm:$0xff] %v19998_v43  ;;  %v20004_v47 = vpop.eup %15864 }
 0x8f9   : > { %v10575_v5 = vadd.f32 %v19986_v21, %v10574_v26  ;;  %v10032_v4 = vadd.f32 %v19998_v43, %v10031_v1  ;;  %v20007_v52 = vpop.eup %15866  ;;  %v21401_v26 = vsub.f32 %v21364_v9, %v19786_v20  ;;  %15880 = vpow2.f32 %v9992_v34 }
 0x8fa   : > { %21400 = vst [vmem:[#allocation31_spill] sm:$0xff] %v20007_v52  ;;  %v20013_v61 = vpop.eup %15868  ;;  %v9996_v1 = vmul.f32 1.442695, %v21403_v48  ;;  %v21405_v9 = vsub.f32 %v21366_v56, %v19786_v20  ;;  %v10000_v34 = vmul.f32 1.442695, %v21406_v60  ;;  %v21407_v56 = vsub.f32 %v19610_v57, %v19786_v20 }
 0x8fb   : > { %v10576_v15 = vadd.f32 %v19995_v27, %v10575_v5  ;;  %v9994_v7 = vmul.f32 1.442695, %v21401_v26  ;;  %v10033_v49 = vadd.f32 %v20007_v52, %v10032_v4  ;;  %v20016_v5 = vpop.eup %15870 }
 0x8fc   : > { %21402 = vst [vmem:[#allocation67_spill] sm:$0xff] %v20016_v5  ;;  %v20023_v38 = vpop.eup %15872  ;;  %v9998_v26 = vmul.f32 1.442695, %v21405_v9 }
 0x8fd   : > { %v10577_v50 = vadd.f32 %v20004_v47, %v10576_v15  ;;  %v10034_v15 = vadd.f32 %v20016_v5, %v10033_v49  ;;  %21404 = vst [vmem:[#allocation43_spill] sm:$0xff] %v20023_v38  ;;  %15882 = vpow2.f32 %v9994_v7  ;;  %v20029_v52 = vpop.eup %15874  ;;  %v10002_v7 = vmul.f32 1.442695, %v21407_v56 }
 0x8fe   : > { %15884 = vpow2.f32 %v9996_v1  ;;  %v20035_v48 = vpop.eup %15876  ;;  %v10004_v1 = vmul.f32 1.442695, %v21408_v46 }
 0x8ff   : > { %v10578_v22 = vadd.f32 %v20013_v61, %v10577_v50  ;;  %v10035_v4 = vadd.f32 %v20023_v38, %v10034_v15  ;;  %15886 = vpow2.f32 %v9998_v26  ;;  %v20041_v9 = vpop.eup %15878 }
 0x900   : > { %15888 = vpow2.f32 %v10000_v34 }
 0x901   : > { %v10579_v42 = vrot.slane %v10578_v22, 4  ;;  %v10036_v49 = vadd.f32 %v20029_v52, %v10035_v4  ;;  %15890 = vpow2.f32 %v10002_v7 }
 0x902   : > { %15892 = vpow2.f32 %v10004_v1 }
 0x903   : > { %v10580_v50 = vadd.f32 %v10579_v42, %v10578_v22  ;;  %v10037_v15 = vadd.f32 %v20035_v48, %v10036_v49  ;;  %v21409_v42 = vsub.f32 %v19616_v8, %v19786_v20  ;;  %v20050_v60 = vpop.eup %15880 }
 0x905   : > { %v10581_v5 = vrot.slane %v10580_v50, 2  ;;  %v10006_v4 = vmul.f32 1.442695, %v21409_v42  ;;  %v10038_v26 = vadd.f32 %v20041_v9, %v10037_v15  ;;  %v21411_v15 = vsub.f32 %v21368_v35, %v19786_v20 }
 0x906   : > { %v21413_v35 = vsub.f32 %v19636_v23, %v19786_v20  ;;  %v21415_v23 = vsub.f32 %v19705_v44, %v19786_v20 }
 0x907   : > { %v10582_v22 = vadd.f32 %v10581_v5, %v10580_v50  ;;  %v10039_v49 = vadd.f32 %v20050_v60, %v10038_v26  ;;  %v20053_v56 = vpop.eup %15882  ;;  %v10008_v50 = vmul.f32 1.442695, %v21410_v54  ;;  %15894 = vpow2.f32 %v10006_v4  ;;  %v15627_v26 = vpop.permute.xlu0 %15626 }
 0x908   : > { %v20059_v34 = vpop.eup %15884  ;;  %v10010_v7 = vmul.f32 1.442695, %v21411_v15  ;;  %v15628_v15 = vunpack.i.l.bf16 %v15627_v26 }
 0x909   : > { %v10583_v57 = vrot.slane %v10582_v22, 1  ;;  %v10040_v8 = vadd.f32 %v20053_v56, %v10039_v49  ;;  %v20065_v42 = vpop.eup %15886  ;;  %v10014_v49 = vmul.f32 1.442695, %v21413_v35 }
 0x90a   : > { %v20071_v4 = vpop.eup %15888 }
 0x90b   : > { %v10584_v5 = vadd.f32 %v10583_v57, %v10582_v22  ;;  %v10041_v46 = vadd.f32 %v20059_v34, %v10040_v8  ;;  %v21412_v22 = vsub.f32 %v19703_v39, %v19786_v20  ;;  %v15622_v57 = vpop.permute.xlu1 %15621  ;;  %v20077_v54 = vpop.eup %15890  ;;  %v21414_v39 = vsub.f32 %v19707_v11, %v19786_v20 }
 0x90c   : > { %v15629_v8 = vunpack.i.h.bf16 %v15627_v26  ;;  %v15623_v38 = vunpack.i.l.bf16 %v15622_v57  ;;  %v21416_v26 = vsub.f32 %v19717_v19, %v19786_v20 }
 0x90d   : > { %15896 = vrcp.f32 %v10584_v5  ;;  %v10012_v24 = vmul.f32 1.442695, %v21412_v22  ;;  %v10042_v1 = vadd.f32 %v20065_v42, %v10041_v46  ;;  %v20083_v22 = vpop.eup %15892 }
 0x90e   : > { %15898 = vpow2.f32 %v10008_v50  ;;  %v10016_v50 = vmul.f32 1.442695, %v21414_v39  ;;  %v14718_v25 = vpack.c.bf16 %v15629_v8, %v15628_v15  ;;  %v21418_v15 = vld [vmem:[#allocation64_spill] sm:$0xff] }
 0x90f   : > { %15900 = vpow2.f32 %v10010_v7  ;;  %v10043_v5 = vadd.f32 %v20071_v4, %v10042_v1  ;;  %v15624_v7 = vunpack.i.h.bf16 %v15622_v57  ;;  %v10018_v1 = vmul.f32 1.442695, %v21415_v23  ;;  %v15632_v11 = vpop.permute.xlu1 %15631 }
 0x910   : > { %15902 = vpow2.f32 %v10012_v24  ;;  %v21417_v57 = vsub.f32 %v19709_v51, %v19786_v20  ;;  %v15634_v58 = vunpack.i.h.bf16 %v15632_v11  ;;  %v15633_v19 = vunpack.i.l.bf16 %v15632_v11 }
 0x911   : > { %v10044_v46 = vadd.f32 %v20077_v54, %v10043_v5  ;;  %15904 = vpow2.f32 %v10014_v49  ;;  %v20088_v35 = vpop.eup %15894  ;;  %v10020_v5 = vmul.f32 1.442695, %v21416_v26 }
 0x912   : > { %15906 = vpow2.f32 %v10016_v50  ;;  %v10022_v49 = vmul.f32 1.442695, %v21417_v57  ;;  %v14714_v50 = vpack.c.bf16 %v15624_v7, %v15623_v38 }
 0x913   : > { %v10045_v24 = vadd.f32 %v20083_v22, %v10044_v46  ;;  %15908 = vpow2.f32 %v10018_v1 }
 0x914   : > { %15910 = vpow2.f32 %v10020_v5 }
 0x915   : > { %v10046_v39 = vadd.f32 %v20088_v35, %v10045_v24  ;;  %15912 = vpow2.f32 %v10022_v49 }
 0x917   : > { %v20091_v43 = vpop.eup %15896 }
 0x918   : > { %v10586_v44 = vmul.f32 %v20091_v43, %v19711_v6  ;;  %v10587_v46 = vmul.f32 %v20091_v43, %v19719_v28  ;;  %v20104_v23 = vpop.eup %15898  ;;  %v10588_v51 = vmul.f32 %v20091_v43, %v19729_v0  ;;  %v10589_v6 = vmul.f32 %v20091_v43, %v19732_v14 }
 0x919   : > { %v10047_v26 = vadd.f32 %v20104_v23, %v10046_v39  ;;  %v20109_v20 = vpop.eup %15900  ;;  %v10590_v28 = vmul.f32 %v20091_v43, %v19738_v32  ;;  %v20117_v38 = vmul.f32 %v20091_v43, %v19826_v53  ;;  %v20123_v0 = vmul.f32 %v20091_v43, %v19835_v18 }
 0x91a   : > { %14454 = vmatprep.mubr.f32.mxu0 %v10586_v44  ;;  %v20127_v14 = vmul.f32 %v20091_v43, %v19845_v37  ;;  %v20129_v7 = vpop.eup %15902  ;;  %v20133_v32 = vmul.f32 %v20091_v43, %v19854_v33  ;;  %v20137_v53 = vmul.f32 %v20091_v43, %v19864_v62  ;;  %v20141_v1 = vmul.f32 %v20091_v43, %v19873_v30  ;;  %v21420_v44 = vld [vmem:[#allocation16_spill] sm:$0xff] }
 0x91b   : > { %14455 = vmatmul.mubr.f32.vlgmr.msra.gmra.mrb[96].mxu0 %v10587_v46  ;;  %v10048_v8 = vadd.f32 %v20109_v20, %v10047_v26  ;;  %v20145_v18 = vmul.f32 %v20091_v43, %v19881_v2  ;;  %v20150_v24 = vmul.f32 %v20091_v43, %v19884_v12  ;;  %v20154_v33 = vmul.f32 %v20091_v43, %v19905_v40  ;;  %v20160_v30 = vpop.eup %15904 }
 0x91c   : > { %14713 = vmatpush3.bf16.msra.mxu0 %v21418_v15  ;;  %14457 = vmatprep.mubr.f32.mxu0 %v10588_v51  ;;  %v20158_v62 = vmul.f32 %v20091_v43, %v19922_v29  ;;  %v20164_v2 = vmul.f32 %v20091_v43, %v19935_v10  ;;  %v20168_v11 = vmul.f32 %v20091_v43, %v19947_v59  ;;  %v15637_v29 = vpop.permute.xlu0 %15636  ;;  %v20187_v57 = vpop.eup %15906 }
 0x91d   : > { %14715 = vmatprep.subr.bf16.mxu0 %v14714_v50  ;;  %v10049_v37 = vadd.f32 %v20129_v7, %v10048_v8  ;;  %v20172_v12 = vmul.f32 %v20091_v43, %v19959_v31  ;;  %v20176_v40 = vmul.f32 %v20091_v43, %v19968_v45  ;;  %v20181_v10 = vmul.f32 %v20091_v43, %v19977_v13  ;;  %v21419_v31 = vld [vmem:[#allocation35_spill] sm:$0xff] }
 0x91e   : > { %v20185_v59 = vmul.f32 %v20091_v43, %v19986_v21  ;;  %v10591_v45 = vmul.f32 %v20091_v43, %v21419_v31  ;;  %v20193_v49 = vmul.f32 %v20091_v43, %v19995_v27  ;;  %v20197_v39 = vmul.f32 %v20091_v43, %v20004_v47  ;;  %v15642_v27 = vpop.permute.xlu1 %15641 }
 0x91f   : > { %14458 = vmatmul.mubr.f32.gmra.mrb[98].mxu0 %v10589_v6  ;;  %v10050_v5 = vadd.f32 %v20160_v30, %v10049_v37  ;;  %v20201_v13 = vmul.f32 %v20091_v43, %v20013_v61  ;;  %v10592_v46 = vmul.f32 %v20091_v43, %v21420_v44  ;;  %v15639_v26 = vunpack.i.h.bf16 %v15637_v29  ;;  %v21421_v61 = vld [vmem:[#allocation36_spill] sm:$0xff] }
 0x920   : > { %14717 = vmatpush3.bf16.msra.mxu0 %v14714_v50  ;;  %14460 = vmatprep.mubr.f32.mxu0 %v10590_v28  ;;  %v20206_v50 = vpop.eup %15908  ;;  %v15638_v51 = vunpack.i.l.bf16 %v15637_v29  ;;  %v14722_v6 = vpack.c.bf16 %v15634_v58, %v15633_v19  ;;  %v10593_v8 = vmul.f32 %v20091_v43, %v21421_v61  ;;  %v15644_v19 = vunpack.i.h.bf16 %v15642_v27  ;;  %v21424_v61 = vld [vmem:[#allocation40_spill] sm:$0xff] }
 0x921   : > { %14719 = vmatprep.subr.bf16.mxu0 %v14718_v25  ;;  %v10051_v21 = vadd.f32 %v20187_v57, %v10050_v5  ;;  %v20209_v47 = vpop.eup %15910  ;;  %v21422_v5 = vld [vmem:[#allocation19_spill] sm:$0xff]  ;;  %v15643_v31 = vunpack.i.l.bf16 %v15642_v27  ;;  %v21425_v27 = vld [vmem:[#allocation22_spill] sm:$0xff] }
 0x922   : > { %v20213_v15 = vpop.eup %15912  ;;  %v10594_v29 = vmul.f32 %v20091_v43, %v21422_v5  ;;  %v14726_v58 = vpack.c.bf16 %v15639_v26, %v15638_v51  ;;  %v15652_v26 = vpop.permute.xlu1 %15651 }
 0x923   : > { %14461 = vmatmul.mubr.f32.gmra.mrb[100].mxu0 %v10591_v45  ;;  %v10052_v28 = vadd.f32 %v20206_v50, %v10051_v21  ;;  %v15647_v45 = vpop.permute.xlu0 %15646  ;;  %v21423_v21 = vld [vmem:[#allocation39_spill] sm:$0xff]  ;;  %v14730_v5 = vpack.c.bf16 %v15644_v19, %v15643_v31  ;;  %v15654_v36 = vunpack.i.h.bf16 %v15652_v26  ;;  %v15653_v63 = vunpack.i.l.bf16 %v15652_v26 }
 0x924   : > { %14721 = vmatpush3.bf16.msra.mxu0 %v14718_v25  ;;  %14463 = vmatprep.mubr.f32.mxu0 %v10592_v46  ;;  %v10595_v44 = vmul.f32 %v20091_v43, %v21423_v21  ;;  %v15649_v16 = vunpack.i.h.bf16 %v15647_v45  ;;  %v15648_v55 = vunpack.i.l.bf16 %v15647_v45  ;;  %v21439_v45 = vmov 0.0  }
 0x925   : > { %14723 = vmatprep.subr.bf16.mxu0 %v14722_v6  ;;  %v10053_v37 = vadd.f32 %v20209_v47, %v10052_v28  ;;  %v10596_v28 = vmul.f32 %v20091_v43, %v21424_v61  ;;  %v14738_v31 = vpack.c.bf16 %v15654_v36, %v15653_v63 }
 0x926   : > { %v14734_v21 = vpack.c.bf16 %v15649_v16, %v15648_v55 }
 0x927   : > { %14464 = vmatmul.mubr.f32.gmra.mrb[102].mxu0 %v10593_v8  ;;  %v10054_v25 = vadd.f32 %v20213_v15, %v10053_v37  ;;  %v21426_v37 = vld [vmem:[#allocation44_spill] sm:$0xff] }
 0x928   : > { %14725 = vmatpush3.bf16.msra.mxu0 %v14722_v6  ;;  %14466 = vmatprep.mubr.f32.mxu0 %v10594_v29  ;;  %v10597_v6 = vmul.f32 %v20091_v43, %v21425_v27  ;;  %v10598_v29 = vmul.f32 %v20091_v43, %v21426_v37 }
 0x929   : > { %14727 = vmatprep.subr.bf16.mxu0 %v14726_v58  ;;  %v10055_v46 = vrot.slane %v10054_v25, 4 }
 0x92b   : > { %14467 = vmatmul.mubr.f32.gmra.mrb[104].mxu0 %v10595_v44  ;;  %v10056_v51 = vadd.f32 %v10055_v46, %v10054_v25  ;;  %v20286_v44 = vld [vmem:[%s20382_s8] sm:$0xff] }
 0x92c   : > { %14729 = vmatpush3.bf16.msra.mxu0 %v14726_v58  ;;  %14469 = vmatprep.mubr.f32.mxu0 %v10596_v28  ;;  %v11243_v46 = vld [vmem:[%s20383_s9] sm:$0xff]  ;;  %v16014_v28 = vmov 0  }
 0x92d   : > { %14731 = vmatprep.subr.bf16.mxu0 %v14730_v5  ;;  %v10057_v8 = vrot.slane %v10056_v51, 2  ;;  %15655 = vset.pattern.permute.xlu0 %v16014_v28 }
 0x92e   : > { %11246 = vperm.xlu0 %15655, %v11243_v46  }
 0x92f   : > { %14470 = vmatmul.mubr.f32.gmra.mrb[106].mxu0 %v10597_v6  ;;  %v10058_v61 = vadd.f32 %v10057_v8, %v10056_v51 }
 0x930   : > { %14733 = vmatpush3.bf16.msra.mxu0 %v14730_v5  ;;  %14472 = vmatprep.mubr.f32.mxu0 %v10598_v29 }
 0x931   : > { %14735 = vmatprep.subr.bf16.mxu0 %v14734_v21  ;;  %v10059_v19 = vrot.slane %v10058_v61, 1 }
 0x933   : > { %14473 = vmatmul.mubr.f32.gmra.mrb[108].mxu0 %v20117_v38  ;;  %v10060_v58 = vadd.f32 %v10059_v19, %v10058_v61 }
 0x934   : > { %14737 = vmatpush3.bf16.msra.mxu0 %v14734_v21  ;;  %14475 = vmatprep.mubr.f32.mxu0 %v20123_v0 }
 0x935   : > { %14739 = vmatprep.subr.bf16.mxu0 %v14738_v31  ;;  %15914 = vrcp.f32 %v10060_v58 }
 0x937   : > { %14476 = vmatmul.mubr.f32.gmra.mrb[110].mxu0 %v20127_v14 }
 0x938   : > { %14741 = vmatpush3.bf16.msra.mxu0 %v14738_v31  ;;  %14478 = vmatprep.mubr.f32.mxu0 %v20133_v32 }
 0x93b   : > { %14479 = vmatmul.mubr.f32.gmra.mrb[112].mxu0 %v20137_v53 }
 0x93c   : > { %14481 = vmatprep.mubr.f32.mxu0 %v20141_v1 }
 0x93f   : > { %14482 = vmatmul.mubr.f32.gmra.mrb[114].mxu0 %v20145_v18  ;;  %v15915_v63 = vpop.eup %15914  ;;  %v21428_v18 = vld [vmem:[#allocation25_spill] sm:$0xff] }
 0x940   : > { %14484 = vmatprep.mubr.f32.mxu0 %v20150_v24  ;;  %v10075_v36 = vmul.f32 %v15915_v63, %v20029_v52  ;;  %v10076_v55 = vmul.f32 %v15915_v63, %v20035_v48  ;;  %v10077_v16 = vmul.f32 %v15915_v63, %v20041_v9  ;;  %v10078_v43 = vmul.f32 %v15915_v63, %v20050_v60 }
 0x941   : > { %v10079_v38 = vmul.f32 %v15915_v63, %v20053_v56  ;;  %v10080_v0 = vmul.f32 %v15915_v63, %v20059_v34  ;;  %v10081_v14 = vmul.f32 %v15915_v63, %v20065_v42  ;;  %v10082_v32 = vmul.f32 %v15915_v63, %v20071_v4 }
 0x942   : > { %v10083_v53 = vmul.f32 %v15915_v63, %v20077_v54  ;;  %v10084_v1 = vmul.f32 %v15915_v63, %v20083_v22  ;;  %v10085_v52 = vmul.f32 %v15915_v63, %v20088_v35  ;;  %v10086_v48 = vmul.f32 %v15915_v63, %v20104_v23 }
 0x943   : > { %14485 = vmatmul.mubr.f32.gmra.mrb[116].mxu0 %v20154_v33  ;;  %v10087_v9 = vmul.f32 %v15915_v63, %v20109_v20  ;;  %v10088_v60 = vmul.f32 %v15915_v63, %v20129_v7  ;;  %v10089_v56 = vmul.f32 %v15915_v63, %v20160_v30  ;;  %v10090_v34 = vmul.f32 %v15915_v63, %v20187_v57  ;;  %v21427_v20 = vld [vmem:[#allocation45_spill] sm:$0xff]  ;;  %v21430_v30 = vld [vmem:[#allocation54_spill] sm:$0xff]  ;;  %v21435_v57 = vld [vmem:[#allocation67_spill] sm:$0xff] }
 0x944   : > { %14487 = vmatprep.mubr.f32.mxu0 %v20158_v62  ;;  %v10091_v42 = vmul.f32 %v15915_v63, %v20206_v50  ;;  %v10092_v4 = vmul.f32 %v15915_v63, %v20209_v47  ;;  %v10093_v54 = vmul.f32 %v15915_v63, %v20213_v15  ;;  %v10062_v22 = vmul.f32 %v15915_v63, %v19911_v3  ;;  %v21429_v33 = vld [vmem:[#allocation49_spill] sm:$0xff]  ;;  %v21431_v3 = vld [vmem:[#allocation28_spill] sm:$0xff]  ;;  %v21438_v15 = vld [vmem:[#allocation7_spill] sm:$0xff] }
 0x945   : > { %v10063_v35 = vmul.f32 %v15915_v63, %v19916_v41  ;;  %v10064_v23 = vmul.f32 %v15915_v63, %v19929_v17  ;;  %v10065_v7 = vmul.f32 %v15915_v63, %v21427_v20  ;;  %v10066_v24 = vmul.f32 %v15915_v63, %v21428_v18  ;;  %v21433_v17 = vld [vmem:[#allocation66_spill] sm:$0xff] }
 0x946   : > { %v10067_v62 = vmul.f32 %v15915_v63, %v21429_v33  ;;  %v21437_v50 = vlaneseq }
 0x947   : > { %14488 = vmatmul.mubr.f32.gmra.mrb[118].mxu0 %v20164_v2  ;;  %v10068_v2 = vmul.f32 %v15915_v63, %v21430_v30 }
 0x948   : > { %14490 = vmatprep.mubr.f32.mxu0 %v20168_v11  ;;  %v10069_v11 = vmul.f32 %v15915_v63, %v21431_v3  ;;  %v11165_v47 = vand.u32 127, %v21437_v50 }
 0x94a   : > { %vm11166_vm10 = vcmp.eq.s32.totalorder %v21438_v15, %v11165_v47 }
 0x94b   : > { %14491 = vmatmul.mubr.f32.gmra.mrb[120].mxu0 %v20172_v12  ;;  %v21432_v12 = vld [vmem:[#allocation59_spill] sm:$0xff]  ;;  %v11167_v25 = vsel %vm11166_vm10, 1.0, %v21439_v45 }
 0x94c   : > { %14493 = vmatprep.mubr.f32.mxu0 %v20176_v40  ;;  %v10070_v41 = vmul.f32 %v15915_v63, %v21432_v12  ;;  %v10071_v40 = vmul.f32 %v15915_v63, %v21433_v17  ;;  %13226 = vmatprep.mubr.msk.f32.mxu1 %vm5400_vm12, %v11167_v25 }
 0x94d   : > { %13227 = vmatmul.mubr.msk.f32.vlgmr.msra.gmra.mrb[78].mxu1 %vm5400_vm12, %v11167_v25 }
 0x94e   : > { %13260 = vmatprep.mubr.msk.f32.mxu1 %vm5400_vm12, %v20286_v44 }
 0x94f   : > { %14494 = vmatmul.mubr.f32.gmra.mrb[122].mxu0 %v20181_v10  ;;  %v21434_v10 = vld [vmem:[#allocation31_spill] sm:$0xff] }
 0x950   : > { %14496 = vmatprep.mubr.f32.mxu0 %v20185_v59  ;;  %v10072_v59 = vmul.f32 %v15915_v63, %v21434_v10 }
 0x953   : > { %14497 = vmatmul.mubr.f32.gmra.mrb[124].mxu0 %v20193_v49  ;;  %v10073_v49 = vmul.f32 %v15915_v63, %v21435_v57 }
 0x954   : > { %14499 = vmatprep.mubr.f32.mxu0 %v20197_v39  ;;  %v21436_v39 = vld [vmem:[#allocation43_spill] sm:$0xff] }
 0x957   : > { %14500 = vmatmul.mubr.f32.gmra.mrb[126].mxu0 %v20201_v13  ;;  %v10074_v13 = vmul.f32 %v15915_v63, %v21436_v39 }
 0x958   : > { %14534 = vmatprep.mubr.f32.mxu0 %v10062_v22 }
 0x95b   : > { %14535 = vmatmul.mubr.f32.vlgmr.msra.gmra.mrb[96].mxu0 %v10063_v35 }
 0x95c   : > { %14537 = vmatprep.mubr.f32.mxu0 %v10064_v23 }
 0x95f   : > { %14538 = vmatmul.mubr.f32.gmra.mrb[98].mxu0 %v10065_v7 }
 0x960   : > { %14540 = vmatprep.mubr.f32.mxu0 %v10066_v24 }
 0x963   : > { %14541 = vmatmul.mubr.f32.gmra.mrb[100].mxu0 %v10067_v62 }
 0x964   : > { %14543 = vmatprep.mubr.f32.mxu0 %v10068_v2 }
 0x967   : > { %14544 = vmatmul.mubr.f32.gmra.mrb[102].mxu0 %v10069_v11 }
 0x968   : > { %14546 = vmatprep.mubr.f32.mxu0 %v10070_v41 }
 0x96b   : > { %14547 = vmatmul.mubr.f32.gmra.mrb[104].mxu0 %v10071_v40 }
 0x96c   : > { %14549 = vmatprep.mubr.f32.mxu0 %v10072_v59 }
 0x96f   : > { %14550 = vmatmul.mubr.f32.gmra.mrb[106].mxu0 %v10073_v49 }
 0x970   : > { %14552 = vmatprep.mubr.f32.mxu0 %v10074_v13 }
 0x973   : > { %14553 = vmatmul.mubr.f32.gmra.mrb[108].mxu0 %v10075_v36 }
 0x974   : > { %14555 = vmatprep.mubr.f32.mxu0 %v10076_v55 }
 0x977   : > { %14556 = vmatmul.mubr.f32.gmra.mrb[110].mxu0 %v10077_v16 }
 0x978   : > { %14558 = vmatprep.mubr.f32.mxu0 %v10078_v43 }
 0x97b   : > { %14559 = vmatmul.mubr.f32.gmra.mrb[112].mxu0 %v10079_v38 }
 0x97c   : > { %14561 = vmatprep.mubr.f32.mxu0 %v10080_v0 }
 0x97f   : > { %14562 = vmatmul.mubr.f32.gmra.mrb[114].mxu0 %v10081_v14 }
 0x980   : > { %14564 = vmatprep.mubr.f32.mxu0 %v10082_v32 }
 0x983   : > { %14565 = vmatmul.mubr.f32.gmra.mrb[116].mxu0 %v10083_v53 }
 0x984   : > { %14567 = vmatprep.mubr.f32.mxu0 %v10084_v1 }
 0x987   : > { %14568 = vmatmul.mubr.f32.gmra.mrb[118].mxu0 %v10085_v52 }
 0x988   : > { %14570 = vmatprep.mubr.f32.mxu0 %v10086_v48 }
 0x98b   : > { %14571 = vmatmul.mubr.f32.gmra.mrb[120].mxu0 %v10087_v9 }
 0x98c   : > { %14573 = vmatprep.mubr.f32.mxu0 %v10088_v60 }
 0x98f   : > { %14574 = vmatmul.mubr.f32.gmra.mrb[122].mxu0 %v10089_v56 }
 0x990   : > { %14576 = vmatprep.mubr.f32.mxu0 %v10090_v34 }
 0x993   : > { %14577 = vmatmul.mubr.f32.gmra.mrb[124].mxu0 %v10091_v42 }
 0x994   : > { %14579 = vmatprep.mubr.f32.mxu0 %v10092_v4 }
 0x997   : > { %14580 = vmatmul.mubr.f32.gmra.mrb[126].mxu0 %v10093_v54 }
 0x9ad   : > { %v11247_v40 = vpop.permute.xlu0 %11246 }
 0xa2e   : > { %v14536_v5 = vpop.f32.mrb[96].mxu0 }
 0xa2f   : > { %v11005_v26 = vpop.f32.mrb[97].mxu0 }
 0xa30   : > { %v14793_v51 = vpack.c.bf16 %v14536_v5, %v11005_v26 }
 0xa32   : > { %v14539_v27 = vpop.f32.mrb[98].mxu0 }
 0xa33   : > { %v11015_v6 = vpop.f32.mrb[99].mxu0 }
 0xa34   : > { %v14799_v8 = vpack.c.bf16 %v14539_v27, %v11015_v6 }
 0xa36   : > { %v14542_v37 = vpop.f32.mrb[100].mxu0 }
 0xa37   : > { %v11025_v29 = vpop.f32.mrb[101].mxu0 }
 0xa38   : > { %v14805_v21 = vpack.c.bf16 %v14542_v37, %v11025_v29 }
 0xa3a   : > { %v14545_v61 = vpop.f32.mrb[102].mxu0 }
 0xa3b   : > { %v11035_v19 = vpop.f32.mrb[103].mxu0 }
 0xa3c   : > { %v14811_v31 = vpack.c.bf16 %v14545_v61, %v11035_v19 }
 0xa3e   : > { %v14548_v58 = vpop.f32.mrb[104].mxu0 }
 0xa3f   : > { %v11045_v63 = vpop.f32.mrb[105].mxu0 }
 0xa40   : > { %v14817_v36 = vpack.c.bf16 %v14548_v58, %v11045_v63 }
 0xa42   : > { %v14551_v55 = vpop.f32.mrb[106].mxu0 }
 0xa43   : > { %v11055_v16 = vpop.f32.mrb[107].mxu0 }
 0xa44   : > { %v14823_v43 = vpack.c.bf16 %v14551_v55, %v11055_v16 }
 0xa46   : > { %v14554_v38 = vpop.f32.mrb[108].mxu0 }
 0xa47   : > { %v11065_v0 = vpop.f32.mrb[109].mxu0 }
 0xa48   : > { %v14829_v14 = vpack.c.bf16 %v14554_v38, %v11065_v0 }
 0xa4a   : > { %v14557_v32 = vpop.f32.mrb[110].mxu0 }
 0xa4b   : > { %v11075_v53 = vpop.f32.mrb[111].mxu0 }
 0xa4c   : > { %v14835_v1 = vpack.c.bf16 %v14557_v32, %v11075_v53 }
 0xa4e   : > { %v14560_v52 = vpop.f32.mrb[112].mxu0 }
 0xa4f   : > { %v11085_v48 = vpop.f32.mrb[113].mxu0 }
 0xa50   : > { %v14790_v9 = vpack.c.bf16 %v14560_v52, %v11085_v48 }
 0xa52   : > { %v14563_v60 = vpop.f32.mrb[114].mxu0  ;;  %14792 = vmatprep.subr.msk.bf16.mxu1 %vm19175_vm9, %v14790_v9 }
 0xa53   : > { %v11095_v34 = vpop.f32.mrb[115].mxu0  ;;  %14795 = vmatpush3.bf16.xpose.msk.msra.mxu1 %vm19175_vm9, %v14793_v51 }
 0xa54   : > { %v14796_v42 = vpack.c.bf16 %v14563_v60, %v11095_v34 }
 0xa56   : > { %v14566_v4 = vpop.f32.mrb[116].mxu0  ;;  %14798 = vmatprep.subr.msk.bf16.mxu1 %vm19175_vm9, %v14796_v42 }
 0xa57   : > { %v11105_v54 = vpop.f32.mrb[117].mxu0 }
 0xa58   : > { %v14802_v22 = vpack.c.bf16 %v14566_v4, %v11105_v54 }
 0xa5a   : > { %v14569_v35 = vpop.f32.mrb[118].mxu0 }
 0xa5b   : > { %v11115_v23 = vpop.f32.mrb[119].mxu0  ;;  %14801 = vmatpush3.bf16.xpose.msk.msra.mxu1 %vm19175_vm9, %v14799_v8 }
 0xa5c   : > { %v14808_v20 = vpack.c.bf16 %v14569_v35, %v11115_v23  ;;  %14804 = vmatprep.subr.msk.bf16.mxu1 %vm19175_vm9, %v14802_v22 }
 0xa5e   : > { %v14572_v7 = vpop.f32.mrb[120].mxu0 }
 0xa5f   : > { %v11125_v18 = vpop.f32.mrb[121].mxu0 }
 0xa60   : > { %v14814_v24 = vpack.c.bf16 %v14572_v7, %v11125_v18 }
 0xa62   : > { %v14575_v33 = vpop.f32.mrb[122].mxu0 }
 0xa63   : > { %v11135_v62 = vpop.f32.mrb[123].mxu0  ;;  %14807 = vmatpush3.bf16.xpose.msk.msra.mxu1 %vm19175_vm9, %v14805_v21 }
 0xa64   : > { %v14820_v30 = vpack.c.bf16 %v14575_v33, %v11135_v62  ;;  %14810 = vmatprep.subr.msk.bf16.mxu1 %vm19175_vm9, %v14808_v20 }
 0xa66   : > { %v14578_v2 = vpop.f32.mrb[124].mxu0 }
 0xa67   : > { %v11145_v3 = vpop.f32.mrb[125].mxu0 }
 0xa68   : > { %v14826_v11 = vpack.c.bf16 %v14578_v2, %v11145_v3 }
 0xa6a   : > { %v14581_v12 = vpop.f32.mrb[126].mxu0 }
 0xa6b   : > { %v11155_v41 = vpop.f32.mrb[127].mxu0  ;;  %14813 = vmatpush3.bf16.xpose.msk.msra.mxu1 %vm19175_vm9, %v14811_v31 }
 0xa6c   : > { %v14832_v17 = vpack.c.bf16 %v14581_v12, %v11155_v41  ;;  %14816 = vmatprep.subr.msk.bf16.mxu1 %vm19175_vm9, %v14814_v24 }
 0xa73   : > { %14819 = vmatpush3.bf16.xpose.msk.msra.mxu1 %vm19175_vm9, %v14817_v36 }
 0xa74   : > { %14822 = vmatprep.subr.msk.bf16.mxu1 %vm19175_vm9, %v14820_v30 }
 0xa7b   : > { %14825 = vmatpush3.bf16.xpose.msk.msra.mxu1 %vm19175_vm9, %v14823_v43 }
 0xa7c   : > { %14828 = vmatprep.subr.msk.bf16.mxu1 %vm19175_vm9, %v14826_v11 }
 0xa83   : > { %14831 = vmatpush3.bf16.xpose.msk.msra.mxu1 %vm19175_vm9, %v14829_v14 }
 0xa84   : > { %14834 = vmatprep.subr.msk.bf16.mxu1 %vm19175_vm9, %v14832_v17 }
 0xa8b   : > { %14837 = vmatpush3.bf16.xpose.msk.msra.mxu1 %vm19175_vm9, %v14835_v1 }
 0xa92   : > { %13261 = vmatmul.mubr.msk.f32.vlgmr.msra.gmra.mrb[78].mxu1 %vm5400_vm12, %v20286_v44 }
 0xb65   : > { %v11414_v10 = vpop.f32.mrb[78].mxu1 }
 0xb66   : > { %v11415_v59 = vadd.f32 %v11414_v10, %v11247_v40  ;;  %v11416_v57 = vpop.f32.mrb[79].mxu1 }
 0xb67   : > { %v11417_v49 = vadd.f32 %v11416_v57, %v11247_v40 }
 0xb68   : > { %11421 = vst [vmem:[%s352_s18] sm:$0xff] %v11415_v59 }
 0xb69   : > { %11422 = vst [vmem:[%s352_s18 + $0x8] sm:$0xff] %v11417_v49 }
 0xb6a   : > { %15960 = shalt.err (!%p15957_p3)
}
 0xb6b   : > { %s15961_s28 = scalar_lea.hbm %s20332_s21, 256  ;;  %s15965_s12 = scalar_lea.hbm %s20384_s10, 512 }
 0xb6c   : > { %p15962_p4 = scmp.ne.s32.totalorder %s20332_s21, %s15961_s28  ;;  %p15966_p9 = scmp.lt.u32.totalorder %s20332_s21, %s20384_s10 }
 0xb6d   : > { %p15967_p10 = scmp.lt.u32.totalorder %s15965_s12, %s15961_s28  ;;  %p15969_p12 = scmp.lt.u32.totalorder %s15961_s28, %s20332_s21 }
 0xb6e   : > { %p15963_p7 = pnand %p15962_p4, %p16109_p5 }
 0xb6f   : > { %p15968_p11 = por %p15967_p10, %p15966_p9 }
 0xb70   : > { %p15964_p8 = pneg %p15963_p7 }
 0xb71   : > { %p15970_p13 = por %p15969_p12, %p15968_p11 }
 0xb73   : > { %p15971_p0 = pnand %p15970_p13, %p15964_p8 }
 0xb75   : > { %15974 = shalt.err (!%p15971_p0)
}
 0xb76   : > { %15452 = dma.vmem_to_hbm [thread:$0]  (%p16109_p5), %s20334_s11, 256, %s20332_s21, %s11424_s25  }
 0xb77 PF: > { %p15458_p1 = scmp.ge.s32.totalorder %s16009_s16, 2  ;;  %s11450_s17 = sand.u32 1, %s15997_s13  }
 0xb78   : > { %s11451_s27 = scalar_lea.sflag [#allocation5], %s11450_s17 }
 0xb79   : > { %p15455_p2 = pnand %p15458_p1, %p16113_p6 }
 0xb7b   : > { %15992 = dma.done.wait (!%p15455_p2), %s11451_s27, 256  }
 0xb7c   : > { %15994 = vsyncadd (!%p15455_p2), %s11451_s27, 4294967040  ;;  %p20_p3 = scmp.ge.s32.totalorder %s16096_s19, 4   ;;  %s21441_s13 = smov %s16001_s14 }
 0xb7d   : > { %s21442_s14 = smov %s16005_s15  ;;  %s21443_s15 = smov %s16107_s22 }
 0xb7e   : > { %s21444_s16 = smov %s16096_s19  ;;  %22 = sbr.rel (!%p20_p3) target bundleno = 3 (0x3), region = 111 }
 0xb85   :  { %11456 = vsyncpa [#allocation5], 1 }
 0xb86   :  { %11458 = vsyncpa [#allocation5 + $0x1], 1 }

</bundles_post_ra>
